<compile_context>
chip_gen: v7x
topology: tpu7x:2x2x1
jax: 0.10.0
libtpu: 0.0.40
codegen_flags: <defaults>
</compile_context>

<pallas_src>
import functools

import jax
import jax.numpy as jnp
from jax.experimental import pallas as pl
from jax.experimental.pallas import tpu as pltpu


# ----------------------------------------------------------------------------
# In-kernel compute helpers (lane-dense (C, H*W) layout, BN scales pre-folded)
# ----------------------------------------------------------------------------
def _shift_lanes(h, off):
    """out[:, p] = h[:, p + off], zero fill at the ends (no wraparound)."""
    if off == 0:
        return h
    c = h.shape[0]
    z = jnp.zeros((c, abs(off)), h.dtype)
    if off > 0:
        return jnp.concatenate([h[:, off:], z], axis=1)
    return jnp.concatenate([z, h[:, :off]], axis=1)


def _dwconv3x3_lane(h, wd9, H, W):
    """Depthwise 3x3, stride 1, zero padding 1, on lane-dense (C, H*W) activations.

    wd9: (C, 9) per-channel taps, tap index t = (dy+1)*3 + (dx+1).
    Row (dy) boundaries are handled by the zero fill of the lane shift; column
    (dx) boundaries need an explicit mask because rows are flattened onto lanes.
    """
    HW = H * W
    pix = jax.lax.broadcasted_iota(jnp.int32, (1, HW), 1)
    col = (pix & (W - 1)) if (W & (W - 1)) == 0 else (pix % W)
    col_mask = {
        -1: (col >= 1).astype(h.dtype),        # dx = -1 invalid at col 0
        0: None,
        1: (col < (W - 1)).astype(h.dtype),    # dx = +1 invalid at col W-1
    }
    acc = h * wd9[:, 4:5]                      # center tap (dy=0, dx=0)
    for dy in (-1, 0, 1):
        for dx in (-1, 0, 1):
            if dy == 0 and dx == 0:
                continue
            shifted = _shift_lanes(h, dy * W + dx)
            if col_mask[dx] is not None:
                shifted = shifted * col_mask[dx]
            t = (dy + 1) * 3 + (dx + 1)
            acc = acc + shifted * wd9[:, t:t + 1]
    return acc


def _ib_block(x, p, H, W, projection):
    """Inverted bottleneck (1x1 expand -> dw3x3 -> 1x1 project) + shortcut.

    x: (Cin, H*W) f32.  p = (w1t, b1, wd9, b2, w3t, b3[, wsct, bsc]) with the BN
    scales already folded into the (transposed) weights.
    """
    if projection:
        w1t, b1, wd9, b2, w3t, b3, wsct, bsc = p
    else:
        w1t, b1, wd9, b2, w3t, b3 = p
    h = jnp.dot(w1t, x, preferred_element_type=jnp.float32) + b1
    h = jnp.maximum(h, 0.0)
    h = _dwconv3x3_lane(h, wd9, H, W) + b2
    h = jnp.maximum(h, 0.0)
    h = jnp.dot(w3t, h, preferred_element_type=jnp.float32) + b3
    if projection:
        sc = jnp.dot(wsct, x, preferred_element_type=jnp.float32) + bsc
    else:
        sc = x                                  # identity shortcut: just add
    return h + sc


def _make_feblock_kernel(G, H, W, final_projection):
    n_params = 18 + (8 if final_projection else 6)

    def kernel(x_ref, *refs):
        o_ref = refs[-1]
        p = [r[...] for r in refs[:n_params]]

        x = x_ref[0]                            # (Cin, H*W), lane-dense
        g1 = x[: 4 * G]
        g2 = x[4 * G: 6 * G]
        g3 = x[6 * G: 7 * G]
        g4 = x[7 * G:]

        y = _ib_block(g4, p[0:6], H, W, projection=False)                       # G -> G
        y = _ib_block(jnp.concatenate([g3, y], axis=0), p[6:12], H, W, False)   # 2G
        y = _ib_block(jnp.concatenate([g2, y], axis=0), p[12:18], H, W, False)  # 4G
        y = _ib_block(jnp.concatenate([g1, y], axis=0), p[18:], H, W,
                      projection=final_projection)                              # -> Cout
        o_ref[0] = y

    return kernel


# ----------------------------------------------------------------------------
# Wrapper
# ----------------------------------------------------------------------------
@functools.partial(jax.jit, static_argnums=(2,))
def _feblock_pallas(x_nchw, flat_params, final_projection):
    N, Cin, H, W = x_nchw.shape
    HW = H * W
    G = Cin // 8
    Cout = flat_params[-1].shape[0]             # last param is always a (Cout, 1) bias

    x = x_nchw.reshape(N, Cin, HW)              # free reshape, already lane-dense

    in_specs = [pl.BlockSpec((1, Cin, HW), lambda b: (b, 0, 0))]
    in_specs += [pl.BlockSpec(p.shape, lambda b: (0, 0)) for p in flat_params]

    y = pl.pallas_call(
        _make_feblock_kernel(G, H, W, final_projection),
        out_shape=jax.ShapeDtypeStruct((N, Cout, HW), jnp.float32),
        grid=(N,),
        in_specs=in_specs,
        out_specs=pl.BlockSpec((1, Cout, HW), lambda b: (b, 0, 0)),
        compiler_params=pltpu.CompilerParams(dimension_semantics=("parallel",)),
    )(x, *flat_params)
    return y.reshape(N, Cout, H, W)


def feblock4n1s_forward(x_nchw, params):
    """FEBlock4n1s.forward. x_nchw: (N, in_planes, H, W) f32. Returns NCHW."""
    flat = tuple(params["res1"] + params["res2"] + params["res3"] + params["ibssl"])
    final_projection = len(params["ibssl"]) == 8
    return _feblock_pallas(x_nchw, flat, final_projection)


# ----------------------------------------------------------------------------
# Parameter construction (synthetic, eval-mode BN folded, lane-dense layout)
# ----------------------------------------------------------------------------
def make_ibssl_params(key, cin, cout, expansion, identity_shortcut):
    cmid = cin * expansion
    ks = jax.random.split(key, 12)
    norm = jax.random.normal
    w1 = 0.1 * norm(ks[0], (cin, cmid), jnp.float32)
    s1 = 1.0 + 0.05 * norm(ks[1], (1, cmid), jnp.float32)
    b1 = 0.05 * norm(ks[2], (1, cmid), jnp.float32)
    wd = 0.1 * norm(ks[3], (3, 3, cmid), jnp.float32)
    s2 = 1.0 + 0.05 * norm(ks[4], (1, cmid), jnp.float32)
    b2 = 0.05 * norm(ks[5], (1, cmid), jnp.float32)
    w3 = 0.1 * norm(ks[6], (cmid, cout), jnp.float32)
    s3 = 1.0 + 0.05 * norm(ks[7], (1, cout), jnp.float32)
    b3 = 0.05 * norm(ks[8], (1, cout), jnp.float32)

    # Fold BN scales into weights and transpose to the lane-dense kernel layout.
    w1t = jnp.transpose(w1 * s1)                                    # (cmid, cin)
    b1c = b1.reshape(cmid, 1)
    wd9 = jnp.transpose((wd * s2.reshape(1, 1, cmid)).reshape(9, cmid))  # (cmid, 9)
    b2c = b2.reshape(cmid, 1)
    w3t = jnp.transpose(w3 * s3)                                    # (cout, cmid)
    b3c = b3.reshape(cout, 1)
    if identity_shortcut:
        assert cin == cout
        return [w1t, b1c, wd9, b2c, w3t, b3c]
    wsc = 0.1 * norm(ks[9], (cin, cout), jnp.float32)
    ssc = 1.0 + 0.05 * norm(ks[10], (1, cout), jnp.float32)
    bsc = 0.05 * norm(ks[11], (1, cout), jnp.float32)
    wsct = jnp.transpose(wsc * ssc)                                 # (cout, cin)
    bscc = bsc.reshape(cout, 1)
    return [w1t, b1c, wd9, b2c, w3t, b3c, wsct, bscc]


def make_feblock_params(key, in_planes, out_planes, expansion):
    G = in_planes // 8
    k1, k2, k3, k4 = jax.random.split(key, 4)
    return {
        "res1": make_ibssl_params(k1, G, G, expansion, identity_shortcut=True),
        "res2": make_ibssl_params(k2, 2 * G, 2 * G, expansion, identity_shortcut=True),
        "res3": make_ibssl_params(k3, 4 * G, 4 * G, expansion, identity_shortcut=True),
        "ibssl": make_ibssl_params(
            k4, in_planes, out_planes, expansion,
            identity_shortcut=(in_planes == out_planes)),
    }


# ----------------------------------------------------------------------------
# Pure-JAX reference (same folded params) for a numerical sanity check
# ----------------------------------------------------------------------------
def _ref_block(x, p, H, W, projection):
    hp_prec = jax.lax.Precision.HIGHEST
    if projection:
        w1t, b1, wd9, b2, w3t, b3, wsct, bsc = p
    else:
        w1t, b1, wd9, b2, w3t, b3 = p
    h = jnp.maximum(jnp.einsum("oc,ncp->nop", w1t, x, precision=hp_prec) + b1, 0.0)
    N, C, HW = h.shape
    hh = jnp.pad(h.reshape(N, C, H, W), ((0, 0), (0, 0), (1, 1), (1, 1)))
    acc = jnp.zeros((N, C, H, W), jnp.float32)
    for a in range(3):
        for b in range(3):
            acc = acc + hh[:, :, a:a + H, b:b + W] * wd9[:, a * 3 + b][None, :, None, None]
    h = jnp.maximum(acc.reshape(N, C, HW) + b2, 0.0)
    h = jnp.einsum("oc,ncp->nop", w3t, h, precision=hp_prec) + b3
    sc = jnp.einsum("oc,ncp->nop", wsct, x, precision=hp_prec) + bsc if projection else x
    return h + sc


def _ref_feblock(x_nchw, params):
    N, Cin, H, W = x_nchw.shape
    G = Cin // 8
    x = x_nchw.reshape(N, Cin, H * W)
    g1, g2, g3, g4 = x[:, :4 * G], x[:, 4 * G:6 * G], x[:, 6 * G:7 * G], x[:, 7 * G:]
    y = _ref_block(g4, params["res1"], H, W, False)
    y = _ref_block(jnp.concatenate([g3, y], axis=1), params["res2"], H, W, False)
    y = _ref_block(jnp.concatenate([g2, y], axis=1), params["res3"], H, W, False)
    last = params["ibssl"]
    y = _ref_block(jnp.concatenate([g1, y], axis=1), last, H, W, len(last) == 8)
    return y.reshape(N, y.shape[1], H, W)


if __name__ == "__main__":
    key = jax.random.PRNGKey(0)
    kx, kp = jax.random.split(key)

    N, in_planes, H, W = 2, 16, 16, 16
    out_planes, expansion = 24, 6

    params = make_feblock_params(kp, in_planes, out_planes, expansion)
    x = jax.random.normal(kx, (N, in_planes, H, W), jnp.float32)   # NCHW like PyTorch

    y = feblock4n1s_forward(x, params)
    jax.block_until_ready(y)
    assert y.shape == (N, out_planes, H, W), y.shape

    y_ref = _ref_feblock(x, params)
    err = float(jnp.max(jnp.abs(y - y_ref)))
    assert err < 5e-2, f"max abs error vs reference: {err}"
    print("KERNEL_OK")
</pallas_src>

<mosaic_0001>
module attributes {stable_mosaic.version = 11 : i64} {
  func.func @kernel(%arg0: i32, %arg1: memref<1x16x256xf32, #tpu.memory_space<vmem>>, %arg2: memref<12x2xf32, #tpu.memory_space<vmem>>, %arg3: memref<12x1xf32, #tpu.memory_space<vmem>>, %arg4: memref<12x9xf32, #tpu.memory_space<vmem>>, %arg5: memref<12x1xf32, #tpu.memory_space<vmem>>, %arg6: memref<2x12xf32, #tpu.memory_space<vmem>>, %arg7: memref<2x1xf32, #tpu.memory_space<vmem>>, %arg8: memref<24x4xf32, #tpu.memory_space<vmem>>, %arg9: memref<24x1xf32, #tpu.memory_space<vmem>>, %arg10: memref<24x9xf32, #tpu.memory_space<vmem>>, %arg11: memref<24x1xf32, #tpu.memory_space<vmem>>, %arg12: memref<4x24xf32, #tpu.memory_space<vmem>>, %arg13: memref<4x1xf32, #tpu.memory_space<vmem>>, %arg14: memref<48x8xf32, #tpu.memory_space<vmem>>, %arg15: memref<48x1xf32, #tpu.memory_space<vmem>>, %arg16: memref<48x9xf32, #tpu.memory_space<vmem>>, %arg17: memref<48x1xf32, #tpu.memory_space<vmem>>, %arg18: memref<8x48xf32, #tpu.memory_space<vmem>>, %arg19: memref<8x1xf32, #tpu.memory_space<vmem>>, %arg20: memref<96x16xf32, #tpu.memory_space<vmem>>, %arg21: memref<96x1xf32, #tpu.memory_space<vmem>>, %arg22: memref<96x9xf32, #tpu.memory_space<vmem>>, %arg23: memref<96x1xf32, #tpu.memory_space<vmem>>, %arg24: memref<24x96xf32, #tpu.memory_space<vmem>>, %arg25: memref<24x1xf32, #tpu.memory_space<vmem>>, %arg26: memref<24x16xf32, #tpu.memory_space<vmem>>, %arg27: memref<24x1xf32, #tpu.memory_space<vmem>>, %arg28: memref<1x24x256xf32, #tpu.memory_space<vmem>>) attributes {dimension_semantics = [#tpu.dimension_semantics<parallel>], iteration_bounds = array<i64: 2>, scalar_prefetch = 0 : i64, scratch_operands = 0 : i64, tpu.core_type = #tpu.core_type<tc>, window_params = [{transform_indices = @transform_0, window_bounds = array<i64: 1, 16, 256>}, {pipeline_mode = #tpu.pipeline_mode<synchronous>, transform_indices = @transform_1, window_bounds = array<i64: 12, 2>}, {pipeline_mode = #tpu.pipeline_mode<synchronous>, transform_indices = @transform_2, window_bounds = array<i64: 12, 1>}, {pipeline_mode = #tpu.pipeline_mode<synchronous>, transform_indices = @transform_3, window_bounds = array<i64: 12, 9>}, {pipeline_mode = #tpu.pipeline_mode<synchronous>, transform_indices = @transform_4, window_bounds = array<i64: 12, 1>}, {pipeline_mode = #tpu.pipeline_mode<synchronous>, transform_indices = @transform_5, window_bounds = array<i64: 2, 12>}, {pipeline_mode = #tpu.pipeline_mode<synchronous>, transform_indices = @transform_6, window_bounds = array<i64: 2, 1>}, {pipeline_mode = #tpu.pipeline_mode<synchronous>, transform_indices = @transform_7, window_bounds = array<i64: 24, 4>}, {pipeline_mode = #tpu.pipeline_mode<synchronous>, transform_indices = @transform_8, window_bounds = array<i64: 24, 1>}, {pipeline_mode = #tpu.pipeline_mode<synchronous>, transform_indices = @transform_9, window_bounds = array<i64: 24, 9>}, {pipeline_mode = #tpu.pipeline_mode<synchronous>, transform_indices = @transform_10, window_bounds = array<i64: 24, 1>}, {pipeline_mode = #tpu.pipeline_mode<synchronous>, transform_indices = @transform_11, window_bounds = array<i64: 4, 24>}, {pipeline_mode = #tpu.pipeline_mode<synchronous>, transform_indices = @transform_12, window_bounds = array<i64: 4, 1>}, {pipeline_mode = #tpu.pipeline_mode<synchronous>, transform_indices = @transform_13, window_bounds = array<i64: 48, 8>}, {pipeline_mode = #tpu.pipeline_mode<synchronous>, transform_indices = @transform_14, window_bounds = array<i64: 48, 1>}, {pipeline_mode = #tpu.pipeline_mode<synchronous>, transform_indices = @transform_15, window_bounds = array<i64: 48, 9>}, {pipeline_mode = #tpu.pipeline_mode<synchronous>, transform_indices = @transform_16, window_bounds = array<i64: 48, 1>}, {pipeline_mode = #tpu.pipeline_mode<synchronous>, transform_indices = @transform_17, window_bounds = array<i64: 8, 48>}, {pipeline_mode = #tpu.pipeline_mode<synchronous>, transform_indices = @transform_18, window_bounds = array<i64: 8, 1>}, {pipeline_mode = #tpu.pipeline_mode<synchronous>, transform_indices = @transform_19, window_bounds = array<i64: 96, 16>}, {pipeline_mode = #tpu.pipeline_mode<synchronous>, transform_indices = @transform_20, window_bounds = array<i64: 96, 1>}, {pipeline_mode = #tpu.pipeline_mode<synchronous>, transform_indices = @transform_21, window_bounds = array<i64: 96, 9>}, {pipeline_mode = #tpu.pipeline_mode<synchronous>, transform_indices = @transform_22, window_bounds = array<i64: 96, 1>}, {pipeline_mode = #tpu.pipeline_mode<synchronous>, transform_indices = @transform_23, window_bounds = array<i64: 24, 96>}, {pipeline_mode = #tpu.pipeline_mode<synchronous>, transform_indices = @transform_24, window_bounds = array<i64: 24, 1>}, {pipeline_mode = #tpu.pipeline_mode<synchronous>, transform_indices = @transform_25, window_bounds = array<i64: 24, 16>}, {pipeline_mode = #tpu.pipeline_mode<synchronous>, transform_indices = @transform_26, window_bounds = array<i64: 24, 1>}, {transform_indices = @transform_27, window_bounds = array<i64: 1, 24, 256>}]} {
    %c0 = arith.constant 0 : index
    %c0_0 = arith.constant 0 : index
    %0 = vector.load %arg2[%c0, %c0_0] : memref<12x2xf32, #tpu.memory_space<vmem>>, vector<12x2xf32>
    %c0_1 = arith.constant 0 : index
    %c0_2 = arith.constant 0 : index
    %1 = vector.load %arg3[%c0_1, %c0_2] : memref<12x1xf32, #tpu.memory_space<vmem>>, vector<12x1xf32>
    %c0_3 = arith.constant 0 : index
    %c0_4 = arith.constant 0 : index
    %2 = vector.load %arg4[%c0_3, %c0_4] : memref<12x9xf32, #tpu.memory_space<vmem>>, vector<12x9xf32>
    %c0_5 = arith.constant 0 : index
    %c0_6 = arith.constant 0 : index
    %3 = vector.load %arg5[%c0_5, %c0_6] : memref<12x1xf32, #tpu.memory_space<vmem>>, vector<12x1xf32>
    %c0_7 = arith.constant 0 : index
    %c0_8 = arith.constant 0 : index
    %4 = vector.load %arg6[%c0_7, %c0_8] : memref<2x12xf32, #tpu.memory_space<vmem>>, vector<2x12xf32>
    %c0_9 = arith.constant 0 : index
    %c0_10 = arith.constant 0 : index
    %5 = vector.load %arg7[%c0_9, %c0_10] : memref<2x1xf32, #tpu.memory_space<vmem>>, vector<2x1xf32>
    %c0_11 = arith.constant 0 : index
    %c0_12 = arith.constant 0 : index
    %6 = vector.load %arg8[%c0_11, %c0_12] : memref<24x4xf32, #tpu.memory_space<vmem>>, vector<24x4xf32>
    %c0_13 = arith.constant 0 : index
    %c0_14 = arith.constant 0 : index
    %7 = vector.load %arg9[%c0_13, %c0_14] : memref<24x1xf32, #tpu.memory_space<vmem>>, vector<24x1xf32>
    %c0_15 = arith.constant 0 : index
    %c0_16 = arith.constant 0 : index
    %8 = vector.load %arg10[%c0_15, %c0_16] : memref<24x9xf32, #tpu.memory_space<vmem>>, vector<24x9xf32>
    %c0_17 = arith.constant 0 : index
    %c0_18 = arith.constant 0 : index
    %9 = vector.load %arg11[%c0_17, %c0_18] : memref<24x1xf32, #tpu.memory_space<vmem>>, vector<24x1xf32>
    %c0_19 = arith.constant 0 : index
    %c0_20 = arith.constant 0 : index
    %10 = vector.load %arg12[%c0_19, %c0_20] : memref<4x24xf32, #tpu.memory_space<vmem>>, vector<4x24xf32>
    %c0_21 = arith.constant 0 : index
    %c0_22 = arith.constant 0 : index
    %11 = vector.load %arg13[%c0_21, %c0_22] : memref<4x1xf32, #tpu.memory_space<vmem>>, vector<4x1xf32>
    %c0_23 = arith.constant 0 : index
    %c0_24 = arith.constant 0 : index
    %12 = vector.load %arg14[%c0_23, %c0_24] : memref<48x8xf32, #tpu.memory_space<vmem>>, vector<48x8xf32>
    %c0_25 = arith.constant 0 : index
    %c0_26 = arith.constant 0 : index
    %13 = vector.load %arg15[%c0_25, %c0_26] : memref<48x1xf32, #tpu.memory_space<vmem>>, vector<48x1xf32>
    %c0_27 = arith.constant 0 : index
    %c0_28 = arith.constant 0 : index
    %14 = vector.load %arg16[%c0_27, %c0_28] : memref<48x9xf32, #tpu.memory_space<vmem>>, vector<48x9xf32>
    %c0_29 = arith.constant 0 : index
    %c0_30 = arith.constant 0 : index
    %15 = vector.load %arg17[%c0_29, %c0_30] : memref<48x1xf32, #tpu.memory_space<vmem>>, vector<48x1xf32>
    %c0_31 = arith.constant 0 : index
    %c0_32 = arith.constant 0 : index
    %16 = vector.load %arg18[%c0_31, %c0_32] : memref<8x48xf32, #tpu.memory_space<vmem>>, vector<8x48xf32>
    %c0_33 = arith.constant 0 : index
    %c0_34 = arith.constant 0 : index
    %17 = vector.load %arg19[%c0_33, %c0_34] : memref<8x1xf32, #tpu.memory_space<vmem>>, vector<8x1xf32>
    %c0_35 = arith.constant 0 : index
    %c0_36 = arith.constant 0 : index
    %18 = vector.load %arg20[%c0_35, %c0_36] : memref<96x16xf32, #tpu.memory_space<vmem>>, vector<96x16xf32>
    %c0_37 = arith.constant 0 : index
    %c0_38 = arith.constant 0 : index
    %19 = vector.load %arg21[%c0_37, %c0_38] : memref<96x1xf32, #tpu.memory_space<vmem>>, vector<96x1xf32>
    %c0_39 = arith.constant 0 : index
    %c0_40 = arith.constant 0 : index
    %20 = vector.load %arg22[%c0_39, %c0_40] : memref<96x9xf32, #tpu.memory_space<vmem>>, vector<96x9xf32>
    %c0_41 = arith.constant 0 : index
    %c0_42 = arith.constant 0 : index
    %21 = vector.load %arg23[%c0_41, %c0_42] : memref<96x1xf32, #tpu.memory_space<vmem>>, vector<96x1xf32>
    %c0_43 = arith.constant 0 : index
    %c0_44 = arith.constant 0 : index
    %22 = vector.load %arg24[%c0_43, %c0_44] : memref<24x96xf32, #tpu.memory_space<vmem>>, vector<24x96xf32>
    %c0_45 = arith.constant 0 : index
    %c0_46 = arith.constant 0 : index
    %23 = vector.load %arg25[%c0_45, %c0_46] : memref<24x1xf32, #tpu.memory_space<vmem>>, vector<24x1xf32>
    %c0_47 = arith.constant 0 : index
    %c0_48 = arith.constant 0 : index
    %24 = vector.load %arg26[%c0_47, %c0_48] : memref<24x16xf32, #tpu.memory_space<vmem>>, vector<24x16xf32>
    %c0_49 = arith.constant 0 : index
    %c0_50 = arith.constant 0 : index
    %25 = vector.load %arg27[%c0_49, %c0_50] : memref<24x1xf32, #tpu.memory_space<vmem>>, vector<24x1xf32>
    %c0_51 = arith.constant 0 : index
    %c0_52 = arith.constant 0 : index
    %c0_53 = arith.constant 0 : index
    %26 = vector.load %arg1[%c0_51, %c0_52, %c0_53] : memref<1x16x256xf32, #tpu.memory_space<vmem>>, vector<1x16x256xf32>
    %27 = vector.shape_cast %26 : vector<1x16x256xf32> to vector<16x256xf32>
    %28 = vector.extract_strided_slice %27 {offsets = [0, 0], sizes = [8, 256], strides = [1, 1]} : vector<16x256xf32> to vector<8x256xf32>
    %29 = vector.extract_strided_slice %27 {offsets = [8, 0], sizes = [4, 256], strides = [1, 1]} : vector<16x256xf32> to vector<4x256xf32>
    %30 = vector.extract_strided_slice %27 {offsets = [12, 0], sizes = [2, 256], strides = [1, 1]} : vector<16x256xf32> to vector<2x256xf32>
    %31 = vector.extract_strided_slice %27 {offsets = [14, 0], sizes = [2, 256], strides = [1, 1]} : vector<16x256xf32> to vector<2x256xf32>
    %cst = arith.constant dense<0.000000e+00> : vector<12x256xf32>
    %32 = tpu.matmul %0, %31, %cst {dimension_numbers = #tpu.dot_dimension_numbers<[1], [0], [0], [1], [0, 0, 1, 1], [], []>} : vector<12x2xf32>, vector<2x256xf32>, vector<12x256xf32> -> vector<12x256xf32>
    %33 = vector.broadcast %1 : vector<12x1xf32> to vector<12x256xf32>
    %34 = arith.addf %32, %33 : vector<12x256xf32>
    %cst_54 = arith.constant 0.000000e+00 : f32
    %35 = vector.broadcast %cst_54 : f32 to vector<12x256xf32>
    %36 = arith.maximumf %34, %35 : vector<12x256xf32>
    %37 = tpu.iota {dimensions = array<i32: 1>} : vector<1x256xi32>
    %c15_i32 = arith.constant 15 : i32
    %38 = vector.broadcast %c15_i32 : i32 to vector<1x256xi32>
    %39 = arith.andi %37, %38 : vector<1x256xi32>
    %c1_i32 = arith.constant 1 : i32
    %40 = vector.broadcast %c1_i32 : i32 to vector<1x256xi32>
    %41 = arith.cmpi sge, %39, %40 : vector<1x256xi32>
    %42 = arith.extui %41 : vector<1x256xi1> to vector<1x256xi32>
    %43 = arith.sitofp %42 : vector<1x256xi32> to vector<1x256xf32>
    %c15_i32_55 = arith.constant 15 : i32
    %44 = vector.broadcast %c15_i32_55 : i32 to vector<1x256xi32>
    %45 = arith.cmpi slt, %39, %44 : vector<1x256xi32>
    %46 = arith.extui %45 : vector<1x256xi1> to vector<1x256xi32>
    %47 = arith.sitofp %46 : vector<1x256xi32> to vector<1x256xf32>
    %48 = vector.extract_strided_slice %2 {offsets = [0, 4], sizes = [12, 1], strides = [1, 1]} : vector<12x9xf32> to vector<12x1xf32>
    %49 = vector.broadcast %48 : vector<12x1xf32> to vector<12x256xf32>
    %50 = arith.mulf %36, %49 : vector<12x256xf32>
    %cst_56 = arith.constant 0.000000e+00 : f32
    %51 = vector.broadcast %cst_56 : f32 to vector<12x17xf32>
    %52 = vector.extract_strided_slice %36 {offsets = [0, 0], sizes = [12, 239], strides = [1, 1]} : vector<12x256xf32> to vector<12x239xf32>
    %53 = tpu.concatenate %51, %52 in 1 : vector<12x17xf32>, vector<12x239xf32> -> vector<12x256xf32>
    %54 = vector.broadcast %43 : vector<1x256xf32> to vector<12x256xf32>
    %55 = arith.mulf %53, %54 : vector<12x256xf32>
    %56 = vector.extract_strided_slice %2 {offsets = [0, 0], sizes = [12, 1], strides = [1, 1]} : vector<12x9xf32> to vector<12x1xf32>
    %57 = vector.broadcast %56 : vector<12x1xf32> to vector<12x256xf32>
    %58 = arith.mulf %55, %57 : vector<12x256xf32>
    %59 = arith.addf %50, %58 : vector<12x256xf32>
    %cst_57 = arith.constant 0.000000e+00 : f32
    %60 = vector.broadcast %cst_57 : f32 to vector<12x16xf32>
    %61 = vector.extract_strided_slice %36 {offsets = [0, 0], sizes = [12, 240], strides = [1, 1]} : vector<12x256xf32> to vector<12x240xf32>
    %62 = tpu.concatenate %60, %61 in 1 : vector<12x16xf32>, vector<12x240xf32> -> vector<12x256xf32>
    %63 = vector.extract_strided_slice %2 {offsets = [0, 1], sizes = [12, 1], strides = [1, 1]} : vector<12x9xf32> to vector<12x1xf32>
    %64 = vector.broadcast %63 : vector<12x1xf32> to vector<12x256xf32>
    %65 = arith.mulf %62, %64 : vector<12x256xf32>
    %66 = arith.addf %59, %65 : vector<12x256xf32>
    %cst_58 = arith.constant 0.000000e+00 : f32
    %67 = vector.broadcast %cst_58 : f32 to vector<12x15xf32>
    %68 = vector.extract_strided_slice %36 {offsets = [0, 0], sizes = [12, 241], strides = [1, 1]} : vector<12x256xf32> to vector<12x241xf32>
    %69 = tpu.concatenate %67, %68 in 1 : vector<12x15xf32>, vector<12x241xf32> -> vector<12x256xf32>
    %70 = vector.broadcast %47 : vector<1x256xf32> to vector<12x256xf32>
    %71 = arith.mulf %69, %70 : vector<12x256xf32>
    %72 = vector.extract_strided_slice %2 {offsets = [0, 2], sizes = [12, 1], strides = [1, 1]} : vector<12x9xf32> to vector<12x1xf32>
    %73 = vector.broadcast %72 : vector<12x1xf32> to vector<12x256xf32>
    %74 = arith.mulf %71, %73 : vector<12x256xf32>
    %75 = arith.addf %66, %74 : vector<12x256xf32>
    %cst_59 = arith.constant 0.000000e+00 : f32
    %76 = vector.broadcast %cst_59 : f32 to vector<12x1xf32>
    %77 = vector.extract_strided_slice %36 {offsets = [0, 0], sizes = [12, 255], strides = [1, 1]} : vector<12x256xf32> to vector<12x255xf32>
    %78 = tpu.concatenate %76, %77 in 1 : vector<12x1xf32>, vector<12x255xf32> -> vector<12x256xf32>
    %79 = vector.broadcast %43 : vector<1x256xf32> to vector<12x256xf32>
    %80 = arith.mulf %78, %79 : vector<12x256xf32>
    %81 = vector.extract_strided_slice %2 {offsets = [0, 3], sizes = [12, 1], strides = [1, 1]} : vector<12x9xf32> to vector<12x1xf32>
    %82 = vector.broadcast %81 : vector<12x1xf32> to vector<12x256xf32>
    %83 = arith.mulf %80, %82 : vector<12x256xf32>
    %84 = arith.addf %75, %83 : vector<12x256xf32>
    %cst_60 = arith.constant 0.000000e+00 : f32
    %85 = vector.broadcast %cst_60 : f32 to vector<12x1xf32>
    %86 = vector.extract_strided_slice %36 {offsets = [0, 1], sizes = [12, 255], strides = [1, 1]} : vector<12x256xf32> to vector<12x255xf32>
    %87 = tpu.concatenate %86, %85 in 1 : vector<12x255xf32>, vector<12x1xf32> -> vector<12x256xf32>
    %88 = vector.broadcast %47 : vector<1x256xf32> to vector<12x256xf32>
    %89 = arith.mulf %87, %88 : vector<12x256xf32>
    %90 = vector.extract_strided_slice %2 {offsets = [0, 5], sizes = [12, 1], strides = [1, 1]} : vector<12x9xf32> to vector<12x1xf32>
    %91 = vector.broadcast %90 : vector<12x1xf32> to vector<12x256xf32>
    %92 = arith.mulf %89, %91 : vector<12x256xf32>
    %93 = arith.addf %84, %92 : vector<12x256xf32>
    %cst_61 = arith.constant 0.000000e+00 : f32
    %94 = vector.broadcast %cst_61 : f32 to vector<12x15xf32>
    %95 = vector.extract_strided_slice %36 {offsets = [0, 15], sizes = [12, 241], strides = [1, 1]} : vector<12x256xf32> to vector<12x241xf32>
    %96 = tpu.concatenate %95, %94 in 1 : vector<12x241xf32>, vector<12x15xf32> -> vector<12x256xf32>
    %97 = vector.broadcast %43 : vector<1x256xf32> to vector<12x256xf32>
    %98 = arith.mulf %96, %97 : vector<12x256xf32>
    %99 = vector.extract_strided_slice %2 {offsets = [0, 6], sizes = [12, 1], strides = [1, 1]} : vector<12x9xf32> to vector<12x1xf32>
    %100 = vector.broadcast %99 : vector<12x1xf32> to vector<12x256xf32>
    %101 = arith.mulf %98, %100 : vector<12x256xf32>
    %102 = arith.addf %93, %101 : vector<12x256xf32>
    %cst_62 = arith.constant 0.000000e+00 : f32
    %103 = vector.broadcast %cst_62 : f32 to vector<12x16xf32>
    %104 = vector.extract_strided_slice %36 {offsets = [0, 16], sizes = [12, 240], strides = [1, 1]} : vector<12x256xf32> to vector<12x240xf32>
    %105 = tpu.concatenate %104, %103 in 1 : vector<12x240xf32>, vector<12x16xf32> -> vector<12x256xf32>
    %106 = vector.extract_strided_slice %2 {offsets = [0, 7], sizes = [12, 1], strides = [1, 1]} : vector<12x9xf32> to vector<12x1xf32>
    %107 = vector.broadcast %106 : vector<12x1xf32> to vector<12x256xf32>
    %108 = arith.mulf %105, %107 : vector<12x256xf32>
    %109 = arith.addf %102, %108 : vector<12x256xf32>
    %cst_63 = arith.constant 0.000000e+00 : f32
    %110 = vector.broadcast %cst_63 : f32 to vector<12x17xf32>
    %111 = vector.extract_strided_slice %36 {offsets = [0, 17], sizes = [12, 239], strides = [1, 1]} : vector<12x256xf32> to vector<12x239xf32>
    %112 = tpu.concatenate %111, %110 in 1 : vector<12x239xf32>, vector<12x17xf32> -> vector<12x256xf32>
    %113 = vector.broadcast %47 : vector<1x256xf32> to vector<12x256xf32>
    %114 = arith.mulf %112, %113 : vector<12x256xf32>
    %115 = vector.extract_strided_slice %2 {offsets = [0, 8], sizes = [12, 1], strides = [1, 1]} : vector<12x9xf32> to vector<12x1xf32>
    %116 = vector.broadcast %115 : vector<12x1xf32> to vector<12x256xf32>
    %117 = arith.mulf %114, %116 : vector<12x256xf32>
    %118 = arith.addf %109, %117 : vector<12x256xf32>
    %119 = vector.broadcast %3 : vector<12x1xf32> to vector<12x256xf32>
    %120 = arith.addf %118, %119 : vector<12x256xf32>
    %cst_64 = arith.constant 0.000000e+00 : f32
    %121 = vector.broadcast %cst_64 : f32 to vector<12x256xf32>
    %122 = arith.maximumf %120, %121 : vector<12x256xf32>
    %cst_65 = arith.constant dense<0.000000e+00> : vector<2x256xf32>
    %123 = tpu.matmul %4, %122, %cst_65 {dimension_numbers = #tpu.dot_dimension_numbers<[1], [0], [0], [1], [0, 0, 1, 1], [], []>} : vector<2x12xf32>, vector<12x256xf32>, vector<2x256xf32> -> vector<2x256xf32>
    %124 = vector.broadcast %5 : vector<2x1xf32> to vector<2x256xf32>
    %125 = arith.addf %123, %124 : vector<2x256xf32>
    %126 = arith.addf %125, %31 : vector<2x256xf32>
    %127 = tpu.concatenate %30, %126 in 0 : vector<2x256xf32>, vector<2x256xf32> -> vector<4x256xf32>
    %cst_66 = arith.constant dense<0.000000e+00> : vector<24x256xf32>
    %128 = tpu.matmul %6, %127, %cst_66 {dimension_numbers = #tpu.dot_dimension_numbers<[1], [0], [0], [1], [0, 0, 1, 1], [], []>} : vector<24x4xf32>, vector<4x256xf32>, vector<24x256xf32> -> vector<24x256xf32>
    %129 = vector.broadcast %7 : vector<24x1xf32> to vector<24x256xf32>
    %130 = arith.addf %128, %129 : vector<24x256xf32>
    %cst_67 = arith.constant 0.000000e+00 : f32
    %131 = vector.broadcast %cst_67 : f32 to vector<24x256xf32>
    %132 = arith.maximumf %130, %131 : vector<24x256xf32>
    %133 = tpu.iota {dimensions = array<i32: 1>} : vector<1x256xi32>
    %c15_i32_68 = arith.constant 15 : i32
    %134 = vector.broadcast %c15_i32_68 : i32 to vector<1x256xi32>
    %135 = arith.andi %133, %134 : vector<1x256xi32>
    %c1_i32_69 = arith.constant 1 : i32
    %136 = vector.broadcast %c1_i32_69 : i32 to vector<1x256xi32>
    %137 = arith.cmpi sge, %135, %136 : vector<1x256xi32>
    %138 = arith.extui %137 : vector<1x256xi1> to vector<1x256xi32>
    %139 = arith.sitofp %138 : vector<1x256xi32> to vector<1x256xf32>
    %c15_i32_70 = arith.constant 15 : i32
    %140 = vector.broadcast %c15_i32_70 : i32 to vector<1x256xi32>
    %141 = arith.cmpi slt, %135, %140 : vector<1x256xi32>
    %142 = arith.extui %141 : vector<1x256xi1> to vector<1x256xi32>
    %143 = arith.sitofp %142 : vector<1x256xi32> to vector<1x256xf32>
    %144 = vector.extract_strided_slice %8 {offsets = [0, 4], sizes = [24, 1], strides = [1, 1]} : vector<24x9xf32> to vector<24x1xf32>
    %145 = vector.broadcast %144 : vector<24x1xf32> to vector<24x256xf32>
    %146 = arith.mulf %132, %145 : vector<24x256xf32>
    %cst_71 = arith.constant 0.000000e+00 : f32
    %147 = vector.broadcast %cst_71 : f32 to vector<24x17xf32>
    %148 = vector.extract_strided_slice %132 {offsets = [0, 0], sizes = [24, 239], strides = [1, 1]} : vector<24x256xf32> to vector<24x239xf32>
    %149 = tpu.concatenate %147, %148 in 1 : vector<24x17xf32>, vector<24x239xf32> -> vector<24x256xf32>
    %150 = vector.broadcast %139 : vector<1x256xf32> to vector<24x256xf32>
    %151 = arith.mulf %149, %150 : vector<24x256xf32>
    %152 = vector.extract_strided_slice %8 {offsets = [0, 0], sizes = [24, 1], strides = [1, 1]} : vector<24x9xf32> to vector<24x1xf32>
    %153 = vector.broadcast %152 : vector<24x1xf32> to vector<24x256xf32>
    %154 = arith.mulf %151, %153 : vector<24x256xf32>
    %155 = arith.addf %146, %154 : vector<24x256xf32>
    %cst_72 = arith.constant 0.000000e+00 : f32
    %156 = vector.broadcast %cst_72 : f32 to vector<24x16xf32>
    %157 = vector.extract_strided_slice %132 {offsets = [0, 0], sizes = [24, 240], strides = [1, 1]} : vector<24x256xf32> to vector<24x240xf32>
    %158 = tpu.concatenate %156, %157 in 1 : vector<24x16xf32>, vector<24x240xf32> -> vector<24x256xf32>
    %159 = vector.extract_strided_slice %8 {offsets = [0, 1], sizes = [24, 1], strides = [1, 1]} : vector<24x9xf32> to vector<24x1xf32>
    %160 = vector.broadcast %159 : vector<24x1xf32> to vector<24x256xf32>
    %161 = arith.mulf %158, %160 : vector<24x256xf32>
    %162 = arith.addf %155, %161 : vector<24x256xf32>
    %cst_73 = arith.constant 0.000000e+00 : f32
    %163 = vector.broadcast %cst_73 : f32 to vector<24x15xf32>
    %164 = vector.extract_strided_slice %132 {offsets = [0, 0], sizes = [24, 241], strides = [1, 1]} : vector<24x256xf32> to vector<24x241xf32>
    %165 = tpu.concatenate %163, %164 in 1 : vector<24x15xf32>, vector<24x241xf32> -> vector<24x256xf32>
    %166 = vector.broadcast %143 : vector<1x256xf32> to vector<24x256xf32>
    %167 = arith.mulf %165, %166 : vector<24x256xf32>
    %168 = vector.extract_strided_slice %8 {offsets = [0, 2], sizes = [24, 1], strides = [1, 1]} : vector<24x9xf32> to vector<24x1xf32>
    %169 = vector.broadcast %168 : vector<24x1xf32> to vector<24x256xf32>
    %170 = arith.mulf %167, %169 : vector<24x256xf32>
    %171 = arith.addf %162, %170 : vector<24x256xf32>
    %cst_74 = arith.constant 0.000000e+00 : f32
    %172 = vector.broadcast %cst_74 : f32 to vector<24x1xf32>
    %173 = vector.extract_strided_slice %132 {offsets = [0, 0], sizes = [24, 255], strides = [1, 1]} : vector<24x256xf32> to vector<24x255xf32>
    %174 = tpu.concatenate %172, %173 in 1 : vector<24x1xf32>, vector<24x255xf32> -> vector<24x256xf32>
    %175 = vector.broadcast %139 : vector<1x256xf32> to vector<24x256xf32>
    %176 = arith.mulf %174, %175 : vector<24x256xf32>
    %177 = vector.extract_strided_slice %8 {offsets = [0, 3], sizes = [24, 1], strides = [1, 1]} : vector<24x9xf32> to vector<24x1xf32>
    %178 = vector.broadcast %177 : vector<24x1xf32> to vector<24x256xf32>
    %179 = arith.mulf %176, %178 : vector<24x256xf32>
    %180 = arith.addf %171, %179 : vector<24x256xf32>
    %cst_75 = arith.constant 0.000000e+00 : f32
    %181 = vector.broadcast %cst_75 : f32 to vector<24x1xf32>
    %182 = vector.extract_strided_slice %132 {offsets = [0, 1], sizes = [24, 255], strides = [1, 1]} : vector<24x256xf32> to vector<24x255xf32>
    %183 = tpu.concatenate %182, %181 in 1 : vector<24x255xf32>, vector<24x1xf32> -> vector<24x256xf32>
    %184 = vector.broadcast %143 : vector<1x256xf32> to vector<24x256xf32>
    %185 = arith.mulf %183, %184 : vector<24x256xf32>
    %186 = vector.extract_strided_slice %8 {offsets = [0, 5], sizes = [24, 1], strides = [1, 1]} : vector<24x9xf32> to vector<24x1xf32>
    %187 = vector.broadcast %186 : vector<24x1xf32> to vector<24x256xf32>
    %188 = arith.mulf %185, %187 : vector<24x256xf32>
    %189 = arith.addf %180, %188 : vector<24x256xf32>
    %cst_76 = arith.constant 0.000000e+00 : f32
    %190 = vector.broadcast %cst_76 : f32 to vector<24x15xf32>
    %191 = vector.extract_strided_slice %132 {offsets = [0, 15], sizes = [24, 241], strides = [1, 1]} : vector<24x256xf32> to vector<24x241xf32>
    %192 = tpu.concatenate %191, %190 in 1 : vector<24x241xf32>, vector<24x15xf32> -> vector<24x256xf32>
    %193 = vector.broadcast %139 : vector<1x256xf32> to vector<24x256xf32>
    %194 = arith.mulf %192, %193 : vector<24x256xf32>
    %195 = vector.extract_strided_slice %8 {offsets = [0, 6], sizes = [24, 1], strides = [1, 1]} : vector<24x9xf32> to vector<24x1xf32>
    %196 = vector.broadcast %195 : vector<24x1xf32> to vector<24x256xf32>
    %197 = arith.mulf %194, %196 : vector<24x256xf32>
    %198 = arith.addf %189, %197 : vector<24x256xf32>
    %cst_77 = arith.constant 0.000000e+00 : f32
    %199 = vector.broadcast %cst_77 : f32 to vector<24x16xf32>
    %200 = vector.extract_strided_slice %132 {offsets = [0, 16], sizes = [24, 240], strides = [1, 1]} : vector<24x256xf32> to vector<24x240xf32>
    %201 = tpu.concatenate %200, %199 in 1 : vector<24x240xf32>, vector<24x16xf32> -> vector<24x256xf32>
    %202 = vector.extract_strided_slice %8 {offsets = [0, 7], sizes = [24, 1], strides = [1, 1]} : vector<24x9xf32> to vector<24x1xf32>
    %203 = vector.broadcast %202 : vector<24x1xf32> to vector<24x256xf32>
    %204 = arith.mulf %201, %203 : vector<24x256xf32>
    %205 = arith.addf %198, %204 : vector<24x256xf32>
    %cst_78 = arith.constant 0.000000e+00 : f32
    %206 = vector.broadcast %cst_78 : f32 to vector<24x17xf32>
    %207 = vector.extract_strided_slice %132 {offsets = [0, 17], sizes = [24, 239], strides = [1, 1]} : vector<24x256xf32> to vector<24x239xf32>
    %208 = tpu.concatenate %207, %206 in 1 : vector<24x239xf32>, vector<24x17xf32> -> vector<24x256xf32>
    %209 = vector.broadcast %143 : vector<1x256xf32> to vector<24x256xf32>
    %210 = arith.mulf %208, %209 : vector<24x256xf32>
    %211 = vector.extract_strided_slice %8 {offsets = [0, 8], sizes = [24, 1], strides = [1, 1]} : vector<24x9xf32> to vector<24x1xf32>
    %212 = vector.broadcast %211 : vector<24x1xf32> to vector<24x256xf32>
    %213 = arith.mulf %210, %212 : vector<24x256xf32>
    %214 = arith.addf %205, %213 : vector<24x256xf32>
    %215 = vector.broadcast %9 : vector<24x1xf32> to vector<24x256xf32>
    %216 = arith.addf %214, %215 : vector<24x256xf32>
    %cst_79 = arith.constant 0.000000e+00 : f32
    %217 = vector.broadcast %cst_79 : f32 to vector<24x256xf32>
    %218 = arith.maximumf %216, %217 : vector<24x256xf32>
    %cst_80 = arith.constant dense<0.000000e+00> : vector<4x256xf32>
    %219 = tpu.matmul %10, %218, %cst_80 {dimension_numbers = #tpu.dot_dimension_numbers<[1], [0], [0], [1], [0, 0, 1, 1], [], []>} : vector<4x24xf32>, vector<24x256xf32>, vector<4x256xf32> -> vector<4x256xf32>
    %220 = vector.broadcast %11 : vector<4x1xf32> to vector<4x256xf32>
    %221 = arith.addf %219, %220 : vector<4x256xf32>
    %222 = arith.addf %221, %127 : vector<4x256xf32>
    %223 = tpu.concatenate %29, %222 in 0 : vector<4x256xf32>, vector<4x256xf32> -> vector<8x256xf32>
    %cst_81 = arith.constant dense<0.000000e+00> : vector<48x256xf32>
    %224 = tpu.matmul %12, %223, %cst_81 {dimension_numbers = #tpu.dot_dimension_numbers<[1], [0], [0], [1], [0, 0, 1, 1], [], []>} : vector<48x8xf32>, vector<8x256xf32>, vector<48x256xf32> -> vector<48x256xf32>
    %225 = vector.broadcast %13 : vector<48x1xf32> to vector<48x256xf32>
    %226 = arith.addf %224, %225 : vector<48x256xf32>
    %cst_82 = arith.constant 0.000000e+00 : f32
    %227 = vector.broadcast %cst_82 : f32 to vector<48x256xf32>
    %228 = arith.maximumf %226, %227 : vector<48x256xf32>
    %229 = tpu.iota {dimensions = array<i32: 1>} : vector<1x256xi32>
    %c15_i32_83 = arith.constant 15 : i32
    %230 = vector.broadcast %c15_i32_83 : i32 to vector<1x256xi32>
    %231 = arith.andi %229, %230 : vector<1x256xi32>
    %c1_i32_84 = arith.constant 1 : i32
    %232 = vector.broadcast %c1_i32_84 : i32 to vector<1x256xi32>
    %233 = arith.cmpi sge, %231, %232 : vector<1x256xi32>
    %234 = arith.extui %233 : vector<1x256xi1> to vector<1x256xi32>
    %235 = arith.sitofp %234 : vector<1x256xi32> to vector<1x256xf32>
    %c15_i32_85 = arith.constant 15 : i32
    %236 = vector.broadcast %c15_i32_85 : i32 to vector<1x256xi32>
    %237 = arith.cmpi slt, %231, %236 : vector<1x256xi32>
    %238 = arith.extui %237 : vector<1x256xi1> to vector<1x256xi32>
    %239 = arith.sitofp %238 : vector<1x256xi32> to vector<1x256xf32>
    %240 = vector.extract_strided_slice %14 {offsets = [0, 4], sizes = [48, 1], strides = [1, 1]} : vector<48x9xf32> to vector<48x1xf32>
    %241 = vector.broadcast %240 : vector<48x1xf32> to vector<48x256xf32>
    %242 = arith.mulf %228, %241 : vector<48x256xf32>
    %cst_86 = arith.constant 0.000000e+00 : f32
    %243 = vector.broadcast %cst_86 : f32 to vector<48x17xf32>
    %244 = vector.extract_strided_slice %228 {offsets = [0, 0], sizes = [48, 239], strides = [1, 1]} : vector<48x256xf32> to vector<48x239xf32>
    %245 = tpu.concatenate %243, %244 in 1 : vector<48x17xf32>, vector<48x239xf32> -> vector<48x256xf32>
    %246 = vector.broadcast %235 : vector<1x256xf32> to vector<48x256xf32>
    %247 = arith.mulf %245, %246 : vector<48x256xf32>
    %248 = vector.extract_strided_slice %14 {offsets = [0, 0], sizes = [48, 1], strides = [1, 1]} : vector<48x9xf32> to vector<48x1xf32>
    %249 = vector.broadcast %248 : vector<48x1xf32> to vector<48x256xf32>
    %250 = arith.mulf %247, %249 : vector<48x256xf32>
    %251 = arith.addf %242, %250 : vector<48x256xf32>
    %cst_87 = arith.constant 0.000000e+00 : f32
    %252 = vector.broadcast %cst_87 : f32 to vector<48x16xf32>
    %253 = vector.extract_strided_slice %228 {offsets = [0, 0], sizes = [48, 240], strides = [1, 1]} : vector<48x256xf32> to vector<48x240xf32>
    %254 = tpu.concatenate %252, %253 in 1 : vector<48x16xf32>, vector<48x240xf32> -> vector<48x256xf32>
    %255 = vector.extract_strided_slice %14 {offsets = [0, 1], sizes = [48, 1], strides = [1, 1]} : vector<48x9xf32> to vector<48x1xf32>
    %256 = vector.broadcast %255 : vector<48x1xf32> to vector<48x256xf32>
    %257 = arith.mulf %254, %256 : vector<48x256xf32>
    %258 = arith.addf %251, %257 : vector<48x256xf32>
    %cst_88 = arith.constant 0.000000e+00 : f32
    %259 = vector.broadcast %cst_88 : f32 to vector<48x15xf32>
    %260 = vector.extract_strided_slice %228 {offsets = [0, 0], sizes = [48, 241], strides = [1, 1]} : vector<48x256xf32> to vector<48x241xf32>
    %261 = tpu.concatenate %259, %260 in 1 : vector<48x15xf32>, vector<48x241xf32> -> vector<48x256xf32>
    %262 = vector.broadcast %239 : vector<1x256xf32> to vector<48x256xf32>
    %263 = arith.mulf %261, %262 : vector<48x256xf32>
    %264 = vector.extract_strided_slice %14 {offsets = [0, 2], sizes = [48, 1], strides = [1, 1]} : vector<48x9xf32> to vector<48x1xf32>
    %265 = vector.broadcast %264 : vector<48x1xf32> to vector<48x256xf32>
    %266 = arith.mulf %263, %265 : vector<48x256xf32>
    %267 = arith.addf %258, %266 : vector<48x256xf32>
    %cst_89 = arith.constant 0.000000e+00 : f32
    %268 = vector.broadcast %cst_89 : f32 to vector<48x1xf32>
    %269 = vector.extract_strided_slice %228 {offsets = [0, 0], sizes = [48, 255], strides = [1, 1]} : vector<48x256xf32> to vector<48x255xf32>
    %270 = tpu.concatenate %268, %269 in 1 : vector<48x1xf32>, vector<48x255xf32> -> vector<48x256xf32>
    %271 = vector.broadcast %235 : vector<1x256xf32> to vector<48x256xf32>
    %272 = arith.mulf %270, %271 : vector<48x256xf32>
    %273 = vector.extract_strided_slice %14 {offsets = [0, 3], sizes = [48, 1], strides = [1, 1]} : vector<48x9xf32> to vector<48x1xf32>
    %274 = vector.broadcast %273 : vector<48x1xf32> to vector<48x256xf32>
    %275 = arith.mulf %272, %274 : vector<48x256xf32>
    %276 = arith.addf %267, %275 : vector<48x256xf32>
    %cst_90 = arith.constant 0.000000e+00 : f32
    %277 = vector.broadcast %cst_90 : f32 to vector<48x1xf32>
    %278 = vector.extract_strided_slice %228 {offsets = [0, 1], sizes = [48, 255], strides = [1, 1]} : vector<48x256xf32> to vector<48x255xf32>
    %279 = tpu.concatenate %278, %277 in 1 : vector<48x255xf32>, vector<48x1xf32> -> vector<48x256xf32>
    %280 = vector.broadcast %239 : vector<1x256xf32> to vector<48x256xf32>
    %281 = arith.mulf %279, %280 : vector<48x256xf32>
    %282 = vector.extract_strided_slice %14 {offsets = [0, 5], sizes = [48, 1], strides = [1, 1]} : vector<48x9xf32> to vector<48x1xf32>
    %283 = vector.broadcast %282 : vector<48x1xf32> to vector<48x256xf32>
    %284 = arith.mulf %281, %283 : vector<48x256xf32>
    %285 = arith.addf %276, %284 : vector<48x256xf32>
    %cst_91 = arith.constant 0.000000e+00 : f32
    %286 = vector.broadcast %cst_91 : f32 to vector<48x15xf32>
    %287 = vector.extract_strided_slice %228 {offsets = [0, 15], sizes = [48, 241], strides = [1, 1]} : vector<48x256xf32> to vector<48x241xf32>
    %288 = tpu.concatenate %287, %286 in 1 : vector<48x241xf32>, vector<48x15xf32> -> vector<48x256xf32>
    %289 = vector.broadcast %235 : vector<1x256xf32> to vector<48x256xf32>
    %290 = arith.mulf %288, %289 : vector<48x256xf32>
    %291 = vector.extract_strided_slice %14 {offsets = [0, 6], sizes = [48, 1], strides = [1, 1]} : vector<48x9xf32> to vector<48x1xf32>
    %292 = vector.broadcast %291 : vector<48x1xf32> to vector<48x256xf32>
    %293 = arith.mulf %290, %292 : vector<48x256xf32>
    %294 = arith.addf %285, %293 : vector<48x256xf32>
    %cst_92 = arith.constant 0.000000e+00 : f32
    %295 = vector.broadcast %cst_92 : f32 to vector<48x16xf32>
    %296 = vector.extract_strided_slice %228 {offsets = [0, 16], sizes = [48, 240], strides = [1, 1]} : vector<48x256xf32> to vector<48x240xf32>
    %297 = tpu.concatenate %296, %295 in 1 : vector<48x240xf32>, vector<48x16xf32> -> vector<48x256xf32>
    %298 = vector.extract_strided_slice %14 {offsets = [0, 7], sizes = [48, 1], strides = [1, 1]} : vector<48x9xf32> to vector<48x1xf32>
    %299 = vector.broadcast %298 : vector<48x1xf32> to vector<48x256xf32>
    %300 = arith.mulf %297, %299 : vector<48x256xf32>
    %301 = arith.addf %294, %300 : vector<48x256xf32>
    %cst_93 = arith.constant 0.000000e+00 : f32
    %302 = vector.broadcast %cst_93 : f32 to vector<48x17xf32>
    %303 = vector.extract_strided_slice %228 {offsets = [0, 17], sizes = [48, 239], strides = [1, 1]} : vector<48x256xf32> to vector<48x239xf32>
    %304 = tpu.concatenate %303, %302 in 1 : vector<48x239xf32>, vector<48x17xf32> -> vector<48x256xf32>
    %305 = vector.broadcast %239 : vector<1x256xf32> to vector<48x256xf32>
    %306 = arith.mulf %304, %305 : vector<48x256xf32>
    %307 = vector.extract_strided_slice %14 {offsets = [0, 8], sizes = [48, 1], strides = [1, 1]} : vector<48x9xf32> to vector<48x1xf32>
    %308 = vector.broadcast %307 : vector<48x1xf32> to vector<48x256xf32>
    %309 = arith.mulf %306, %308 : vector<48x256xf32>
    %310 = arith.addf %301, %309 : vector<48x256xf32>
    %311 = vector.broadcast %15 : vector<48x1xf32> to vector<48x256xf32>
    %312 = arith.addf %310, %311 : vector<48x256xf32>
    %cst_94 = arith.constant 0.000000e+00 : f32
    %313 = vector.broadcast %cst_94 : f32 to vector<48x256xf32>
    %314 = arith.maximumf %312, %313 : vector<48x256xf32>
    %cst_95 = arith.constant dense<0.000000e+00> : vector<8x256xf32>
    %315 = tpu.matmul %16, %314, %cst_95 {dimension_numbers = #tpu.dot_dimension_numbers<[1], [0], [0], [1], [0, 0, 1, 1], [], []>} : vector<8x48xf32>, vector<48x256xf32>, vector<8x256xf32> -> vector<8x256xf32>
    %316 = vector.broadcast %17 : vector<8x1xf32> to vector<8x256xf32>
    %317 = arith.addf %315, %316 : vector<8x256xf32>
    %318 = arith.addf %317, %223 : vector<8x256xf32>
    %319 = tpu.concatenate %28, %318 in 0 : vector<8x256xf32>, vector<8x256xf32> -> vector<16x256xf32>
    %cst_96 = arith.constant dense<0.000000e+00> : vector<96x256xf32>
    %320 = tpu.matmul %18, %319, %cst_96 {dimension_numbers = #tpu.dot_dimension_numbers<[1], [0], [0], [1], [0, 0, 1, 1], [], []>} : vector<96x16xf32>, vector<16x256xf32>, vector<96x256xf32> -> vector<96x256xf32>
    %321 = vector.broadcast %19 : vector<96x1xf32> to vector<96x256xf32>
    %322 = arith.addf %320, %321 : vector<96x256xf32>
    %cst_97 = arith.constant 0.000000e+00 : f32
    %323 = vector.broadcast %cst_97 : f32 to vector<96x256xf32>
    %324 = arith.maximumf %322, %323 : vector<96x256xf32>
    %325 = tpu.iota {dimensions = array<i32: 1>} : vector<1x256xi32>
    %c15_i32_98 = arith.constant 15 : i32
    %326 = vector.broadcast %c15_i32_98 : i32 to vector<1x256xi32>
    %327 = arith.andi %325, %326 : vector<1x256xi32>
    %c1_i32_99 = arith.constant 1 : i32
    %328 = vector.broadcast %c1_i32_99 : i32 to vector<1x256xi32>
    %329 = arith.cmpi sge, %327, %328 : vector<1x256xi32>
    %330 = arith.extui %329 : vector<1x256xi1> to vector<1x256xi32>
    %331 = arith.sitofp %330 : vector<1x256xi32> to vector<1x256xf32>
    %c15_i32_100 = arith.constant 15 : i32
    %332 = vector.broadcast %c15_i32_100 : i32 to vector<1x256xi32>
    %333 = arith.cmpi slt, %327, %332 : vector<1x256xi32>
    %334 = arith.extui %333 : vector<1x256xi1> to vector<1x256xi32>
    %335 = arith.sitofp %334 : vector<1x256xi32> to vector<1x256xf32>
    %336 = vector.extract_strided_slice %20 {offsets = [0, 4], sizes = [96, 1], strides = [1, 1]} : vector<96x9xf32> to vector<96x1xf32>
    %337 = vector.broadcast %336 : vector<96x1xf32> to vector<96x256xf32>
    %338 = arith.mulf %324, %337 : vector<96x256xf32>
    %cst_101 = arith.constant 0.000000e+00 : f32
    %339 = vector.broadcast %cst_101 : f32 to vector<96x17xf32>
    %340 = vector.extract_strided_slice %324 {offsets = [0, 0], sizes = [96, 239], strides = [1, 1]} : vector<96x256xf32> to vector<96x239xf32>
    %341 = tpu.concatenate %339, %340 in 1 : vector<96x17xf32>, vector<96x239xf32> -> vector<96x256xf32>
    %342 = vector.broadcast %331 : vector<1x256xf32> to vector<96x256xf32>
    %343 = arith.mulf %341, %342 : vector<96x256xf32>
    %344 = vector.extract_strided_slice %20 {offsets = [0, 0], sizes = [96, 1], strides = [1, 1]} : vector<96x9xf32> to vector<96x1xf32>
    %345 = vector.broadcast %344 : vector<96x1xf32> to vector<96x256xf32>
    %346 = arith.mulf %343, %345 : vector<96x256xf32>
    %347 = arith.addf %338, %346 : vector<96x256xf32>
    %cst_102 = arith.constant 0.000000e+00 : f32
    %348 = vector.broadcast %cst_102 : f32 to vector<96x16xf32>
    %349 = vector.extract_strided_slice %324 {offsets = [0, 0], sizes = [96, 240], strides = [1, 1]} : vector<96x256xf32> to vector<96x240xf32>
    %350 = tpu.concatenate %348, %349 in 1 : vector<96x16xf32>, vector<96x240xf32> -> vector<96x256xf32>
    %351 = vector.extract_strided_slice %20 {offsets = [0, 1], sizes = [96, 1], strides = [1, 1]} : vector<96x9xf32> to vector<96x1xf32>
    %352 = vector.broadcast %351 : vector<96x1xf32> to vector<96x256xf32>
    %353 = arith.mulf %350, %352 : vector<96x256xf32>
    %354 = arith.addf %347, %353 : vector<96x256xf32>
    %cst_103 = arith.constant 0.000000e+00 : f32
    %355 = vector.broadcast %cst_103 : f32 to vector<96x15xf32>
    %356 = vector.extract_strided_slice %324 {offsets = [0, 0], sizes = [96, 241], strides = [1, 1]} : vector<96x256xf32> to vector<96x241xf32>
    %357 = tpu.concatenate %355, %356 in 1 : vector<96x15xf32>, vector<96x241xf32> -> vector<96x256xf32>
    %358 = vector.broadcast %335 : vector<1x256xf32> to vector<96x256xf32>
    %359 = arith.mulf %357, %358 : vector<96x256xf32>
    %360 = vector.extract_strided_slice %20 {offsets = [0, 2], sizes = [96, 1], strides = [1, 1]} : vector<96x9xf32> to vector<96x1xf32>
    %361 = vector.broadcast %360 : vector<96x1xf32> to vector<96x256xf32>
    %362 = arith.mulf %359, %361 : vector<96x256xf32>
    %363 = arith.addf %354, %362 : vector<96x256xf32>
    %cst_104 = arith.constant 0.000000e+00 : f32
    %364 = vector.broadcast %cst_104 : f32 to vector<96x1xf32>
    %365 = vector.extract_strided_slice %324 {offsets = [0, 0], sizes = [96, 255], strides = [1, 1]} : vector<96x256xf32> to vector<96x255xf32>
    %366 = tpu.concatenate %364, %365 in 1 : vector<96x1xf32>, vector<96x255xf32> -> vector<96x256xf32>
    %367 = vector.broadcast %331 : vector<1x256xf32> to vector<96x256xf32>
    %368 = arith.mulf %366, %367 : vector<96x256xf32>
    %369 = vector.extract_strided_slice %20 {offsets = [0, 3], sizes = [96, 1], strides = [1, 1]} : vector<96x9xf32> to vector<96x1xf32>
    %370 = vector.broadcast %369 : vector<96x1xf32> to vector<96x256xf32>
    %371 = arith.mulf %368, %370 : vector<96x256xf32>
    %372 = arith.addf %363, %371 : vector<96x256xf32>
    %cst_105 = arith.constant 0.000000e+00 : f32
    %373 = vector.broadcast %cst_105 : f32 to vector<96x1xf32>
    %374 = vector.extract_strided_slice %324 {offsets = [0, 1], sizes = [96, 255], strides = [1, 1]} : vector<96x256xf32> to vector<96x255xf32>
    %375 = tpu.concatenate %374, %373 in 1 : vector<96x255xf32>, vector<96x1xf32> -> vector<96x256xf32>
    %376 = vector.broadcast %335 : vector<1x256xf32> to vector<96x256xf32>
    %377 = arith.mulf %375, %376 : vector<96x256xf32>
    %378 = vector.extract_strided_slice %20 {offsets = [0, 5], sizes = [96, 1], strides = [1, 1]} : vector<96x9xf32> to vector<96x1xf32>
    %379 = vector.broadcast %378 : vector<96x1xf32> to vector<96x256xf32>
    %380 = arith.mulf %377, %379 : vector<96x256xf32>
    %381 = arith.addf %372, %380 : vector<96x256xf32>
    %cst_106 = arith.constant 0.000000e+00 : f32
    %382 = vector.broadcast %cst_106 : f32 to vector<96x15xf32>
    %383 = vector.extract_strided_slice %324 {offsets = [0, 15], sizes = [96, 241], strides = [1, 1]} : vector<96x256xf32> to vector<96x241xf32>
    %384 = tpu.concatenate %383, %382 in 1 : vector<96x241xf32>, vector<96x15xf32> -> vector<96x256xf32>
    %385 = vector.broadcast %331 : vector<1x256xf32> to vector<96x256xf32>
    %386 = arith.mulf %384, %385 : vector<96x256xf32>
    %387 = vector.extract_strided_slice %20 {offsets = [0, 6], sizes = [96, 1], strides = [1, 1]} : vector<96x9xf32> to vector<96x1xf32>
    %388 = vector.broadcast %387 : vector<96x1xf32> to vector<96x256xf32>
    %389 = arith.mulf %386, %388 : vector<96x256xf32>
    %390 = arith.addf %381, %389 : vector<96x256xf32>
    %cst_107 = arith.constant 0.000000e+00 : f32
    %391 = vector.broadcast %cst_107 : f32 to vector<96x16xf32>
    %392 = vector.extract_strided_slice %324 {offsets = [0, 16], sizes = [96, 240], strides = [1, 1]} : vector<96x256xf32> to vector<96x240xf32>
    %393 = tpu.concatenate %392, %391 in 1 : vector<96x240xf32>, vector<96x16xf32> -> vector<96x256xf32>
    %394 = vector.extract_strided_slice %20 {offsets = [0, 7], sizes = [96, 1], strides = [1, 1]} : vector<96x9xf32> to vector<96x1xf32>
    %395 = vector.broadcast %394 : vector<96x1xf32> to vector<96x256xf32>
    %396 = arith.mulf %393, %395 : vector<96x256xf32>
    %397 = arith.addf %390, %396 : vector<96x256xf32>
    %cst_108 = arith.constant 0.000000e+00 : f32
    %398 = vector.broadcast %cst_108 : f32 to vector<96x17xf32>
    %399 = vector.extract_strided_slice %324 {offsets = [0, 17], sizes = [96, 239], strides = [1, 1]} : vector<96x256xf32> to vector<96x239xf32>
    %400 = tpu.concatenate %399, %398 in 1 : vector<96x239xf32>, vector<96x17xf32> -> vector<96x256xf32>
    %401 = vector.broadcast %335 : vector<1x256xf32> to vector<96x256xf32>
    %402 = arith.mulf %400, %401 : vector<96x256xf32>
    %403 = vector.extract_strided_slice %20 {offsets = [0, 8], sizes = [96, 1], strides = [1, 1]} : vector<96x9xf32> to vector<96x1xf32>
    %404 = vector.broadcast %403 : vector<96x1xf32> to vector<96x256xf32>
    %405 = arith.mulf %402, %404 : vector<96x256xf32>
    %406 = arith.addf %397, %405 : vector<96x256xf32>
    %407 = vector.broadcast %21 : vector<96x1xf32> to vector<96x256xf32>
    %408 = arith.addf %406, %407 : vector<96x256xf32>
    %cst_109 = arith.constant 0.000000e+00 : f32
    %409 = vector.broadcast %cst_109 : f32 to vector<96x256xf32>
    %410 = arith.maximumf %408, %409 : vector<96x256xf32>
    %cst_110 = arith.constant dense<0.000000e+00> : vector<24x256xf32>
    %411 = tpu.matmul %22, %410, %cst_110 {dimension_numbers = #tpu.dot_dimension_numbers<[1], [0], [0], [1], [0, 0, 1, 1], [], []>} : vector<24x96xf32>, vector<96x256xf32>, vector<24x256xf32> -> vector<24x256xf32>
    %412 = vector.broadcast %23 : vector<24x1xf32> to vector<24x256xf32>
    %413 = arith.addf %411, %412 : vector<24x256xf32>
    %cst_111 = arith.constant dense<0.000000e+00> : vector<24x256xf32>
    %414 = tpu.matmul %24, %319, %cst_111 {dimension_numbers = #tpu.dot_dimension_numbers<[1], [0], [0], [1], [0, 0, 1, 1], [], []>} : vector<24x16xf32>, vector<16x256xf32>, vector<24x256xf32> -> vector<24x256xf32>
    %415 = vector.broadcast %25 : vector<24x1xf32> to vector<24x256xf32>
    %416 = arith.addf %414, %415 : vector<24x256xf32>
    %417 = arith.addf %413, %416 : vector<24x256xf32>
    %c0_112 = arith.constant 0 : index
    %c0_113 = arith.constant 0 : index
    %c0_114 = arith.constant 0 : index
    %418 = vector.load %arg28[%c0_112, %c0_113, %c0_114] : memref<1x24x256xf32, #tpu.memory_space<vmem>>, vector<1x24x256xf32>
    %419 = vector.shape_cast %418 : vector<1x24x256xf32> to vector<24x256xf32>
    %420 = vector.shape_cast %417 : vector<24x256xf32> to vector<1x24x256xf32>
    tpu.vector_store %arg28[%c0_112, %c0_113, %c0_114], %420 {strides = array<i32>} : memref<1x24x256xf32, #tpu.memory_space<vmem>>, vector<1x24x256xf32>,
    return
  }
  func.func @transform_0(%arg0: i32) -> (i32, i32, i32) {
    %c0_i32 = arith.constant 0 : i32
    %c0_i32_0 = arith.constant 0 : i32
    %c0_i32_1 = arith.constant 0 : i32
    return %arg0, %c0_i32, %c0_i32_0 : i32, i32, i32
  }
  func.func @transform_1(%arg0: i32) -> (i32, i32) {
    %c0_i32 = arith.constant 0 : i32
    %c0_i32_0 = arith.constant 0 : i32
    %c0_i32_1 = arith.constant 0 : i32
    return %c0_i32, %c0_i32_0 : i32, i32
  }
  func.func @transform_2(%arg0: i32) -> (i32, i32) {
    %c0_i32 = arith.constant 0 : i32
    %c0_i32_0 = arith.constant 0 : i32
    %c0_i32_1 = arith.constant 0 : i32
    return %c0_i32, %c0_i32_0 : i32, i32
  }
  func.func @transform_3(%arg0: i32) -> (i32, i32) {
    %c0_i32 = arith.constant 0 : i32
    %c0_i32_0 = arith.constant 0 : i32
    %c0_i32_1 = arith.constant 0 : i32
    return %c0_i32, %c0_i32_0 : i32, i32
  }
  func.func @transform_4(%arg0: i32) -> (i32, i32) {
    %c0_i32 = arith.constant 0 : i32
    %c0_i32_0 = arith.constant 0 : i32
    %c0_i32_1 = arith.constant 0 : i32
    return %c0_i32, %c0_i32_0 : i32, i32
  }
  func.func @transform_5(%arg0: i32) -> (i32, i32) {
    %c0_i32 = arith.constant 0 : i32
    %c0_i32_0 = arith.constant 0 : i32
    %c0_i32_1 = arith.constant 0 : i32
    return %c0_i32, %c0_i32_0 : i32, i32
  }
  func.func @transform_6(%arg0: i32) -> (i32, i32) {
    %c0_i32 = arith.constant 0 : i32
    %c0_i32_0 = arith.constant 0 : i32
    %c0_i32_1 = arith.constant 0 : i32
    return %c0_i32, %c0_i32_0 : i32, i32
  }
  func.func @transform_7(%arg0: i32) -> (i32, i32) {
    %c0_i32 = arith.constant 0 : i32
    %c0_i32_0 = arith.constant 0 : i32
    %c0_i32_1 = arith.constant 0 : i32
    return %c0_i32, %c0_i32_0 : i32, i32
  }
  func.func @transform_8(%arg0: i32) -> (i32, i32) {
    %c0_i32 = arith.constant 0 : i32
    %c0_i32_0 = arith.constant 0 : i32
    %c0_i32_1 = arith.constant 0 : i32
    return %c0_i32, %c0_i32_0 : i32, i32
  }
  func.func @transform_9(%arg0: i32) -> (i32, i32) {
    %c0_i32 = arith.constant 0 : i32
    %c0_i32_0 = arith.constant 0 : i32
    %c0_i32_1 = arith.constant 0 : i32
    return %c0_i32, %c0_i32_0 : i32, i32
  }
  func.func @transform_10(%arg0: i32) -> (i32, i32) {
    %c0_i32 = arith.constant 0 : i32
    %c0_i32_0 = arith.constant 0 : i32
    %c0_i32_1 = arith.constant 0 : i32
    return %c0_i32, %c0_i32_0 : i32, i32
  }
  func.func @transform_11(%arg0: i32) -> (i32, i32) {
    %c0_i32 = arith.constant 0 : i32
    %c0_i32_0 = arith.constant 0 : i32
    %c0_i32_1 = arith.constant 0 : i32
    return %c0_i32, %c0_i32_0 : i32, i32
  }
  func.func @transform_12(%arg0: i32) -> (i32, i32) {
    %c0_i32 = arith.constant 0 : i32
    %c0_i32_0 = arith.constant 0 : i32
    %c0_i32_1 = arith.constant 0 : i32
    return %c0_i32, %c0_i32_0 : i32, i32
  }
  func.func @transform_13(%arg0: i32) -> (i32, i32) {
    %c0_i32 = arith.constant 0 : i32
    %c0_i32_0 = arith.constant 0 : i32
    %c0_i32_1 = arith.constant 0 : i32
    return %c0_i32, %c0_i32_0 : i32, i32
  }
  func.func @transform_14(%arg0: i32) -> (i32, i32) {
    %c0_i32 = arith.constant 0 : i32
    %c0_i32_0 = arith.constant 0 : i32
    %c0_i32_1 = arith.constant 0 : i32
    return %c0_i32, %c0_i32_0 : i32, i32
  }
  func.func @transform_15(%arg0: i32) -> (i32, i32) {
    %c0_i32 = arith.constant 0 : i32
    %c0_i32_0 = arith.constant 0 : i32
    %c0_i32_1 = arith.constant 0 : i32
    return %c0_i32, %c0_i32_0 : i32, i32
  }
  func.func @transform_16(%arg0: i32) -> (i32, i32) {
    %c0_i32 = arith.constant 0 : i32
    %c0_i32_0 = arith.constant 0 : i32
    %c0_i32_1 = arith.constant 0 : i32
    return %c0_i32, %c0_i32_0 : i32, i32
  }
  func.func @transform_17(%arg0: i32) -> (i32, i32) {
    %c0_i32 = arith.constant 0 : i32
    %c0_i32_0 = arith.constant 0 : i32
    %c0_i32_1 = arith.constant 0 : i32
    return %c0_i32, %c0_i32_0 : i32, i32
  }
  func.func @transform_18(%arg0: i32) -> (i32, i32) {
    %c0_i32 = arith.constant 0 : i32
    %c0_i32_0 = arith.constant 0 : i32
    %c0_i32_1 = arith.constant 0 : i32
    return %c0_i32, %c0_i32_0 : i32, i32
  }
  func.func @transform_19(%arg0: i32) -> (i32, i32) {
    %c0_i32 = arith.constant 0 : i32
    %c0_i32_0 = arith.constant 0 : i32
    %c0_i32_1 = arith.constant 0 : i32
    return %c0_i32, %c0_i32_0 : i32, i32
  }
  func.func @transform_20(%arg0: i32) -> (i32, i32) {
    %c0_i32 = arith.constant 0 : i32
    %c0_i32_0 = arith.constant 0 : i32
    %c0_i32_1 = arith.constant 0 : i32
    return %c0_i32, %c0_i32_0 : i32, i32
  }
  func.func @transform_21(%arg0: i32) -> (i32, i32) {
    %c0_i32 = arith.constant 0 : i32
    %c0_i32_0 = arith.constant 0 : i32
    %c0_i32_1 = arith.constant 0 : i32
    return %c0_i32, %c0_i32_0 : i32, i32
  }
  func.func @transform_22(%arg0: i32) -> (i32, i32) {
    %c0_i32 = arith.constant 0 : i32
    %c0_i32_0 = arith.constant 0 : i32
    %c0_i32_1 = arith.constant 0 : i32
    return %c0_i32, %c0_i32_0 : i32, i32
  }
  func.func @transform_23(%arg0: i32) -> (i32, i32) {
    %c0_i32 = arith.constant 0 : i32
    %c0_i32_0 = arith.constant 0 : i32
    %c0_i32_1 = arith.constant 0 : i32
    return %c0_i32, %c0_i32_0 : i32, i32
  }
  func.func @transform_24(%arg0: i32) -> (i32, i32) {
    %c0_i32 = arith.constant 0 : i32
    %c0_i32_0 = arith.constant 0 : i32
    %c0_i32_1 = arith.constant 0 : i32
    return %c0_i32, %c0_i32_0 : i32, i32
  }
  func.func @transform_25(%arg0: i32) -> (i32, i32) {
    %c0_i32 = arith.constant 0 : i32
    %c0_i32_0 = arith.constant 0 : i32
    %c0_i32_1 = arith.constant 0 : i32
    return %c0_i32, %c0_i32_0 : i32, i32
  }
  func.func @transform_26(%arg0: i32) -> (i32, i32) {
    %c0_i32 = arith.constant 0 : i32
    %c0_i32_0 = arith.constant 0 : i32
    %c0_i32_1 = arith.constant 0 : i32
    return %c0_i32, %c0_i32_0 : i32, i32
  }
  func.func @transform_27(%arg0: i32) -> (i32, i32, i32) {
    %c0_i32 = arith.constant 0 : i32
    %c0_i32_0 = arith.constant 0 : i32
    %c0_i32_1 = arith.constant 0 : i32
    return %arg0, %c0_i32, %c0_i32_0 : i32, i32, i32
  }
}

</mosaic_0001>

<bundles_post_ra>
// kernel: _feblock_pallas.1
= control target key start
LH: loop header
LB: loop body
LE: loop exit
PB: predicated region body
PF: predicated region fallthrough
CT: control target
= control target key end

     0   :  { %s10260_s0 = inlined_call_operand.vmem [shape: f32[2,16,256], index: 0, kind: input, shape index: {}]   ;;  %s10261_s1 = inlined_call_operand.vmem [shape: f32[12,2], index: 1, kind: input, shape index: {}]   ;;  %s10262_s2 = inlined_call_operand.vmem [shape: f32[12,1], index: 2, kind: input, shape index: {}]   ;;  %s10263_s3 = inlined_call_operand.vmem [shape: f32[12,9], index: 3, kind: input, shape index: {}]   ;;  %s10264_s4 = inlined_call_operand.vmem [shape: f32[12,1], index: 4, kind: input, shape index: {}]   ;;  %s10265_s5 = inlined_call_operand.vmem [shape: f32[2,12], index: 5, kind: input, shape index: {}]   ;;  %s10266_s6 = inlined_call_operand.vmem [shape: f32[2,1], index: 6, kind: input, shape index: {}]   ;;  %s10267_s7 = inlined_call_operand.vmem [shape: f32[24,4], index: 7, kind: input, shape index: {}]   ;;  %s10268_s8 = inlined_call_operand.vmem [shape: f32[24,1], index: 8, kind: input, shape index: {}]   ;;  %s10269_s9 = inlined_call_operand.vmem [shape: f32[24,9], index: 9, kind: input, shape index: {}]   ;;  %s10270_s10 = inlined_call_operand.vmem [shape: f32[24,1], index: 10, kind: input, shape index: {}]   ;;  %s10271_s11 = inlined_call_operand.vmem [shape: f32[4,24], index: 11, kind: input, shape index: {}]   ;;  %s10272_s12 = inlined_call_operand.vmem [shape: f32[4,1], index: 12, kind: input, shape index: {}]   ;;  %s10273_s13 = inlined_call_operand.vmem [shape: f32[48,8], index: 13, kind: input, shape index: {}]   ;;  %s10274_s14 = inlined_call_operand.vmem [shape: f32[48,1], index: 14, kind: input, shape index: {}]   ;;  %s10275_s15 = inlined_call_operand.vmem [shape: f32[48,9], index: 15, kind: input, shape index: {}]   ;;  %s10276_s16 = inlined_call_operand.vmem [shape: f32[48,1], index: 16, kind: input, shape index: {}]   ;;  %s10277_s17 = inlined_call_operand.vmem [shape: f32[8,48], index: 17, kind: input, shape index: {}]   ;;  %s10278_s18 = inlined_call_operand.vmem [shape: f32[8,1], index: 18, kind: input, shape index: {}]   ;;  %s10279_s19 = inlined_call_operand.vmem [shape: f32[96,16], index: 19, kind: input, shape index: {}]   ;;  %s10280_s20 = inlined_call_operand.vmem [shape: f32[96,1], index: 20, kind: input, shape index: {}]   ;;  %s10281_s21 = inlined_call_operand.vmem [shape: f32[96,9], index: 21, kind: input, shape index: {}]   ;;  %s10282_s22 = inlined_call_operand.vmem [shape: f32[96,1], index: 22, kind: input, shape index: {}]   ;;  %s10283_s23 = inlined_call_operand.vmem [shape: f32[24,96], index: 23, kind: input, shape index: {}]   ;;  %s10284_s24 = inlined_call_operand.vmem [shape: f32[24,1], index: 24, kind: input, shape index: {}]   ;;  %s10285_s25 = inlined_call_operand.vmem [shape: f32[24,16], index: 25, kind: input, shape index: {}]   ;;  %s10286_s26 = inlined_call_operand.vmem [shape: f32[24,1], index: 26, kind: input, shape index: {}]   ;;  %s10287_s27 = inlined_call_operand.vmem [shape: f32[2,24,256], index: 27, kind: output, shape index: {}]  }
   0x1   :  { %10535 = sst [smem:[#allocation129_spill]] %s10260_s0 }
   0x2   :  { %10536 = sst [smem:[#allocation130_spill]] %s10261_s1 }
   0x3   :  { %10537 = sst [smem:[#allocation131_spill]] %s10262_s2 }
   0x4   :  { %10538 = sst [smem:[#allocation132_spill]] %s10263_s3 }
   0x5   :  { %10539 = sst [smem:[#allocation133_spill]] %s10264_s4 }
   0x6   :  { %10540 = sst [smem:[#allocation134_spill]] %s10265_s5 }
   0x7   :  { %10541 = sst [smem:[#allocation135_spill]] %s10266_s6 }
   0x8   :  { %10542 = sst [smem:[#allocation136_spill]] %s10267_s7  ;;  %s6221_s7 = smov 0  }
   0x9   :  { %10543 = sst [smem:[#allocation137_spill]] %s10268_s8 }
   0xa   :  { %10544 = sst [smem:[#allocation138_spill]] %s10269_s9 }
   0xb   :  { %10545 = sst [smem:[#allocation139_spill]] %s10270_s10 }
   0xc   :  { %10546 = sst [smem:[#allocation140_spill]] %s10271_s11 }
   0xd   :  { %10547 = sst [smem:[#allocation141_spill]] %s10272_s12 }
   0xe   :  { %10548 = sst [smem:[#allocation142_spill]] %s10283_s23 }
   0xf   :  { %10549 = sst [smem:[#allocation143_spill]] %s10285_s25 }
  0x10   :  { %10550 = sst [smem:[#allocation144_spill]] %s10287_s27 }
  0x11 LB: > { %10551 = sst [smem:[#allocation2_spill]] %s6060_s7  ;;  %s5795_s4 = sadd.s32 4294967295, %s6060_s7   ;;  %s6060_s7 = sphi %s6221_s7, %s37_s7  }
  0x12   : > { %p5799_p0 = scmp.ge.s32.totalorder %s6060_s7, 1  ;;  %p737_p1 = scmp.lt.s32.totalorder %s6060_s7, 3 }
  0x14   : > { %p738_p2 = pnand %p5799_p0, %p737_p1 }
  0x16   : > { %741 = sbr.rel (%p738_p2) target bundleno = 3115 (0xc2b), region = 128 }
  0x1d   : > { %p809_p3 = scmp.lt.s32.totalorder %s5795_s4, 1  ;;  %v10337_v0 = vmov 0.0   ;;  %v10345_v1 = vmov 0   ;;  %s10552_s9 = sld [smem:[#allocation131_spill]]  ;;  %v10308_v3 = vmov 4   ;;  %vm954_vm0 = vcmask 1041408  }
  0x1e   : > { %1023 = vmatprep.mubr.f32.mxu0 %v10337_v0  ;;  %5948 = vset.pattern.permute.xlu0 %v10345_v1  ;;  %s10554_s0 = sld [smem:[#allocation132_spill]]  ;;  %s10555_s8 = sld [smem:[#allocation129_spill]]  ;;  %vm947_vm1 = vcmask 15360   ;;  %v10341_v12 = vmov 1   ;;  %v10339_v14 = vmov 2   ;;  %v10320_v15 = vmov 5  }
  0x1f   : > { %s10984_s4 = smov (!%p809_p3, %s5795_s4), 1  ;;  %5949 = vset.pattern.permute.xlu1 %v10308_v3  ;;  %1579 = vmatprep.mubr.f32.mxu1 %v10337_v0  ;;  %s10556_s10 = sld [smem:[#allocation130_spill]]  ;;  %v10312_v16 = vmov 3   ;;  %v10318_v17 = vmov 6   ;;  %v10316_v18 = vmov 7   ;;  %v10314_v19 = vmov 8  }
  0x20   : > { %10553 = sst [smem:[#allocation3_spill]] %s10984_s4  ;;  %s5847_s1 = sshll.u32 %s10984_s4, 5  ;;  %vm1083_vm4 = vcmask 138240   ;;  %vm1153_vm5 = vcmask 121856   ;;  %vm1120_vm7 = vcmask 130048   ;;  %vm1190_vm9 = vcmask 7168  }
  0x21   : > { %s10557_s2 = sld [smem:[#allocation133_spill]]  ;;  %s10306_s5 = smov 16   ;;  %vm1227_vm10 = vcmask 1039360   ;;  %vm1264_vm11 = vcmask 924672   ;;  %vm1301_vm12 = vcmask 916480   ;;  %vm1334_vm13 = vcmask 908288  }
  0x22   : > { %s10324_s28 = smov 17   ;;  %s10304_s29 = smov 15   ;;  %vm1390_vm14 = vcmask 1043456   ;;  %vm6080_vm15 = vmmov 1  }
  0x23   : > { %v821_v2 = vld [vmem:[%s10552_s9] sm:$0xff]  ;;  %v822_v5 = vld [vmem:[%s10552_s9 + $0x8] sm:$0xf]  ;;  %s10300_s6 = smov 127   ;;  %s10296_s11 = smov 113  }
  0x24   : > { %935 = vperm.xlu0 %5948, %v821_v2   ;;  %v823_v4 = vld [vmem:[%s10554_s0] sm:$0xff]  ;;  %v824_v6 = vld [vmem:[%s10554_s0 + $0x8] sm:$0xf]  ;;  %s6251_s30 = scalar_lea.vmem %s10555_s8, %s5847_s1  ;;  %s10298_s1 = smov 1  }
  0x25   : > { %1059 = vperm.xlu1 %5949, %v823_v4   ;;  %v6254_v7 = vld [vmem:[%s6251_s30 + $0x18] sm:$0xff]  ;;  %v6257_v8 = vld [vmem:[%s6251_s30 + $0x10] sm:$0xff]  ;;  %v819_v11 = vld [vmem:[%s10556_s10] sm:$0xff]  ;;  %s10302_s3 = smov 112   ;;  %s10322_s8 = smov 111  }
  0x26   : > { %v10310_v9 = vrot.slane %v6254_v7, 6  ;;  %v10311_v10 = vrot.slane %v6257_v8, 6  ;;  %v820_v13 = vld [vmem:[%s10556_s10 + $0x8] sm:$0xf]  ;;  %s10574_s9 = smov 16   ;;  %s10576_s0 = smov 15  }
  0x27   : > { %v825_v20 = vld [vmem:[%s10557_s2] sm:$0xff]  ;;  %v826_v21 = vld [vmem:[%s10557_s2 + $0x8] sm:$0xf]  ;;  %s10571_s2 = sld [smem:[#allocation136_spill]]  ;;  %s10591_s12 = sld [smem:[#allocation141_spill]] }
  0x28   : > { %940 = vperm.xlu0 %5948, %v822_v5   ;;  %5803 = vmatprep.subr.msk.mxu0 %vm954_vm0, %v10310_v9  ;;  %v1040_v5 = vlaneseq  ;;  %s10613_s7 = sld [smem:[#allocation140_spill]]  ;;  %s10980_s25 = sld [smem:[#allocation143_spill]] }
  0x29   : > { %1064 = vperm.xlu1 %5949, %v824_v6   ;;  %5804 = vmatpush1.msk.msra.mxu0 %vm954_vm0, %v10311_v10 }
  0x2a   : > { %5805 = vmatmul.mubr.msk.f32.vlgmr.msra.gmra.mrb[0].mxu0 %vm947_vm1, %v819_v11 }
  0x2b   : > { %1029 = vmatprep.mubr.f32.mxu0 %v10337_v0 }
  0x2c   : > { %5951 = vset.pattern.permute.xlu0 %v10341_v12 }
  0x2d   : > { %5950 = vset.pattern.permute.xlu1 %v10345_v1  ;;  %1130 = vperm.xlu0 %5951, %v823_v4  }
  0x2e   : > { %1101 = vperm.xlu1 %5950, %v824_v6   ;;  %5806 = vmatmul.mubr.msk.f32.gmra.mrb[2].mxu0 %vm947_vm1, %v820_v13  ;;  %v1041_v13 = vand.u32 127, %v1040_v5  ;;  %vm5849_vm1 = vmpackc.low %vm1390_vm14, %vm6080_vm15 }
  0x2f   : > { %1461 = vmatprep.mubr.f32.mxu0 %v10337_v0 }
  0x31   : > { %5954 = vset.pattern.permute.xlu0 %v10339_v14 }
  0x32   : > { %5952 = vset.pattern.permute.xlu1 %v10341_v12  ;;  %1171 = vperm.xlu0 %5954, %v824_v6  }
  0x33   : > { %1134 = vperm.xlu1 %5952, %v824_v6  }
  0x36   : > { %5956 = vset.pattern.permute.xlu0 %v10320_v15 }
  0x37   : > { %5953 = vset.pattern.permute.xlu1 %v10339_v14  ;;  %1241 = vperm.xlu0 %5956, %v823_v4  }
  0x38   : > { %1167 = vperm.xlu1 %5953, %v823_v4  }
  0x3b   : > { %5959 = vset.pattern.permute.xlu0 %v10318_v17 }
  0x3c   : > { %5955 = vset.pattern.permute.xlu1 %v10312_v16  ;;  %1282 = vperm.xlu0 %5959, %v824_v6  }
  0x3d   : > { %1204 = vperm.xlu1 %5955, %v823_v4  }
  0x40   : > { %5960 = vset.pattern.permute.xlu0 %v10316_v18 }
  0x41   : > { %1208 = vperm.xlu1 %5955, %v824_v6   ;;  %1311 = vperm.xlu0 %5960, %v823_v4  }
  0x45   : > { %5957 = vset.pattern.permute.xlu1 %v10320_v15  ;;  %5963 = vset.pattern.permute.xlu0 %v10314_v19 }
  0x46   : > { %1245 = vperm.xlu1 %5957, %v824_v6   ;;  %1352 = vperm.xlu0 %5963, %v824_v6  }
  0x4a   : > { %5958 = vset.pattern.permute.xlu1 %v10318_v17  ;;  %5964 = vset.pattern.permute.xlu0 %v10345_v1 }
  0x4b   : > { %1278 = vperm.xlu1 %5958, %v823_v4   ;;  %1097 = vperm.xlu0 %5964, %v823_v4  }
  0x4f   : > { %5961 = vset.pattern.permute.xlu1 %v10316_v18  ;;  %1365 = vperm.xlu0 %5964, %v825_v20   ;;  %v1042_v20 = vadd.s32 128, %v1041_v13 }
  0x50   : > { %1315 = vperm.xlu1 %5961, %v824_v6  }
  0x53   : > { %5967 = vset.pattern.permute.xlu0 %v10308_v3 }
  0x54   : > { %5962 = vset.pattern.permute.xlu1 %v10314_v19 }
  0x55   : > { %1348 = vperm.xlu1 %5962, %v823_v4  }
  0x59   : > { %5965 = vset.pattern.permute.xlu1 %v10345_v1 }
  0x5a   : > { %1370 = vperm.xlu1 %5965, %v826_v21  }
  0xa3   : > { %v936_v22 = vpop.permute.xlu0 %935 }
  0xa4   : > { %v6354_v36 = vpop.permute.xlu1 %1059 }
  0xa7   : > { %v941_v31 = vpop.permute.xlu0 %940 }
  0xa8   : > { %v6360_v37 = vpop.permute.xlu1 %1064 }
  0xac   : > { %v6376_v40 = vpop.permute.xlu0 %1130 }
  0xad   : > { %v6368_v38 = vpop.permute.xlu1 %1101 }
  0xb1   : > { %v6385_v43 = vpop.permute.xlu0 %1171 }
  0xb2   : > { %v6372_v39 = vpop.permute.xlu1 %1134 }
  0xb6   : > { %v6392_v46 = vpop.permute.xlu0 %1241 }
  0xb7   : > { %v6380_v41 = vpop.permute.xlu1 %1167 }
  0xbb   : > { %v6399_v49 = vpop.permute.xlu0 %1282 }
  0xbc   : > { %v6390_v45 = vpop.permute.xlu1 %1204 }
  0xc0   : > { %v6394_v47 = vpop.permute.xlu1 %1208  ;;  %v6403_v51 = vpop.permute.xlu0 %1311 }
  0xc5   : > { %v6397_v48 = vpop.permute.xlu1 %1245  ;;  %v6407_v53 = vpop.permute.xlu0 %1352 }
  0xca   : > { %v6401_v50 = vpop.permute.xlu1 %1278  ;;  %v1098_v55 = vpop.permute.xlu0 %1097 }
  0xce   : > { %v6413_v57 = vpop.permute.xlu0 %1365 }
  0xcf   : > { %v6405_v52 = vpop.permute.xlu1 %1315 }
  0xd4   : > { %v6409_v54 = vpop.permute.xlu1 %1348 }
  0xd9   : > { %v6411_v56 = vpop.permute.xlu1 %1370 }
  0xfd   : > { %v1025_v23 = vpop.f32.mrb[0].mxu0 }
  0xfe   : > { %v1026_v24 = vadd.f32 %v1025_v23, %v936_v22  ;;  %v1027_v25 = vpop.f32.mrb[1].mxu0  ;;  %v1044_v23 = vand.u32 15, %v1042_v20 }
  0xff   : > { %v1028_v29 = vadd.f32 %v1027_v25, %v936_v22 }
 0x100   : > { %v6298_v26 = vmax.f32 %v1026_v24, 0.0  ;;  %v1043_v24 = vand.u32 15, %v1041_v13  ;;  %vm1046_vm2 = vcmp.ge.s32.totalorder %v1044_v23, 1  ;;  %vm1052_vm6 = vcmp.lt.s32.totalorder %v1044_v23, 15 }
 0x101   : > { %v1031_v27 = vpop.f32.mrb[2].mxu0  ;;  %v6308_v30 = vmax.f32 %v1028_v29, 0.0 }
 0x102   : > { %v1033_v28 = vpop.f32.mrb[3].mxu0  ;;  %1112 = vrot.lane.b32.xlu0 %v6298_v26, %s10306_s5  ;;  %1075 = vrot.lane.b32.xlu1 %v6298_v26, %s10324_s28  ;;  %v1032_v32 = vadd.f32 %v1031_v27, %v941_v31  ;;  %vm1045_vm3 = vcmp.ge.s32.totalorder %v1043_v24, 1  ;;  %vm1051_vm8 = vcmp.lt.s32.totalorder %v1043_v24, 15 }
 0x103   : > { %v1034_v34 = vadd.f32 %v1033_v28, %v941_v31  ;;  %v6434_v31 = vsel %vm1046_vm2, 1.0, %v10337_v0  ;;  %v6455_v19 = vsel %vm1051_vm8, 1.0, %v10337_v0  ;;  %vm1386_vm2 = vcmask 97280  }
 0x104   : > { %v6326_v33 = vmax.f32 %v1032_v32, 0.0  ;;  %vm3283_vm8 = vcmask 392192  }
 0x105   : > { %v6340_v35 = vmax.f32 %v1034_v34, 0.0  ;;  %v6438_v34 = vsel %vm1045_vm3, 1.0, %v10337_v0  ;;  %vm1499_vm3 = vcmask 31744  }
 0x106   : > { %1145 = vrot.lane.b32.xlu0 %v6298_v26, %s10304_s29  ;;  %1182 = vrot.lane.b32.xlu1 %v6298_v26, %s10298_s1 }
 0x10a   : > { %1077 = vrot.lane.b32.xlu0 %v6308_v30, %s10324_s28  ;;  %1219 = vrot.lane.b32.xlu1 %v6298_v26, %s10300_s6 }
 0x10e   : > { %1184 = vrot.lane.b32.xlu0 %v6308_v30, %s10298_s1  ;;  %1256 = vrot.lane.b32.xlu1 %v6298_v26, %s10296_s11 }
 0x112   : > { %1295 = vrot.lane.b32.xlu0 %v6308_v30, %s10302_s3  ;;  %1293 = vrot.lane.b32.xlu1 %v6298_v26, %s10302_s3 }
 0x116   : > { %1328 = vrot.lane.b32.xlu0 %v6308_v30, %s10322_s8  ;;  %1114 = vrot.lane.b32.xlu1 %v6308_v30, %s10306_s5 }
 0x11a   : > { %1116 = vrot.lane.b32.xlu0 %v6326_v33, %s10306_s5  ;;  %1147 = vrot.lane.b32.xlu1 %v6308_v30, %s10304_s29 }
 0x11e   : > { %1149 = vrot.lane.b32.xlu0 %v6326_v33, %s10304_s29  ;;  %1221 = vrot.lane.b32.xlu1 %v6308_v30, %s10300_s6 }
 0x122   : > { %1223 = vrot.lane.b32.xlu0 %v6326_v33, %s10300_s6  ;;  %1258 = vrot.lane.b32.xlu1 %v6308_v30, %s10296_s11 }
 0x126   : > { %1081 = vrot.lane.b32.xlu0 %v6340_v35, %s10324_s28  ;;  %1079 = vrot.lane.b32.xlu1 %v6326_v33, %s10324_s28  ;;  %s10577_s28 = smov 1  }
 0x12a   : > { %1188 = vrot.lane.b32.xlu0 %v6340_v35, %s10298_s1  ;;  %1186 = vrot.lane.b32.xlu1 %v6326_v33, %s10298_s1  ;;  %s10580_s1 = smov 113  }
 0x12e   : > { %1262 = vrot.lane.b32.xlu0 %v6340_v35, %s10296_s11  ;;  %1260 = vrot.lane.b32.xlu1 %v6326_v33, %s10296_s11  ;;  %s10581_s11 = smov 112  }
 0x132   : > { %1297 = vrot.lane.b32.xlu0 %v6326_v33, %s10302_s3  ;;  %1118 = vrot.lane.b32.xlu1 %v6340_v35, %s10306_s5  ;;  %s10559_s5 = sld [smem:[#allocation137_spill]] }
 0x136   : > { %1330 = vrot.lane.b32.xlu0 %v6326_v33, %s10322_s8  ;;  %1151 = vrot.lane.b32.xlu1 %v6340_v35, %s10304_s29  ;;  %s10578_s29 = smov 127  }
 0x138   : > { %v833_v44 = vld [vmem:[%s10559_s5 + $0x8] sm:$0xff] }
 0x13a   : > { %1225 = vrot.lane.b32.xlu1 %v6340_v35, %s10300_s6  ;;  %s10558_s6 = sld [smem:[#allocation135_spill]] }
 0x13e   : > { %1299 = vrot.lane.b32.xlu1 %v6340_v35, %s10302_s3  ;;  %s10573_s3 = smov 17  }
 0x140   : > { %v828_v42 = vld [vmem:[%s10558_s6] sm:$0x3]  ;;  %s10560_s6 = sld [smem:[#allocation134_spill]] }
 0x142   : > { %1332 = vrot.lane.b32.xlu1 %v6340_v35, %s10322_s8 }
 0x146   : > { %1326 = vrot.lane.b32.xlu1 %v6298_v26, %s10322_s8  ;;  %s10561_s8 = sld [smem:[#allocation138_spill]] }
 0x14a   : > { %1383 = vperm.xlu1 %5965, %v828_v42  }
 0x14e   : > { %1491 = vperm.xlu1 %5965, %v833_v44  }
 0x152   : > { %5966 = vset.pattern.permute.xlu1 %v10308_v3 }
 0x174   : > { %v1113_v58 = vpop.permute.xlu0 %1112  ;;  %v1076_v59 = vpop.permute.xlu1 %1075 }
 0x175   : > { %v1090_v42 = vsel %vm1083_vm4, 0.0, %v1076_v59  ;;  %v1127_v18 = vsel %vm1120_vm7, 0.0, %v1113_v58 }
 0x176   : > { %v1092_v20 = vmul.f32 %v6438_v34, %v1090_v42 }
 0x178   : > { %v1146_v60 = vpop.permute.xlu0 %1145  ;;  %v6415_v61 = vpop.permute.xlu1 %1182  ;;  %v1104_v23 = vmul.f32 %v1098_v55, %v1092_v20 }
 0x179   : > { %v1160_v24 = vsel %vm1153_vm5, 0.0, %v1146_v60 }
 0x17c   : > { %v1078_v62 = vpop.permute.xlu0 %1077  ;;  %v6417_v63 = vpop.permute.xlu1 %1219 }
 0x17d   : > { %v1084_v32 = vsel %vm1083_vm4, %v1076_v59, %v1078_v62  ;;  %v6449_v62 = vsel %vm1052_vm6, 1.0, %v10337_v0  ;;  %vm2198_vm6 = vcmask 64512  }
 0x17e   : > { %v1093_v5 = vmul.f32 %v6434_v31, %v1084_v32 }
 0x180   : > { %v1185_v2 = vpop.permute.xlu0 %1184  ;;  %v6419_v4 = vpop.permute.xlu1 %1256  ;;  %v1105_v10 = vmul.f32 %v1098_v55, %v1093_v5  ;;  %v1067_v5 = vmul.f32 %v6354_v36, %v6298_v26 }
 0x184   : > { %v6421_v6 = vpop.permute.xlu0 %1295  ;;  %v6423_v11 = vpop.permute.xlu1 %1293 }
 0x188   : > { %v6425_v21 = vpop.permute.xlu0 %1328  ;;  %v1115_v22 = vpop.permute.xlu1 %1114 }
 0x189   : > { %v1121_v9 = vsel %vm1120_vm7, %v1113_v58, %v1115_v22 }
 0x18a   : > { %v1138_v42 = vmul.f32 %v6376_v40, %v1121_v9  ;;  %v1162_v9 = vmul.f32 %v6455_v19, %v1160_v24 }
 0x18c   : > { %v6427_v25 = vpop.permute.xlu0 %1116  ;;  %v1148_v27 = vpop.permute.xlu1 %1147 }
 0x18d   : > { %v1154_v3 = vsel %vm1153_vm5, %v1146_v60, %v1148_v27  ;;  %v1068_v27 = vmul.f32 %v6354_v36, %v6308_v30  ;;  %v1108_v60 = vadd.f32 %v1104_v23, %v1067_v5  ;;  %v1069_v5 = vmul.f32 %v6360_v37, %v6326_v33 }
 0x18e   : > { %v1163_v16 = vmul.f32 %v6449_v62, %v1154_v3  ;;  %v1191_v3 = vsel %vm1190_vm9, %v6415_v61, %v1185_v2  ;;  %v1197_v33 = vsel %vm1190_vm9, 0.0, %v6415_v61 }
 0x18f   : > { %v1109_v17 = vadd.f32 %v1105_v10, %v1068_v27  ;;  %v1200_v26 = vmul.f32 %v6434_v31, %v1191_v3 }
 0x190   : > { %v6429_v28 = vpop.permute.xlu0 %1149  ;;  %v6431_v29 = vpop.permute.xlu1 %1221  ;;  %v1175_v30 = vmul.f32 %v6380_v41, %v1163_v16 }
 0x191   : > { %v1234_v15 = vsel %vm1227_vm10, %v6431_v29, 0.0  ;;  %v1142_v36 = vadd.f32 %v1138_v42, %v1109_v17  ;;  %v1174_v17 = vmul.f32 %v6380_v41, %v1162_v9  ;;  %v1161_v42 = vsel %vm1153_vm5, 0.0, %v6429_v28 }
 0x192   : > { %v1237_v27 = vmul.f32 %v6449_v62, %v1234_v15  ;;  %v1070_v15 = vmul.f32 %v6360_v37, %v6340_v35 }
 0x193   : > { %v1179_v23 = vadd.f32 %v1175_v30, %v1142_v36 }
 0x194   : > { %v6441_v44 = vpop.permute.xlu1 %1258  ;;  %v6444_v13 = vpop.permute.xlu0 %1223 }
 0x195   : > { %v1271_v58 = vsel %vm1264_vm11, %v6441_v44, 0.0 }
 0x198   : > { %v1080_v59 = vpop.permute.xlu1 %1079  ;;  %v1082_v22 = vpop.permute.xlu0 %1081 }
 0x199   : > { %v1091_v32 = vsel %vm1083_vm4, 0.0, %v1080_v59  ;;  %v1085_v2 = vsel %vm1083_vm4, %v1080_v59, %v1082_v22  ;;  %v1274_v22 = vmul.f32 %v6434_v31, %v1271_v58  ;;  %v1308_v58 = vsel %vm1301_vm12, %v6421_v6, 0.0 }
 0x19a   : > { %v1094_v55 = vmul.f32 %v6438_v34, %v1091_v32  ;;  %v1137_v32 = vmul.f32 %v6376_v40, %v1127_v18  ;;  %v1095_v59 = vmul.f32 %v6434_v31, %v1085_v2  ;;  %v1212_v18 = vmul.f32 %v6390_v45, %v1200_v26 }
 0x19b   : > { %v1128_v40 = vsel %vm1120_vm7, 0.0, %v6427_v25  ;;  %v1164_v2 = vmul.f32 %v6455_v19, %v1161_v42 }
 0x19c   : > { %v1187_v20 = vpop.permute.xlu1 %1186  ;;  %v1106_v10 = vmul.f32 %v6368_v38, %v1094_v55  ;;  %v1189_v24 = vpop.permute.xlu0 %1188  ;;  %v1141_v3 = vadd.f32 %v1137_v32, %v1108_v60  ;;  %v1216_v30 = vadd.f32 %v1212_v18, %v1179_v23  ;;  %v1249_v60 = vmul.f32 %v6392_v46, %v1237_v27 }
 0x19d   : > { %v1198_v9 = vsel %vm1190_vm9, 0.0, %v1187_v20  ;;  %v1139_v36 = vmul.f32 %v6372_v39, %v1128_v40  ;;  %v1107_v35 = vmul.f32 %v6368_v38, %v1095_v59  ;;  %v1192_v37 = vsel %vm1190_vm9, %v1187_v20, %v1189_v24 }
 0x19e   : > { %v1110_v41 = vadd.f32 %v1106_v10, %v1069_v5  ;;  %v1178_v61 = vadd.f32 %v1174_v17, %v1141_v3  ;;  %v1199_v32 = vmul.f32 %v6438_v34, %v1197_v33  ;;  %v1286_v10 = vmul.f32 %v6401_v50, %v1274_v22 }
 0x19f   : > { %v1201_v5 = vmul.f32 %v6438_v34, %v1198_v9  ;;  %v1341_v20 = vsel %vm1334_vm13, %v6425_v21, 0.0  ;;  %v1253_v24 = vadd.f32 %v1249_v60, %v1216_v30  ;;  %v1202_v3 = vmul.f32 %v6434_v31, %v1192_v37 }
 0x1a0   : > { %v1261_v16 = vpop.permute.xlu1 %1260  ;;  %v1263_v23 = vpop.permute.xlu0 %1262  ;;  %v1143_v27 = vadd.f32 %v1139_v36, %v1110_v41  ;;  %v1176_v18 = vmul.f32 %v6385_v43, %v1164_v2  ;;  %v1319_v37 = vmul.f32 %v6403_v51, %v1308_v58 }
 0x1a1   : > { %v1272_v40 = vsel %vm1264_vm11, %v1263_v23, 0.0  ;;  %v1290_v22 = vadd.f32 %v1286_v10, %v1253_v24  ;;  %v1266_v33 = vsel %vm1264_vm11, %v1261_v16, %v1263_v23 }
 0x1a2   : > { %v1180_v41 = vadd.f32 %v1176_v18, %v1143_v27  ;;  %v1276_v9 = vmul.f32 %v6434_v31, %v1272_v40 }
 0x1a3   : > { %v1323_v24 = vadd.f32 %v1319_v37, %v1290_v22 }
 0x1a4   : > { %v1119_v55 = vpop.permute.xlu1 %1118 }
 0x1a5   : > { %v1122_v26 = vsel %vm1120_vm7, %v6427_v25, %v1119_v55  ;;  %v1228_v25 = vsel %vm1227_vm10, %v6417_v63, %v6431_v29  ;;  %v1111_v63 = vadd.f32 %v1107_v35, %v1070_v15  ;;  %v1213_v55 = vmul.f32 %v6394_v47, %v1201_v5 }
 0x1a6   : > { %v1140_v38 = vmul.f32 %v6372_v39, %v1122_v26  ;;  %v1236_v42 = vmul.f32 %v6455_v19, %v1228_v25  ;;  %v1265_v39 = vsel %vm1264_vm11, %v6419_v4, %v6441_v44  ;;  %v1214_v15 = vmul.f32 %v6394_v47, %v1202_v3  ;;  %v1298_v44 = vpop.permute.xlu0 %1297 }
 0x1a7   : > { %v1275_v4 = vmul.f32 %v6438_v34, %v1266_v33  ;;  %v1344_v47 = vmul.f32 %v6449_v62, %v1341_v20  ;;  %v1273_v10 = vmul.f32 %v6438_v34, %v1265_v39  ;;  %v1217_v23 = vadd.f32 %v1213_v55, %v1180_v41 }
 0x1a8   : > { %v1152_v59 = vpop.permute.xlu1 %1151  ;;  %v1288_v3 = vmul.f32 %v6399_v49, %v1276_v9 }
 0x1a9   : > { %v1155_v17 = vsel %vm1153_vm5, %v6429_v28, %v1152_v59  ;;  %v1144_v28 = vadd.f32 %v1140_v38, %v1111_v63  ;;  %v1248_v59 = vmul.f32 %v6392_v46, %v1236_v42  ;;  %v1356_v20 = vmul.f32 %v6409_v54, %v1344_v47 }
 0x1aa   : > { %v1165_v29 = vmul.f32 %v6449_v62, %v1155_v17  ;;  %v1285_v17 = vmul.f32 %v6401_v50, %v1273_v10  ;;  %v1331_v46 = vpop.permute.xlu0 %1330 }
 0x1ab   : > { %v1360_v22 = vadd.f32 %v1356_v20, %v1323_v24  ;;  %v832_v24 = vld [vmem:[%s10559_s5] sm:$0xff] }
 0x1ac   : > { %v1177_v30 = vmul.f32 %v6385_v43, %v1165_v29  ;;  %v1226_v60 = vpop.permute.xlu1 %1225  ;;  %v1211_v43 = vmul.f32 %v6390_v45, %v1199_v32  ;;  %v1287_v45 = vmul.f32 %v6399_v49, %v1275_v4 }
 0x1ad   : > { %v1229_v26 = vsel %vm1227_vm10, %v6444_v13, %v1226_v60  ;;  %v1235_v36 = vsel %vm1227_vm10, %v1226_v60, 0.0 }
 0x1ae   : > { %v1181_v16 = vadd.f32 %v1177_v30, %v1144_v28  ;;  %v1238_v2 = vmul.f32 %v6455_v19, %v1229_v26  ;;  %v1239_v35 = vmul.f32 %v6449_v62, %v1235_v36  ;;  %v1215_v38 = vadd.f32 %v1211_v43, %v1178_v61 }
 0x1b0   : > { %v1218_v13 = vadd.f32 %v1214_v15, %v1181_v16  ;;  %v1250_v25 = vmul.f32 %v6397_v48, %v1238_v2  ;;  %v1251_v27 = vmul.f32 %v6397_v48, %v1239_v35  ;;  %v1300_v5 = vpop.permute.xlu1 %1299  ;;  %v1302_v48 = vsel %vm1301_vm12, %v6423_v11, %v6421_v6 }
 0x1b1   : > { %v1303_v18 = vsel %vm1301_vm12, %v1298_v44, %v1300_v5  ;;  %v1309_v40 = vsel %vm1301_vm12, %v1300_v5, 0.0  ;;  %v1252_v42 = vadd.f32 %v1248_v59, %v1215_v38  ;;  %v1318_v9 = vmul.f32 %v6403_v51, %v1302_v48 }
 0x1b2   : > { %v1254_v32 = vadd.f32 %v1250_v25, %v1217_v23  ;;  %v1255_v58 = vadd.f32 %v1251_v27, %v1218_v13  ;;  %v1320_v50 = vmul.f32 %v6405_v52, %v1303_v18  ;;  %v1321_v33 = vmul.f32 %v6405_v52, %v1309_v40  ;;  %v837_v25 = vld [vmem:[%s10561_s8 + $0x10] sm:$0xff] }
 0x1b3   : > { %v1289_v28 = vadd.f32 %v1285_v17, %v1252_v42  ;;  %v1374_v44 = vadd.f32 %v6413_v57, %v1360_v22  ;;  %v10562_v27 = vmov 5   ;;  %v10563_v5 = vmov 6  }
 0x1b4   : > { %v1291_v61 = vadd.f32 %v1287_v45, %v1254_v32  ;;  %v1292_v63 = vadd.f32 %v1288_v3, %v1255_v58  ;;  %v1333_v29 = vpop.permute.xlu1 %1332  ;;  %v10564_v38 = vmov 7   ;;  %v10565_v59 = vmov 8   ;;  %v834_v3 = vld [vmem:[%s10559_s5 + $0x10] sm:$0xff] }
 0x1b5   : > { %v1336_v49 = vsel %vm1334_vm13, %v1331_v46, %v1333_v29  ;;  %v1342_v39 = vsel %vm1334_vm13, %v1333_v29, 0.0  ;;  %v1322_v16 = vadd.f32 %v1318_v9, %v1289_v28  ;;  %v1378_v37 = vmax.f32 %v1374_v44, 0.0 }
 0x1b6   : > { %v1345_v41 = vmul.f32 %v6455_v19, %v1336_v49  ;;  %v1346_v55 = vmul.f32 %v6449_v62, %v1342_v39  ;;  %v1324_v6 = vadd.f32 %v1320_v50, %v1291_v61  ;;  %v1325_v11 = vadd.f32 %v1321_v33, %v1292_v63  ;;  %v829_v33 = vld [vmem:[%s10571_s2] sm:$0xff] }
 0x1b7   : > { %v10566_v45 = vmov 3   ;;  %v10568_v46 = vrot.slane %v6257_v8, 6  ;;  %v10569_v63 = vrot.slane %v6254_v7, 6  ;;  %v1473_v42 = vrot.slane %v6254_v7, 4  ;;  %v830_v7 = vld [vmem:[%s10571_s2 + $0x8] sm:$0xff] }
 0x1b8   : > { %v1357_v30 = vmul.f32 %v6407_v53, %v1345_v41  ;;  %v1358_v60 = vmul.f32 %v6407_v53, %v1346_v55  ;;  %v1327_v15 = vpop.permute.xlu1 %1326  ;;  %v1472_v39 = vrot.slane %v6257_v8, 4  ;;  %v831_v8 = vld [vmem:[%s10571_s2 + $0x10] sm:$0xff]  ;;  %s10582_s2 = smov 111  }
 0x1b9   : > { %v1335_v26 = vsel %vm1334_vm13, %v1327_v15, %v6425_v21 }
 0x1ba   : > { %v1361_v36 = vadd.f32 %v1357_v30, %v1324_v6  ;;  %v1362_v4 = vadd.f32 %v1358_v60, %v1325_v11  ;;  %v1343_v52 = vmul.f32 %v6455_v19, %v1335_v26 }
 0x1bc   : > { %v1355_v2 = vmul.f32 %v6409_v54, %v1343_v52  ;;  %v1376_v35 = vadd.f32 %v6411_v56, %v1362_v4  ;;  %v1375_v53 = vadd.f32 %v6411_v56, %v1361_v36  ;;  %v827_v54 = vld [vmem:[%s10560_s6] sm:$0x3]  ;;  %v836_v56 = vld [vmem:[%s10561_s8 + $0x8] sm:$0xff]  ;;  %s10567_s6 = sld [smem:[#allocation139_spill]] }
 0x1bd   : > { %1611 = vperm.xlu0 %5967, %v836_v56  }
 0x1be   : > { %v1359_v43 = vadd.f32 %v1355_v2, %v1322_v16  ;;  %v1380_v51 = vmax.f32 %v1376_v35, 0.0  ;;  %v1379_v10 = vmax.f32 %v1375_v53, 0.0 }
 0x1c0   : > { %v1373_v21 = vadd.f32 %v6413_v57, %v1359_v43  ;;  %v5848_v47 = vpack.c.bf16 %v1380_v51, %v1378_v37  ;;  %v835_v57 = vld [vmem:[%s10561_s8] sm:$0xff] }
 0x1c1   : > { %1606 = vperm.xlu1 %5966, %v835_v57   ;;  %5970 = vset.pattern.permute.xlu0 %v10341_v12 }
 0x1c2   : > { %v1377_v23 = vmax.f32 %v1373_v21, 0.0  ;;  %5850 = vmatprep.subr.msk.bf16.mxu0 %vm5849_vm1, %v5848_v47  ;;  %1714 = vperm.xlu0 %5970, %v836_v56   ;;  %v838_v32 = vld [vmem:[%s10567_s6] sm:$0xff]  ;;  %v839_v58 = vld [vmem:[%s10567_s6 + $0x8] sm:$0xff] }
 0x1c4   : > { %v5851_v13 = vpack.c.bf16 %v1379_v10, %v1377_v23 }
 0x1c5   : > { %1616 = vperm.xlu1 %5966, %v837_v25  }
 0x1c6   : > { %5853 = vmatpush1.bf16.msk.msra.mxu0 %vm5849_vm1, %v5851_v13  ;;  %5972 = vset.pattern.permute.xlu0 %v10339_v14 }
 0x1c7   : > { %1768 = vperm.xlu0 %5972, %v836_v56  }
 0x1c9   : > { %5813 = vmatmul.mubr.msk.f32.vlgmr.msra.gmra.mrb[4].mxu0 %vm1386_vm2, %v827_v54  ;;  %5968 = vset.pattern.permute.xlu1 %v10345_v1  ;;  %v1384_v20 = vpop.permute.xlu1 %1383 }
 0x1ca   : > { %2151 = vmatprep.mubr.f32.mxu0 %v10337_v0  ;;  %1662 = vperm.xlu1 %5968, %v835_v57  }
 0x1cb   : > { %5975 = vset.pattern.permute.xlu0 %v10562_v27 }
 0x1cc   : > { %1876 = vperm.xlu0 %5975, %v836_v56  }
 0x1cd   : > { %v1492_v35 = vpop.permute.xlu1 %1491 }
 0x1ce   : > { %1670 = vperm.xlu1 %5968, %v837_v25  }
 0x1d0   : > { %5977 = vset.pattern.permute.xlu0 %v10563_v5 }
 0x1d1   : > { %1930 = vperm.xlu0 %5977, %v836_v56  }
 0x1d2   : > { %5969 = vset.pattern.permute.xlu1 %v10341_v12 }
 0x1d3   : > { %1710 = vperm.xlu1 %5969, %v835_v57  }
 0x1d5   : > { %5979 = vset.pattern.permute.xlu0 %v10564_v38 }
 0x1d6   : > { %1978 = vperm.xlu0 %5979, %v836_v56  }
 0x1d7   : > { %1718 = vperm.xlu1 %5969, %v837_v25  }
 0x1da   : > { %5981 = vset.pattern.permute.xlu0 %v10565_v59 }
 0x1db   : > { %5971 = vset.pattern.permute.xlu1 %v10339_v14  ;;  %2032 = vperm.xlu0 %5981, %v836_v56  }
 0x1dc   : > { %1764 = vperm.xlu1 %5971, %v835_v57  }
 0x1df   : > { %5982 = vset.pattern.permute.xlu0 %v10345_v1 }
 0x1e0   : > { %1772 = vperm.xlu1 %5971, %v837_v25   ;;  %1486 = vperm.xlu0 %5982, %v832_v24  }
 0x1e4   : > { %5973 = vset.pattern.permute.xlu1 %v10566_v45  ;;  %1496 = vperm.xlu0 %5982, %v834_v3  }
 0x1e5   : > { %1818 = vperm.xlu1 %5973, %v835_v57  }
 0x1e8   : > { %1666 = vperm.xlu0 %5982, %v836_v56  }
 0x1e9   : > { %1826 = vperm.xlu1 %5973, %v837_v25  }
 0x1ec   : > { %2053 = vperm.xlu0 %5982, %v838_v32  }
 0x1ed   : > { %5974 = vset.pattern.permute.xlu1 %v10562_v27 }
 0x1ee   : > { %1872 = vperm.xlu1 %5974, %v835_v57  }
 0x1f0   : > { %5983 = vset.pattern.permute.xlu0 %v10566_v45 }
 0x1f1   : > { %1822 = vperm.xlu0 %5983, %v836_v56  }
 0x1f2   : > { %1880 = vperm.xlu1 %5974, %v837_v25  }
 0x1f6   : > { %5976 = vset.pattern.permute.xlu1 %v10563_v5 }
 0x1f7   : > { %1926 = vperm.xlu1 %5976, %v835_v57  }
 0x1fb   : > { %1934 = vperm.xlu1 %5976, %v837_v25  }
 0x1ff   : > { %5978 = vset.pattern.permute.xlu1 %v10564_v38 }
 0x200   : > { %1974 = vperm.xlu1 %5978, %v835_v57  }
 0x204   : > { %1982 = vperm.xlu1 %5978, %v837_v25  }
 0x208   : > { %5980 = vset.pattern.permute.xlu1 %v10565_v59 }
 0x209   : > { %2028 = vperm.xlu1 %5980, %v835_v57  }
 0x20d   : > { %5984 = vset.pattern.permute.xlu1 %v10345_v1 }
 0x20e   : > { %2058 = vperm.xlu1 %5984, %v839_v58  }
 0x212   : > { %5985 = vset.pattern.permute.xlu1 %v10565_v59 }
 0x213   : > { %2036 = vperm.xlu1 %5985, %v837_v25  }
 0x217   : > { %5986 = vset.pattern.permute.xlu1 %v10345_v1 }
 0x23c   : > { %v6638_v55 = vpop.permute.xlu0 %1611 }
 0x240   : > { %v6660_v37 = vpop.permute.xlu1 %1606 }
 0x241   : > { %v6640_v28 = vpop.permute.xlu0 %1714 }
 0x244   : > { %v6666_v21 = vpop.permute.xlu1 %1616 }
 0x245   : > { %10575 = vst [vmem:[#allocation6_spill] sm:$0xff] %v6666_v21 }
 0x246   : > { %v6642_v6 = vpop.permute.xlu0 %1768 }
 0x249   : > { %v6674_v47 = vpop.permute.xlu1 %1662 }
 0x24b   : > { %v6644_v11 = vpop.permute.xlu0 %1876 }
 0x24d   : > { %v6682_v10 = vpop.permute.xlu1 %1670 }
 0x24e   : > { %10579 = vst [vmem:[#allocation7_spill] sm:$0xff] %v6682_v10 }
 0x250   : > { %v6646_v30 = vpop.permute.xlu0 %1930 }
 0x252   : > { %v6690_v13 = vpop.permute.xlu1 %1710 }
 0x255   : > { %v6648_v60 = vpop.permute.xlu0 %1978 }
 0x256   : > { %v6700_v57 = vpop.permute.xlu1 %1718 }
 0x257   : > { %10583 = vst [vmem:[#allocation8_spill] sm:$0xff] %v6700_v57 }
 0x25a   : > { %v6650_v15 = vpop.permute.xlu0 %2032 }
 0x25b   : > { %v6710_v24 = vpop.permute.xlu1 %1764 }
 0x25f   : > { %v1487_v9 = vpop.permute.xlu0 %1486  ;;  %v6718_v3 = vpop.permute.xlu1 %1772 }
 0x260   : > { %10584 = vst [vmem:[#allocation9_spill] sm:$0xff] %v6718_v3 }
 0x263   : > { %v1497_v58 = vpop.permute.xlu0 %1496 }
 0x264   : > { %v6726_v32 = vpop.permute.xlu1 %1818 }
 0x29c   : > { %v1463_v17 = vpop.f32.mrb[4].mxu0 }
 0x29d   : > { %v1464_v18 = vadd.f32 %v1463_v17, %v1384_v20  ;;  %v1465_v40 = vpop.f32.mrb[5].mxu0 }
 0x29e   : > { %v1466_v48 = vadd.f32 %v1465_v40, %v1384_v20  ;;  %v6734_v20 = vpop.permute.xlu1 %1826 }
 0x29f   : > { %v1470_v61 = vadd.f32 %v1464_v18, %v10568_v46  ;;  %10585 = vst [vmem:[#allocation10_spill] sm:$0xff] %v6734_v20 }
 0x2a0   : > { %v1471_v29 = vadd.f32 %v1466_v48, %v10569_v63 }
 0x2a1   : > { %v1478_v49 = vrot.slane %v1470_v61, 6 }
 0x2a2   : > { %v1479_v22 = vrot.slane %v1471_v29, 6  ;;  %v6744_v40 = vpop.permute.xlu1 %1872 }
 0x2a3   : > { %v6625_v41 = vsel %vm954_vm0, %v1472_v39, %v1478_v49  ;;  %v840_v39 = vld [vmem:[%s10567_s6 + $0x10] sm:$0xff]  ;;  %s10975_s6 = sld [smem:[#allocation142_spill]] }
 0x2a4   : > { %v6617_v50 = vsel %vm954_vm0, %v1473_v42, %v1479_v22  ;;  %10572 = vst [vmem:[#allocation5_spill] sm:$0xff] %v6625_v41  ;;  %v6798_v22 = vld [vmem:[%s10275_s15] sm:$0xff]  ;;  %vm2083_vm0 = vcmask 195584  }
 0x2a5   : > { %10570 = vst [vmem:[#allocation4_spill] sm:$0xff] %v6617_v50  ;;  %5814 = vmatprep.subr.msk.mxu1 %vm1390_vm14, %v6617_v50 }
 0x2a6   : > { %5815 = vmatpush1.msk.msra.mxu1 %vm1390_vm14, %v6625_v41  ;;  %v6754_v61 = vpop.permute.xlu1 %1880 }
 0x2a7   : > { %5816 = vmatmul.mubr.msk.f32.vlgmr.msra.gmra.mrb[0].mxu1 %vm1499_vm3, %v829_v33  ;;  %10588 = vst [vmem:[#allocation13_spill] sm:$0xff] %v6754_v61 }
 0x2a8   : > { %1585 = vmatprep.mubr.f32.mxu1 %v10337_v0 }
 0x2aa   : > { %v6762_v63 = vpop.permute.xlu1 %1926 }
 0x2ab   : > { %5817 = vmatmul.mubr.msk.f32.gmra.mrb[2].mxu1 %vm1499_vm3, %v830_v7  ;;  %v842_v7 = vld [vmem:[%s10591_s12] sm:$0xf] }
 0x2ac   : > { %1591 = vmatprep.mubr.f32.mxu1 %v10337_v0 }
 0x2ae   : > { %v6770_v29 = vpop.permute.xlu1 %1934 }
 0x2af   : > { %5818 = vmatmul.mubr.msk.f32.gmra.mrb[4].mxu1 %vm1499_vm3, %v831_v8  ;;  %10589 = vst [vmem:[#allocation14_spill] sm:$0xff] %v6770_v29  ;;  %v6809_v8 = vld [vmem:[%s10275_s15 + $0x18] sm:$0xff] }
 0x2b0   : > { %3351 = vmatprep.mubr.f32.mxu1 %v10337_v0 }
 0x2b2   : > { %v6778_v42 = vpop.permute.xlu1 %1974 }
 0x2b6   : > { %v6786_v49 = vpop.permute.xlu1 %1982 }
 0x2b7   : > { %10590 = vst [vmem:[#allocation15_spill] sm:$0xff] %v6786_v49 }
 0x2ba   : > { %v6800_v33 = vpop.permute.xlu1 %2028 }
 0x37a   : > { %v1581_v26 = vpop.f32.mrb[0].mxu1 }
 0x37b   : > { %v1582_v36 = vadd.f32 %v1581_v26, %v1487_v9  ;;  %v1583_v4 = vpop.f32.mrb[1].mxu1  ;;  %v850_v26 = vld [vmem:[%s10274_s14 + $0x8] sm:$0xff] }
 0x37c   : > { %v1584_v52 = vadd.f32 %v1583_v4, %v1487_v9  ;;  %v6811_v9 = vpop.permute.xlu0 %1666  ;;  %v6822_v4 = vpop.permute.xlu1 %2058 }
 0x37d   : > { %v6652_v44 = vmax.f32 %v1582_v36, 0.0  ;;  %v6820_v36 = vld [vmem:[%s10275_s15 + $0x28] sm:$0xff]  ;;  %10592 = vst [vmem:[#allocation16_spill] sm:$0xff] %v6822_v4 }
 0x37e   : > { %v6654_v16 = vmax.f32 %v1584_v52, 0.0  ;;  %v1587_v2 = vpop.f32.mrb[2].mxu1 }
 0x37f   : > { %v1589_v53 = vpop.f32.mrb[3].mxu1  ;;  %1631 = vrot.lane.b32.xlu1 %v6652_v44, %s10573_s3  ;;  %v1588_v23 = vadd.f32 %v1587_v2, %v1492_v35  ;;  %v852_v2 = vld [vmem:[%s10274_s14 + $0x18] sm:$0xff] }
 0x380   : > { %1633 = vrot.lane.b32.xlu0 %v6654_v16, %s10573_s3  ;;  %v1590_v56 = vadd.f32 %v1589_v53, %v1492_v35  ;;  %v6824_v52 = vpop.permute.xlu0 %2053  ;;  %v6830_v35 = vpop.permute.xlu1 %2036  ;;  %v1620_v57 = vmul.f32 %v6660_v37, %v6654_v16 }
 0x381   : > { %v6694_v54 = vmax.f32 %v1588_v23, 0.0  ;;  %10593 = vst [vmem:[#allocation17_spill] sm:$0xff] %v6830_v35 }
 0x382   : > { %v1593_v43 = vpop.f32.mrb[4].mxu1  ;;  %v6702_v25 = vmax.f32 %v1590_v56, 0.0 }
 0x383   : > { %v1595_v51 = vpop.f32.mrb[5].mxu1  ;;  %1685 = vrot.lane.b32.xlu1 %v6652_v44, %s10574_s9  ;;  %v1594_v48 = vadd.f32 %v1593_v43, %v1497_v58  ;;  %v854_v43 = vld [vmem:[%s10274_s14 + $0x28] sm:$0xff] }
 0x384   : > { %1687 = vrot.lane.b32.xlu0 %v6654_v16, %s10574_s9  ;;  %v1596_v17 = vadd.f32 %v1595_v51, %v1497_v58  ;;  %v6832_v53 = vpop.permute.xlu0 %1822  ;;  %v6841_v51 = vld [vmem:[%s10275_s15 + $0x8] sm:$0xff]  ;;  %v6847_v58 = vld [vmem:[%s10275_s15 + $0x20] sm:$0xff] }
 0x385   : > { %v6752_v46 = vmax.f32 %v1594_v48, 0.0 }
 0x386   : > { %v6740_v18 = vmax.f32 %v1596_v17, 0.0  ;;  %v10594_v17 = vmov 4  }
 0x387   : > { %1733 = vrot.lane.b32.xlu1 %v6652_v44, %s10576_s0  ;;  %10587 = vst [vmem:[#allocation12_spill] sm:$0xff] %v6752_v46 }
 0x388   : > { %1735 = vrot.lane.b32.xlu0 %v6654_v16, %s10576_s0  ;;  %10586 = vst [vmem:[#allocation11_spill] sm:$0xff] %v6740_v18 }
 0x38b   : > { %1787 = vrot.lane.b32.xlu1 %v6652_v44, %s10577_s28 }
 0x38c   : > { %1789 = vrot.lane.b32.xlu0 %v6654_v16, %s10577_s28 }
 0x38f   : > { %1841 = vrot.lane.b32.xlu1 %v6652_v44, %s10578_s29 }
 0x390   : > { %1843 = vrot.lane.b32.xlu0 %v6654_v16, %s10578_s29 }
 0x393   : > { %1895 = vrot.lane.b32.xlu1 %v6652_v44, %s10580_s1 }
 0x394   : > { %1897 = vrot.lane.b32.xlu0 %v6654_v16, %s10580_s1 }
 0x397   : > { %1949 = vrot.lane.b32.xlu1 %v6652_v44, %s10581_s11 }
 0x398   : > { %1951 = vrot.lane.b32.xlu0 %v6654_v16, %s10581_s11 }
 0x39b   : > { %1997 = vrot.lane.b32.xlu1 %v6652_v44, %s10582_s2 }
 0x39c   : > { %2001 = vrot.lane.b32.xlu0 %v6694_v54, %s10582_s2 }
 0x39f   : > { %1999 = vrot.lane.b32.xlu1 %v6654_v16, %s10582_s2 }
 0x3a0   : > { %1637 = vrot.lane.b32.xlu0 %v6702_v25, %s10573_s3 }
 0x3a3   : > { %1635 = vrot.lane.b32.xlu1 %v6694_v54, %s10573_s3 }
 0x3a4   : > { %1691 = vrot.lane.b32.xlu0 %v6702_v25, %s10574_s9 }
 0x3a7   : > { %1689 = vrot.lane.b32.xlu1 %v6694_v54, %s10574_s9 }
 0x3a8   : > { %1739 = vrot.lane.b32.xlu0 %v6702_v25, %s10576_s0 }
 0x3ab   : > { %1737 = vrot.lane.b32.xlu1 %v6694_v54, %s10576_s0 }
 0x3ac   : > { %1793 = vrot.lane.b32.xlu0 %v6702_v25, %s10577_s28 }
 0x3af   : > { %1791 = vrot.lane.b32.xlu1 %v6694_v54, %s10577_s28 }
 0x3b0   : > { %1847 = vrot.lane.b32.xlu0 %v6702_v25, %s10578_s29 }
 0x3b3   : > { %1845 = vrot.lane.b32.xlu1 %v6694_v54, %s10578_s29 }
 0x3b4   : > { %1901 = vrot.lane.b32.xlu0 %v6702_v25, %s10580_s1 }
 0x3b7   : > { %1899 = vrot.lane.b32.xlu1 %v6694_v54, %s10580_s1 }
 0x3b8   : > { %1955 = vrot.lane.b32.xlu0 %v6702_v25, %s10581_s11 }
 0x3bb   : > { %1953 = vrot.lane.b32.xlu1 %v6694_v54, %s10581_s11 }
 0x3bc   : > { %1641 = vrot.lane.b32.xlu0 %v6740_v18, %s10573_s3 }
 0x3bf   : > { %2003 = vrot.lane.b32.xlu1 %v6702_v25, %s10582_s2 }
 0x3c0   : > { %1695 = vrot.lane.b32.xlu0 %v6740_v18, %s10574_s9 }
 0x3c3   : > { %1639 = vrot.lane.b32.xlu1 %v6752_v46, %s10573_s3 }
 0x3c4   : > { %1743 = vrot.lane.b32.xlu0 %v6740_v18, %s10576_s0 }
 0x3c7   : > { %1693 = vrot.lane.b32.xlu1 %v6752_v46, %s10574_s9 }
 0x3c8   : > { %1797 = vrot.lane.b32.xlu0 %v6740_v18, %s10577_s28 }
 0x3cb   : > { %1741 = vrot.lane.b32.xlu1 %v6752_v46, %s10576_s0 }
 0x3cc   : > { %1851 = vrot.lane.b32.xlu0 %v6740_v18, %s10578_s29 }
 0x3cf   : > { %1795 = vrot.lane.b32.xlu1 %v6752_v46, %s10577_s28 }
 0x3d0   : > { %1905 = vrot.lane.b32.xlu0 %v6740_v18, %s10580_s1 }
 0x3d3   : > { %1849 = vrot.lane.b32.xlu1 %v6752_v46, %s10578_s29 }
 0x3d4   : > { %1959 = vrot.lane.b32.xlu0 %v6740_v18, %s10581_s11 }
 0x3d7   : > { %1903 = vrot.lane.b32.xlu1 %v6752_v46, %s10580_s1 }
 0x3d8   : > { %2007 = vrot.lane.b32.xlu0 %v6740_v18, %s10582_s2 }
 0x3db   : > { %1957 = vrot.lane.b32.xlu1 %v6752_v46, %s10581_s11 }
 0x3dc   : > { %2005 = vrot.lane.b32.xlu0 %v6752_v46, %s10582_s2  ;;  %v10595_v46 = vmov 1  }
 0x3df   : > { %2063 = vperm.xlu1 %5986, %v840_v39   ;;  %v6855_v39 = vld [vmem:[%s10275_s15 + $0x10] sm:$0xff] }
 0x3e0   : > { %2757 = vperm.xlu0 %5983, %v6798_v22  }
 0x3e3   : > { %2080 = vperm.xlu1 %5986, %v842_v7  }
 0x3e4   : > { %2769 = vperm.xlu0 %5983, %v6809_v8  }
 0x3e7   : > { %2175 = vperm.xlu1 %5986, %v850_v26  }
 0x3e8   : > { %2777 = vperm.xlu0 %5983, %v6820_v36  }
 0x3eb   : > { %2185 = vperm.xlu1 %5986, %v852_v2  }
 0x3ec   : > { %5993 = vset.pattern.permute.xlu0 %v10562_v27 }
 0x3ed   : > { %2869 = vperm.xlu0 %5993, %v6841_v51  }
 0x3ef   : > { %2195 = vperm.xlu1 %5986, %v854_v43  }
 0x3f1   : > { %v1632_v23 = vpop.permute.xlu1 %1631  ;;  %2881 = vperm.xlu0 %5993, %v6847_v58  }
 0x3f2   : > { %v1634_v56 = vpop.permute.xlu0 %1633  ;;  %v1652_v35 = vsel %vm1083_vm4, 0.0, %v1632_v23 }
 0x3f3   : > { %5987 = vset.pattern.permute.xlu1 %v10594_v17  ;;  %v1655_v61 = vmul.f32 %v6438_v34, %v1652_v35 }
 0x3f4   : > { %2337 = vperm.xlu1 %5987, %v6841_v51  }
 0x3f5   : > { %v1686_v48 = vpop.permute.xlu1 %1685  ;;  %5994 = vset.pattern.permute.xlu0 %v10563_v5 }
 0x3f6   : > { %v1688_v7 = vpop.permute.xlu0 %1687  ;;  %2973 = vperm.xlu0 %5994, %v6798_v22  }
 0x3f7   : > { %v1697_v21 = vsel %vm1120_vm7, %v1686_v48, %v1688_v7 }
 0x3f8   : > { %2342 = vperm.xlu1 %5987, %v6855_v39   ;;  %v1722_v7 = vmul.f32 %v6690_v13, %v1697_v21 }
 0x3f9   : > { %v1734_v26 = vpop.permute.xlu1 %1733 }
 0x3fa   : > { %v1736_v2 = vpop.permute.xlu0 %1735  ;;  %2985 = vperm.xlu0 %5994, %v6809_v8  }
 0x3fc   : > { %2352 = vperm.xlu1 %5987, %v6847_v58  }
 0x3fd   : > { %v1788_v43 = vpop.permute.xlu1 %1787 }
 0x3fe   : > { %v1790_v0 = vpop.permute.xlu0 %1789  ;;  %2993 = vperm.xlu0 %5994, %v6820_v36   ;;  %v1808_v18 = vsel %vm1190_vm9, 0.0, %v1788_v43 }
 0x400   : > { %5988 = vset.pattern.permute.xlu1 %v10345_v1 }
 0x401   : > { %v6864_v14 = vpop.permute.xlu1 %1841  ;;  %2445 = vperm.xlu1 %5988, %v6798_v22  }
 0x402   : > { %v6867_v12 = vpop.permute.xlu0 %1843  ;;  %5997 = vset.pattern.permute.xlu0 %v10564_v38  ;;  %v1643_v38 = vsel %vm1083_vm4, %v1632_v23, %v1634_v56  ;;  %v1754_v23 = vsel %vm1153_vm5, 0.0, %v1734_v26  ;;  %v1619_v56 = vmul.f32 %v6660_v37, %v6652_v44  ;;  %v1799_v44 = vsel %vm1190_vm9, %v1788_v43, %v1790_v0 }
 0x403   : > { %3073 = vperm.xlu0 %5997, %v6841_v51   ;;  %v1656_v5 = vmul.f32 %v6434_v31, %v1643_v38  ;;  %v1745_v38 = vsel %vm1153_vm5, %v1734_v26, %v1736_v2  ;;  %v1757_v27 = vmul.f32 %v6455_v19, %v1754_v23  ;;  %v1812_v26 = vmul.f32 %v6434_v31, %v1799_v44 }
 0x405   : > { %v6870_v50 = vpop.permute.xlu1 %1895  ;;  %2453 = vperm.xlu1 %5988, %v6855_v39   ;;  %v1674_v35 = vmul.f32 %v6674_v47, %v1656_v5  ;;  %v1758_v5 = vmul.f32 %v6449_v62, %v1745_v38  ;;  %v1775_v43 = vmul.f32 %v6710_v24, %v1757_v27  ;;  %v1853_v27 = vsel %vm1227_vm10, %v6864_v14, %v6867_v12 }
 0x406   : > { %v6874_v41 = vpop.permute.xlu0 %1897 }
 0x407   : > { %3085 = vperm.xlu0 %5997, %v6847_v58   ;;  %v1916_v14 = vsel %vm1264_vm11, %v6874_v41, 0.0 }
 0x409   : > { %v6876_v17 = vpop.permute.xlu1 %1949  ;;  %2457 = vperm.xlu1 %5988, %v6809_v8  }
 0x40a   : > { %v6880_v1 = vpop.permute.xlu0 %1951 }
 0x40b   : > { %5998 = vset.pattern.permute.xlu0 %v10565_v59  ;;  %v1673_v59 = vmul.f32 %v6674_v47, %v1655_v61  ;;  %v1680_v47 = vadd.f32 %v1674_v35, %v1620_v57  ;;  %v1776_v57 = vmul.f32 %v6710_v24, %v1758_v5  ;;  %v1622_v24 = vmul.f32 %v6638_v55, %v6702_v25 }
 0x40c   : > { %3177 = vperm.xlu0 %5998, %v6798_v22  }
 0x40d   : > { %v6884_v49 = vpop.permute.xlu1 %1997  ;;  %2465 = vperm.xlu1 %5988, %v6820_v36   ;;  %v1679_v16 = vadd.f32 %v1673_v59, %v1619_v56  ;;  %v10596_v59 = vmov 0   ;;  %v1830_v56 = vmul.f32 %v6726_v32, %v1812_v26 }
 0x40e   : > { %v6888_v29 = vpop.permute.xlu0 %2001 }
 0x410   : > { %3189 = vperm.xlu0 %5998, %v6809_v8  }
 0x411   : > { %v6893_v20 = vpop.permute.xlu1 %1999  ;;  %5989 = vset.pattern.permute.xlu1 %v10595_v46  ;;  %v1706_v46 = vsel %vm1120_vm7, 0.0, %v1686_v48  ;;  %v1811_v48 = vmul.f32 %v6438_v34, %v1808_v18 }
 0x412   : > { %v1638_v3 = vpop.permute.xlu0 %1637  ;;  %2545 = vperm.xlu1 %5989, %v6841_v51   ;;  %v1721_v37 = vmul.f32 %v6690_v13, %v1706_v46  ;;  %v1728_v13 = vadd.f32 %v1722_v7, %v1680_v47 }
 0x413   : > { %v1829_v18 = vmul.f32 %v6726_v32, %v1811_v48  ;;  %v1862_v32 = vsel %vm1227_vm10, %v6867_v12, 0.0 }
 0x414   : > { %3197 = vperm.xlu0 %5998, %v6820_v36   ;;  %v1727_v46 = vadd.f32 %v1721_v37, %v1679_v16  ;;  %v1782_v37 = vadd.f32 %v1776_v57, %v1728_v13 }
 0x415   : > { %v1636_v10 = vpop.permute.xlu1 %1635 }
 0x416   : > { %v1644_v61 = vsel %vm1083_vm4, %v1636_v10, %v1638_v3  ;;  %v1692_v4 = vpop.permute.xlu0 %1691  ;;  %2549 = vperm.xlu1 %5989, %v6855_v39   ;;  %v1653_v0 = vsel %vm1083_vm4, 0.0, %v1636_v10  ;;  %v1621_v10 = vmul.f32 %v6638_v55, %v6694_v54  ;;  %v1781_v44 = vadd.f32 %v1775_v43, %v1727_v46 }
 0x417   : > { %v1658_v3 = vmul.f32 %v6434_v31, %v1644_v61  ;;  %v1657_v21 = vmul.f32 %v6438_v34, %v1653_v0  ;;  %v10597_v54 = vmov 2   ;;  %v1865_v55 = vmul.f32 %v6455_v19, %v1853_v27 }
 0x418   : > { %6000 = vset.pattern.permute.xlu0 %v10596_v59  ;;  %v1835_v48 = vadd.f32 %v1829_v18, %v1781_v44  ;;  %v1836_v7 = vadd.f32 %v1830_v56, %v1782_v37  ;;  %v1866_v43 = vmul.f32 %v6449_v62, %v1862_v32 }
 0x419   : > { %v1690_v2 = vpop.permute.xlu1 %1689  ;;  %v1676_v35 = vmul.f32 %v6811_v9, %v1658_v3  ;;  %v1675_v25 = vmul.f32 %v6811_v9, %v1657_v21  ;;  %v1907_v9 = vsel %vm1264_vm11, %v6870_v50, %v6874_v41  ;;  %v1883_v56 = vmul.f32 %v6744_v40, %v1865_v55 }
 0x41a   : > { %v1740_v23 = vpop.permute.xlu0 %1739  ;;  %2557 = vperm.xlu1 %5989, %v6847_v58   ;;  %v1698_v61 = vsel %vm1120_vm7, %v1690_v2, %v1692_v4  ;;  %v1707_v0 = vsel %vm1120_vm7, 0.0, %v1690_v2 }
 0x41b   : > { %v1682_v26 = vadd.f32 %v1676_v35, %v1622_v24  ;;  %v1724_v12 = vmul.f32 %v6640_v28, %v1698_v61  ;;  %v1681_v27 = vadd.f32 %v1675_v25, %v1621_v10  ;;  %v1723_v35 = vmul.f32 %v6640_v28, %v1707_v0 }
 0x41c   : > { %v1970_v28 = vsel %vm1301_vm12, %v6880_v1, 0.0  ;;  %v2018_v25 = vsel %vm1334_vm13, %v6893_v20, 0.0 }
 0x41d   : > { %v1738_v38 = vpop.permute.xlu1 %1737  ;;  %v1730_v44 = vadd.f32 %v1724_v12, %v1682_v26 }
 0x41e   : > { %v1746_v5 = vsel %vm1153_vm5, %v1738_v38, %v1740_v23  ;;  %v1794_v16 = vpop.permute.xlu0 %1793  ;;  %5990 = vset.pattern.permute.xlu1 %v10597_v54  ;;  %v1755_v4 = vsel %vm1153_vm5, 0.0, %v1738_v38  ;;  %v1920_v23 = vmul.f32 %v6434_v31, %v1916_v14 }
 0x41f   : > { %v1760_v47 = vmul.f32 %v6449_v62, %v1746_v5  ;;  %2649 = vperm.xlu1 %5990, %v6798_v22   ;;  %v1759_v21 = vmul.f32 %v6455_v19, %v1755_v4  ;;  %v1884_v5 = vmul.f32 %v6744_v40, %v1866_v43  ;;  %v2009_v40 = vsel %vm1334_vm13, %v6884_v49, %v6893_v20 }
 0x420   : > { %v1938_v37 = vmul.f32 %v6762_v63, %v1920_v23  ;;  %v1729_v4 = vadd.f32 %v1723_v35, %v1681_v27  ;;  %v1961_v49 = vsel %vm1301_vm12, %v6876_v17, %v6880_v1 }
 0x421   : > { %v1792_v3 = vpop.permute.xlu1 %1791  ;;  %v1778_v2 = vmul.f32 %v6642_v6, %v1760_v47  ;;  %v1777_v14 = vmul.f32 %v6642_v6, %v1759_v21  ;;  %v1890_v23 = vadd.f32 %v1884_v5, %v1836_v7 }
 0x422   : > { %v1800_v57 = vsel %vm1190_vm9, %v1792_v3, %v1794_v16  ;;  %v1809_v46 = vsel %vm1190_vm9, 0.0, %v1792_v3  ;;  %v1848_v18 = vpop.permute.xlu0 %1847  ;;  %v1919_v16 = vmul.f32 %v6438_v34, %v1907_v9 }
 0x423   : > { %v1814_v13 = vmul.f32 %v6434_v31, %v1800_v57  ;;  %2657 = vperm.xlu1 %5990, %v6855_v39   ;;  %v1863_v38 = vsel %vm1227_vm10, %v1848_v18, 0.0  ;;  %v1813_v24 = vmul.f32 %v6438_v34, %v1809_v46  ;;  %v1784_v47 = vadd.f32 %v1778_v2, %v1730_v44 }
 0x424   : > { %v1868_v41 = vmul.f32 %v6449_v62, %v1863_v38  ;;  %v1937_v57 = vmul.f32 %v6762_v63, %v1919_v16  ;;  %v1783_v9 = vadd.f32 %v1777_v14, %v1729_v4  ;;  %v1889_v2 = vadd.f32 %v1883_v56, %v1835_v48 }
 0x425   : > { %v1832_v50 = vmul.f32 %v6832_v53, %v1814_v13  ;;  %v1846_v61 = vpop.permute.xlu1 %1845  ;;  %v1831_v0 = vmul.f32 %v6832_v53, %v1813_v24  ;;  %v1944_v7 = vadd.f32 %v1938_v37, %v1890_v23  ;;  %v1986_v63 = vmul.f32 %v6778_v42, %v1970_v28 }
 0x426   : > { %v1854_v10 = vsel %vm1227_vm10, %v1846_v61, %v1848_v18  ;;  %v1902_v32 = vpop.permute.xlu0 %1901  ;;  %v1886_v6 = vmul.f32 %v6644_v11, %v1868_v41  ;;  %v2022_v18 = vmul.f32 %v6449_v62, %v2018_v25  ;;  %v2021_v13 = vmul.f32 %v6455_v19, %v2009_v40 }
 0x427   : > { %v1867_v55 = vmul.f32 %v6455_v19, %v1854_v10  ;;  %2661 = vperm.xlu1 %5990, %v6809_v8   ;;  %v1917_v26 = vsel %vm1264_vm11, %v1902_v32, 0.0  ;;  %v1838_v12 = vadd.f32 %v1832_v50, %v1784_v47  ;;  %v1837_v27 = vadd.f32 %v1831_v0, %v1783_v9 }
 0x428   : > { %v1922_v3 = vmul.f32 %v6434_v31, %v1917_v26  ;;  %v1943_v44 = vadd.f32 %v1937_v57, %v1889_v2  ;;  %v2040_v56 = vmul.f32 %v6800_v33, %v2022_v18  ;;  %v1992_v61 = vadd.f32 %v1986_v63, %v1944_v7 }
 0x429   : > { %v1900_v43 = vpop.permute.xlu1 %1899  ;;  %v1885_v53 = vmul.f32 %v6644_v11, %v1867_v55  ;;  %v1892_v1 = vadd.f32 %v1886_v6, %v1838_v12  ;;  %v1985_v11 = vmul.f32 %v6778_v42, %v1961_v49  ;;  %v2039_v5 = vmul.f32 %v6800_v33, %v2021_v13 }
 0x42a   : > { %v1908_v20 = vsel %vm1264_vm11, %v1900_v43, %v1902_v32  ;;  %v1956_v46 = vpop.permute.xlu0 %1955  ;;  %v1940_v17 = vmul.f32 %v6646_v30, %v1922_v3  ;;  %v2046_v40 = vadd.f32 %v2040_v56, %v1992_v61  ;;  %v10599_v63 = vmov 5   ;;  %v10602_v56 = vld [vmem:[#allocation6_spill] sm:$0xff] }
 0x42b   : > { %v1921_v21 = vmul.f32 %v6438_v34, %v1908_v20  ;;  %2669 = vperm.xlu1 %5990, %v6820_v36   ;;  %v1971_v24 = vsel %vm1301_vm12, %v1956_v46, 0.0  ;;  %v1891_v41 = vadd.f32 %v1885_v53, %v1837_v27  ;;  %v1991_v32 = vadd.f32 %v1985_v11, %v1943_v44  ;;  %v10598_v20 = vld [vmem:[#allocation16_spill] sm:$0xff] }
 0x42c   : > { %v1988_v16 = vmul.f32 %v6648_v60, %v1971_v24  ;;  %v2067_v43 = vadd.f32 %v6824_v52, %v2046_v40 }
 0x42d   : > { %v1939_v35 = vmul.f32 %v6646_v30, %v1921_v21  ;;  %v1954_v38 = vpop.permute.xlu1 %1953  ;;  %v1946_v30 = vadd.f32 %v1940_v17, %v1892_v1  ;;  %v2045_v25 = vadd.f32 %v2039_v5, %v1991_v32 }
 0x42e   : > { %v1962_v50 = vsel %vm1301_vm12, %v1954_v38, %v1956_v46  ;;  %v1642_v48 = vpop.permute.xlu0 %1641  ;;  %v2073_v53 = vmax.f32 %v2067_v43, 0.0  ;;  %v10600_v38 = vld [vmem:[#allocation7_spill] sm:$0xff] }
 0x42f   : > { %5991 = vset.pattern.permute.xlu1 %v10566_v45  ;;  %v1945_v37 = vadd.f32 %v1939_v35, %v1891_v41  ;;  %v1987_v42 = vmul.f32 %v6648_v60, %v1962_v50  ;;  %v1994_v4 = vadd.f32 %v1988_v16, %v1946_v30  ;;  %v2066_v23 = vadd.f32 %v6824_v52, %v2045_v25 }
 0x430   : > { %2761 = vperm.xlu1 %5991, %v6841_v51  }
 0x431   : > { %v2004_v10 = vpop.permute.xlu1 %2003  ;;  %v1993_v26 = vadd.f32 %v1987_v42, %v1945_v37  ;;  %v2072_v2 = vmax.f32 %v2066_v23, 0.0  ;;  %v10603_v37 = vld [vmem:[#allocation8_spill] sm:$0xff] }
 0x432   : > { %v2010_v28 = vsel %vm1334_vm13, %v6888_v29, %v2004_v10  ;;  %v2019_v14 = vsel %vm1334_vm13, %v2004_v10, 0.0  ;;  %v1696_v47 = vpop.permute.xlu0 %1695 }
 0x433   : > { %v2023_v55 = vmul.f32 %v6455_v19, %v2010_v28  ;;  %v2024_v33 = vmul.f32 %v6449_v62, %v2019_v14 }
 0x434   : > { %2765 = vperm.xlu1 %5991, %v6855_v39  }
 0x435   : > { %v2041_v60 = vmul.f32 %v6650_v15, %v2023_v55  ;;  %v2042_v0 = vmul.f32 %v6650_v15, %v2024_v33  ;;  %v1640_v12 = vpop.permute.xlu1 %1639  ;;  %v10604_v55 = vld [vmem:[#allocation9_spill] sm:$0xff] }
 0x436   : > { %v1744_v6 = vpop.permute.xlu0 %1743  ;;  %v1645_v57 = vsel %vm1083_vm4, %v1640_v12, %v1642_v48  ;;  %v1654_v52 = vsel %vm1083_vm4, 0.0, %v1640_v12  ;;  %v10601_v48 = vld [vmem:[#allocation11_spill] sm:$0xff] }
 0x437   : > { %v2047_v29 = vadd.f32 %v2041_v60, %v1993_v26  ;;  %v2048_v3 = vadd.f32 %v2042_v0, %v1994_v4  ;;  %v1660_v15 = vmul.f32 %v6434_v31, %v1645_v57  ;;  %v1659_v11 = vmul.f32 %v6438_v34, %v1654_v52  ;;  %v10605_v4 = vld [vmem:[#allocation12_spill] sm:$0xff] }
 0x438   : > { %2773 = vperm.xlu1 %5991, %v6847_v58   ;;  %v1624_v41 = vmul.f32 %v10602_v56, %v10601_v48  ;;  %v1623_v26 = vmul.f32 %v10602_v56, %v10605_v4  ;;  %v10609_v56 = vld [vmem:[#allocation14_spill] sm:$0xff]  ;;  %v10611_v4 = vld [vmem:[#allocation17_spill] sm:$0xff] }
 0x439   : > { %v1694_v49 = vpop.permute.xlu1 %1693  ;;  %v2069_v46 = vadd.f32 %v10598_v20, %v2048_v3  ;;  %v2068_v18 = vadd.f32 %v10598_v20, %v2047_v29  ;;  %v1678_v44 = vmul.f32 %v10600_v38, %v1660_v15  ;;  %v1677_v28 = vmul.f32 %v10600_v38, %v1659_v11 }
 0x43a   : > { %v1798_v9 = vpop.permute.xlu0 %1797  ;;  %v1699_v24 = vsel %vm1120_vm7, %v1694_v49, %v1696_v47  ;;  %v1708_v47 = vsel %vm1120_vm7, 0.0, %v1694_v49 }
 0x43b   : > { %v2075_v21 = vmax.f32 %v2069_v46, 0.0  ;;  %v2074_v7 = vmax.f32 %v2068_v18, 0.0  ;;  %v1684_v16 = vadd.f32 %v1678_v44, %v1624_v41  ;;  %v1726_v42 = vmul.f32 %v10603_v37, %v1699_v24 }
 0x43c   : > { %5992 = vset.pattern.permute.xlu1 %v10599_v63  ;;  %v1683_v43 = vadd.f32 %v1677_v28, %v1623_v26  ;;  %v1725_v23 = vmul.f32 %v10603_v37, %v1708_v47 }
 0x43d   : > { %v1742_v13 = vpop.permute.xlu1 %1741  ;;  %2865 = vperm.xlu1 %5992, %v6798_v22   ;;  %v5854_v1 = vpack.c.bf16 %v2075_v21, %v2073_v53  ;;  %v5856_v17 = vpack.c.bf16 %v2074_v7, %v2072_v2  ;;  %v1732_v12 = vadd.f32 %v1726_v42, %v1684_v16 }
 0x43e   : > { %v1852_v27 = vpop.permute.xlu0 %1851  ;;  %v1747_v35 = vsel %vm1153_vm5, %v1742_v13, %v1744_v6  ;;  %v1756_v10 = vsel %vm1153_vm5, 0.0, %v1742_v13  ;;  %v10606_v6 = vld [vmem:[#allocation10_spill] sm:$0xff]  ;;  %v1731_v7 = vadd.f32 %v1725_v23, %v1683_v43 }
 0x43f   : > { %5855 = vmatprep.subr.bf16.mxu0 %v5854_v1  ;;  %v1762_v61 = vmul.f32 %v6449_v62, %v1747_v35  ;;  %v1761_v60 = vmul.f32 %v6455_v19, %v1756_v10  ;;  %v1864_v0 = vsel %vm1227_vm10, %v1852_v27, 0.0  ;;  %v10608_v1 = vld [vmem:[#allocation13_spill] sm:$0xff] }
 0x440   : > { %5857 = vmatpush1.bf16.msra.mxu0 %v5856_v17  ;;  %v1870_v46 = vmul.f32 %v6449_v62, %v1864_v0 }
 0x441   : > { %v1796_v50 = vpop.permute.xlu1 %1795  ;;  %2873 = vperm.xlu1 %5992, %v6855_v39   ;;  %v1780_v33 = vmul.f32 %v10604_v55, %v1762_v61  ;;  %v1779_v53 = vmul.f32 %v10604_v55, %v1761_v60 }
 0x442   : > { %v1801_v5 = vsel %vm1190_vm9, %v1796_v50, %v1798_v9  ;;  %v1906_v30 = vpop.permute.xlu0 %1905  ;;  %v1810_v40 = vsel %vm1190_vm9, 0.0, %v1796_v50  ;;  %v1888_v17 = vmul.f32 %v10608_v1, %v1870_v46  ;;  %v10615_v46 = vmov 8  }
 0x443   : > { %v1816_v32 = vmul.f32 %v6434_v31, %v1801_v5  ;;  %v1815_v57 = vmul.f32 %v6438_v34, %v1810_v40  ;;  %v1786_v20 = vadd.f32 %v1780_v33, %v1732_v12  ;;  %v1918_v15 = vsel %vm1264_vm11, %v1906_v30, 0.0 }
 0x444   : > { %v1924_v35 = vmul.f32 %v6434_v31, %v1918_v15  ;;  %v1785_v38 = vadd.f32 %v1779_v53, %v1731_v7  ;;  %v10612_v12 = vmov 7   ;;  %v863_v53 = vld [vmem:[%s10276_s16 + $0x10] sm:$0xff]  ;;  %v864_v15 = vld [vmem:[%s10276_s16 + $0x18] sm:$0xff]  ;;  %v881_v7 = vld [vmem:[%s10280_s20] sm:$0xff] }
 0x445   : > { %v1850_v14 = vpop.permute.xlu1 %1849  ;;  %2877 = vperm.xlu1 %5992, %v6809_v8   ;;  %v1834_v29 = vmul.f32 %v10606_v6, %v1816_v32  ;;  %v1833_v13 = vmul.f32 %v10606_v6, %v1815_v57 }
 0x446   : > { %v1960_v25 = vpop.permute.xlu0 %1959  ;;  %v1855_v3 = vsel %vm1227_vm10, %v1850_v14, %v1852_v27  ;;  %v10607_v27 = vmov 6   ;;  %v1942_v61 = vmul.f32 %v10609_v56, %v1924_v35  ;;  %v10610_v14 = vld [vmem:[#allocation15_spill] sm:$0xff]  ;;  %v887_v35 = vld [vmem:[%s10280_s20 + $0x30] sm:$0xff] }
 0x447   : > { %v1869_v21 = vmul.f32 %v6455_v19, %v1855_v3  ;;  %v1840_v2 = vadd.f32 %v1834_v29, %v1786_v20  ;;  %v1839_v48 = vadd.f32 %v1833_v13, %v1785_v38  ;;  %v1972_v10 = vsel %vm1301_vm12, %v1960_v25, 0.0  ;;  %v883_v13 = vld [vmem:[%s10280_s20 + $0x10] sm:$0xff] }
 0x448   : > { %v1990_v33 = vmul.f32 %v10610_v14, %v1972_v10  ;;  %v10614_v20 = vmov 0.0   ;;  %v7191_v10 = vld [vmem:[%s10281_s21 + $0x28] sm:$0xff] }
 0x449   : > { %v1904_v49 = vpop.permute.xlu1 %1903  ;;  %2885 = vperm.xlu1 %5992, %v6820_v36   ;;  %v1887_v44 = vmul.f32 %v10608_v1, %v1869_v21  ;;  %v1894_v50 = vadd.f32 %v1888_v17, %v1840_v2  ;;  %v853_v21 = vld [vmem:[%s10274_s14 + $0x20] sm:$0xff]  ;;  %v866_v2 = vld [vmem:[%s10276_s16 + $0x28] sm:$0xff] }
 0x44a   : > { %v1909_v18 = vsel %vm1264_vm11, %v1904_v49, %v1906_v30  ;;  %v2008_v9 = vpop.permute.xlu0 %2007  ;;  %v841_v49 = vld [vmem:[%s10613_s7] sm:$0xf]  ;;  %s10979_s7 = sld [smem:[#allocation3_spill]] }
 0x44b   : > { %v1923_v52 = vmul.f32 %v6438_v34, %v1909_v18  ;;  %v2020_v5 = vsel %vm1334_vm13, %v2008_v9, 0.0  ;;  %v1893_v37 = vadd.f32 %v1887_v44, %v1839_v48  ;;  %v1948_v42 = vadd.f32 %v1942_v61, %v1894_v50  ;;  %v861_v18 = vld [vmem:[%s10276_s16] sm:$0xff]  ;;  %v891_v50 = vld [vmem:[%s10280_s20 + $0x50] sm:$0xff] }
 0x44c   : > { %v2026_v32 = vmul.f32 %v6449_v62, %v2020_v5  ;;  %v885_v1 = vld [vmem:[%s10280_s20 + $0x20] sm:$0xff]  ;;  %v7163_v61 = vld [vmem:[%s10281_s21 + $0x10] sm:$0xff] }
 0x44d   : > { %5995 = vset.pattern.permute.xlu1 %v10607_v27  ;;  %v1958_v11 = vpop.permute.xlu1 %1957  ;;  %v1941_v41 = vmul.f32 %v10609_v56, %v1923_v52  ;;  %v1996_v40 = vadd.f32 %v1990_v33, %v1948_v42  ;;  %v862_v52 = vld [vmem:[%s10276_s16 + $0x8] sm:$0xff]  ;;  %v865_v17 = vld [vmem:[%s10276_s16 + $0x20] sm:$0xff] }
 0x44e   : > { %2977 = vperm.xlu1 %5995, %v6841_v51   ;;  %v2006_v24 = vpop.permute.xlu0 %2005  ;;  %v1963_v30 = vsel %vm1301_vm12, %v1958_v11, %v1960_v25  ;;  %v2044_v26 = vmul.f32 %v10611_v4, %v2026_v32  ;;  %v889_v44 = vld [vmem:[%s10280_s20 + $0x40] sm:$0xff]  ;;  %v10616_v11 = vmov 4  }
 0x44f   : > { %v2011_v16 = vsel %vm1334_vm13, %v2006_v24, %v2008_v9  ;;  %v1947_v28 = vadd.f32 %v1941_v41, %v1893_v37  ;;  %v1989_v47 = vmul.f32 %v10610_v14, %v1963_v30  ;;  %v849_v9 = vld [vmem:[%s10274_s14] sm:$0xff]  ;;  %v7156_v41 = vld [vmem:[%s10281_s21 + $0x8] sm:$0xff]  ;;  %v7183_v37 = vld [vmem:[%s10281_s21 + $0x30] sm:$0xff] }
 0x450   : > { %v2025_v55 = vmul.f32 %v6455_v19, %v2011_v16  ;;  %v2050_v6 = vadd.f32 %v2044_v26, %v1996_v40  ;;  %2170 = vperm.xlu0 %6000, %v849_v9   ;;  %v7150_v56 = vld [vmem:[%s10281_s21] sm:$0xff]  ;;  %v7177_v16 = vld [vmem:[%s10281_s21 + $0x18] sm:$0xff] }
 0x451   : > { %v1995_v60 = vadd.f32 %v1989_v47, %v1947_v28  ;;  %v7169_v5 = vld [vmem:[%s10281_s21 + $0x20] sm:$0xff]  ;;  %v7205_v14 = vld [vmem:[%s10281_s21 + $0x38] sm:$0xff]  ;;  %v7211_v47 = vld [vmem:[%s10281_s21 + $0x50] sm:$0xff] }
 0x452   : > { %2981 = vperm.xlu1 %5995, %v6855_v39   ;;  %v2043_v0 = vmul.f32 %v10611_v4, %v2025_v55  ;;  %v7197_v32 = vld [vmem:[%s10281_s21 + $0x40] sm:$0xff]  ;;  %v7217_v55 = vld [vmem:[%s10281_s21 + $0x48] sm:$0xff]  ;;  %v7226_v40 = vld [vmem:[%s10281_s21 + $0x58] sm:$0xff]  ;;  %v10619_v4 = vmov 1  }
 0x454   : > { %v2049_v25 = vadd.f32 %v2043_v0, %v1995_v60 }
 0x456   : > { %2989 = vperm.xlu1 %5995, %v6847_v58  }
 0x45a   : > { %5996 = vset.pattern.permute.xlu1 %v10612_v12 }
 0x45b   : > { %3069 = vperm.xlu1 %5996, %v6798_v22  }
 0x45e   : > { %v2064_v29 = vpop.permute.xlu1 %2063 }
 0x45f   : > { %v2070_v3 = vadd.f32 %v2064_v29, %v2049_v25  ;;  %v2071_v43 = vadd.f32 %v2064_v29, %v2050_v6  ;;  %3077 = vperm.xlu1 %5996, %v6855_v39  }
 0x461   : > { %v2076_v23 = vmax.f32 %v2070_v3, 0.0  ;;  %v2077_v57 = vmax.f32 %v2071_v43, 0.0  ;;  %v10624_v43 = vld [vmem:[#allocation5_spill] sm:$0xff] }
 0x462   : > { %v7132_v38 = vpop.permute.xlu1 %2080 }
 0x463   : > { %2091 = vmatprep.subr.mxu0 %v2077_v57  ;;  %3081 = vperm.xlu1 %5996, %v6809_v8   ;;  %v10625_v57 = vld [vmem:[#allocation4_spill] sm:$0xff] }
 0x464   : > { %2092 = vmatpush1.msra.mxu0 %v2076_v23 }
 0x465   : > { %5819 = vmatmul.mubr.msk.f32.vlgmr.msra.gmra.mrb[6].mxu0 %vm2083_vm0, %v841_v49 }
 0x466   : > { %2281 = vmatprep.mubr.f32.mxu0 %v10614_v20  ;;  %v7139_v24 = vpop.permute.xlu1 %2175 }
 0x467   : > { %3089 = vperm.xlu1 %5996, %v6820_v36  }
 0x46a   : > { %v7145_v48 = vpop.permute.xlu1 %2185 }
 0x46b   : > { %5999 = vset.pattern.permute.xlu1 %v10615_v46 }
 0x46c   : > { %3181 = vperm.xlu1 %5999, %v6841_v51  }
 0x46e   : > { %v7171_v30 = vpop.permute.xlu1 %2195 }
 0x470   : > { %3185 = vperm.xlu1 %5999, %v6855_v39   ;;  %v851_v39 = vld [vmem:[%s10274_s14 + $0x10] sm:$0xff] }
 0x471   : > { %2180 = vperm.xlu0 %6000, %v851_v39  }
 0x473   : > { %v7185_v42 = vpop.permute.xlu1 %2337 }
 0x474   : > { %3193 = vperm.xlu1 %5999, %v6847_v58  }
 0x475   : > { %2190 = vperm.xlu0 %6000, %v853_v21  }
 0x477   : > { %v7200_v28 = vpop.permute.xlu1 %2342 }
 0x478   : > { %6001 = vset.pattern.permute.xlu1 %v10596_v59  ;;  %10617 = vst [vmem:[#allocation16_spill] sm:$0xff] %v7200_v28 }
 0x479   : > { %3226 = vperm.xlu1 %6001, %v861_v18   ;;  %2449 = vperm.xlu0 %6000, %v6841_v51  }
 0x47b   : > { %v7220_v33 = vpop.permute.xlu1 %2352 }
 0x47c   : > { %10618 = vst [vmem:[#allocation7_spill] sm:$0xff] %v7220_v33 }
 0x47d   : > { %3236 = vperm.xlu1 %6001, %v863_v53   ;;  %2461 = vperm.xlu0 %6000, %v6847_v58  }
 0x480   : > { %v7231_v26 = vpop.permute.xlu1 %2445 }
 0x481   : > { %3241 = vperm.xlu1 %6001, %v864_v15   ;;  %3231 = vperm.xlu0 %6000, %v862_v52   ;;  %v843_v15 = vld [vmem:[%s10273_s13] sm:$0xff] }
 0x484   : > { %v7237_v60 = vpop.permute.xlu1 %2453 }
 0x485   : > { %3251 = vperm.xlu1 %6001, %v866_v2   ;;  %3246 = vperm.xlu0 %6000, %v865_v17   ;;  %10620 = vst [vmem:[#allocation11_spill] sm:$0xff] %v7237_v60  ;;  %v844_v2 = vld [vmem:[%s10273_s13 + $0x8] sm:$0xff]  ;;  %v847_v17 = vld [vmem:[%s10273_s13 + $0x20] sm:$0xff] }
 0x488   : > { %v7241_v0 = vpop.permute.xlu1 %2457 }
 0x489   : > { %3362 = vperm.xlu1 %6001, %v881_v7   ;;  %6002 = vset.pattern.permute.xlu0 %v10616_v11  ;;  %10621 = vst [vmem:[#allocation6_spill] sm:$0xff] %v7241_v0 }
 0x48a   : > { %2332 = vperm.xlu0 %6002, %v6798_v22  }
 0x48d   : > { %3372 = vperm.xlu1 %6001, %v883_v13   ;;  %v845_v13 = vld [vmem:[%s10273_s13 + $0x10] sm:$0xff] }
 0x48e   : > { %2347 = vperm.xlu0 %6002, %v6809_v8  }
 0x491   : > { %3382 = vperm.xlu1 %6001, %v885_v1   ;;  %v846_v1 = vld [vmem:[%s10273_s13 + $0x18] sm:$0xff] }
 0x492   : > { %2357 = vperm.xlu0 %6002, %v6820_v36  }
 0x495   : > { %3392 = vperm.xlu1 %6001, %v887_v35  }
 0x496   : > { %3624 = vperm.xlu0 %6002, %v7156_v41  }
 0x499   : > { %3402 = vperm.xlu1 %6001, %v889_v44  }
 0x49a   : > { %3639 = vperm.xlu0 %6002, %v7169_v5  }
 0x49d   : > { %3412 = vperm.xlu1 %6001, %v891_v50  }
 0x49e   : > { %3649 = vperm.xlu0 %6002, %v7183_v37  }
 0x4a1   : > { %6003 = vset.pattern.permute.xlu1 %v10616_v11 }
 0x4a2   : > { %3619 = vperm.xlu1 %6003, %v7150_v56   ;;  %3659 = vperm.xlu0 %6002, %v7197_v32  }
 0x4a6   : > { %3629 = vperm.xlu1 %6003, %v7163_v61   ;;  %3669 = vperm.xlu0 %6002, %v7211_v47  }
 0x4aa   : > { %3634 = vperm.xlu1 %6003, %v7177_v16   ;;  %6004 = vset.pattern.permute.xlu0 %v10619_v4 }
 0x4ab   : > { %2541 = vperm.xlu0 %6004, %v6798_v22   ;;  %v7247_v22 = vpop.permute.xlu1 %2465 }
 0x4ac   : > { %10622 = vst [vmem:[#allocation8_spill] sm:$0xff] %v7247_v22 }
 0x4ae   : > { %3644 = vperm.xlu1 %6003, %v7191_v10  }
 0x4af   : > { %2553 = vperm.xlu0 %6004, %v6809_v8   ;;  %v7251_v8 = vpop.permute.xlu1 %2545 }
 0x4b2   : > { %3654 = vperm.xlu1 %6003, %v7205_v14  }
 0x4b3   : > { %2561 = vperm.xlu0 %6004, %v6820_v36   ;;  %v7258_v25 = vpop.permute.xlu1 %2549 }
 0x4b4   : > { %10623 = vst [vmem:[#allocation9_spill] sm:$0xff] %v7258_v25 }
 0x4b6   : > { %3664 = vperm.xlu1 %6003, %v7217_v55  }
 0x4b7   : > { %4042 = vperm.xlu0 %6004, %v7156_v41   ;;  %v7267_v53 = vpop.permute.xlu1 %2557 }
 0x4b8   : > { %10626 = vst [vmem:[#allocation12_spill] sm:$0xff] %v7267_v53 }
 0x4ba   : > { %3674 = vperm.xlu1 %6003, %v7226_v40  }
 0x4bb   : > { %4054 = vperm.xlu0 %6004, %v7169_v5   ;;  %v7290_v7 = vpop.permute.xlu1 %2649 }
 0x4be   : > { %6005 = vset.pattern.permute.xlu1 %v10596_v59 }
 0x4bf   : > { %3850 = vperm.xlu1 %6005, %v7156_v41   ;;  %4062 = vperm.xlu0 %6004, %v7183_v37   ;;  %v7299_v52 = vpop.permute.xlu1 %2657 }
 0x4c0   : > { %10629 = vst [vmem:[#allocation14_spill] sm:$0xff] %v7299_v52 }
 0x4c3   : > { %3854 = vperm.xlu1 %6005, %v7163_v61   ;;  %4070 = vperm.xlu0 %6004, %v7197_v32   ;;  %v7313_v35 = vpop.permute.xlu1 %2661 }
 0x4c4   : > { %10630 = vst [vmem:[#allocation15_spill] sm:$0xff] %v7313_v35 }
 0x4c7   : > { %3862 = vperm.xlu1 %6005, %v7169_v5   ;;  %4078 = vperm.xlu0 %6004, %v7211_v47   ;;  %v7322_v44 = vpop.permute.xlu1 %2669 }
 0x4c8   : > { %10631 = vst [vmem:[#allocation17_spill] sm:$0xff] %v7322_v44 }
 0x4cb   : > { %3870 = vperm.xlu1 %6005, %v7183_v37   ;;  %6007 = vset.pattern.permute.xlu0 %v10597_v54  ;;  %v7327_v11 = vpop.permute.xlu1 %2761 }
 0x4cc   : > { %2653 = vperm.xlu0 %6007, %v6841_v51   ;;  %v6040_v51 = vld [vmem:[%s6251_s30 + $0x18] sm:$0xff] }
 0x4cf   : > { %3878 = vperm.xlu1 %6005, %v7197_v32  }
 0x4d0   : > { %2665 = vperm.xlu0 %6007, %v6847_v58   ;;  %v6041_v58 = vld [vmem:[%s6251_s30 + $0x10] sm:$0xff] }
 0x4d3   : > { %3886 = vperm.xlu1 %6005, %v7211_v47  }
 0x4d4   : > { %4254 = vperm.xlu0 %6007, %v7150_v56  }
 0x4d7   : > { %6006 = vset.pattern.permute.xlu1 %v10619_v4 }
 0x4d8   : > { %4038 = vperm.xlu1 %6006, %v7150_v56   ;;  %4266 = vperm.xlu0 %6007, %v7177_v16  }
 0x4dc   : > { %4046 = vperm.xlu1 %6006, %v7163_v61  }
 0x4e0   : > { %4050 = vperm.xlu1 %6006, %v7177_v16  }
 0x4e4   : > { %4058 = vperm.xlu1 %6006, %v7191_v10  }
 0x4e8   : > { %4066 = vperm.xlu1 %6006, %v7205_v14  }
 0x4ec   : > { %4074 = vperm.xlu1 %6006, %v7217_v55  }
 0x4f0   : > { %4082 = vperm.xlu1 %6006, %v7226_v40  }
 0x4f4   : > { %6008 = vset.pattern.permute.xlu1 %v10597_v54  ;;  %v7330_v54 = vpop.permute.xlu1 %2765 }
 0x4f5   : > { %4258 = vperm.xlu1 %6008, %v7156_v41   ;;  %10632 = vst [vmem:[#allocation5_spill] sm:$0xff] %v7330_v54 }
 0x4f8   : > { %v7332_v50 = vpop.permute.xlu1 %2773 }
 0x4f9   : > { %4262 = vperm.xlu1 %6008, %v7163_v61   ;;  %10633 = vst [vmem:[#allocation4_spill] sm:$0xff] %v7332_v50 }
 0x4fc   : > { %v7334_v56 = vpop.permute.xlu1 %2865 }
 0x4fd   : > { %4270 = vperm.xlu1 %6008, %v7169_v5   ;;  %v7350_v5 = vpop.permute.xlu0 %2757 }
 0x500   : > { %v7336_v16 = vpop.permute.xlu1 %2873 }
 0x501   : > { %10634 = vst [vmem:[#allocation18_spill] sm:$0xff] %v7336_v16 }
 0x504   : > { %v7338_v41 = vpop.permute.xlu1 %2877 }
 0x505   : > { %10635 = vst [vmem:[#allocation19_spill] sm:$0xff] %v7338_v41 }
 0x508   : > { %v7340_v4 = vpop.permute.xlu1 %2885 }
 0x509   : > { %10636 = vst [vmem:[#allocation20_spill] sm:$0xff] %v7340_v4 }
 0x538   : > { %v2153_v36 = vpop.f32.mrb[6].mxu0 }
 0x539   : > { %v2154_v6 = vadd.f32 %v2153_v36, %v7132_v38  ;;  %v2155_v29 = vpop.f32.mrb[7].mxu0  ;;  %v7342_v36 = vpop.permute.xlu1 %2977 }
 0x53a   : > { %v2156_v3 = vadd.f32 %v2155_v29, %v7132_v38  ;;  %v848_v38 = vld [vmem:[%s10273_s13 + $0x28] sm:$0xff] }
 0x53b   : > { %v2158_v23 = vadd.f32 %v2154_v6, %v10624_v43  ;;  %v7354_v43 = vpop.permute.xlu0 %2769 }
 0x53c   : > { %v2159_v49 = vadd.f32 %v2156_v3, %v10625_v57  ;;  %10640 = vst [vmem:[#allocation24_spill] sm:$0xff] %v7354_v43 }
 0x53d   : > { %v2162_v18 = vrot.slane %v2158_v23, 4  ;;  %v7344_v61 = vpop.permute.xlu1 %2981 }
 0x53e   : > { %v2163_v9 = vrot.slane %v2159_v49, 4  ;;  %10637 = vst [vmem:[#allocation21_spill] sm:$0xff] %v7344_v61 }
 0x53f   : > { %v7281_v21 = vsel %vm1390_vm14, %v6041_v58, %v2162_v18  ;;  %v7358_v57 = vpop.permute.xlu0 %2777 }
 0x540   : > { %v7272_v39 = vsel %vm1390_vm14, %v6040_v51, %v2163_v9  ;;  %10628 = vst [vmem:[#allocation13_spill] sm:$0xff] %v7281_v21  ;;  %10642 = vst [vmem:[#allocation26_spill] sm:$0xff] %v7358_v57 }
 0x541   : > { %10627 = vst [vmem:[#allocation10_spill] sm:$0xff] %v7272_v39  ;;  %2217 = vmatprep.subr.mxu0 %v7272_v39  ;;  %v7346_v6 = vpop.permute.xlu1 %2989 }
 0x542   : > { %2218 = vmatpush1.msra.mxu0 %v7281_v21  ;;  %10638 = vst [vmem:[#allocation22_spill] sm:$0xff] %v7346_v6 }
 0x543   : > { %5820 = vmatmul.mubr.msk.f32.vlgmr.msra.gmra.mrb[8].mxu0 %vm2198_vm6, %v843_v15  ;;  %v7362_v18 = vpop.permute.xlu0 %2869 }
 0x544   : > { %2287 = vmatprep.mubr.f32.mxu0 %v10614_v20 }
 0x545   : > { %v7348_v29 = vpop.permute.xlu1 %3069 }
 0x547   : > { %5821 = vmatmul.mubr.msk.f32.gmra.mrb[10].mxu0 %vm2198_vm6, %v844_v2  ;;  %v7366_v51 = vpop.permute.xlu0 %2881 }
 0x548   : > { %2293 = vmatprep.mubr.f32.mxu0 %v10614_v20  ;;  %10644 = vst [vmem:[#allocation28_spill] sm:$0xff] %v7366_v51 }
 0x549   : > { %v7352_v3 = vpop.permute.xlu1 %3077 }
 0x54a   : > { %10639 = vst [vmem:[#allocation23_spill] sm:$0xff] %v7352_v3 }
 0x54b   : > { %5822 = vmatmul.mubr.msk.f32.gmra.mrb[12].mxu0 %vm2198_vm6, %v845_v13  ;;  %v7370_v58 = vpop.permute.xlu0 %2973 }
 0x54c   : > { %2299 = vmatprep.mubr.f32.mxu0 %v10614_v20 }
 0x54d   : > { %v7356_v23 = vpop.permute.xlu1 %3081 }
 0x54e   : > { %10641 = vst [vmem:[#allocation25_spill] sm:$0xff] %v7356_v23 }
 0x54f   : > { %5823 = vmatmul.mubr.msk.f32.gmra.mrb[14].mxu0 %vm2198_vm6, %v846_v1  ;;  %v7374_v13 = vpop.permute.xlu0 %2985 }
 0x550   : > { %2305 = vmatprep.mubr.f32.mxu0 %v10614_v20  ;;  %10647 = vst [vmem:[#allocation31_spill] sm:$0xff] %v7374_v13 }
 0x551   : > { %v7360_v49 = vpop.permute.xlu1 %3089 }
 0x552   : > { %10643 = vst [vmem:[#allocation27_spill] sm:$0xff] %v7360_v49 }
 0x553   : > { %5824 = vmatmul.mubr.msk.f32.gmra.mrb[16].mxu0 %vm2198_vm6, %v847_v17  ;;  %v7378_v17 = vpop.permute.xlu0 %2993 }
 0x554   : > { %2311 = vmatprep.mubr.f32.mxu0 %v10614_v20  ;;  %10648 = vst [vmem:[#allocation32_spill] sm:$0xff] %v7378_v17 }
 0x555   : > { %v7364_v9 = vpop.permute.xlu1 %3181 }
 0x557   : > { %5825 = vmatmul.mubr.msk.f32.gmra.mrb[18].mxu0 %vm2198_vm6, %v848_v38  ;;  %v7382_v39 = vpop.permute.xlu0 %3073 }
 0x558   : > { %5602 = vmatprep.mubr.f32.mxu0 %v10614_v20 }
 0x559   : > { %v7368_v15 = vpop.permute.xlu1 %3185 }
 0x55a   : > { %10645 = vst [vmem:[#allocation29_spill] sm:$0xff] %v7368_v15 }
 0x55b   : > { %v7386_v20 = vpop.permute.xlu0 %3085 }
 0x55c   : > { %10651 = vst [vmem:[#allocation35_spill] sm:$0xff] %v7386_v20 }
 0x55d   : > { %v7372_v2 = vpop.permute.xlu1 %3193 }
 0x55e   : > { %10646 = vst [vmem:[#allocation30_spill] sm:$0xff] %v7372_v2 }
 0x55f   : > { %v7390_v4 = vpop.permute.xlu0 %3177 }
 0x561   : > { %v7376_v1 = vpop.permute.xlu1 %3226 }
 0x563   : > { %v7394_v2 = vpop.permute.xlu0 %3189 }
 0x564   : > { %10654 = vst [vmem:[#allocation38_spill] sm:$0xff] %v7394_v2 }
 0x565   : > { %v7380_v38 = vpop.permute.xlu1 %3236 }
 0x566   : > { %10649 = vst [vmem:[#allocation33_spill] sm:$0xff] %v7380_v38 }
 0x567   : > { %v7398_v44 = vpop.permute.xlu0 %3197 }
 0x568   : > { %10656 = vst [vmem:[#allocation40_spill] sm:$0xff] %v7398_v44 }
 0x569   : > { %v7384_v21 = vpop.permute.xlu1 %3241 }
 0x56a   : > { %10650 = vst [vmem:[#allocation34_spill] sm:$0xff] %v7384_v21 }
 0x56b   : > { %v2171_v51 = vpop.permute.xlu0 %2170 }
 0x56d   : > { %v7388_v49 = vpop.permute.xlu1 %3251 }
 0x56e   : > { %10652 = vst [vmem:[#allocation36_spill] sm:$0xff] %v7388_v49 }
 0x56f   : > { %v7404_v59 = vpop.permute.xlu0 %2180 }
 0x571   : > { %v7392_v57 = vpop.permute.xlu1 %3362 }
 0x572   : > { %10653 = vst [vmem:[#allocation37_spill] sm:$0xff] %v7392_v57 }
 0x573   : > { %v7408_v49 = vpop.permute.xlu0 %2190 }
 0x575   : > { %v7396_v6 = vpop.permute.xlu1 %3372 }
 0x576   : > { %10655 = vst [vmem:[#allocation39_spill] sm:$0xff] %v7396_v6 }
 0x577   : > { %v7412_v57 = vpop.permute.xlu0 %2449 }
 0x579   : > { %v7400_v17 = vpop.permute.xlu1 %3382 }
 0x57a   : > { %10657 = vst [vmem:[#allocation41_spill] sm:$0xff] %v7400_v17 }
 0x57b   : > { %v7416_v6 = vpop.permute.xlu0 %2461 }
 0x57c   : > { %10662 = vst [vmem:[#allocation46_spill] sm:$0xff] %v7416_v6 }
 0x57d   : > { %v7402_v50 = vpop.permute.xlu1 %3392 }
 0x57e   : > { %10658 = vst [vmem:[#allocation42_spill] sm:$0xff] %v7402_v50 }
 0x57f   : > { %v7420_v17 = vpop.permute.xlu0 %3231 }
 0x581   : > { %v7406_v20 = vpop.permute.xlu1 %3402 }
 0x582   : > { %10659 = vst [vmem:[#allocation43_spill] sm:$0xff] %v7406_v20 }
 0x583   : > { %v7424_v20 = vpop.permute.xlu0 %3246 }
 0x584   : > { %10665 = vst [vmem:[#allocation49_spill] sm:$0xff] %v7424_v20 }
 0x585   : > { %v7410_v22 = vpop.permute.xlu1 %3412 }
 0x586   : > { %10660 = vst [vmem:[#allocation44_spill] sm:$0xff] %v7410_v22 }
 0x589   : > { %v7414_v53 = vpop.permute.xlu1 %3619 }
 0x58a   : > { %10661 = vst [vmem:[#allocation45_spill] sm:$0xff] %v7414_v53 }
 0x58d   : > { %v7418_v44 = vpop.permute.xlu1 %3629 }
 0x58e   : > { %10663 = vst [vmem:[#allocation47_spill] sm:$0xff] %v7418_v44  ;;  %v7434_v44 = vpop.permute.xlu0 %2332 }
 0x591   : > { %v7422_v33 = vpop.permute.xlu1 %3634 }
 0x592   : > { %10664 = vst [vmem:[#allocation48_spill] sm:$0xff] %v7422_v33 }
 0x595   : > { %v7428_v22 = vpop.permute.xlu1 %3644 }
 0x596   : > { %10666 = vst [vmem:[#allocation50_spill] sm:$0xff] %v7428_v22 }
 0x616   : > { %v2283_v50 = vpop.f32.mrb[8].mxu0 }
 0x617   : > { %v2284_v46 = vadd.f32 %v2283_v50, %v2171_v51  ;;  %v2285_v12 = vpop.f32.mrb[9].mxu0  ;;  %v7444_v50 = vpop.permute.xlu0 %2347 }
 0x618   : > { %10668 = vst [vmem:[#allocation52_spill] sm:$0xff] %v7444_v50  ;;  %v2286_v6 = vadd.f32 %v2285_v12, %v2171_v51 }
 0x619   : > { %v7426_v27 = vmax.f32 %v2284_v46, 0.0  ;;  %v7442_v46 = vpop.permute.xlu1 %3654 }
 0x61a   : > { %v2289_v21 = vpop.f32.mrb[10].mxu0  ;;  %10667 = vst [vmem:[#allocation51_spill] sm:$0xff] %v7442_v46  ;;  %v7466_v41 = vmax.f32 %v2286_v6, 0.0 }
 0x61b   : > { %v2291_v38 = vpop.f32.mrb[11].mxu0  ;;  %2492 = vrot.lane.b32.xlu0 %v7426_v27, %s10574_s9  ;;  %2384 = vrot.lane.b32.xlu1 %v7426_v27, %s10573_s3  ;;  %v7454_v2 = vpop.permute.xlu0 %2357 }
 0x61c   : > { %10669 = vst [vmem:[#allocation53_spill] sm:$0xff] %v7454_v2 }
 0x61d   : > { %v7456_v23 = vpop.permute.xlu1 %3664 }
 0x61e   : > { %v2295_v33 = vpop.f32.mrb[12].mxu0  ;;  %10670 = vst [vmem:[#allocation54_spill] sm:$0xff] %v7456_v23 }
 0x61f   : > { %v7436_v53 = vpop.f32.mrb[13].mxu0  ;;  %2696 = vrot.lane.b32.xlu0 %v7426_v27, %s10577_s28  ;;  %2588 = vrot.lane.b32.xlu1 %v7426_v27, %s10576_s0  ;;  %v7468_v15 = vpop.permute.xlu0 %3624 }
 0x620   : > { %10671 = vst [vmem:[#allocation55_spill] sm:$0xff] %v7468_v15  ;;  %v2290_v15 = vadd.f32 %v2289_v21, %v7139_v24 }
 0x621   : > { %v7478_v51 = vpop.permute.xlu1 %3674 }
 0x622   : > { %v7446_v22 = vpop.f32.mrb[14].mxu0  ;;  %10672 = vst [vmem:[#allocation56_spill] sm:$0xff] %v7478_v51 }
 0x623   : > { %v7448_v20 = vpop.f32.mrb[15].mxu0  ;;  %2912 = vrot.lane.b32.xlu0 %v7426_v27, %s10580_s1  ;;  %2804 = vrot.lane.b32.xlu1 %v7426_v27, %s10578_s29  ;;  %v7486_v23 = vpop.permute.xlu0 %3639 }
 0x624   : > { %10674 = vst [vmem:[#allocation58_spill] sm:$0xff] %v7486_v23 }
 0x625   : > { %v7484_v6 = vpop.permute.xlu1 %3850 }
 0x626   : > { %v7458_v13 = vpop.f32.mrb[16].mxu0  ;;  %10673 = vst [vmem:[#allocation57_spill] sm:$0xff] %v7484_v6  ;;  %v7501_v6 = vmax.f32 %v2290_v15, 0.0 }
 0x627   : > { %v7460_v46 = vpop.f32.mrb[17].mxu0  ;;  %3116 = vrot.lane.b32.xlu0 %v7426_v27, %s10582_s2  ;;  %3020 = vrot.lane.b32.xlu1 %v7426_v27, %s10581_s11  ;;  %v7495_v51 = vpop.permute.xlu0 %3649 }
 0x628   : > { %10676 = vst [vmem:[#allocation60_spill] sm:$0xff] %v7495_v51  ;;  %v2310_v16 = vadd.f32 %v7460_v46, %v7408_v49 }
 0x629   : > { %v7493_v2 = vpop.permute.xlu1 %3854 }
 0x62a   : > { %v7470_v43 = vpop.f32.mrb[18].mxu0  ;;  %10675 = vst [vmem:[#allocation59_spill] sm:$0xff] %v7493_v2  ;;  %v7705_v28 = vmax.f32 %v2310_v16, 0.0  ;;  %v2361_v16 = vmul.f32 %v7434_v44, %v7466_v41 }
 0x62b   : > { %v7472_v12 = vpop.f32.mrb[19].mxu0  ;;  %2386 = vrot.lane.b32.xlu0 %v7466_v41, %s10573_s3  ;;  %2494 = vrot.lane.b32.xlu1 %v7466_v41, %s10574_s9  ;;  %v7509_v21 = vpop.permute.xlu0 %3659 }
 0x62c   : > { %10678 = vst [vmem:[#allocation62_spill] sm:$0xff] %v7509_v21 }
 0x62d   : > { %v7507_v23 = vpop.permute.xlu1 %3862 }
 0x62e   : > { %10677 = vst [vmem:[#allocation61_spill] sm:$0xff] %v7507_v23  ;;  %v2292_v23 = vadd.f32 %v2291_v38, %v7139_v24 }
 0x62f   : > { %2590 = vrot.lane.b32.xlu0 %v7466_v41, %s10576_s0  ;;  %2698 = vrot.lane.b32.xlu1 %v7466_v41, %s10577_s28  ;;  %v7517_v15 = vpop.permute.xlu0 %3669 }
 0x630   : > { %10680 = vst [vmem:[#allocation64_spill] sm:$0xff] %v7517_v15 }
 0x631   : > { %v7515_v51 = vpop.permute.xlu1 %3870 }
 0x632   : > { %10679 = vst [vmem:[#allocation63_spill] sm:$0xff] %v7515_v51  ;;  %v7532_v51 = vmax.f32 %v2292_v23, 0.0 }
 0x633   : > { %2806 = vrot.lane.b32.xlu0 %v7466_v41, %s10578_s29  ;;  %2914 = vrot.lane.b32.xlu1 %v7466_v41, %s10580_s1  ;;  %v7530_v2 = vpop.permute.xlu0 %2541 }
 0x635   : > { %v7528_v21 = vpop.permute.xlu1 %3878 }
 0x636   : > { %10681 = vst [vmem:[#allocation65_spill] sm:$0xff] %v7528_v21 }
 0x637   : > { %3022 = vrot.lane.b32.xlu0 %v7466_v41, %s10581_s11  ;;  %3118 = vrot.lane.b32.xlu1 %v7466_v41, %s10582_s2  ;;  %v7540_v24 = vpop.permute.xlu0 %2553 }
 0x638   : > { %10683 = vst [vmem:[#allocation67_spill] sm:$0xff] %v7540_v24 }
 0x639   : > { %v7538_v15 = vpop.permute.xlu1 %3886 }
 0x63a   : > { %10682 = vst [vmem:[#allocation66_spill] sm:$0xff] %v7538_v15  ;;  %v2296_v15 = vadd.f32 %v2295_v33, %v7404_v59 }
 0x63b   : > { %2496 = vrot.lane.b32.xlu0 %v7501_v6, %s10574_s9  ;;  %2388 = vrot.lane.b32.xlu1 %v7501_v6, %s10573_s3  ;;  %v7552_v38 = vpop.permute.xlu0 %2561 }
 0x63c   : > { %10685 = vst [vmem:[#allocation69_spill] sm:$0xff] %v7552_v38  ;;  %v7559_v21 = vmax.f32 %v2296_v15, 0.0 }
 0x63d   : > { %v7550_v23 = vpop.permute.xlu1 %4038 }
 0x63e   : > { %10684 = vst [vmem:[#allocation68_spill] sm:$0xff] %v7550_v23  ;;  %10686 = vst [vmem:[#allocation70_spill] sm:$0xff] %v7559_v21 }
 0x63f   : > { %2700 = vrot.lane.b32.xlu0 %v7501_v6, %s10577_s28  ;;  %2592 = vrot.lane.b32.xlu1 %v7501_v6, %s10576_s0  ;;  %v7563_v63 = vpop.permute.xlu0 %4042 }
 0x640   : > { %10688 = vst [vmem:[#allocation72_spill] sm:$0xff] %v7563_v63 }
 0x641   : > { %v7561_v3 = vpop.permute.xlu1 %4046 }
 0x642   : > { %10687 = vst [vmem:[#allocation71_spill] sm:$0xff] %v7561_v3  ;;  %v2298_v3 = vadd.f32 %v7436_v53, %v7404_v59 }
 0x643   : > { %2916 = vrot.lane.b32.xlu0 %v7501_v6, %s10580_s1  ;;  %2808 = vrot.lane.b32.xlu1 %v7501_v6, %s10578_s29  ;;  %v7575_v15 = vpop.permute.xlu0 %4054 }
 0x644   : > { %10690 = vst [vmem:[#allocation74_spill] sm:$0xff] %v7575_v15  ;;  %v7591_v15 = vmax.f32 %v2298_v3, 0.0 }
 0x645   : > { %v7573_v33 = vpop.permute.xlu1 %4050 }
 0x646   : > { %10689 = vst [vmem:[#allocation73_spill] sm:$0xff] %v7573_v33  ;;  %10693 = vst [vmem:[#allocation77_spill] sm:$0xff] %v7591_v15 }
 0x647   : > { %3120 = vrot.lane.b32.xlu0 %v7501_v6, %s10582_s2  ;;  %3024 = vrot.lane.b32.xlu1 %v7501_v6, %s10581_s11  ;;  %v7585_v23 = vpop.permute.xlu0 %4062 }
 0x648   : > { %10692 = vst [vmem:[#allocation76_spill] sm:$0xff] %v7585_v23 }
 0x649   : > { %v7583_v63 = vpop.permute.xlu1 %4058 }
 0x64a   : > { %10691 = vst [vmem:[#allocation75_spill] sm:$0xff] %v7583_v63  ;;  %v2304_v63 = vadd.f32 %v7448_v20, %v7145_v48 }
 0x64b   : > { %2390 = vrot.lane.b32.xlu0 %v7532_v51, %s10573_s3  ;;  %2498 = vrot.lane.b32.xlu1 %v7532_v51, %s10574_s9  ;;  %v7599_v59 = vpop.permute.xlu0 %4070 }
 0x64c   : > { %10695 = vst [vmem:[#allocation79_spill] sm:$0xff] %v7599_v59 }
 0x64d   : > { %v7597_v33 = vpop.permute.xlu1 %4066 }
 0x64e   : > { %10694 = vst [vmem:[#allocation78_spill] sm:$0xff] %v7597_v33  ;;  %v2302_v33 = vadd.f32 %v7446_v22, %v7145_v48 }
 0x64f   : > { %2594 = vrot.lane.b32.xlu0 %v7532_v51, %s10576_s0  ;;  %2702 = vrot.lane.b32.xlu1 %v7532_v51, %s10577_s28  ;;  %v7607_v3 = vpop.permute.xlu0 %4078 }
 0x650   : > { %10697 = vst [vmem:[#allocation81_spill] sm:$0xff] %v7607_v3  ;;  %v7623_v3 = vmax.f32 %v2302_v33, 0.0 }
 0x651   : > { %v7605_v53 = vpop.permute.xlu1 %4074 }
 0x652   : > { %10696 = vst [vmem:[#allocation80_spill] sm:$0xff] %v7605_v53  ;;  %10699 = vst [vmem:[#allocation83_spill] sm:$0xff] %v7623_v3 }
 0x653   : > { %2810 = vrot.lane.b32.xlu0 %v7532_v51, %s10578_s29  ;;  %2918 = vrot.lane.b32.xlu1 %v7532_v51, %s10580_s1  ;;  %v7615_v59 = vpop.permute.xlu0 %2653 }
 0x655   : > { %v7617_v23 = vpop.permute.xlu1 %4082 }
 0x656   : > { %10698 = vst [vmem:[#allocation82_spill] sm:$0xff] %v7617_v23 }
 0x657   : > { %3026 = vrot.lane.b32.xlu0 %v7532_v51, %s10581_s11  ;;  %3122 = vrot.lane.b32.xlu1 %v7532_v51, %s10582_s2  ;;  %v7629_v53 = vpop.permute.xlu0 %2665 }
 0x658   : > { %10700 = vst [vmem:[#allocation84_spill] sm:$0xff] %v7629_v53 }
 0x659   : > { %v7631_v22 = vpop.permute.xlu1 %4258 }
 0x65a   : > { %10701 = vst [vmem:[#allocation85_spill] sm:$0xff] %v7631_v22 }
 0x65b   : > { %2500 = vrot.lane.b32.xlu0 %v7559_v21, %s10574_s9  ;;  %2392 = vrot.lane.b32.xlu1 %v7559_v21, %s10573_s3  ;;  %v7637_v23 = vpop.permute.xlu0 %4254 }
 0x65c   : > { %10702 = vst [vmem:[#allocation86_spill] sm:$0xff] %v7637_v23 }
 0x65d   : > { %v7639_v33 = vpop.permute.xlu1 %4262 }
 0x65e   : > { %10703 = vst [vmem:[#allocation87_spill] sm:$0xff] %v7639_v33  ;;  %v7655_v33 = vmax.f32 %v2304_v63, 0.0  ;;  %v2308_v63 = vadd.f32 %v7458_v13, %v7408_v49 }
 0x65f   : > { %2704 = vrot.lane.b32.xlu0 %v7559_v21, %s10577_s28  ;;  %2596 = vrot.lane.b32.xlu1 %v7559_v21, %s10576_s0  ;;  %v7651_v22 = vpop.permute.xlu0 %4266 }
 0x660   : > { %10704 = vst [vmem:[#allocation88_spill] sm:$0xff] %v7651_v22  ;;  %10706 = vst [vmem:[#allocation90_spill] sm:$0xff] %v7655_v33  ;;  %v7677_v35 = vmax.f32 %v2308_v63, 0.0 }
 0x661   : > { %v7653_v23 = vpop.permute.xlu1 %4270 }
 0x662   : > { %10705 = vst [vmem:[#allocation89_spill] sm:$0xff] %v7653_v23  ;;  %10707 = vst [vmem:[#allocation91_spill] sm:$0xff] %v7677_v35 }
 0x663   : > { %2920 = vrot.lane.b32.xlu0 %v7559_v21, %s10580_s1  ;;  %2812 = vrot.lane.b32.xlu1 %v7559_v21, %s10578_s29 }
 0x667   : > { %3124 = vrot.lane.b32.xlu0 %v7559_v21, %s10582_s2  ;;  %3028 = vrot.lane.b32.xlu1 %v7559_v21, %s10581_s11 }
 0x66b   : > { %2394 = vrot.lane.b32.xlu0 %v7591_v15, %s10573_s3  ;;  %2502 = vrot.lane.b32.xlu1 %v7591_v15, %s10574_s9 }
 0x66f   : > { %2598 = vrot.lane.b32.xlu0 %v7591_v15, %s10576_s0  ;;  %2706 = vrot.lane.b32.xlu1 %v7591_v15, %s10577_s28 }
 0x673   : > { %2814 = vrot.lane.b32.xlu0 %v7591_v15, %s10578_s29  ;;  %2922 = vrot.lane.b32.xlu1 %v7591_v15, %s10580_s1 }
 0x677   : > { %3030 = vrot.lane.b32.xlu0 %v7591_v15, %s10581_s11  ;;  %3126 = vrot.lane.b32.xlu1 %v7591_v15, %s10582_s2 }
 0x67b   : > { %2504 = vrot.lane.b32.xlu0 %v7623_v3, %s10574_s9  ;;  %2396 = vrot.lane.b32.xlu1 %v7623_v3, %s10573_s3 }
 0x67f   : > { %2708 = vrot.lane.b32.xlu0 %v7623_v3, %s10577_s28  ;;  %2600 = vrot.lane.b32.xlu1 %v7623_v3, %s10576_s0 }
 0x683   : > { %2924 = vrot.lane.b32.xlu0 %v7623_v3, %s10580_s1  ;;  %2816 = vrot.lane.b32.xlu1 %v7623_v3, %s10578_s29 }
 0x687   : > { %3128 = vrot.lane.b32.xlu0 %v7623_v3, %s10582_s2  ;;  %3032 = vrot.lane.b32.xlu1 %v7623_v3, %s10581_s11 }
 0x68b   : > { %2398 = vrot.lane.b32.xlu0 %v7655_v33, %s10573_s3  ;;  %2506 = vrot.lane.b32.xlu1 %v7655_v33, %s10574_s9 }
 0x68d   : > { %v2493_v38 = vpop.permute.xlu0 %2492  ;;  %v2385_v20 = vpop.permute.xlu1 %2384 }
 0x68e   : > { %v2426_v3 = vsel %vm1083_vm4, 0.0, %v2385_v20 }
 0x68f   : > { %2602 = vrot.lane.b32.xlu0 %v7655_v33, %s10576_s0  ;;  %2710 = vrot.lane.b32.xlu1 %v7655_v33, %s10577_s28  ;;  %v2432_v25 = vmul.f32 %v6438_v34, %v2426_v3 }
 0x691   : > { %v2697_v48 = vpop.permute.xlu0 %2696  ;;  %v2589_v22 = vpop.permute.xlu1 %2588  ;;  %v2468_v49 = vmul.f32 %v7231_v26, %v2432_v25  ;;  %v2534_v25 = vsel %vm1120_vm7, 0.0, %v2493_v38 }
 0x692   : > { %v2630_v46 = vsel %vm1153_vm5, 0.0, %v2589_v22 }
 0x693   : > { %2818 = vrot.lane.b32.xlu0 %v7655_v33, %s10578_s29  ;;  %2926 = vrot.lane.b32.xlu1 %v7655_v33, %s10580_s1 }
 0x695   : > { %v7671_v23 = vpop.permute.xlu0 %2912  ;;  %v2805_v53 = vpop.permute.xlu1 %2804 }
 0x697   : > { %3034 = vrot.lane.b32.xlu0 %v7655_v33, %s10581_s11  ;;  %3130 = vrot.lane.b32.xlu1 %v7655_v33, %s10582_s2 }
 0x699   : > { %v7679_v24 = vpop.permute.xlu0 %3116  ;;  %v7681_v61 = vpop.permute.xlu1 %3020 }
 0x69b   : > { %2508 = vrot.lane.b32.xlu0 %v7677_v35, %s10574_s9  ;;  %2400 = vrot.lane.b32.xlu1 %v7677_v35, %s10573_s3 }
 0x69d   : > { %v2387_v13 = vpop.permute.xlu0 %2386  ;;  %v2495_v50 = vpop.permute.xlu1 %2494 }
 0x69e   : > { %v2408_v0 = vsel %vm1083_vm4, %v2385_v20, %v2387_v13  ;;  %v2516_v45 = vsel %vm1120_vm7, %v2493_v38, %v2495_v50 }
 0x69f   : > { %2712 = vrot.lane.b32.xlu0 %v7677_v35, %s10577_s28  ;;  %2604 = vrot.lane.b32.xlu1 %v7677_v35, %s10576_s0  ;;  %v2433_v15 = vmul.f32 %v6434_v31, %v2408_v0  ;;  %v2360_v0 = vmul.f32 %v7434_v44, %v7426_v27  ;;  %v2738_v44 = vsel %vm1190_vm9, 0.0, %v2697_v48  ;;  %v2565_v41 = vmul.f32 %v7530_v2, %v2516_v45 }
 0x6a0   : > { %v2744_v45 = vmul.f32 %v6438_v34, %v2738_v44 }
 0x6a1   : > { %v2591_v63 = vpop.permute.xlu0 %2590  ;;  %v2699_v33 = vpop.permute.xlu1 %2698  ;;  %v2469_v3 = vmul.f32 %v7231_v26, %v2433_v15  ;;  %v2480_v26 = vadd.f32 %v2468_v49, %v2360_v0  ;;  %v2636_v15 = vmul.f32 %v6455_v19, %v2630_v46 }
 0x6a2   : > { %v2612_v13 = vsel %vm1153_vm5, %v2589_v22, %v2591_v63  ;;  %v2564_v63 = vmul.f32 %v7530_v2, %v2534_v25  ;;  %v2720_v0 = vsel %vm1190_vm9, %v2697_v48, %v2699_v33  ;;  %v2314_v33 = vadd.f32 %v7470_v43, %v7171_v30 }
 0x6a3   : > { %2928 = vrot.lane.b32.xlu0 %v7677_v35, %s10580_s1  ;;  %2820 = vrot.lane.b32.xlu1 %v7677_v35, %s10578_s29  ;;  %v2481_v27 = vadd.f32 %v2469_v3, %v2361_v16  ;;  %v2637_v22 = vmul.f32 %v6449_v62, %v2612_v13  ;;  %v2672_v3 = vmul.f32 %v7290_v7, %v2636_v15 }
 0x6a4   : > { %v2576_v38 = vadd.f32 %v2564_v63, %v2480_v26  ;;  %v2745_v48 = vmul.f32 %v6434_v31, %v2720_v0  ;;  %v2316_v43 = vadd.f32 %v7472_v12, %v7171_v30 }
 0x6a5   : > { %v2807_v54 = vpop.permute.xlu0 %2806  ;;  %v2915_v52 = vpop.permute.xlu1 %2914  ;;  %v2577_v16 = vadd.f32 %v2565_v41, %v2481_v27  ;;  %v2673_v25 = vmul.f32 %v7290_v7, %v2637_v22  ;;  %v2780_v41 = vmul.f32 %v7350_v5, %v2744_v45 }
 0x6a6   : > { %v2828_v49 = vsel %vm1227_vm10, %v2805_v53, %v2807_v54  ;;  %v2846_v2 = vsel %vm1227_vm10, %v2807_v54, 0.0  ;;  %v2684_v27 = vadd.f32 %v2672_v3, %v2576_v38  ;;  %v2936_v63 = vsel %vm1264_vm11, %v7671_v23, %v2915_v52 }
 0x6a7   : > { %3132 = vrot.lane.b32.xlu0 %v7677_v35, %s10582_s2  ;;  %3036 = vrot.lane.b32.xlu1 %v7677_v35, %s10581_s11  ;;  %v2852_v53 = vmul.f32 %v6455_v19, %v2828_v49  ;;  %v2685_v22 = vadd.f32 %v2673_v25, %v2577_v16  ;;  %v2853_v54 = vmul.f32 %v6449_v62, %v2846_v2  ;;  %v2954_v44 = vsel %vm1264_vm11, %v2915_v52, 0.0 }
 0x6a8   : > { %v7775_v38 = vmax.f32 %v2314_v33, 0.0  ;;  %v2781_v3 = vmul.f32 %v7350_v5, %v2745_v48  ;;  %v2960_v30 = vmul.f32 %v6438_v34, %v2936_v63  ;;  %v2961_v12 = vmul.f32 %v6434_v31, %v2954_v44 }
 0x6a9   : > { %v7707_v21 = vpop.permute.xlu0 %3022  ;;  %v7709_v20 = vpop.permute.xlu1 %3118  ;;  %v2888_v49 = vmul.f32 %v7334_v56, %v2852_v53  ;;  %v2889_v45 = vmul.f32 %v7334_v56, %v2853_v54  ;;  %v2362_v5 = vmul.f32 %v7185_v42, %v7501_v6  ;;  %v7792_v2 = vmax.f32 %v2316_v43, 0.0 }
 0x6aa   : > { %v2793_v25 = vadd.f32 %v2781_v3, %v2685_v22  ;;  %v2363_v48 = vmul.f32 %v7185_v42, %v7532_v51  ;;  %v3044_v56 = vsel %vm1301_vm12, %v7681_v61, %v7707_v21  ;;  %v2996_v63 = vmul.f32 %v7370_v58, %v2960_v30 }
 0x6ab   : > { %2402 = vrot.lane.b32.xlu0 %v7705_v28, %s10573_s3  ;;  %2510 = vrot.lane.b32.xlu1 %v7705_v28, %s10574_s9  ;;  %v2997_v44 = vmul.f32 %v7370_v58, %v2961_v12  ;;  %v3062_v43 = vsel %vm1301_vm12, %v7707_v21, 0.0  ;;  %v3140_v61 = vsel %vm1334_vm13, %v7679_v24, %v7709_v20  ;;  %v3092_v58 = vmul.f32 %v7348_v29, %v3044_v56 }
 0x6ac   : > { %v2901_v51 = vadd.f32 %v2889_v45, %v2793_v25  ;;  %v3158_v24 = vsel %vm1334_vm13, %v7709_v20, 0.0  ;;  %v3093_v25 = vmul.f32 %v7348_v29, %v3062_v43  ;;  %v3164_v45 = vmul.f32 %v6455_v19, %v3140_v61 }
 0x6ad   : > { %v7724_v35 = vpop.permute.xlu0 %2496  ;;  %v7726_v60 = vpop.permute.xlu1 %2388 }
 0x6ae   : > { %v2427_v13 = vsel %vm1083_vm4, 0.0, %v7726_v60  ;;  %v2535_v33 = vsel %vm1120_vm7, 0.0, %v7724_v35 }
 0x6af   : > { %2606 = vrot.lane.b32.xlu0 %v7705_v28, %s10576_s0  ;;  %2714 = vrot.lane.b32.xlu1 %v7705_v28, %s10577_s28  ;;  %v2434_v26 = vmul.f32 %v6438_v34, %v2427_v13  ;;  %v2792_v13 = vadd.f32 %v2780_v41, %v2684_v27  ;;  %v2566_v41 = vmul.f32 %v7251_v8, %v2535_v33 }
 0x6b1   : > { %v7739_v46 = vpop.permute.xlu0 %2700  ;;  %v7741_v50 = vpop.permute.xlu1 %2592  ;;  %v2470_v23 = vmul.f32 %v7412_v57, %v2434_v26  ;;  %v2900_v53 = vadd.f32 %v2888_v49, %v2792_v13 }
 0x6b2   : > { %v2631_v16 = vsel %vm1153_vm5, 0.0, %v7741_v50  ;;  %v2739_v26 = vsel %vm1190_vm9, 0.0, %v7739_v46 }
 0x6b3   : > { %2822 = vrot.lane.b32.xlu0 %v7705_v28, %s10578_s29  ;;  %2930 = vrot.lane.b32.xlu1 %v7705_v28, %s10580_s1  ;;  %v2482_v6 = vadd.f32 %v2470_v23, %v2362_v5  ;;  %v2638_v27 = vmul.f32 %v6455_v19, %v2631_v16  ;;  %v3008_v3 = vadd.f32 %v2996_v63, %v2900_v53 }
 0x6b4   : > { %v2746_v21 = vmul.f32 %v6438_v34, %v2739_v26 }
 0x6b5   : > { %v7759_v7 = vpop.permute.xlu0 %2916  ;;  %v7761_v15 = vpop.permute.xlu1 %2808  ;;  %v2578_v23 = vadd.f32 %v2566_v41, %v2482_v6  ;;  %v2674_v13 = vmul.f32 %v7615_v59, %v2638_v27  ;;  %v3104_v29 = vadd.f32 %v3092_v58, %v3008_v3  ;;  %v3165_v6 = vmul.f32 %v6449_v62, %v3158_v24 }
 0x6b6   : > { %v2782_v26 = vmul.f32 %v7327_v11, %v2746_v21 }
 0x6b7   : > { %3038 = vrot.lane.b32.xlu0 %v7705_v28, %s10581_s11  ;;  %3134 = vrot.lane.b32.xlu1 %v7705_v28, %s10582_s2  ;;  %v3201_v41 = vmul.f32 %v7390_v4, %v3165_v6 }
 0x6b9   : > { %v7779_v52 = vpop.permute.xlu0 %3120  ;;  %v7781_v0 = vpop.permute.xlu1 %3024 }
 0x6bb   : > { %2512 = vrot.lane.b32.xlu0 %v7775_v38, %s10574_s9  ;;  %2404 = vrot.lane.b32.xlu1 %v7775_v38, %s10573_s3 }
 0x6bd   : > { %v2391_v22 = vpop.permute.xlu0 %2390  ;;  %v2499_v54 = vpop.permute.xlu1 %2498 }
 0x6be   : > { %v2409_v42 = vsel %vm1083_vm4, %v7726_v60, %v2391_v22  ;;  %v2517_v60 = vsel %vm1120_vm7, %v7724_v35, %v2499_v54 }
 0x6bf   : > { %v2435_v49 = vmul.f32 %v6434_v31, %v2409_v42  ;;  %2716 = vrot.lane.b32.xlu0 %v7775_v38, %s10577_s28  ;;  %2608 = vrot.lane.b32.xlu1 %v7775_v38, %s10576_s0  ;;  %v2567_v20 = vmul.f32 %v7251_v8, %v2517_v60 }
 0x6c1   : > { %v2471_v30 = vmul.f32 %v7412_v57, %v2435_v49  ;;  %v2595_v12 = vpop.permute.xlu0 %2594  ;;  %v2703_v16 = vpop.permute.xlu1 %2702  ;;  %v3009_v57 = vadd.f32 %v2997_v44, %v2901_v51 }
 0x6c2   : > { %v2613_v35 = vsel %vm1153_vm5, %v7741_v50, %v2595_v12  ;;  %v2721_v5 = vsel %vm1190_vm9, %v7739_v46, %v2703_v16  ;;  %v2686_v46 = vadd.f32 %v2674_v13, %v2578_v23 }
 0x6c3   : > { %v2483_v53 = vadd.f32 %v2471_v30, %v2363_v48  ;;  %v2639_v33 = vmul.f32 %v6449_v62, %v2613_v35  ;;  %v2747_v56 = vmul.f32 %v6434_v31, %v2721_v5  ;;  %2932 = vrot.lane.b32.xlu0 %v7775_v38, %s10580_s1  ;;  %2824 = vrot.lane.b32.xlu1 %v7775_v38, %s10578_s29 }
 0x6c4   : > { %v2794_v3 = vadd.f32 %v2782_v26, %v2686_v46 }
 0x6c5   : > { %v2579_v50 = vadd.f32 %v2567_v20, %v2483_v53  ;;  %v2675_v8 = vmul.f32 %v7615_v59, %v2639_v33  ;;  %v2783_v48 = vmul.f32 %v7327_v11, %v2747_v56  ;;  %v2811_v27 = vpop.permute.xlu0 %2810  ;;  %v2919_v22 = vpop.permute.xlu1 %2918  ;;  %v3105_v11 = vadd.f32 %v3093_v25, %v3009_v57 }
 0x6c6   : > { %v2829_v54 = vsel %vm1227_vm10, %v7761_v15, %v2811_v27  ;;  %v2847_v63 = vsel %vm1227_vm10, %v2811_v27, 0.0  ;;  %v2937_v44 = vsel %vm1264_vm11, %v7759_v7, %v2919_v22  ;;  %v2955_v43 = vsel %vm1264_vm11, %v2919_v22, 0.0 }
 0x6c7   : > { %v2687_v42 = vadd.f32 %v2675_v8, %v2579_v50  ;;  %v2854_v51 = vmul.f32 %v6455_v19, %v2829_v54  ;;  %v2855_v61 = vmul.f32 %v6449_v62, %v2847_v63  ;;  %v2962_v59 = vmul.f32 %v6438_v34, %v2937_v44  ;;  %3136 = vrot.lane.b32.xlu0 %v7775_v38, %s10582_s2 }
 0x6c8   : > { %v3200_v15 = vmul.f32 %v7390_v4, %v3164_v45  ;;  %v2963_v49 = vmul.f32 %v6434_v31, %v2955_v43  ;;  %3040 = vrot.lane.b32.xlu1 %v7775_v38, %s10581_s11  ;;  %v3213_v5 = vadd.f32 %v3201_v41, %v3105_v11 }
 0x6c9   : > { %v2795_v7 = vadd.f32 %v2783_v48, %v2687_v42  ;;  %v2890_v58 = vmul.f32 %v7362_v18, %v2854_v51  ;;  %v2891_v21 = vmul.f32 %v7362_v18, %v2855_v61  ;;  %v3027_v60 = vpop.permute.xlu0 %3026  ;;  %v3123_v24 = vpop.permute.xlu1 %3122  ;;  %v2998_v25 = vmul.f32 %v7342_v36, %v2962_v59 }
 0x6ca   : > { %v3212_v23 = vadd.f32 %v3200_v15, %v3104_v29  ;;  %v3045_v13 = vsel %vm1301_vm12, %v7781_v0, %v3027_v60  ;;  %v3063_v30 = vsel %vm1301_vm12, %v3027_v60, 0.0  ;;  %v3141_v4 = vsel %vm1334_vm13, %v7779_v52, %v3123_v24 }
 0x6cb   : > { %v2902_v12 = vadd.f32 %v2890_v58, %v2794_v3  ;;  %v2903_v16 = vadd.f32 %v2891_v21, %v2795_v7  ;;  %v2999_v45 = vmul.f32 %v7342_v36, %v2963_v49  ;;  %2406 = vrot.lane.b32.xlu0 %v7792_v2, %s10573_s3  ;;  %v3094_v18 = vmul.f32 %v7382_v39, %v3045_v13  ;;  %v10709_v21 = vld [vmem:[#allocation11_spill] sm:$0xff] }
 0x6cc   : > { %v3159_v35 = vsel %vm1334_vm13, %v3123_v24, 0.0  ;;  %v3166_v0 = vmul.f32 %v6455_v19, %v3141_v4  ;;  %2514 = vrot.lane.b32.xlu1 %v7792_v2, %s10574_s9  ;;  %v3095_v20 = vmul.f32 %v7382_v39, %v3063_v30  ;;  %v3255_v48 = vadd.f32 %v7376_v1, %v3213_v5  ;;  %v10711_v30 = vld [vmem:[#allocation16_spill] sm:$0xff] }
 0x6cd   : > { %v3010_v52 = vadd.f32 %v2998_v25, %v2902_v12  ;;  %v3011_v53 = vadd.f32 %v2999_v45, %v2903_v16  ;;  %v3167_v33 = vmul.f32 %v6449_v62, %v3159_v35  ;;  %v7880_v36 = vpop.permute.xlu0 %2500  ;;  %v2393_v56 = vpop.permute.xlu1 %2392  ;;  %v3254_v27 = vadd.f32 %v7376_v1, %v3212_v23  ;;  %v10712_v25 = vld [vmem:[#allocation77_spill] sm:$0xff] }
 0x6ce   : > { %v3202_v6 = vmul.f32 %v7364_v9, %v3166_v0  ;;  %v3267_v44 = vmax.f32 %v3255_v48, 0.0  ;;  %v2536_v16 = vsel %vm1120_vm7, 0.0, %v7880_v36  ;;  %v2365_v45 = vmul.f32 %v10711_v30, %v10712_v25 }
 0x6cf   : > { %v3106_v57 = vadd.f32 %v3094_v18, %v3010_v52  ;;  %v3107_v29 = vadd.f32 %v3095_v20, %v3011_v53  ;;  %v3203_v26 = vmul.f32 %v7364_v9, %v3167_v33  ;;  %2610 = vrot.lane.b32.xlu0 %v7792_v2, %s10576_s0  ;;  %v3266_v42 = vmax.f32 %v3254_v27, 0.0  ;;  %v7944_v18 = vld [vmem:[%s10281_s21 + $0x8] sm:$0xff]  ;;  %v7957_v20 = vld [vmem:[%s10281_s21 + $0x10] sm:$0xff] }
 0x6d0   : > { %2718 = vrot.lane.b32.xlu1 %v7792_v2, %s10577_s28 }
 0x6d1   : > { %v3214_v46 = vadd.f32 %v3202_v6, %v3106_v57  ;;  %v7888_v50 = vpop.permute.xlu0 %2704  ;;  %v2597_v39 = vpop.permute.xlu1 %2596  ;;  %v3215_v8 = vadd.f32 %v3203_v26, %v3107_v29  ;;  %v10713_v57 = vld [vmem:[#allocation9_spill] sm:$0xff] }
 0x6d2   : > { %v2568_v29 = vmul.f32 %v10713_v57, %v2536_v16  ;;  %v2740_v6 = vsel %vm1190_vm9, 0.0, %v7888_v50 }
 0x6d3   : > { %2826 = vrot.lane.b32.xlu0 %v7792_v2, %s10578_s29  ;;  %v3257_v9 = vadd.f32 %v7420_v17, %v3215_v8  ;;  %v3256_v22 = vadd.f32 %v7420_v17, %v3214_v46  ;;  %v7969_v46 = vld [vmem:[%s10281_s21 + $0x20] sm:$0xff]  ;;  %v10714_v8 = vld [vmem:[#allocation14_spill] sm:$0xff] }
 0x6d4   : > { %2934 = vrot.lane.b32.xlu1 %v7792_v2, %s10580_s1 }
 0x6d5   : > { %v7898_v54 = vpop.permute.xlu0 %2920  ;;  %v2813_v63 = vpop.permute.xlu1 %2812  ;;  %v3269_v43 = vmax.f32 %v3257_v9, 0.0  ;;  %v3268_v51 = vmax.f32 %v3256_v22, 0.0 }
 0x6d7   : > { %3042 = vrot.lane.b32.xlu0 %v7792_v2, %s10581_s11  ;;  %v5858_v1 = vpack.c.bf16 %v3269_v43, %v3267_v44  ;;  %v5860_v61 = vpack.c.bf16 %v3268_v51, %v3266_v42  ;;  %v2748_v51 = vmul.f32 %v6438_v34, %v2740_v6 }
 0x6d8   : > { %4278 = vperm.xlu1 %6008, %v7183_v37   ;;  %v2428_v37 = vsel %vm1083_vm4, 0.0, %v2393_v56 }
 0x6d9   : > { %v7903_v59 = vpop.permute.xlu0 %3124  ;;  %5859 = vmatprep.subr.bf16.mxu1 %v5858_v1  ;;  %v7905_v17 = vpop.permute.xlu1 %3028 }
 0x6da   : > { %5861 = vmatpush1.bf16.msra.mxu1 %v5860_v61 }
 0x6db   : > { %4274 = vperm.xlu0 %6007, %v7191_v10   ;;  %v2436_v10 = vmul.f32 %v6438_v34, %v2428_v37 }
 0x6dc   : > { %4286 = vperm.xlu1 %6008, %v7197_v32  }
 0x6dd   : > { %v2395_v11 = vpop.permute.xlu0 %2394  ;;  %v2503_v15 = vpop.permute.xlu1 %2502  ;;  %v2472_v60 = vmul.f32 %v10709_v21, %v2436_v10 }
 0x6de   : > { %v2410_v7 = vsel %vm1083_vm4, %v2393_v56, %v2395_v11  ;;  %v2518_v5 = vsel %vm1120_vm7, %v7880_v36, %v2503_v15  ;;  %v7996_v15 = vld [vmem:[%s10281_s21 + $0x30] sm:$0xff] }
 0x6df   : > { %4282 = vperm.xlu0 %6007, %v7205_v14   ;;  %v2437_v58 = vmul.f32 %v6434_v31, %v2410_v7  ;;  %v10708_v14 = vmov 3   ;;  %v2569_v36 = vmul.f32 %v10713_v57, %v2518_v5  ;;  %v8006_v7 = vld [vmem:[%s10281_s21 + $0x28] sm:$0xff]  ;;  %v10719_v5 = vld [vmem:[#allocation52_spill] sm:$0xff] }
 0x6e0   : > { %3138 = vrot.lane.b32.xlu1 %v7792_v2, %s10582_s2 }
 0x6e1   : > { %v2599_v41 = vpop.permute.xlu0 %2598  ;;  %v2707_v49 = vpop.permute.xlu1 %2706  ;;  %v2473_v13 = vmul.f32 %v10709_v21, %v2437_v58 }
 0x6e2   : > { %v2614_v12 = vsel %vm1153_vm5, %v2597_v39, %v2599_v41  ;;  %v2722_v27 = vsel %vm1190_vm9, %v7888_v50, %v2707_v49 }
 0x6e3   : > { %4290 = vperm.xlu0 %6007, %v7217_v55   ;;  %v2632_v55 = vsel %vm1153_vm5, 0.0, %v2597_v39  ;;  %v2485_v33 = vadd.f32 %v2473_v13, %v2365_v45  ;;  %v2641_v56 = vmul.f32 %v6449_v62, %v2614_v12  ;;  %v2749_v61 = vmul.f32 %v6434_v31, %v2722_v27  ;;  %v8020_v12 = vld [vmem:[%s10281_s21 + $0x40] sm:$0xff] }
 0x6e4   : > { %4294 = vperm.xlu1 %6008, %v7211_v47   ;;  %v7928_v47 = vld [vmem:[%s10281_s21] sm:$0xff]  ;;  %v2640_v0 = vmul.f32 %v6455_v19, %v2632_v55 }
 0x6e5   : > { %v2815_v32 = vpop.permute.xlu0 %2814  ;;  %v2923_v3 = vpop.permute.xlu1 %2922  ;;  %v2581_v43 = vadd.f32 %v2569_v36, %v2485_v33  ;;  %v2677_v42 = vmul.f32 %v10714_v8, %v2641_v56 }
 0x6e6   : > { %v2830_v26 = vsel %vm1227_vm10, %v2813_v63, %v2815_v32  ;;  %v2676_v48 = vmul.f32 %v10714_v8, %v2640_v0  ;;  %v7984_v63 = vld [vmem:[%s10281_s21 + $0x18] sm:$0xff]  ;;  %v2848_v50 = vsel %vm1227_vm10, %v2815_v32, 0.0  ;;  %v2938_v58 = vsel %vm1264_vm11, %v7898_v54, %v2923_v3  ;;  %v8046_v8 = vld [vmem:[%s10281_s21 + $0x50] sm:$0xff] }
 0x6e7   : > { %4298 = vperm.xlu0 %6007, %v7226_v40   ;;  %v10710_v40 = vld [vmem:[#allocation70_spill] sm:$0xff]  ;;  %v2856_v1 = vmul.f32 %v6455_v19, %v2830_v26  ;;  %v2689_v10 = vadd.f32 %v2677_v42, %v2581_v43  ;;  %v2857_v32 = vmul.f32 %v6449_v62, %v2848_v50  ;;  %v2964_v54 = vmul.f32 %v6438_v34, %v2938_v58  ;;  %v10718_v0 = vld [vmem:[#allocation83_spill] sm:$0xff] }
 0x6e8   : > { %6009 = vset.pattern.permute.xlu1 %v10708_v14  ;;  %v2364_v4 = vmul.f32 %v10711_v30, %v10710_v40  ;;  %v2956_v40 = vsel %vm1264_vm11, %v2923_v3, 0.0  ;;  %v10717_v30 = vld [vmem:[#allocation6_spill] sm:$0xff]  ;;  %v8033_v3 = vld [vmem:[%s10281_s21 + $0x38] sm:$0xff]  ;;  %v2366_v33 = vmul.f32 %v10719_v5, %v10718_v0 }
 0x6e9   : > { %v7921_v24 = vpop.permute.xlu0 %3030  ;;  %v7923_v23 = vpop.permute.xlu1 %3126  ;;  %4470 = vperm.xlu1 %6009, %v7928_v47   ;;  %v2965_v6 = vmul.f32 %v6434_v31, %v2956_v40  ;;  %v10723_v40 = vld [vmem:[#allocation15_spill] sm:$0xff] }
 0x6ea   : > { %v2484_v35 = vadd.f32 %v2472_v60, %v2364_v4  ;;  %v10716_v60 = vld [vmem:[#allocation18_spill] sm:$0xff]  ;;  %v3046_v42 = vsel %vm1301_vm12, %v7905_v17, %v7921_v24  ;;  %v3160_v0 = vsel %vm1334_vm13, %v7923_v23, 0.0 }
 0x6eb   : > { %6010 = vset.pattern.permute.xlu0 %v10708_v14  ;;  %v10715_v14 = vld [vmem:[#allocation5_spill] sm:$0xff]  ;;  %v2892_v55 = vmul.f32 %v10716_v60, %v2856_v1  ;;  %v2893_v57 = vmul.f32 %v10716_v60, %v2857_v32 }
 0x6ec   : > { %4474 = vperm.xlu0 %6010, %v7944_v18   ;;  %v2580_v39 = vadd.f32 %v2568_v29, %v2484_v35  ;;  %v2784_v21 = vmul.f32 %v10715_v14, %v2748_v51  ;;  %v2785_v13 = vmul.f32 %v10715_v14, %v2749_v61  ;;  %v8060_v61 = vld [vmem:[%s10281_s21 + $0x48] sm:$0xff] }
 0x6ed   : > { %v7950_v52 = vpop.permute.xlu0 %2504  ;;  %v7952_v53 = vpop.permute.xlu1 %2396  ;;  %4478 = vperm.xlu1 %6009, %v7957_v20  }
 0x6ee   : > { %v2429_v9 = vsel %vm1083_vm4, 0.0, %v7952_v53  ;;  %v2688_v41 = vadd.f32 %v2676_v48, %v2580_v39  ;;  %v2797_v56 = vadd.f32 %v2785_v13, %v2689_v10  ;;  %v2537_v36 = vsel %vm1120_vm7, 0.0, %v7950_v52  ;;  %v10720_v48 = vld [vmem:[#allocation90_spill] sm:$0xff]  ;;  %v10722_v10 = vld [vmem:[#allocation67_spill] sm:$0xff] }
 0x6ef   : > { %v2438_v11 = vmul.f32 %v6438_v34, %v2429_v9  ;;  %v2367_v27 = vmul.f32 %v10719_v5, %v10720_v48  ;;  %v10721_v9 = vld [vmem:[#allocation21_spill] sm:$0xff]  ;;  %v2570_v32 = vmul.f32 %v10722_v10, %v2537_v36  ;;  %v3169_v48 = vmul.f32 %v6449_v62, %v3160_v0 }
 0x6f0   : > { %4486 = vperm.xlu0 %6010, %v7969_v46   ;;  %v2796_v16 = vadd.f32 %v2784_v21, %v2688_v41  ;;  %v3000_v43 = vmul.f32 %v10721_v9, %v2964_v54  ;;  %v3064_v41 = vsel %vm1301_vm12, %v7921_v24, 0.0  ;;  %v3001_v58 = vmul.f32 %v10721_v9, %v2965_v6  ;;  %v10726_v9 = vld [vmem:[#allocation24_spill] sm:$0xff] }
 0x6f1   : > { %v7977_v22 = vpop.permute.xlu0 %2708  ;;  %v7979_v44 = vpop.permute.xlu1 %2600  ;;  %4482 = vperm.xlu1 %6009, %v7984_v63   ;;  %v2474_v4 = vmul.f32 %v10717_v30, %v2438_v11  ;;  %v2905_v11 = vadd.f32 %v2893_v57, %v2797_v56  ;;  %v3142_v21 = vsel %vm1334_vm13, %v7903_v59, %v7923_v23  ;;  %v8087_v56 = vld [vmem:[%s10281_s21 + $0x58] sm:$0xff] }
 0x6f2   : > { %v2633_v25 = vsel %vm1153_vm5, 0.0, %v7979_v44  ;;  %v2904_v29 = vadd.f32 %v2892_v55, %v2796_v16  ;;  %v2741_v51 = vsel %vm1190_vm9, 0.0, %v7977_v22  ;;  %v10724_v16 = vmov 5  }
 0x6f3   : > { %v2486_v26 = vadd.f32 %v2474_v4, %v2366_v33  ;;  %v2642_v39 = vmul.f32 %v6455_v19, %v2633_v25  ;;  %v2750_v55 = vmul.f32 %v6438_v34, %v2741_v51  ;;  %v3168_v57 = vmul.f32 %v6455_v19, %v3142_v21 }
 0x6f4   : > { %4494 = vperm.xlu0 %6010, %v7996_v15   ;;  %v3012_v14 = vadd.f32 %v3000_v43, %v2904_v29 }
 0x6f5   : > { %v7999_v49 = vpop.permute.xlu0 %2924  ;;  %v8001_v37 = vpop.permute.xlu1 %2816  ;;  %4490 = vperm.xlu1 %6009, %v8006_v7   ;;  %v2582_v13 = vadd.f32 %v2570_v32, %v2486_v26  ;;  %v2678_v4 = vmul.f32 %v10723_v40, %v2642_v39  ;;  %v2786_v43 = vmul.f32 %v10726_v9, %v2750_v55 }
 0x6f8   : > { %4502 = vperm.xlu0 %6010, %v8020_v12  }
 0x6f9   : > { %v8026_v45 = vpop.permute.xlu0 %3128  ;;  %v8028_v35 = vpop.permute.xlu1 %3032  ;;  %4498 = vperm.xlu1 %6009, %v8033_v3  }
 0x6fc   : > { %4510 = vperm.xlu0 %6010, %v8046_v8  }
 0x6fd   : > { %v2399_v50 = vpop.permute.xlu0 %2398  ;;  %v2507_v1 = vpop.permute.xlu1 %2506  ;;  %4506 = vperm.xlu1 %6009, %v8060_v61  }
 0x6fe   : > { %v2411_v17 = vsel %vm1083_vm4, %v7952_v53, %v2399_v50  ;;  %v2519_v24 = vsel %vm1120_vm7, %v7950_v52, %v2507_v1  ;;  %v10725_v53 = vld [vmem:[#allocation23_spill] sm:$0xff]  ;;  %v3013_v52 = vadd.f32 %v3001_v58, %v2905_v11 }
 0x6ff   : > { %v2439_v60 = vmul.f32 %v6434_v31, %v2411_v17  ;;  %v3096_v54 = vmul.f32 %v10725_v53, %v3046_v42  ;;  %v3097_v25 = vmul.f32 %v10725_v53, %v3064_v41  ;;  %v2571_v6 = vmul.f32 %v10722_v10, %v2519_v24 }
 0x700   : > { %6011 = vset.pattern.permute.xlu0 %v10724_v16  ;;  %v2690_v42 = vadd.f32 %v2678_v4, %v2582_v13  ;;  %v10728_v4 = vld [vmem:[#allocation19_spill] sm:$0xff] }
 0x701   : > { %v2475_v59 = vmul.f32 %v10717_v30, %v2439_v60  ;;  %v2603_v5 = vpop.permute.xlu0 %2602  ;;  %v2711_v33 = vpop.permute.xlu1 %2710  ;;  %4686 = vperm.xlu0 %6011, %v7928_v47   ;;  %4514 = vperm.xlu1 %6009, %v8087_v56   ;;  %v3108_v39 = vadd.f32 %v3096_v54, %v3012_v14  ;;  %v3109_v21 = vadd.f32 %v3097_v25, %v3013_v52  ;;  %v10727_v60 = vld [vmem:[#allocation29_spill] sm:$0xff] }
 0x702   : > { %v2615_v29 = vsel %vm1153_vm5, %v7979_v44, %v2603_v5  ;;  %v2723_v23 = vsel %vm1190_vm9, %v7977_v22, %v2711_v33  ;;  %v3204_v55 = vmul.f32 %v10727_v60, %v3168_v57  ;;  %v10729_v57 = vld [vmem:[#allocation31_spill] sm:$0xff] }
 0x703   : > { %v2487_v30 = vadd.f32 %v2475_v59, %v2367_v27  ;;  %v2643_v36 = vmul.f32 %v6449_v62, %v2615_v29  ;;  %v2751_v26 = vmul.f32 %v6434_v31, %v2723_v23 }
 0x704   : > { %v3216_v0 = vadd.f32 %v3204_v55, %v3108_v39 }
 0x705   : > { %v2583_v51 = vadd.f32 %v2571_v6, %v2487_v30  ;;  %v2679_v50 = vmul.f32 %v10723_v40, %v2643_v36  ;;  %v2787_v44 = vmul.f32 %v10726_v9, %v2751_v26  ;;  %v2819_v1 = vpop.permute.xlu0 %2818  ;;  %v2927_v22 = vpop.permute.xlu1 %2926  ;;  %4698 = vperm.xlu0 %6011, %v7984_v63   ;;  %6012 = vset.pattern.permute.xlu1 %v10724_v16  ;;  %v10730_v30 = vld [vmem:[#allocation25_spill] sm:$0xff] }
 0x706   : > { %v2831_v27 = vsel %vm1227_vm10, %v8001_v37, %v2819_v1  ;;  %v2849_v11 = vsel %vm1227_vm10, %v2819_v1, 0.0  ;;  %v2939_v41 = vsel %vm1264_vm11, %v7999_v49, %v2927_v22  ;;  %v2957_v10 = vsel %vm1264_vm11, %v2927_v22, 0.0  ;;  %4690 = vperm.xlu1 %6012, %v7944_v18  }
 0x707   : > { %v2691_v32 = vadd.f32 %v2679_v50, %v2583_v51  ;;  %v2858_v17 = vmul.f32 %v6455_v19, %v2831_v27  ;;  %v2859_v58 = vmul.f32 %v6449_v62, %v2849_v11  ;;  %v2966_v14 = vmul.f32 %v6438_v34, %v2939_v41 }
 0x708   : > { %v3205_v37 = vmul.f32 %v10727_v60, %v3169_v48  ;;  %v2967_v13 = vmul.f32 %v6434_v31, %v2957_v10  ;;  %v2798_v49 = vadd.f32 %v2786_v43, %v2690_v42 }
 0x709   : > { %v2799_v40 = vadd.f32 %v2787_v44, %v2691_v32  ;;  %v2894_v24 = vmul.f32 %v10728_v4, %v2858_v17  ;;  %v2895_v16 = vmul.f32 %v10728_v4, %v2859_v58  ;;  %v3035_v53 = vpop.permute.xlu0 %3034  ;;  %v3131_v54 = vpop.permute.xlu1 %3130  ;;  %4706 = vperm.xlu0 %6011, %v8006_v7   ;;  %v3002_v29 = vmul.f32 %v10729_v57, %v2966_v14  ;;  %v10731_v44 = vld [vmem:[#allocation38_spill] sm:$0xff]  ;;  %v10732_v32 = vld [vmem:[#allocation33_spill] sm:$0xff] }
 0x70a   : > { %v3047_v25 = vsel %vm1301_vm12, %v8028_v35, %v3035_v53  ;;  %v3065_v59 = vsel %vm1301_vm12, %v3035_v53, 0.0  ;;  %v3143_v5 = vsel %vm1334_vm13, %v8026_v45, %v3131_v54  ;;  %4694 = vperm.xlu1 %6012, %v7957_v20   ;;  %v3003_v23 = vmul.f32 %v10729_v57, %v2967_v13  ;;  %v10733_v14 = vld [vmem:[#allocation34_spill] sm:$0xff] }
 0x70b   : > { %v2906_v33 = vadd.f32 %v2894_v24, %v2798_v49  ;;  %v2907_v52 = vadd.f32 %v2895_v16, %v2799_v40  ;;  %v3098_v6 = vmul.f32 %v10730_v30, %v3047_v25  ;;  %v3161_v36 = vsel %vm1334_vm13, %v3131_v54, 0.0 }
 0x70c   : > { %v3170_v26 = vmul.f32 %v6455_v19, %v3143_v5  ;;  %v3217_v35 = vadd.f32 %v3205_v37, %v3109_v21  ;;  %v3099_v9 = vmul.f32 %v10730_v30, %v3065_v59  ;;  %v3171_v45 = vmul.f32 %v6449_v62, %v3161_v36 }
 0x70d   : > { %v3014_v39 = vadd.f32 %v3002_v29, %v2906_v33  ;;  %v3015_v48 = vadd.f32 %v3003_v23, %v2907_v52  ;;  %v8133_v43 = vpop.permute.xlu0 %2508  ;;  %v8135_v42 = vpop.permute.xlu1 %2400  ;;  %4714 = vperm.xlu0 %6011, %v8033_v3   ;;  %v3258_v58 = vadd.f32 %v10732_v32, %v3216_v0  ;;  %v10734_v54 = vmov 6  }
 0x70e   : > { %4702 = vperm.xlu1 %6012, %v7969_v46   ;;  %v3206_v1 = vmul.f32 %v10731_v44, %v3170_v26  ;;  %v3207_v22 = vmul.f32 %v10731_v44, %v3171_v45  ;;  %v3259_v17 = vadd.f32 %v10732_v32, %v3217_v35  ;;  %v10735_v52 = vmov 7  }
 0x70f   : > { %v3110_v51 = vadd.f32 %v3098_v6, %v3014_v39  ;;  %v3111_v50 = vadd.f32 %v3099_v9, %v3015_v48  ;;  %v3270_v49 = vmax.f32 %v3258_v58, 0.0  ;;  %v10736_v35 = vmov 8  }
 0x710   : > { %v3271_v13 = vmax.f32 %v3259_v17, 0.0 }
 0x711   : > { %v3218_v27 = vadd.f32 %v3206_v1, %v3110_v51  ;;  %v8141_v11 = vpop.permute.xlu0 %2712  ;;  %v8143_v41 = vpop.permute.xlu1 %2604  ;;  %v3219_v10 = vadd.f32 %v3207_v22, %v3111_v50  ;;  %4722 = vperm.xlu0 %6011, %v8060_v61   ;;  %v2430_v50 = vsel %vm1083_vm4, 0.0, %v8135_v42  ;;  %v10737_v22 = vld [vmem:[#allocation46_spill] sm:$0xff] }
 0x712   : > { %4710 = vperm.xlu1 %6012, %v7996_v15   ;;  %v2440_v44 = vmul.f32 %v6438_v34, %v2430_v50 }
 0x713   : > { %v3261_v21 = vadd.f32 %v10733_v14, %v3219_v10  ;;  %v3260_v60 = vadd.f32 %v10733_v14, %v3218_v27 }
 0x714   : > { %v2476_v14 = vmul.f32 %v10737_v22, %v2440_v44 }
 0x715   : > { %v8151_v55 = vpop.permute.xlu0 %2928  ;;  %v8153_v37 = vpop.permute.xlu1 %2820  ;;  %v3273_v40 = vmax.f32 %v3261_v21, 0.0  ;;  %v3272_v4 = vmax.f32 %v3260_v60, 0.0  ;;  %4730 = vperm.xlu0 %6011, %v8087_v56   ;;  %v2634_v60 = vsel %vm1153_vm5, 0.0, %v8143_v41 }
 0x716   : > { %4718 = vperm.xlu1 %6012, %v8020_v12  }
 0x717   : > { %v5862_v24 = vpack.c.bf16 %v3273_v40, %v3271_v13  ;;  %v5864_v16 = vpack.c.bf16 %v3272_v4, %v3270_v49  ;;  %v10739_v4 = vld [vmem:[#allocation91_spill] sm:$0xff] }
 0x719   : > { %v8157_v53 = vpop.permute.xlu0 %3132  ;;  %5863 = vmatprep.subr.bf16.mxu1 %v5862_v24  ;;  %6013 = vset.pattern.permute.xlu0 %v10734_v54  ;;  %v8160_v0 = vpop.permute.xlu1 %3036 }
 0x71a   : > { %5865 = vmatpush1.bf16.msra.mxu1 %v5864_v16  ;;  %4902 = vperm.xlu0 %6013, %v7928_v47   ;;  %v2538_v16 = vsel %vm1120_vm7, 0.0, %v8133_v43 }
 0x71b   : > { %4726 = vperm.xlu1 %6012, %v8046_v8  }
 0x71d   : > { %v2403_v25 = vpop.permute.xlu0 %2402  ;;  %v2511_v59 = vpop.permute.xlu1 %2510 }
 0x71e   : > { %4926 = vperm.xlu0 %6013, %v7996_v15   ;;  %v2412_v9 = vsel %vm1083_vm4, %v8135_v42, %v2403_v25  ;;  %v10738_v42 = vld [vmem:[#allocation7_spill] sm:$0xff]  ;;  %v2520_v21 = vsel %vm1120_vm7, %v8133_v43, %v2511_v59  ;;  %v2742_v25 = vsel %vm1190_vm9, 0.0, %v8141_v11  ;;  %v10740_v59 = vld [vmem:[#allocation12_spill] sm:$0xff] }
 0x71f   : > { %6014 = vset.pattern.permute.xlu1 %v10734_v54  ;;  %v2369_v17 = vmul.f32 %v10738_v42, %v7705_v28  ;;  %v2368_v28 = vmul.f32 %v10738_v42, %v10739_v4  ;;  %v2572_v42 = vmul.f32 %v10740_v59, %v2538_v16 }
 0x720   : > { %4906 = vperm.xlu1 %6014, %v7944_v18  }
 0x721   : > { %v2607_v5 = vpop.permute.xlu0 %2606  ;;  %v2715_v33 = vpop.permute.xlu1 %2714 }
 0x722   : > { %4938 = vperm.xlu0 %6013, %v8060_v61   ;;  %v2616_v10 = vsel %vm1153_vm5, %v8143_v41, %v2607_v5  ;;  %v2573_v41 = vmul.f32 %v10740_v59, %v2520_v21  ;;  %v2488_v5 = vadd.f32 %v2476_v14, %v2368_v28 }
 0x723   : > { %v2645_v40 = vmul.f32 %v6449_v62, %v2616_v10 }
 0x724   : > { %6015 = vset.pattern.permute.xlu1 %v10735_v52 }
 0x725   : > { %v8169_v57 = vpop.permute.xlu0 %2822  ;;  %5094 = vperm.xlu1 %6015, %v7928_v47   ;;  %v8172_v29 = vpop.permute.xlu1 %2930 }
 0x726   : > { %4946 = vperm.xlu0 %6013, %v8087_v56   ;;  %v2832_v14 = vsel %vm1227_vm10, %v8153_v37, %v8169_v57  ;;  %v2940_v16 = vsel %vm1264_vm11, %v8151_v55, %v8172_v29  ;;  %v10746_v55 = vld [vmem:[#allocation69_spill] sm:$0xff] }
 0x729   : > { %v8175_v23 = vpop.permute.xlu0 %3038  ;;  %6016 = vset.pattern.permute.xlu1 %v10734_v54  ;;  %v8178_v30 = vpop.permute.xlu1 %3134 }
 0x72a   : > { %6032 = vset.pattern.permute.xlu0 %v10735_v52  ;;  %4910 = vperm.xlu1 %6016, %v7957_v20  }
 0x72b   : > { %5098 = vperm.xlu0 %6032, %v7944_v18  }
 0x72d   : > { %v8183_v6 = vpop.permute.xlu0 %2512  ;;  %v2405_v36 = vpop.permute.xlu1 %2404 }
 0x72e   : > { %4914 = vperm.xlu1 %6016, %v7984_v63   ;;  %v2431_v49 = vsel %vm1083_vm4, 0.0, %v2405_v36 }
 0x72f   : > { %5106 = vperm.xlu0 %6032, %v7984_v63   ;;  %v2442_v50 = vmul.f32 %v6438_v34, %v2431_v49 }
 0x731   : > { %v8187_v26 = vpop.permute.xlu0 %2716  ;;  %v2609_v39 = vpop.permute.xlu1 %2608 }
 0x732   : > { %6017 = vset.pattern.permute.xlu1 %v10736_v35  ;;  %v2635_v28 = vsel %vm1153_vm5, 0.0, %v2609_v39 }
 0x733   : > { %5110 = vperm.xlu0 %6032, %v7969_v46   ;;  %5314 = vperm.xlu1 %6017, %v7944_v18   ;;  %v2441_v18 = vmul.f32 %v6434_v31, %v2412_v9  ;;  %v2724_v9 = vsel %vm1190_vm9, %v8141_v11, %v2715_v33  ;;  %v2752_v11 = vmul.f32 %v6438_v34, %v2742_v25 }
 0x734   : > { %v2753_v33 = vmul.f32 %v6434_v31, %v2724_v9 }
 0x735   : > { %v8192_v48 = vpop.permute.xlu0 %2932  ;;  %v8199_v45 = vpop.permute.xlu1 %2824  ;;  %v2477_v27 = vmul.f32 %v10737_v22, %v2441_v18 }
 0x737   : > { %5118 = vperm.xlu0 %6032, %v7996_v15   ;;  %6018 = vset.pattern.permute.xlu1 %v10735_v52  ;;  %v2489_v13 = vadd.f32 %v2477_v27, %v2369_v17  ;;  %v10742_v27 = vld [vmem:[#allocation53_spill] sm:$0xff]  ;;  %v10743_v17 = vld [vmem:[#allocation8_spill] sm:$0xff] }
 0x738   : > { %5102 = vperm.xlu1 %6018, %v7957_v20   ;;  %v2371_v10 = vmul.f32 %v10742_v27, %v7792_v2  ;;  %v2850_v2 = vsel %vm1227_vm10, %v8169_v57, 0.0  ;;  %v2370_v49 = vmul.f32 %v10742_v27, %v7775_v38  ;;  %v2968_v27 = vmul.f32 %v6438_v34, %v2940_v16 }
 0x739   : > { %v8201_v51 = vpop.permute.xlu0 %3136  ;;  %v2585_v43 = vadd.f32 %v2573_v41, %v2489_v13  ;;  %v10745_v41 = vld [vmem:[#allocation4_spill] sm:$0xff] }
 0x73a   : > { %v8213_v32 = vpop.permute.xlu1 %3040  ;;  %v2788_v38 = vmul.f32 %v10745_v41, %v2752_v11  ;;  %v10748_v11 = vld [vmem:[#allocation17_spill] sm:$0xff] }
 0x73b   : > { %5126 = vperm.xlu0 %6032, %v8020_v12  }
 0x73c   : > { %6019 = vset.pattern.permute.xlu1 %v10734_v54 }
 0x73d   : > { %v2407_v1 = vpop.permute.xlu0 %2406  ;;  %4918 = vperm.xlu1 %6019, %v7969_v46  }
 0x73e   : > { %v2413_v58 = vsel %vm1083_vm4, %v2405_v36, %v2407_v1  ;;  %v2644_v36 = vmul.f32 %v6455_v19, %v2634_v60  ;;  %v2515_v18 = vpop.permute.xlu1 %2514  ;;  %v10741_v1 = vld [vmem:[#allocation84_spill] sm:$0xff]  ;;  %v2584_v60 = vadd.f32 %v2572_v42, %v2488_v5  ;;  %v2789_v5 = vmul.f32 %v10745_v41, %v2753_v33 }
 0x73f   : > { %5134 = vperm.xlu0 %6032, %v8046_v8   ;;  %v2443_v24 = vmul.f32 %v6434_v31, %v2413_v58  ;;  %v2681_v22 = vmul.f32 %v10741_v1, %v2645_v40  ;;  %v2478_v40 = vmul.f32 %v10743_v17, %v2442_v50  ;;  %v2521_v37 = vsel %vm1120_vm7, %v8183_v6, %v2515_v18  ;;  %v10747_v42 = vld [vmem:[#allocation28_spill] sm:$0xff] }
 0x740   : > { %v2680_v13 = vmul.f32 %v10741_v1, %v2644_v36  ;;  %v2539_v36 = vsel %vm1120_vm7, 0.0, %v8183_v6  ;;  %v2646_v18 = vmul.f32 %v6455_v19, %v2635_v28 }
 0x741   : > { %4922 = vperm.xlu1 %6019, %v8006_v7   ;;  %v2611_v44 = vpop.permute.xlu0 %2610  ;;  %v2479_v58 = vmul.f32 %v10743_v17, %v2443_v24  ;;  %v2693_v4 = vadd.f32 %v2681_v22, %v2585_v43  ;;  %v10744_v24 = vmov 0   ;;  %v2490_v50 = vadd.f32 %v2478_v40, %v2370_v49 }
 0x742   : > { %v2617_v21 = vsel %vm1153_vm5, %v2609_v39, %v2611_v44  ;;  %v2719_v59 = vpop.permute.xlu1 %2718  ;;  %v2861_v39 = vmul.f32 %v6449_v62, %v2850_v2  ;;  %v2692_v9 = vadd.f32 %v2680_v13, %v2584_v60  ;;  %v2575_v44 = vmul.f32 %v10746_v55, %v2521_v37 }
 0x743   : > { %6035 = vset.pattern.permute.xlu0 %v10736_v35  ;;  %v2491_v57 = vadd.f32 %v2479_v58, %v2371_v10  ;;  %v2647_v25 = vmul.f32 %v6449_v62, %v2617_v21  ;;  %v2801_v1 = vadd.f32 %v2789_v5, %v2693_v4  ;;  %v2958_v22 = vsel %vm1264_vm11, %v8172_v29, 0.0 }
 0x744   : > { %5310 = vperm.xlu0 %6035, %v7928_v47   ;;  %v2725_v10 = vsel %vm1190_vm9, %v8187_v26, %v2719_v59  ;;  %v2574_v17 = vmul.f32 %v10746_v55, %v2539_v36  ;;  %v2743_v21 = vsel %vm1190_vm9, 0.0, %v8187_v26  ;;  %v2969_v13 = vmul.f32 %v6434_v31, %v2958_v22 }
 0x745   : > { %6020 = vset.pattern.permute.xlu1 %v10736_v35  ;;  %v2827_v43 = vpop.permute.xlu0 %2826  ;;  %v2587_v58 = vadd.f32 %v2575_v44, %v2491_v57  ;;  %v2683_v33 = vmul.f32 %v10748_v11, %v2647_v25  ;;  %v2682_v40 = vmul.f32 %v10748_v11, %v2646_v18  ;;  %v2755_v49 = vmul.f32 %v6434_v31, %v2725_v10  ;;  %v10749_v25 = vld [vmem:[#allocation22_spill] sm:$0xff] }
 0x746   : > { %5322 = vperm.xlu1 %6020, %v7984_v63   ;;  %v2833_v29 = vsel %vm1227_vm10, %v8199_v45, %v2827_v43  ;;  %v2851_v60 = vsel %vm1227_vm10, %v2827_v43, 0.0  ;;  %v2586_v2 = vadd.f32 %v2574_v17, %v2490_v50  ;;  %v2800_v4 = vadd.f32 %v2788_v38, %v2692_v9  ;;  %v2935_v45 = vpop.permute.xlu1 %2934  ;;  %v10751_v43 = vld [vmem:[#allocation20_spill] sm:$0xff] }
 0x747   : > { %v2754_v28 = vmul.f32 %v6438_v34, %v2743_v21  ;;  %v2695_v37 = vadd.f32 %v2683_v33, %v2587_v58  ;;  %v2862_v26 = vmul.f32 %v6455_v19, %v2833_v29  ;;  %v3048_v59 = vsel %vm1301_vm12, %v8160_v0, %v8175_v23  ;;  %v868_v33 = vld [vmem:[%s10278_s18] sm:$0xff] }
 0x748   : > { %5318 = vperm.xlu0 %6035, %v7957_v20   ;;  %v2860_v20 = vmul.f32 %v6455_v19, %v2832_v14  ;;  %v2897_v14 = vmul.f32 %v10747_v42, %v2861_v39  ;;  %v3005_v41 = vmul.f32 %v10749_v25, %v2969_v13  ;;  %v3066_v38 = vsel %vm1301_vm12, %v8175_v23, 0.0  ;;  %v10750_v39 = vld [vmem:[#allocation26_spill] sm:$0xff] }
 0x749   : > { %v2694_v5 = vadd.f32 %v2682_v40, %v2586_v2  ;;  %v2791_v36 = vmul.f32 %v10750_v39, %v2755_v49  ;;  %v3144_v9 = vsel %vm1334_vm13, %v8157_v53, %v8178_v30  ;;  %v3162_v50 = vsel %vm1334_vm13, %v8178_v30, 0.0  ;;  %v3043_v29 = vpop.permute.xlu0 %3042  ;;  %v10755_v40 = vld [vmem:[#allocation32_spill] sm:$0xff] }
 0x74a   : > { %6021 = vset.pattern.permute.xlu1 %v10744_v24  ;;  %v2896_v6 = vmul.f32 %v10747_v42, %v2860_v20  ;;  %v2863_v20 = vmul.f32 %v6449_v62, %v2851_v60  ;;  %v2909_v57 = vadd.f32 %v2897_v14, %v2801_v1  ;;  %v2941_v0 = vsel %vm1264_vm11, %v8192_v48, %v2935_v45  ;;  %v10753_v42 = vld [vmem:[#allocation35_spill] sm:$0xff] }
 0x74b   : > { %v2959_v18 = vsel %vm1264_vm11, %v2935_v45, 0.0  ;;  %v2790_v55 = vmul.f32 %v10750_v39, %v2754_v28  ;;  %v2803_v44 = vadd.f32 %v2791_v36, %v2695_v37  ;;  %v2898_v23 = vmul.f32 %v10751_v43, %v2862_v26  ;;  %v10756_v28 = vld [vmem:[#allocation30_spill] sm:$0xff]  ;;  %v10757_v39 = vld [vmem:[#allocation27_spill] sm:$0xff] }
 0x74c   : > { %5330 = vperm.xlu0 %6035, %v8006_v7   ;;  %v2908_v16 = vadd.f32 %v2896_v6, %v2800_v4  ;;  %v2899_v1 = vmul.f32 %v10751_v43, %v2863_v20  ;;  %v3017_v10 = vadd.f32 %v3005_v41, %v2909_v57  ;;  %v2970_v30 = vmul.f32 %v6438_v34, %v2941_v0  ;;  %v884_v0 = vld [vmem:[%s10280_s20 + $0x18] sm:$0xff] }
 0x74d   : > { %v2802_v53 = vadd.f32 %v2790_v55, %v2694_v5  ;;  %v2971_v48 = vmul.f32 %v6434_v31, %v2959_v18  ;;  %v3100_v6 = vmul.f32 %v10753_v42, %v3048_v59  ;;  %v3101_v17 = vmul.f32 %v10753_v42, %v3066_v38 }
 0x74e   : > { %v3172_v58 = vmul.f32 %v6455_v19, %v3144_v9  ;;  %v3173_v11 = vmul.f32 %v6449_v62, %v3162_v50  ;;  %v2911_v21 = vadd.f32 %v2899_v1, %v2803_v44  ;;  %v3006_v49 = vmul.f32 %v10755_v40, %v2970_v30  ;;  %v10758_v44 = vld [vmem:[#allocation40_spill] sm:$0xff]  ;;  %v886_v30 = vld [vmem:[%s10280_s20 + $0x28] sm:$0xff] }
 0x74f   : > { %v2910_v14 = vadd.f32 %v2898_v23, %v2802_v53  ;;  %v3113_v2 = vadd.f32 %v3101_v17, %v3017_v10  ;;  %v3007_v4 = vmul.f32 %v10755_v40, %v2971_v48  ;;  %v3049_v20 = vsel %vm1301_vm12, %v8213_v32, %v3043_v29  ;;  %v10760_v48 = vld [vmem:[#allocation36_spill] sm:$0xff]  ;;  %v892_v40 = vld [vmem:[%s10280_s20 + $0x58] sm:$0xff] }
 0x750   : > { %5334 = vperm.xlu0 %6035, %v7996_v15   ;;  %v3004_v15 = vmul.f32 %v10749_v25, %v2968_v27  ;;  %v3208_v37 = vmul.f32 %v10756_v28, %v3172_v58  ;;  %v3209_v26 = vmul.f32 %v10756_v28, %v3173_v11  ;;  %v3067_v45 = vsel %vm1301_vm12, %v3043_v29, 0.0  ;;  %v906_v28 = vld [vmem:[%s10282_s22 + $0x8] sm:$0xff] }
 0x751   : > { %v3018_v57 = vadd.f32 %v3006_v49, %v2910_v14  ;;  %v3019_v25 = vadd.f32 %v3007_v4, %v2911_v21  ;;  %v3102_v36 = vmul.f32 %v10757_v39, %v3049_v20  ;;  %v3103_v32 = vmul.f32 %v10757_v39, %v3067_v45  ;;  %v888_v14 = vld [vmem:[%s10280_s20 + $0x38] sm:$0xff]  ;;  %v915_v20 = vld [vmem:[%s10282_s22 + $0x50] sm:$0xff] }
 0x752   : > { %v3016_v27 = vadd.f32 %v3004_v15, %v2908_v16  ;;  %v882_v16 = vld [vmem:[%s10280_s20 + $0x8] sm:$0xff]  ;;  %v3221_v5 = vadd.f32 %v3209_v26, %v3113_v2  ;;  %v10761_v49 = vmov 0.0  }
 0x753   : > { %v3114_v18 = vadd.f32 %v3102_v36, %v3018_v57  ;;  %v3115_v55 = vadd.f32 %v3103_v32, %v3019_v25  ;;  %v890_v2 = vld [vmem:[%s10280_s20 + $0x48] sm:$0xff] }
 0x754   : > { %5342 = vperm.xlu0 %6035, %v8020_v12   ;;  %v3112_v13 = vadd.f32 %v3100_v6, %v3016_v27  ;;  %v10759_v27 = vld [vmem:[#allocation49_spill] sm:$0xff] }
 0x755   : > { %v3263_v10 = vadd.f32 %v10759_v27, %v3221_v5 }
 0x756   : > { %v3220_v59 = vadd.f32 %v3208_v37, %v3112_v13  ;;  %v867_v13 = vld [vmem:[%s10277_s17] sm:$0xff] }
 0x757   : > { %v8319_v22 = vpop.permute.xlu1 %4278  ;;  %v3275_v17 = vmax.f32 %v3263_v10, 0.0 }
 0x758   : > { %10752 = vst [vmem:[#allocation11_spill] sm:$0xff] %v8319_v22  ;;  %5354 = vperm.xlu0 %6035, %v8087_v56   ;;  %v3262_v53 = vadd.f32 %v10759_v27, %v3220_v59 }
 0x75a   : > { %v3274_v11 = vmax.f32 %v3262_v53, 0.0  ;;  %v8381_v4 = vpop.permute.xlu0 %4274 }
 0x75b   : > { %v8331_v60 = vpop.permute.xlu1 %4286  ;;  %10762 = vst [vmem:[#allocation16_spill] sm:$0xff] %v8381_v4 }
 0x75c   : > { %10754 = vst [vmem:[#allocation70_spill] sm:$0xff] %v8331_v60  ;;  %6038 = vset.pattern.permute.xlu0 %v10744_v24 }
 0x75d   : > { %3280 = vperm.xlu0 %6038, %v868_v33  }
 0x75e   : > { %v8387_v37 = vpop.permute.xlu0 %4282 }
 0x75f   : > { %v3139_v15 = vpop.permute.xlu1 %3138  ;;  %10763 = vst [vmem:[#allocation77_spill] sm:$0xff] %v8387_v37 }
 0x760   : > { %v3145_v41 = vsel %vm1334_vm13, %v8201_v51, %v3139_v15  ;;  %v3163_v38 = vsel %vm1334_vm13, %v3139_v15, 0.0 }
 0x761   : > { %v3174_v9 = vmul.f32 %v6455_v19, %v3145_v41  ;;  %v3175_v50 = vmul.f32 %v6449_v62, %v3163_v38  ;;  %3367 = vperm.xlu0 %6038, %v882_v16  }
 0x762   : > { %v8395_v26 = vpop.permute.xlu0 %4290 }
 0x763   : > { %v3210_v51 = vmul.f32 %v10758_v44, %v3174_v9  ;;  %v3211_v43 = vmul.f32 %v10758_v44, %v3175_v50  ;;  %10764 = vst [vmem:[#allocation9_spill] sm:$0xff] %v8395_v26  ;;  %v905_v44 = vld [vmem:[%s10282_s22] sm:$0xff] }
 0x764   : > { %5407 = vperm.xlu1 %6021, %v905_v44   ;;  %v874_v44 = vld [vmem:[%s10279_s19 + $0x28] sm:$0xff] }
 0x765   : > { %v3222_v23 = vadd.f32 %v3210_v51, %v3114_v18  ;;  %v3223_v1 = vadd.f32 %v3211_v43, %v3115_v55  ;;  %3377 = vperm.xlu0 %6038, %v884_v0  }
 0x766   : > { %v8400_v45 = vpop.permute.xlu0 %4298 }
 0x767   : > { %v3265_v42 = vadd.f32 %v10760_v48, %v3223_v1  ;;  %v3264_v6 = vadd.f32 %v10760_v48, %v3222_v23  ;;  %10765 = vst [vmem:[#allocation14_spill] sm:$0xff] %v8400_v45  ;;  %v907_v1 = vld [vmem:[%s10282_s22 + $0x10] sm:$0xff] }
 0x768   : > { %6022 = vset.pattern.permute.xlu1 %v10735_v52 }
 0x769   : > { %v3277_v58 = vmax.f32 %v3265_v42, 0.0  ;;  %v3276_v33 = vmax.f32 %v3264_v6, 0.0  ;;  %3387 = vperm.xlu0 %6038, %v886_v30   ;;  %5114 = vperm.xlu1 %6022, %v8006_v7   ;;  %v909_v30 = vld [vmem:[%s10282_s22 + $0x20] sm:$0xff]  ;;  %v911_v42 = vld [vmem:[%s10282_s22 + $0x30] sm:$0xff] }
 0x76b   : > { %v5866_v21 = vpack.c.bf16 %v3277_v58, %v3275_v17  ;;  %v5868_v29 = vpack.c.bf16 %v3276_v33, %v3274_v11  ;;  %v8402_v16 = vpop.permute.xlu0 %4474 }
 0x76d   : > { %5867 = vmatprep.subr.bf16.mxu1 %v5866_v21  ;;  %3397 = vperm.xlu0 %6038, %v888_v14   ;;  %v930_v21 = vld [vmem:[%s6251_s30 + $0x8] sm:$0xff] }
 0x76e   : > { %5869 = vmatpush1.bf16.msra.mxu1 %v5868_v29  ;;  %6023 = vset.pattern.permute.xlu1 %v10734_v54  ;;  %v929_v29 = vld [vmem:[%s6251_s30] sm:$0xff] }
 0x76f   : > { %v8404_v57 = vpop.permute.xlu0 %4486  ;;  %4930 = vperm.xlu1 %6023, %v8033_v3  }
 0x770   : > { %10766 = vst [vmem:[#allocation5_spill] sm:$0xff] %v8404_v57 }
 0x771   : > { %5826 = vmatmul.mubr.msk.f32.vlgmr.msra.gmra.mrb[6].mxu1 %vm3283_vm8, %v867_v13  ;;  %3407 = vperm.xlu0 %6038, %v890_v2   ;;  %v10789_v13 = vld [vmem:[#allocation10_spill] sm:$0xff] }
 0x772   : > { %3520 = vmatprep.mubr.f32.mxu1 %v10761_v49 }
 0x773   : > { %v8406_v25 = vpop.permute.xlu0 %4494  ;;  %6024 = vset.pattern.permute.xlu1 %v10736_v35 }
 0x774   : > { %10767 = vst [vmem:[#allocation18_spill] sm:$0xff] %v8406_v25  ;;  %5326 = vperm.xlu1 %6024, %v7969_v46  }
 0x775   : > { %3417 = vperm.xlu0 %6038, %v892_v40  }
 0x777   : > { %v8408_v15 = vpop.permute.xlu0 %4502 }
 0x778   : > { %10768 = vst [vmem:[#allocation6_spill] sm:$0xff] %v8408_v15  ;;  %6025 = vset.pattern.permute.xlu1 %v10744_v24 }
 0x779   : > { %3846 = vperm.xlu0 %6038, %v7928_v47   ;;  %v910_v47 = vld [vmem:[%s10282_s22 + $0x28] sm:$0xff]  ;;  %5417 = vperm.xlu1 %6025, %v907_v1   ;;  %v875_v1 = vld [vmem:[%s10279_s19 + $0x30] sm:$0xff] }
 0x77b   : > { %v8410_v59 = vpop.permute.xlu0 %4510 }
 0x77c   : > { %10769 = vst [vmem:[#allocation83_spill] sm:$0xff] %v8410_v59 }
 0x77d   : > { %3858 = vperm.xlu0 %6038, %v7984_v63   ;;  %v912_v63 = vld [vmem:[%s10282_s22 + $0x38] sm:$0xff] }
 0x780   : > { %v8412_v41 = vpop.permute.xlu0 %4686 }
 0x781   : > { %3866 = vperm.xlu0 %6038, %v8006_v7   ;;  %v908_v7 = vld [vmem:[%s10282_s22 + $0x18] sm:$0xff] }
 0x782   : > { %5422 = vperm.xlu1 %6025, %v908_v7   ;;  %v876_v7 = vld [vmem:[%s10279_s19 + $0x38] sm:$0xff] }
 0x784   : > { %v8414_v38 = vpop.permute.xlu0 %4698 }
 0x785   : > { %3874 = vperm.xlu0 %6038, %v8033_v3   ;;  %10770 = vst [vmem:[#allocation52_spill] sm:$0xff] %v8414_v38 }
 0x786   : > { %6026 = vset.pattern.permute.xlu1 %v10735_v52 }
 0x787   : > { %5122 = vperm.xlu1 %6026, %v8033_v3  }
 0x788   : > { %v8416_v5 = vpop.permute.xlu0 %4706 }
 0x789   : > { %3882 = vperm.xlu0 %6038, %v8060_v61   ;;  %10771 = vst [vmem:[#allocation90_spill] sm:$0xff] %v8416_v5 }
 0x78b   : > { %6027 = vset.pattern.permute.xlu1 %v10734_v54 }
 0x78c   : > { %v8418_v39 = vpop.permute.xlu0 %4714  ;;  %4934 = vperm.xlu1 %6027, %v8020_v12  }
 0x78d   : > { %3890 = vperm.xlu0 %6038, %v8087_v56   ;;  %10772 = vst [vmem:[#allocation21_spill] sm:$0xff] %v8418_v39 }
 0x790   : > { %v8420_v36 = vpop.permute.xlu0 %4722  ;;  %6028 = vset.pattern.permute.xlu1 %v10736_v35 }
 0x791   : > { %5412 = vperm.xlu0 %6038, %v906_v28   ;;  %10773 = vst [vmem:[#allocation67_spill] sm:$0xff] %v8420_v36  ;;  %5338 = vperm.xlu1 %6028, %v8033_v3   ;;  %v916_v28 = vld [vmem:[%s10282_s22 + $0x58] sm:$0xff] }
 0x794   : > { %v8422_v32 = vpop.permute.xlu0 %4730 }
 0x795   : > { %5432 = vperm.xlu0 %6038, %v910_v47   ;;  %10774 = vst [vmem:[#allocation15_spill] sm:$0xff] %v8422_v32  ;;  %6029 = vset.pattern.permute.xlu1 %v10744_v24  ;;  %v871_v47 = vld [vmem:[%s10279_s19 + $0x10] sm:$0xff] }
 0x796   : > { %5427 = vperm.xlu1 %6029, %v909_v30   ;;  %v877_v30 = vld [vmem:[%s10279_s19 + $0x40] sm:$0xff] }
 0x799   : > { %5442 = vperm.xlu0 %6038, %v912_v63   ;;  %v8424_v9 = vpop.permute.xlu0 %4902  ;;  %v872_v63 = vld [vmem:[%s10279_s19 + $0x18] sm:$0xff] }
 0x79a   : > { %6030 = vset.pattern.permute.xlu1 %v10735_v52 }
 0x79b   : > { %5130 = vperm.xlu1 %6030, %v8060_v61  }
 0x79d   : > { %5457 = vperm.xlu0 %6038, %v915_v20   ;;  %v8426_v50 = vpop.permute.xlu0 %4926  ;;  %v873_v20 = vld [vmem:[%s10279_s19 + $0x20] sm:$0xff] }
 0x79e   : > { %10775 = vst [vmem:[#allocation23_spill] sm:$0xff] %v8426_v50 }
 0x79f   : > { %6031 = vset.pattern.permute.xlu1 %v10734_v54 }
 0x7a0   : > { %4942 = vperm.xlu1 %6031, %v8046_v8  }
 0x7a1   : > { %v8428_v0 = vpop.permute.xlu0 %4938 }
 0x7a2   : > { %10776 = vst [vmem:[#allocation24_spill] sm:$0xff] %v8428_v0 }
 0x7a4   : > { %6033 = vset.pattern.permute.xlu1 %v10736_v35 }
 0x7a5   : > { %v8430_v18 = vpop.permute.xlu0 %4946  ;;  %5346 = vperm.xlu1 %6033, %v8060_v61   ;;  %v10788_v61 = vld [vmem:[#allocation13_spill] sm:$0xff] }
 0x7a6   : > { %10777 = vst [vmem:[#allocation29_spill] sm:$0xff] %v8430_v18 }
 0x7a9   : > { %6034 = vset.pattern.permute.xlu1 %v10744_v24 }
 0x7aa   : > { %v8432_v55 = vpop.permute.xlu0 %5098  ;;  %5437 = vperm.xlu1 %6034, %v911_v42   ;;  %v878_v42 = vld [vmem:[%s10279_s19 + $0x48] sm:$0xff] }
 0x7ae   : > { %v8438_v51 = vpop.permute.xlu0 %5106  ;;  %6036 = vset.pattern.permute.xlu1 %v10735_v52  ;;  %v913_v52 = vld [vmem:[%s10282_s22 + $0x40] sm:$0xff] }
 0x7af   : > { %10778 = vst [vmem:[#allocation19_spill] sm:$0xff] %v8438_v51  ;;  %5138 = vperm.xlu1 %6036, %v8087_v56  }
 0x7b2   : > { %v8443_v43 = vpop.permute.xlu0 %5110 }
 0x7b3   : > { %10779 = vst [vmem:[#allocation31_spill] sm:$0xff] %v8443_v43  ;;  %6037 = vset.pattern.permute.xlu1 %v10736_v35  ;;  %v914_v35 = vld [vmem:[%s10282_s22 + $0x48] sm:$0xff] }
 0x7b4   : > { %5350 = vperm.xlu1 %6037, %v8046_v8   ;;  %v869_v8 = vld [vmem:[%s10279_s19] sm:$0xff] }
 0x7b6   : > { %v8447_v23 = vpop.permute.xlu0 %5118 }
 0x7b7   : > { %10780 = vst [vmem:[#allocation25_spill] sm:$0xff] %v8447_v23 }
 0x7b8   : > { %6039 = vset.pattern.permute.xlu1 %v10744_v24  ;;  %v870_v24 = vld [vmem:[%s10279_s19 + $0x8] sm:$0xff] }
 0x7b9   : > { %5447 = vperm.xlu1 %6039, %v913_v52  }
 0x7ba   : > { %v8456_v27 = vpop.permute.xlu0 %5126 }
 0x7bb   : > { %10781 = vst [vmem:[#allocation38_spill] sm:$0xff] %v8456_v27 }
 0x7bd   : > { %5452 = vperm.xlu1 %6039, %v914_v35  }
 0x7be   : > { %v8459_v10 = vpop.permute.xlu0 %5134 }
 0x7bf   : > { %10782 = vst [vmem:[#allocation33_spill] sm:$0xff] %v8459_v10 }
 0x7c1   : > { %5462 = vperm.xlu1 %6039, %v916_v28  }
 0x7c3   : > { %v8464_v46 = vpop.permute.xlu0 %5310 }
 0x7c7   : > { %v8468_v53 = vpop.permute.xlu0 %5318 }
 0x7c8   : > { %10783 = vst [vmem:[#allocation34_spill] sm:$0xff] %v8468_v53 }
 0x7cb   : > { %v8474_v48 = vpop.permute.xlu0 %5330 }
 0x7cc   : > { %10784 = vst [vmem:[#allocation46_spill] sm:$0xff] %v8474_v48 }
 0x7cf   : > { %v8478_v12 = vpop.permute.xlu0 %5334 }
 0x7d0   : > { %10785 = vst [vmem:[#allocation7_spill] sm:$0xff] %v8478_v12 }
 0x7d3   : > { %v8483_v3 = vpop.permute.xlu0 %5342 }
 0x7d4   : > { %10786 = vst [vmem:[#allocation91_spill] sm:$0xff] %v8483_v3 }
 0x7d7   : > { %v8490_v6 = vpop.permute.xlu0 %5354 }
 0x7d8   : > { %10787 = vst [vmem:[#allocation12_spill] sm:$0xff] %v8490_v6 }
 0x7dc   : > { %v3281_v54 = vpop.permute.xlu0 %3280 }
 0x7e0   : > { %v3368_v0 = vpop.permute.xlu0 %3367 }
 0x7e4   : > { %v8687_v12 = vpop.permute.xlu0 %3377 }
 0x7e8   : > { %v8703_v50 = vpop.permute.xlu0 %3387 }
 0x7ec   : > { %v8721_v22 = vpop.permute.xlu0 %3397 }
 0x7f0   : > { %v8733_v43 = vpop.permute.xlu0 %3407 }
 0x7f1   : > { %10824 = vst [vmem:[#allocation105_spill] sm:$0xff] %v8733_v43 }
 0x844   : > { %v3353_v17 = vpop.f32.mrb[6].mxu1 }
 0x845   : > { %v3354_v58 = vadd.f32 %v3353_v17, %v3281_v54  ;;  %v3355_v11 = vpop.f32.mrb[7].mxu1  ;;  %v880_v17 = vld [vmem:[%s10279_s19 + $0x58] sm:$0xff] }
 0x846   : > { %v3356_v33 = vadd.f32 %v3355_v11, %v3281_v54  ;;  %v879_v54 = vld [vmem:[%s10279_s19 + $0x50] sm:$0xff] }
 0x847   : > { %v3358_v14 = vadd.f32 %v3354_v58, %v10788_v61  ;;  %v8575_v58 = vpop.permute.xlu1 %4294 }
 0x848   : > { %v3359_v2 = vadd.f32 %v3356_v33, %v10789_v13  ;;  %10792 = vst [vmem:[#allocation8_spill] sm:$0xff] %v8575_v58 }
 0x849   : > { %v8505_v40 = vpack.c.bf16 %v3358_v14, %v929_v29 }
 0x84a   : > { %v8503_v56 = vpack.c.bf16 %v3359_v2, %v930_v21 }
 0x84b   : > { %10791 = vst [vmem:[#allocation53_spill] sm:$0xff] %v8505_v40  ;;  %v8577_v11 = vpop.permute.xlu1 %4470 }
 0x84c   : > { %10790 = vst [vmem:[#allocation84_spill] sm:$0xff] %v8503_v56  ;;  %5871 = vmatprep.subr.bf16.mxu1 %v8503_v56 }
 0x84d   : > { %5873 = vmatpush1.bf16.msra.mxu1 %v8505_v40 }
 0x84f   : > { %v8579_v33 = vpop.permute.xlu1 %4478 }
 0x850   : > { %5827 = vmatmul.mubr.msk.f32.vlgmr.msra.gmra.mrb[8].mxu1 %vm1120_vm7, %v869_v8 }
 0x851   : > { %3526 = vmatprep.mubr.f32.mxu1 %v10761_v49 }
 0x853   : > { %v8581_v61 = vpop.permute.xlu1 %4482 }
 0x854   : > { %5828 = vmatmul.mubr.msk.f32.gmra.mrb[10].mxu1 %vm1120_vm7, %v870_v24  ;;  %10793 = vst [vmem:[#allocation4_spill] sm:$0xff] %v8581_v61 }
 0x855   : > { %3532 = vmatprep.mubr.f32.mxu1 %v10761_v49 }
 0x857   : > { %v8583_v14 = vpop.permute.xlu1 %4490 }
 0x858   : > { %5829 = vmatmul.mubr.msk.f32.gmra.mrb[12].mxu1 %vm1120_vm7, %v871_v47  ;;  %10794 = vst [vmem:[#allocation69_spill] sm:$0xff] %v8583_v14 }
 0x859   : > { %3538 = vmatprep.mubr.f32.mxu1 %v10761_v49 }
 0x85b   : > { %v8585_v21 = vpop.permute.xlu1 %4498 }
 0x85c   : > { %5830 = vmatmul.mubr.msk.f32.gmra.mrb[14].mxu1 %vm1120_vm7, %v872_v63  ;;  %10795 = vst [vmem:[#allocation28_spill] sm:$0xff] %v8585_v21 }
 0x85d   : > { %3544 = vmatprep.mubr.f32.mxu1 %v10761_v49 }
 0x85f   : > { %v8587_v29 = vpop.permute.xlu1 %4506 }
 0x860   : > { %5831 = vmatmul.mubr.msk.f32.gmra.mrb[16].mxu1 %vm1120_vm7, %v873_v20  ;;  %10796 = vst [vmem:[#allocation17_spill] sm:$0xff] %v8587_v29 }
 0x861   : > { %3550 = vmatprep.mubr.f32.mxu1 %v10761_v49 }
 0x863   : > { %v8589_v13 = vpop.permute.xlu1 %4514 }
 0x864   : > { %5832 = vmatmul.mubr.msk.f32.gmra.mrb[18].mxu1 %vm1120_vm7, %v874_v44  ;;  %10797 = vst [vmem:[#allocation22_spill] sm:$0xff] %v8589_v13 }
 0x865   : > { %3556 = vmatprep.mubr.f32.mxu1 %v10761_v49 }
 0x867   : > { %v8591_v2 = vpop.permute.xlu1 %4690 }
 0x868   : > { %5833 = vmatmul.mubr.msk.f32.gmra.mrb[20].mxu1 %vm1120_vm7, %v875_v1 }
 0x869   : > { %3562 = vmatprep.mubr.f32.mxu1 %v10761_v49 }
 0x86b   : > { %v8593_v52 = vpop.permute.xlu1 %4694 }
 0x86c   : > { %5834 = vmatmul.mubr.msk.f32.gmra.mrb[22].mxu1 %vm1120_vm7, %v876_v7  ;;  %10798 = vst [vmem:[#allocation26_spill] sm:$0xff] %v8593_v52 }
 0x86d   : > { %3568 = vmatprep.mubr.f32.mxu1 %v10761_v49 }
 0x86f   : > { %v8595_v8 = vpop.permute.xlu1 %4702 }
 0x870   : > { %5835 = vmatmul.mubr.msk.f32.gmra.mrb[24].mxu1 %vm1120_vm7, %v877_v30  ;;  %10799 = vst [vmem:[#allocation20_spill] sm:$0xff] %v8595_v8 }
 0x871   : > { %3574 = vmatprep.mubr.f32.mxu1 %v10761_v49 }
 0x873   : > { %v8597_v35 = vpop.permute.xlu1 %4710 }
 0x874   : > { %5836 = vmatmul.mubr.msk.f32.gmra.mrb[26].mxu1 %vm1120_vm7, %v878_v42  ;;  %10800 = vst [vmem:[#allocation35_spill] sm:$0xff] %v8597_v35 }
 0x875   : > { %3580 = vmatprep.mubr.f32.mxu1 %v10761_v49 }
 0x877   : > { %v8599_v24 = vpop.permute.xlu1 %4718 }
 0x878   : > { %5837 = vmatmul.mubr.msk.f32.gmra.mrb[28].mxu1 %vm1120_vm7, %v879_v54  ;;  %10801 = vst [vmem:[#allocation32_spill] sm:$0xff] %v8599_v24 }
 0x879   : > { %3586 = vmatprep.mubr.f32.mxu1 %v10761_v49 }
 0x87b   : > { %v8601_v28 = vpop.permute.xlu1 %4726 }
 0x87c   : > { %5838 = vmatmul.mubr.msk.f32.gmra.mrb[30].mxu1 %vm1120_vm7, %v880_v17  ;;  %10802 = vst [vmem:[#allocation30_spill] sm:$0xff] %v8601_v28  ;;  %v10808_v17 = vld [vmem:[#allocation37_spill] sm:$0xff] }
 0x87f   : > { %v8603_v47 = vpop.permute.xlu1 %4906 }
 0x883   : > { %v8605_v63 = vpop.permute.xlu1 %5094 }
 0x887   : > { %v8607_v20 = vpop.permute.xlu1 %4910 }
 0x888   : > { %10803 = vst [vmem:[#allocation27_spill] sm:$0xff] %v8607_v20 }
 0x88b   : > { %v8609_v44 = vpop.permute.xlu1 %4914 }
 0x88c   : > { %10804 = vst [vmem:[#allocation40_spill] sm:$0xff] %v8609_v44 }
 0x88f   : > { %v8611_v1 = vpop.permute.xlu1 %5314 }
 0x893   : > { %v8613_v7 = vpop.permute.xlu1 %5102 }
 0x894   : > { %10805 = vst [vmem:[#allocation49_spill] sm:$0xff] %v8613_v7 }
 0x897   : > { %v8615_v30 = vpop.permute.xlu1 %4918 }
 0x898   : > { %10806 = vst [vmem:[#allocation36_spill] sm:$0xff] %v8615_v30 }
 0x89b   : > { %v8617_v42 = vpop.permute.xlu1 %4922 }
 0x89c   : > { %10807 = vst [vmem:[#allocation13_spill] sm:$0xff] %v8617_v42 }
 0x89f   : > { %v8622_v6 = vpop.permute.xlu1 %5322 }
 0x8a0   : > { %10809 = vst [vmem:[#allocation10_spill] sm:$0xff] %v8622_v6 }
 0x923   : > { %v3522_v54 = vpop.f32.mrb[8].mxu1 }
 0x924   : > { %v3523_v49 = vadd.f32 %v3522_v54, %v10808_v17  ;;  %v3524_v40 = vpop.f32.mrb[9].mxu1 }
 0x925   : > { %v3525_v28 = vadd.f32 %v3524_v40, %v10808_v17 }
 0x926   : > { %v8620_v56 = vmax.f32 %v3523_v49, 0.0  ;;  %v8636_v49 = vpop.permute.xlu1 %5407 }
 0x927   : > { %v3528_v18 = vpop.f32.mrb[10].mxu1  ;;  %v8657_v3 = vmax.f32 %v3525_v28, 0.0 }
 0x928   : > { %v3530_v32 = vpop.f32.mrb[11].mxu1  ;;  %3941 = vrot.lane.b32.xlu1 %v8620_v56, %s10574_s9  ;;  %3725 = vrot.lane.b32.xlu0 %v8620_v56, %s10573_s3  ;;  %v3529_v28 = vadd.f32 %v3528_v18, %v3368_v0 }
 0x929   : > { %v3531_v42 = vadd.f32 %v3530_v32, %v3368_v0  ;;  %v10828_v0 = vld [vmem:[#allocation39_spill] sm:$0xff] }
 0x92a   : > { %v8647_v59 = vpop.permute.xlu1 %5114 }
 0x92b   : > { %v8628_v10 = vpop.f32.mrb[12].mxu1  ;;  %10810 = vst [vmem:[#allocation37_spill] sm:$0xff] %v8647_v59 }
 0x92c   : > { %v8630_v13 = vpop.f32.mrb[13].mxu1  ;;  %4349 = vrot.lane.b32.xlu1 %v8620_v56, %s10577_s28  ;;  %4133 = vrot.lane.b32.xlu0 %v8620_v56, %s10576_s0 }
 0x92e   : > { %v8667_v40 = vpop.permute.xlu1 %4930 }
 0x92f   : > { %v8638_v54 = vpop.f32.mrb[14].mxu1  ;;  %10811 = vst [vmem:[#allocation92_spill] sm:$0xff] %v8667_v40  ;;  %v8689_v40 = vmax.f32 %v3529_v28, 0.0 }
 0x930   : > { %v8640_v45 = vpop.f32.mrb[15].mxu1  ;;  %4781 = vrot.lane.b32.xlu1 %v8620_v56, %s10580_s1  ;;  %4565 = vrot.lane.b32.xlu0 %v8620_v56, %s10578_s29 }
 0x932   : > { %v8677_v24 = vpop.permute.xlu1 %5326 }
 0x933   : > { %v8649_v58 = vpop.f32.mrb[16].mxu1  ;;  %10812 = vst [vmem:[#allocation93_spill] sm:$0xff] %v8677_v24 }
 0x934   : > { %v8651_v36 = vpop.f32.mrb[17].mxu1  ;;  %4997 = vrot.lane.b32.xlu1 %v8620_v56, %s10581_s11  ;;  %5189 = vrot.lane.b32.xlu0 %v8620_v56, %s10582_s2 }
 0x936   : > { %v8699_v18 = vpop.permute.xlu1 %5417 }
 0x937   : > { %v8659_v29 = vpop.f32.mrb[18].mxu1  ;;  %10815 = vst [vmem:[#allocation96_spill] sm:$0xff] %v8699_v18 }
 0x938   : > { %v8661_v27 = vpop.f32.mrb[19].mxu1  ;;  %3727 = vrot.lane.b32.xlu1 %v8657_v3, %s10573_s3  ;;  %3943 = vrot.lane.b32.xlu0 %v8657_v3, %s10574_s9 }
 0x93a   : > { %v8711_v28 = vpop.permute.xlu1 %5422 }
 0x93b   : > { %v8669_v17 = vpop.f32.mrb[20].mxu1  ;;  %10818 = vst [vmem:[#allocation99_spill] sm:$0xff] %v8711_v28 }
 0x93c   : > { %v8671_v26 = vpop.f32.mrb[21].mxu1  ;;  %4135 = vrot.lane.b32.xlu1 %v8657_v3, %s10576_s0  ;;  %4351 = vrot.lane.b32.xlu0 %v8657_v3, %s10577_s28 }
 0x93e   : > { %v8723_v48 = vpop.permute.xlu1 %5122 }
 0x93f   : > { %v8679_v15 = vpop.f32.mrb[22].mxu1  ;;  %10821 = vst [vmem:[#allocation102_spill] sm:$0xff] %v8723_v48 }
 0x940   : > { %v8681_v60 = vpop.f32.mrb[23].mxu1  ;;  %4567 = vrot.lane.b32.xlu1 %v8657_v3, %s10578_s29  ;;  %4783 = vrot.lane.b32.xlu0 %v8657_v3, %s10580_s1 }
 0x942   : > { %v8739_v48 = vpop.permute.xlu1 %4934 }
 0x943   : > { %v8691_v39 = vpop.f32.mrb[24].mxu1  ;;  %10825 = vst [vmem:[#allocation106_spill] sm:$0xff] %v8739_v48 }
 0x944   : > { %10813 = vst [vmem:[#allocation94_spill] sm:$0xff] %v8691_v39  ;;  %v8693_v21 = vpop.f32.mrb[25].mxu1  ;;  %3945 = vrot.lane.b32.xlu1 %v8689_v40, %s10574_s9  ;;  %4999 = vrot.lane.b32.xlu0 %v8657_v3, %s10581_s11 }
 0x945   : > { %10814 = vst [vmem:[#allocation95_spill] sm:$0xff] %v8693_v21 }
 0x946   : > { %v8749_v32 = vpop.permute.xlu1 %5338 }
 0x947   : > { %v8701_v23 = vpop.f32.mrb[26].mxu1  ;;  %10827 = vst [vmem:[#allocation108_spill] sm:$0xff] %v8749_v32 }
 0x948   : > { %10816 = vst [vmem:[#allocation97_spill] sm:$0xff] %v8701_v23  ;;  %v8705_v37 = vpop.f32.mrb[27].mxu1  ;;  %4353 = vrot.lane.b32.xlu1 %v8689_v40, %s10577_s28  ;;  %5191 = vrot.lane.b32.xlu0 %v8657_v3, %s10582_s2 }
 0x949   : > { %10817 = vst [vmem:[#allocation98_spill] sm:$0xff] %v8705_v37 }
 0x94b   : > { %v8713_v35 = vpop.f32.mrb[28].mxu1 }
 0x94c   : > { %10819 = vst [vmem:[#allocation100_spill] sm:$0xff] %v8713_v35  ;;  %v8715_v25 = vpop.f32.mrb[29].mxu1  ;;  %4785 = vrot.lane.b32.xlu1 %v8689_v40, %s10580_s1  ;;  %3729 = vrot.lane.b32.xlu0 %v8689_v40, %s10573_s3 }
 0x94d   : > { %10820 = vst [vmem:[#allocation101_spill] sm:$0xff] %v8715_v25 }
 0x94f   : > { %v8725_v24 = vpop.f32.mrb[30].mxu1 }
 0x950   : > { %10822 = vst [vmem:[#allocation103_spill] sm:$0xff] %v8725_v24  ;;  %v8727_v59 = vpop.f32.mrb[31].mxu1  ;;  %5001 = vrot.lane.b32.xlu1 %v8689_v40, %s10581_s11  ;;  %4137 = vrot.lane.b32.xlu0 %v8689_v40, %s10576_s0  ;;  %v8741_v24 = vmax.f32 %v3531_v42, 0.0  ;;  %v3535_v42 = vadd.f32 %v8628_v10, %v10828_v0 }
 0x951   : > { %10823 = vst [vmem:[#allocation104_spill] sm:$0xff] %v8727_v59  ;;  %v8747_v59 = vpop.permute.xlu0 %3417 }
 0x952   : > { %10826 = vst [vmem:[#allocation107_spill] sm:$0xff] %v8747_v59  ;;  %v8763_v59 = vpop.permute.xlu1 %5427  ;;  %v8765_v32 = vmax.f32 %v3535_v42, 0.0 }
 0x953   : > { %10829 = vst [vmem:[#allocation39_spill] sm:$0xff] %v8763_v59  ;;  %v3537_v59 = vadd.f32 %v8630_v13, %v10828_v0 }
 0x954   : > { %5193 = vrot.lane.b32.xlu1 %v8689_v40, %s10582_s2  ;;  %4569 = vrot.lane.b32.xlu0 %v8689_v40, %s10578_s29 }
 0x955   : > { %v8757_v48 = vpop.permute.xlu0 %3846 }
 0x956   : > { %v8773_v10 = vpop.permute.xlu1 %5130 }
 0x957   : > { %10831 = vst [vmem:[#allocation110_spill] sm:$0xff] %v8773_v10 }
 0x958   : > { %3731 = vrot.lane.b32.xlu1 %v8741_v24, %s10573_s3  ;;  %3947 = vrot.lane.b32.xlu0 %v8741_v24, %s10574_s9 }
 0x959   : > { %v8771_v5 = vpop.permute.xlu0 %3858 }
 0x95a   : > { %10830 = vst [vmem:[#allocation109_spill] sm:$0xff] %v8771_v5  ;;  %v8785_v42 = vpop.permute.xlu1 %4942  ;;  %v10853_v5 = vld [vmem:[#allocation68_spill] sm:$0xff] }
 0x95b   : > { %10833 = vst [vmem:[#allocation112_spill] sm:$0xff] %v8785_v42  ;;  %v8801_v42 = vmax.f32 %v3537_v59, 0.0  ;;  %v3541_v59 = vadd.f32 %v8638_v54, %v8687_v12 }
 0x95c   : > { %4139 = vrot.lane.b32.xlu1 %v8741_v24, %s10576_s0  ;;  %4355 = vrot.lane.b32.xlu0 %v8741_v24, %s10577_s28 }
 0x95d   : > { %v8779_v14 = vpop.permute.xlu0 %3866 }
 0x95e   : > { %10832 = vst [vmem:[#allocation111_spill] sm:$0xff] %v8779_v14  ;;  %v8795_v30 = vpop.permute.xlu1 %5346 }
 0x95f   : > { %10835 = vst [vmem:[#allocation114_spill] sm:$0xff] %v8795_v30  ;;  %v8825_v30 = vmax.f32 %v3541_v59, 0.0  ;;  %v3543_v59 = vadd.f32 %v8640_v45, %v8687_v12 }
 0x960   : > { %4571 = vrot.lane.b32.xlu1 %v8741_v24, %s10578_s29  ;;  %4787 = vrot.lane.b32.xlu0 %v8741_v24, %s10580_s1 }
 0x961   : > { %v8791_v10 = vpop.permute.xlu0 %3874  ;;  %10840 = vst [vmem:[#allocation119_spill] sm:$0xff] %v8825_v30 }
 0x962   : > { %10834 = vst [vmem:[#allocation113_spill] sm:$0xff] %v8791_v10  ;;  %v8809_v10 = vpop.permute.xlu1 %5437 }
 0x963   : > { %10837 = vst [vmem:[#allocation116_spill] sm:$0xff] %v8809_v10 }
 0x964   : > { %5003 = vrot.lane.b32.xlu1 %v8741_v24, %s10581_s11  ;;  %3733 = vrot.lane.b32.xlu0 %v8765_v32, %s10573_s3 }
 0x965   : > { %v8803_v4 = vpop.permute.xlu0 %3882 }
 0x966   : > { %10836 = vst [vmem:[#allocation115_spill] sm:$0xff] %v8803_v4  ;;  %v8819_v0 = vpop.permute.xlu1 %5138 }
 0x967   : > { %10839 = vst [vmem:[#allocation118_spill] sm:$0xff] %v8819_v0 }
 0x968   : > { %5195 = vrot.lane.b32.xlu1 %v8741_v24, %s10582_s2  ;;  %4141 = vrot.lane.b32.xlu0 %v8765_v32, %s10576_s0 }
 0x969   : > { %v8815_v13 = vpop.permute.xlu0 %3890 }
 0x96a   : > { %10838 = vst [vmem:[#allocation117_spill] sm:$0xff] %v8815_v13  ;;  %v8833_v13 = vpop.permute.xlu1 %5350 }
 0x96b   : > { %10841 = vst [vmem:[#allocation120_spill] sm:$0xff] %v8833_v13  ;;  %v8849_v13 = vmax.f32 %v3543_v59, 0.0 }
 0x96c   : > { %3949 = vrot.lane.b32.xlu1 %v8765_v32, %s10574_s9  ;;  %4573 = vrot.lane.b32.xlu0 %v8765_v32, %s10578_s29 }
 0x96d   : > { %v8827_v4 = vpop.permute.xlu0 %5412  ;;  %10844 = vst [vmem:[#allocation123_spill] sm:$0xff] %v8849_v13 }
 0x96e   : > { %v8843_v0 = vpop.permute.xlu1 %5447 }
 0x96f   : > { %10843 = vst [vmem:[#allocation122_spill] sm:$0xff] %v8843_v0  ;;  %v10849_v0 = vld [vmem:[#allocation41_spill] sm:$0xff] }
 0x970   : > { %4357 = vrot.lane.b32.xlu1 %v8765_v32, %s10577_s28  ;;  %5005 = vrot.lane.b32.xlu0 %v8765_v32, %s10581_s11  ;;  %v3549_v43 = vadd.f32 %v8651_v36, %v10849_v0 }
 0x971   : > { %v8839_v54 = vpop.permute.xlu0 %5432 }
 0x972   : > { %10842 = vst [vmem:[#allocation121_spill] sm:$0xff] %v8839_v54  ;;  %v8853_v8 = vpop.permute.xlu1 %5452  ;;  %v8917_v51 = vmax.f32 %v3549_v43, 0.0 }
 0x973   : > { %10846 = vst [vmem:[#allocation125_spill] sm:$0xff] %v8853_v8 }
 0x974   : > { %4789 = vrot.lane.b32.xlu1 %v8765_v32, %s10580_s1  ;;  %5197 = vrot.lane.b32.xlu0 %v8765_v32, %s10582_s2  ;;  %10851 = vst [vmem:[#allocation128_spill] sm:$0xff] %v8917_v51 }
 0x975   : > { %v8851_v10 = vpop.permute.xlu0 %5442 }
 0x976   : > { %10845 = vst [vmem:[#allocation124_spill] sm:$0xff] %v8851_v10  ;;  %v8865_v12 = vpop.permute.xlu1 %5462  ;;  %v3547_v10 = vadd.f32 %v8649_v58, %v10849_v0 }
 0x977   : > { %10848 = vst [vmem:[#allocation127_spill] sm:$0xff] %v8865_v12 }
 0x978   : > { %3735 = vrot.lane.b32.xlu1 %v8801_v42, %s10573_s3  ;;  %3951 = vrot.lane.b32.xlu0 %v8801_v42, %s10574_s9  ;;  %v8883_v54 = vmax.f32 %v3547_v10, 0.0 }
 0x979   : > { %v8863_v45 = vpop.permute.xlu0 %5457 }
 0x97a   : > { %10847 = vst [vmem:[#allocation126_spill] sm:$0xff] %v8863_v45  ;;  %10850 = vst [vmem:[#allocation41_spill] sm:$0xff] %v8883_v54 }
 0x97c   : > { %4143 = vrot.lane.b32.xlu1 %v8801_v42, %s10576_s0  ;;  %4359 = vrot.lane.b32.xlu0 %v8801_v42, %s10577_s28 }
 0x980   : > { %4575 = vrot.lane.b32.xlu1 %v8801_v42, %s10578_s29  ;;  %4791 = vrot.lane.b32.xlu0 %v8801_v42, %s10580_s1 }
 0x984   : > { %5007 = vrot.lane.b32.xlu1 %v8801_v42, %s10581_s11  ;;  %3737 = vrot.lane.b32.xlu0 %v8825_v30, %s10573_s3 }
 0x988   : > { %5199 = vrot.lane.b32.xlu1 %v8801_v42, %s10582_s2  ;;  %4145 = vrot.lane.b32.xlu0 %v8825_v30, %s10576_s0 }
 0x98c   : > { %3953 = vrot.lane.b32.xlu1 %v8825_v30, %s10574_s9  ;;  %4577 = vrot.lane.b32.xlu0 %v8825_v30, %s10578_s29 }
 0x990   : > { %4361 = vrot.lane.b32.xlu1 %v8825_v30, %s10577_s28  ;;  %3955 = vrot.lane.b32.xlu0 %v8849_v13, %s10574_s9 }
 0x994   : > { %4793 = vrot.lane.b32.xlu1 %v8825_v30, %s10580_s1  ;;  %4363 = vrot.lane.b32.xlu0 %v8849_v13, %s10577_s28 }
 0x998   : > { %5009 = vrot.lane.b32.xlu1 %v8825_v30, %s10581_s11  ;;  %4795 = vrot.lane.b32.xlu0 %v8849_v13, %s10580_s1 }
 0x99a   : > { %v3942_v59 = vpop.permute.xlu1 %3941  ;;  %v3726_v8 = vpop.permute.xlu0 %3725 }
 0x99b   : > { %v3809_v6 = vsel %vm1083_vm4, 0.0, %v3726_v8  ;;  %v4025_v7 = vsel %vm1120_vm7, 0.0, %v3942_v59 }
 0x99c   : > { %5201 = vrot.lane.b32.xlu1 %v8825_v30, %s10582_s2  ;;  %5011 = vrot.lane.b32.xlu0 %v8849_v13, %s10581_s11  ;;  %v3821_v44 = vmul.f32 %v6438_v34, %v3809_v6  ;;  %v4085_v52 = vmul.f32 %v10853_v5, %v4025_v7 }
 0x99e   : > { %v8877_v45 = vpop.permute.xlu1 %4349  ;;  %v4134_v12 = vpop.permute.xlu0 %4133 }
 0x99f   : > { %v4217_v6 = vsel %vm1153_vm5, 0.0, %v4134_v12 }
 0x9a0   : > { %3739 = vrot.lane.b32.xlu1 %v8849_v13, %s10573_s3  ;;  %5203 = vrot.lane.b32.xlu0 %v8849_v13, %s10582_s2 }
 0x9a2   : > { %v8885_v14 = vpop.permute.xlu1 %4781  ;;  %v8887_v25 = vpop.permute.xlu0 %4565 }
 0x9a4   : > { %4147 = vrot.lane.b32.xlu1 %v8849_v13, %s10576_s0  ;;  %3741 = vrot.lane.b32.xlu0 %v8883_v54, %s10573_s3 }
 0x9a6   : > { %v8893_v58 = vpop.permute.xlu1 %4997  ;;  %v8895_v57 = vpop.permute.xlu0 %5189 }
 0x9a8   : > { %4579 = vrot.lane.b32.xlu1 %v8849_v13, %s10578_s29  ;;  %4149 = vrot.lane.b32.xlu0 %v8883_v54, %s10576_s0  ;;  %v4229_v13 = vmul.f32 %v6455_v19, %v4217_v6 }
 0x9aa   : > { %v3728_v10 = vpop.permute.xlu1 %3727  ;;  %v3944_v35 = vpop.permute.xlu0 %3943 }
 0x9ab   : > { %v3773_v21 = vsel %vm1083_vm4, %v3726_v8, %v3728_v10  ;;  %v3893_v8 = vmul.f32 %v8757_v48, %v3821_v44 }
 0x9ac   : > { %3957 = vrot.lane.b32.xlu1 %v8883_v54, %s10574_s9  ;;  %4581 = vrot.lane.b32.xlu0 %v8883_v54, %s10578_s29  ;;  %v3822_v36 = vmul.f32 %v6434_v31, %v3773_v21 }
 0x9ae   : > { %v4136_v37 = vpop.permute.xlu1 %4135  ;;  %v4352_v23 = vpop.permute.xlu0 %4351  ;;  %v3894_v10 = vmul.f32 %v8757_v48, %v3822_v36  ;;  %v3989_v48 = vsel %vm1120_vm7, %v3942_v59, %v3944_v35  ;;  %v10854_v59 = vld [vmem:[#allocation86_spill] sm:$0xff] }
 0x9af   : > { %v4181_v21 = vsel %vm1153_vm5, %v4134_v12, %v4136_v37  ;;  %v4086_v35 = vmul.f32 %v10853_v5, %v3989_v48  ;;  %v4397_v7 = vsel %vm1190_vm9, %v8877_v45, %v4352_v23  ;;  %v3555_v23 = vadd.f32 %v8661_v27, %v8703_v50 }
 0x9b0   : > { %4365 = vrot.lane.b32.xlu1 %v8883_v54, %s10577_s28  ;;  %5013 = vrot.lane.b32.xlu0 %v8883_v54, %s10581_s11  ;;  %v4230_v12 = vmul.f32 %v6449_v62, %v4181_v21 }
 0x9b2   : > { %v4568_v28 = vpop.permute.xlu1 %4567  ;;  %v4784_v18 = vpop.permute.xlu0 %4783 }
 0x9b3   : > { %v4613_v5 = vsel %vm1227_vm10, %v8887_v25, %v4568_v28 }
 0x9b4   : > { %4797 = vrot.lane.b32.xlu1 %v8883_v54, %s10580_s1  ;;  %5205 = vrot.lane.b32.xlu0 %v8883_v54, %s10582_s2  ;;  %v10852_v54 = vld [vmem:[#allocation45_spill] sm:$0xff] }
 0x9b5   : > { %v3677_v61 = vmul.f32 %v10852_v54, %v8620_v56  ;;  %v3678_v44 = vmul.f32 %v10852_v54, %v8657_v3  ;;  %v3553_v3 = vadd.f32 %v8659_v29, %v8703_v50  ;;  %v4661_v50 = vmul.f32 %v6455_v19, %v4613_v5 }
 0x9b6   : > { %v8920_v38 = vpop.permute.xlu1 %3945  ;;  %v8922_v53 = vpop.permute.xlu0 %4999 }
 0x9b7   : > { %v3917_v20 = vadd.f32 %v3893_v8, %v3677_v61  ;;  %v3918_v37 = vadd.f32 %v3894_v10, %v3678_v44  ;;  %v4433_v61 = vsel %vm1190_vm9, 0.0, %v8877_v45  ;;  %v4301_v8 = vmul.f32 %v10854_v59, %v4229_v13 }
 0x9b8   : > { %3743 = vrot.lane.b32.xlu1 %v8917_v51, %s10573_s3  ;;  %3959 = vrot.lane.b32.xlu0 %v8917_v51, %s10574_s9  ;;  %v4302_v44 = vmul.f32 %v10854_v59, %v4230_v12  ;;  %v4445_v39 = vmul.f32 %v6438_v34, %v4433_v61  ;;  %v4865_v13 = vsel %vm1264_vm11, %v4784_v18, 0.0  ;;  %v8983_v45 = vmax.f32 %v3553_v3, 0.0 }
 0x9b9   : > { %v4109_v54 = vadd.f32 %v4085_v52, %v3917_v20  ;;  %v4110_v29 = vadd.f32 %v4086_v35, %v3918_v37  ;;  %v4649_v52 = vsel %vm1227_vm10, %v4568_v28, 0.0  ;;  %v4446_v20 = vmul.f32 %v6434_v31, %v4397_v7  ;;  %v10855_v28 = vld [vmem:[#allocation57_spill] sm:$0xff] }
 0x9ba   : > { %v8930_v0 = vpop.permute.xlu1 %4353  ;;  %v8932_v43 = vpop.permute.xlu0 %5191  ;;  %v4662_v27 = vmul.f32 %v6449_v62, %v4649_v52  ;;  %v4878_v3 = vmul.f32 %v6434_v31, %v4865_v13 }
 0x9bb   : > { %v4325_v25 = vadd.f32 %v4301_v8, %v4109_v54  ;;  %v4326_v61 = vadd.f32 %v4302_v44, %v4110_v29  ;;  %v10856_v54 = vld [vmem:[#allocation55_spill] sm:$0xff]  ;;  %v8998_v8 = vmax.f32 %v3555_v23, 0.0  ;;  %v4518_v7 = vmul.f32 %v8577_v11, %v4446_v20 }
 0x9bc   : > { %4151 = vrot.lane.b32.xlu1 %v8917_v51, %s10576_s0  ;;  %4367 = vrot.lane.b32.xlu0 %v8917_v51, %s10577_s28  ;;  %v3679_v59 = vmul.f32 %v10856_v54, %v8689_v40  ;;  %v4434_v40 = vsel %vm1190_vm9, 0.0, %v8930_v0  ;;  %v4734_v20 = vmul.f32 %v8412_v41, %v4662_v27  ;;  %v10858_v27 = vld [vmem:[#allocation85_spill] sm:$0xff] }
 0x9be   : > { %v8948_v36 = vpop.permute.xlu1 %4785  ;;  %v3730_v56 = vpop.permute.xlu0 %3729 }
 0x9bf   : > { %v3810_v30 = vsel %vm1083_vm4, 0.0, %v3730_v56 }
 0x9c0   : > { %4583 = vrot.lane.b32.xlu1 %v8917_v51, %s10578_s29  ;;  %4799 = vrot.lane.b32.xlu0 %v8917_v51, %s10580_s1  ;;  %v3823_v6 = vmul.f32 %v6438_v34, %v3810_v30  ;;  %v4829_v30 = vsel %vm1264_vm11, %v8885_v14, %v4784_v18  ;;  %v4517_v18 = vmul.f32 %v8577_v11, %v4445_v39 }
 0x9c1   : > { %v4877_v35 = vmul.f32 %v6438_v34, %v4829_v30  ;;  %v3680_v39 = vmul.f32 %v10856_v54, %v8741_v24  ;;  %v4542_v30 = vadd.f32 %v4518_v7, %v4326_v61  ;;  %v4733_v11 = vmul.f32 %v8412_v41, %v4661_v50 }
 0x9c2   : > { %v8966_v10 = vpop.permute.xlu1 %5001  ;;  %v4138_v21 = vpop.permute.xlu0 %4137  ;;  %v3895_v48 = vmul.f32 %v10855_v28, %v3823_v6  ;;  %v4026_v6 = vsel %vm1120_vm7, 0.0, %v8920_v38  ;;  %v4541_v29 = vadd.f32 %v4517_v18, %v4325_v25  ;;  %v4950_v24 = vmul.f32 %v8424_v9, %v4878_v3  ;;  %v10857_v25 = vld [vmem:[#allocation72_spill] sm:$0xff] }
 0x9c3   : > { %v4218_v14 = vsel %vm1153_vm5, 0.0, %v4138_v21  ;;  %v4087_v18 = vmul.f32 %v10857_v25, %v4026_v6  ;;  %v4447_v61 = vmul.f32 %v6438_v34, %v4434_v40  ;;  %v5237_v41 = vsel %vm1334_vm13, %v8895_v57, %v8932_v43 }
 0x9c4   : > { %5015 = vrot.lane.b32.xlu1 %v8917_v51, %s10581_s11  ;;  %5207 = vrot.lane.b32.xlu0 %v8917_v51, %s10582_s2  ;;  %v3919_v44 = vadd.f32 %v3895_v48, %v3679_v59  ;;  %v4231_v5 = vmul.f32 %v6455_v19, %v4218_v14  ;;  %v4949_v51 = vmul.f32 %v8424_v9, %v4877_v35  ;;  %v5081_v57 = vsel %vm1301_vm12, %v8922_v53, 0.0 }
 0x9c5   : > { %v5045_v48 = vsel %vm1301_vm12, %v8893_v58, %v8922_v53  ;;  %v4757_v59 = vadd.f32 %v4733_v11, %v4541_v29  ;;  %v4519_v29 = vmul.f32 %v8402_v16, %v4447_v61  ;;  %v5285_v53 = vmul.f32 %v6455_v19, %v5237_v41 }
 0x9c6   : > { %v8986_v37 = vpop.permute.xlu1 %5193  ;;  %v4570_v12 = vpop.permute.xlu0 %4569  ;;  %v4111_v50 = vadd.f32 %v4087_v18, %v3919_v44  ;;  %v4303_v14 = vmul.f32 %v10858_v27, %v4231_v5 }
 0x9c8   : > { %3961 = vrot.lane.b32.xlu1 %v8983_v45, %s10574_s9  ;;  %3745 = vrot.lane.b32.xlu0 %v8983_v45, %s10573_s3 }
 0x9ca   : > { %v3732_v52 = vpop.permute.xlu1 %3731  ;;  %v3948_v23 = vpop.permute.xlu0 %3947 }
 0x9cb   : > { %v3774_v13 = vsel %vm1083_vm4, %v3730_v56, %v3732_v52  ;;  %v3990_v9 = vsel %vm1120_vm7, %v8920_v38, %v3948_v23  ;;  %v5273_v56 = vsel %vm1334_vm13, %v8932_v43, 0.0 }
 0x9cc   : > { %v3824_v54 = vmul.f32 %v6434_v31, %v3774_v13  ;;  %4369 = vrot.lane.b32.xlu1 %v8983_v45, %s10577_s28  ;;  %4153 = vrot.lane.b32.xlu0 %v8983_v45, %s10576_s0  ;;  %v4088_v40 = vmul.f32 %v10857_v25, %v3990_v9 }
 0x9ce   : > { %v3896_v58 = vmul.f32 %v10855_v28, %v3824_v54  ;;  %v4140_v35 = vpop.permute.xlu1 %4139  ;;  %v4356_v3 = vpop.permute.xlu0 %4355  ;;  %v4758_v28 = vadd.f32 %v4734_v20, %v4542_v30 }
 0x9cf   : > { %v4182_v7 = vsel %vm1153_vm5, %v4138_v21, %v4140_v35  ;;  %v4398_v38 = vsel %vm1190_vm9, %v8930_v0, %v4356_v3  ;;  %v5286_v21 = vmul.f32 %v6449_v62, %v5273_v56  ;;  %v4327_v0 = vadd.f32 %v4303_v14, %v4111_v50 }
 0x9d0   : > { %v3920_v6 = vadd.f32 %v3896_v58, %v3680_v39  ;;  %v4232_v43 = vmul.f32 %v6449_v62, %v4182_v7  ;;  %v4448_v44 = vmul.f32 %v6434_v31, %v4398_v38  ;;  %4801 = vrot.lane.b32.xlu1 %v8983_v45, %s10580_s1  ;;  %4585 = vrot.lane.b32.xlu0 %v8983_v45, %s10578_s29 }
 0x9d1   : > { %v4974_v9 = vadd.f32 %v4950_v24, %v4758_v28  ;;  %v4973_v56 = vadd.f32 %v4949_v51, %v4757_v59  ;;  %v5141_v7 = vmul.f32 %v8605_v63, %v5045_v48  ;;  %v5357_v51 = vmul.f32 %v8464_v46, %v5285_v53 }
 0x9d2   : > { %v4112_v39 = vadd.f32 %v4088_v40, %v3920_v6  ;;  %v4304_v5 = vmul.f32 %v10858_v27, %v4232_v43  ;;  %v4520_v52 = vmul.f32 %v8402_v16, %v4448_v44  ;;  %v4572_v23 = vpop.permute.xlu1 %4571  ;;  %v4788_v11 = vpop.permute.xlu0 %4787  ;;  %v10859_v16 = vld [vmem:[#allocation42_spill] sm:$0xff]  ;;  %v4543_v27 = vadd.f32 %v4519_v29, %v4327_v0 }
 0x9d3   : > { %v4614_v13 = vsel %vm1227_vm10, %v4570_v12, %v4572_v23  ;;  %v4650_v30 = vsel %vm1227_vm10, %v4572_v23, 0.0  ;;  %v4830_v20 = vsel %vm1264_vm11, %v8948_v36, %v4788_v11  ;;  %v4866_v25 = vsel %vm1264_vm11, %v4788_v11, 0.0 }
 0x9d4   : > { %v4328_v18 = vadd.f32 %v4304_v5, %v4112_v39  ;;  %v4663_v54 = vmul.f32 %v6455_v19, %v4614_v13  ;;  %v4664_v61 = vmul.f32 %v6449_v62, %v4650_v30  ;;  %v4879_v41 = vmul.f32 %v6438_v34, %v4830_v20  ;;  %5017 = vrot.lane.b32.xlu1 %v8983_v45, %s10581_s11 }
 0x9d5   : > { %v3559_v12 = vadd.f32 %v8669_v17, %v10859_v16  ;;  %v4880_v50 = vmul.f32 %v6434_v31, %v4866_v25  ;;  %3963 = vrot.lane.b32.xlu0 %v8998_v8, %s10574_s9  ;;  %v5142_v17 = vmul.f32 %v8605_v63, %v5081_v57  ;;  %v5358_v24 = vmul.f32 %v8464_v46, %v5286_v21 }
 0x9d6   : > { %v4544_v36 = vadd.f32 %v4520_v52, %v4328_v18  ;;  %v4735_v14 = vmul.f32 %v8591_v2, %v4663_v54  ;;  %v4736_v58 = vmul.f32 %v8591_v2, %v4664_v61  ;;  %v5004_v35 = vpop.permute.xlu1 %5003  ;;  %v9068_v3 = vpop.permute.xlu0 %3733  ;;  %v4951_v6 = vmul.f32 %v8603_v47, %v4879_v41 }
 0x9d7   : > { %v4952_v40 = vmul.f32 %v8603_v47, %v4880_v50  ;;  %v5165_v2 = vadd.f32 %v5141_v7, %v4973_v56  ;;  %v5166_v43 = vadd.f32 %v5142_v17, %v4974_v9  ;;  %v5046_v48 = vsel %vm1301_vm12, %v8966_v10, %v5004_v35 }
 0x9d8   : > { %v4759_v59 = vadd.f32 %v4735_v14, %v4543_v27  ;;  %v4760_v38 = vadd.f32 %v4736_v58, %v4544_v36  ;;  %5209 = vrot.lane.b32.xlu1 %v8983_v45, %s10582_s2  ;;  %v5082_v63 = vsel %vm1301_vm12, %v5004_v35, 0.0  ;;  %v9083_v46 = vmax.f32 %v3559_v12, 0.0 }
 0x9d9   : > { %4371 = vrot.lane.b32.xlu0 %v8998_v8, %s10577_s28  ;;  %v5381_v47 = vadd.f32 %v5357_v51, %v5165_v2  ;;  %v5382_v0 = vadd.f32 %v5358_v24, %v5166_v43  ;;  %v5143_v10 = vmul.f32 %v8432_v55, %v5046_v48  ;;  %v5144_v39 = vmul.f32 %v8432_v55, %v5082_v63 }
 0x9da   : > { %v4975_v57 = vadd.f32 %v4951_v6, %v4759_v59  ;;  %v4976_v44 = vadd.f32 %v4952_v40, %v4760_v38  ;;  %v5196_v28 = vpop.permute.xlu1 %5195  ;;  %v9085_v29 = vpop.permute.xlu0 %4141  ;;  %v3561_v7 = vadd.f32 %v8671_v26, %v10859_v16  ;;  %v3565_v40 = vadd.f32 %v8679_v15, %v8721_v22  ;;  %v10860_v15 = vld [vmem:[#allocation59_spill] sm:$0xff] }
 0x9db   : > { %v5238_v53 = vsel %vm1334_vm13, %v8986_v37, %v5196_v28  ;;  %v5274_v21 = vsel %vm1334_vm13, %v5196_v28, 0.0  ;;  %v5466_v18 = vadd.f32 %v8636_v49, %v5382_v0  ;;  %v5465_v54 = vadd.f32 %v8636_v49, %v5381_v47  ;;  %v10861_v0 = vld [vmem:[#allocation47_spill] sm:$0xff] }
 0x9dc   : > { %v5287_v5 = vmul.f32 %v6455_v19, %v5238_v53  ;;  %v5288_v52 = vmul.f32 %v6449_v62, %v5274_v21  ;;  %3747 = vrot.lane.b32.xlu1 %v8998_v8, %s10573_s3  ;;  %v5167_v23 = vadd.f32 %v5143_v10, %v4975_v57  ;;  %v5168_v11 = vadd.f32 %v5144_v39, %v4976_v44 }
 0x9dd   : > { %3749 = vrot.lane.b32.xlu0 %v9083_v46, %s10573_s3  ;;  %v5490_v9 = vmax.f32 %v5466_v18, 0.0  ;;  %v5489_v50 = vmax.f32 %v5465_v54, 0.0  ;;  %v9132_v24 = vmax.f32 %v3561_v7, 0.0  ;;  %v9161_v63 = vmax.f32 %v3565_v40, 0.0 }
 0x9de   : > { %v5359_v37 = vmul.f32 %v8611_v1, %v5287_v5  ;;  %v5360_v13 = vmul.f32 %v8611_v1, %v5288_v52  ;;  %v3950_v30 = vpop.permute.xlu1 %3949  ;;  %v9100_v20 = vpop.permute.xlu0 %4573  ;;  %v3811_v57 = vsel %vm1083_vm4, 0.0, %v9068_v3 }
 0x9df   : > { %v3825_v28 = vmul.f32 %v6438_v34, %v3811_v57  ;;  %v4027_v39 = vsel %vm1120_vm7, 0.0, %v3950_v30 }
 0x9e0   : > { %v5383_v55 = vadd.f32 %v5359_v37, %v5167_v23  ;;  %4155 = vrot.lane.b32.xlu1 %v8998_v8, %s10576_s0  ;;  %v5384_v25 = vadd.f32 %v5360_v13, %v5168_v11  ;;  %v4219_v13 = vsel %vm1153_vm5, 0.0, %v9085_v29 }
 0x9e1   : > { %4157 = vrot.lane.b32.xlu0 %v9083_v46, %s10576_s0  ;;  %v3897_v23 = vmul.f32 %v10860_v15, %v3825_v28  ;;  %v10865_v28 = vld [vmem:[#allocation94_spill] sm:$0xff] }
 0x9e2   : > { %v9108_v61 = vpop.permute.xlu1 %4357  ;;  %v9110_v41 = vpop.permute.xlu0 %5005  ;;  %v5468_v1 = vadd.f32 %v8827_v4, %v5384_v25  ;;  %v5467_v12 = vadd.f32 %v8827_v4, %v5383_v55  ;;  %v10862_v55 = vld [vmem:[#allocation71_spill] sm:$0xff]  ;;  %v3681_v25 = vmul.f32 %v10861_v0, %v8765_v32 }
 0x9e3   : > { %v4089_v18 = vmul.f32 %v10862_v55, %v4027_v39  ;;  %v4435_v54 = vsel %vm1190_vm9, 0.0, %v9108_v61  ;;  %v10866_v39 = vld [vmem:[#allocation26_spill] sm:$0xff] }
 0x9e4   : > { %4587 = vrot.lane.b32.xlu1 %v8998_v8, %s10578_s29  ;;  %v5492_v56 = vmax.f32 %v5468_v1, 0.0  ;;  %v5491_v36 = vmax.f32 %v5467_v12, 0.0  ;;  %v3921_v32 = vadd.f32 %v3897_v23, %v3681_v25 }
 0x9e5   : > { %4589 = vrot.lane.b32.xlu0 %v9083_v46, %s10578_s29 }
 0x9e6   : > { %v9118_v49 = vpop.permute.xlu1 %4789  ;;  %v9120_v27 = vpop.permute.xlu0 %5197  ;;  %v5874_v14 = vpack.c.bf16 %v5492_v56, %v5490_v9  ;;  %v5876_v58 = vpack.c.bf16 %v5491_v36, %v5489_v50 }
 0x9e8   : > { %4803 = vrot.lane.b32.xlu1 %v8998_v8, %s10580_s1  ;;  %5875 = vmatprep.subr.bf16.mxu0 %v5874_v14  ;;  %v4449_v14 = vmul.f32 %v6438_v34, %v4435_v54  ;;  %v10868_v54 = vld [vmem:[#allocation119_spill] sm:$0xff] }
 0x9e9   : > { %5021 = vrot.lane.b32.xlu0 %v9083_v46, %s10581_s11  ;;  %5877 = vmatpush1.bf16.msra.mxu0 %v5876_v58 }
 0x9ea   : > { %v3736_v4 = vpop.permute.xlu1 %3735  ;;  %v3952_v35 = vpop.permute.xlu0 %3951  ;;  %v4521_v40 = vmul.f32 %v8579_v33, %v4449_v14 }
 0x9eb   : > { %v3775_v26 = vsel %vm1083_vm4, %v9068_v3, %v3736_v4  ;;  %v3682_v3 = vmul.f32 %v10861_v0, %v8801_v42  ;;  %v3991_v10 = vsel %vm1120_vm7, %v3950_v30, %v3952_v35  ;;  %v3567_v42 = vadd.f32 %v8681_v60, %v8721_v22  ;;  %v10863_v60 = vld [vmem:[#allocation87_spill] sm:$0xff] }
 0x9ec   : > { %5019 = vrot.lane.b32.xlu1 %v8998_v8, %s10581_s11  ;;  %v3826_v2 = vmul.f32 %v6434_v31, %v3775_v26  ;;  %v4090_v30 = vmul.f32 %v10862_v55, %v3991_v10  ;;  %v4113_v4 = vadd.f32 %v4089_v18, %v3921_v32  ;;  %v10870_v32 = vld [vmem:[#allocation123_spill] sm:$0xff] }
 0x9ed   : > { %5213 = vrot.lane.b32.xlu0 %v9083_v46, %s10582_s2  ;;  %v9214_v36 = vmax.f32 %v3567_v42, 0.0 }
 0x9ee   : > { %v4144_v17 = vpop.permute.xlu1 %4143  ;;  %v4360_v51 = vpop.permute.xlu0 %4359  ;;  %v3898_v44 = vmul.f32 %v10860_v15, %v3826_v2 }
 0x9ef   : > { %v4183_v47 = vsel %vm1153_vm5, %v9085_v29, %v4144_v17  ;;  %v4399_v1 = vsel %vm1190_vm9, %v9108_v61, %v4360_v51  ;;  %v4233_v29 = vmul.f32 %v6455_v19, %v4219_v13 }
 0x9f0   : > { %5211 = vrot.lane.b32.xlu1 %v8998_v8, %s10582_s2  ;;  %v3922_v5 = vadd.f32 %v3898_v44, %v3682_v3  ;;  %v4234_v52 = vmul.f32 %v6449_v62, %v4183_v47  ;;  %v4450_v58 = vmul.f32 %v6434_v31, %v4399_v1  ;;  %v10864_v44 = vld [vmem:[#allocation43_spill] sm:$0xff]  ;;  %v10869_v1 = vld [vmem:[#allocation48_spill] sm:$0xff] }
 0x9f1   : > { %3967 = vrot.lane.b32.xlu0 %v9132_v24, %s10574_s9  ;;  %v4305_v51 = vmul.f32 %v10863_v60, %v4233_v29  ;;  %v3571_v47 = vadd.f32 %v10865_v28, %v10864_v44 }
 0x9f2   : > { %v4576_v59 = vpop.permute.xlu1 %4575  ;;  %v9138_v38 = vpop.permute.xlu0 %4791  ;;  %v4114_v22 = vadd.f32 %v4090_v30, %v3922_v5  ;;  %v4306_v12 = vmul.f32 %v10863_v60, %v4234_v52  ;;  %v4522_v2 = vmul.f32 %v8579_v33, %v4450_v58  ;;  %v10867_v30 = vld [vmem:[#allocation109_spill] sm:$0xff] }
 0x9f3   : > { %v4615_v9 = vsel %vm1227_vm10, %v9100_v20, %v4576_v59  ;;  %v4651_v56 = vsel %vm1227_vm10, %v4576_v59, 0.0  ;;  %v4831_v57 = vsel %vm1264_vm11, %v9118_v49, %v9138_v38  ;;  %v4867_v15 = vsel %vm1264_vm11, %v9138_v38, 0.0 }
 0x9f4   : > { %3965 = vrot.lane.b32.xlu1 %v9083_v46, %s10574_s9  ;;  %v4330_v35 = vadd.f32 %v4306_v12, %v4114_v22  ;;  %v4665_v7 = vmul.f32 %v6455_v19, %v4615_v9  ;;  %v4666_v20 = vmul.f32 %v6449_v62, %v4651_v56  ;;  %v4329_v3 = vadd.f32 %v4305_v51, %v4113_v4  ;;  %v10871_v9 = vld [vmem:[#allocation27_spill] sm:$0xff]  ;;  %v10872_v4 = vld [vmem:[#allocation73_spill] sm:$0xff] }
 0x9f5   : > { %4375 = vrot.lane.b32.xlu0 %v9132_v24, %s10577_s28  ;;  %v4881_v49 = vmul.f32 %v6438_v34, %v4831_v57  ;;  %v4882_v38 = vmul.f32 %v6434_v31, %v4867_v15  ;;  %v3683_v22 = vmul.f32 %v10869_v1, %v10868_v54  ;;  %v9263_v60 = vmax.f32 %v3571_v47, 0.0 }
 0x9f6   : > { %v9146_v16 = vpop.permute.xlu1 %5007  ;;  %v9148_v6 = vpop.permute.xlu0 %3737  ;;  %v4546_v10 = vadd.f32 %v4522_v2, %v4330_v35  ;;  %v4737_v5 = vmul.f32 %v10866_v39, %v4665_v7  ;;  %v4738_v33 = vmul.f32 %v10866_v39, %v4666_v20  ;;  %v4545_v42 = vadd.f32 %v4521_v40, %v4329_v3 }
 0x9f7   : > { %v3812_v17 = vsel %vm1083_vm4, 0.0, %v9148_v6  ;;  %v5047_v55 = vsel %vm1301_vm12, %v9110_v41, %v9146_v16  ;;  %v3684_v41 = vmul.f32 %v10869_v1, %v10870_v32  ;;  %v4953_v56 = vmul.f32 %v10871_v9, %v4881_v49 }
 0x9f8   : > { %4373 = vrot.lane.b32.xlu1 %v9083_v46, %s10577_s28  ;;  %v3827_v0 = vmul.f32 %v6438_v34, %v3812_v17  ;;  %v4761_v12 = vadd.f32 %v4737_v5, %v4545_v42  ;;  %v4762_v29 = vadd.f32 %v4738_v33, %v4546_v10  ;;  %v4954_v14 = vmul.f32 %v10871_v9, %v4882_v38  ;;  %v10873_v17 = vld [vmem:[#allocation49_spill] sm:$0xff]  ;;  %v10874_v33 = vld [vmem:[#allocation88_spill] sm:$0xff] }
 0x9f9   : > { %5215 = vrot.lane.b32.xlu0 %v9132_v24, %s10582_s2  ;;  %v5083_v58 = vsel %vm1301_vm12, %v9146_v16, 0.0  ;;  %v5145_v51 = vmul.f32 %v10873_v17, %v5047_v55 }
 0x9fa   : > { %v9157_v43 = vpop.permute.xlu1 %5199  ;;  %v9159_v48 = vpop.permute.xlu0 %4145  ;;  %v3899_v25 = vmul.f32 %v10867_v30, %v3827_v0  ;;  %v4977_v0 = vadd.f32 %v4953_v56, %v4761_v12  ;;  %v4978_v3 = vadd.f32 %v4954_v14, %v4762_v29  ;;  %v5146_v10 = vmul.f32 %v10873_v17, %v5083_v58  ;;  %v10876_v17 = vld [vmem:[#allocation34_spill] sm:$0xff] }
 0x9fb   : > { %v4220_v18 = vsel %vm1153_vm5, 0.0, %v9159_v48 }
 0x9fc   : > { %4805 = vrot.lane.b32.xlu1 %v9083_v46, %s10580_s1  ;;  %v4235_v40 = vmul.f32 %v6455_v19, %v4220_v18  ;;  %v3923_v15 = vadd.f32 %v3899_v25, %v3683_v22  ;;  %v5169_v25 = vadd.f32 %v5145_v51, %v4977_v0  ;;  %v5170_v18 = vadd.f32 %v5146_v10, %v4978_v3  ;;  %v10875_v22 = vld [vmem:[#allocation4_spill] sm:$0xff] }
 0x9fd   : > { %3753 = vrot.lane.b32.xlu0 %v9161_v63, %s10573_s3  ;;  %v10878_v10 = vld [vmem:[#allocation40_spill] sm:$0xff] }
 0x9fe   : > { %v9173_v53 = vpop.permute.xlu1 %3953  ;;  %v9175_v21 = vpop.permute.xlu0 %4577  ;;  %v4307_v49 = vmul.f32 %v10874_v33, %v4235_v40 }
 0x9ff   : > { %v4028_v13 = vsel %vm1120_vm7, 0.0, %v9173_v53 }
 0xa00   : > { %3751 = vrot.lane.b32.xlu1 %v9132_v24, %s10573_s3  ;;  %v4091_v35 = vmul.f32 %v10872_v4, %v4028_v13 }
 0xa01   : > { %4161 = vrot.lane.b32.xlu0 %v9161_v63, %s10576_s0 }
 0xa02   : > { %v9187_v11 = vpop.permute.xlu1 %4361  ;;  %v9189_v37 = vpop.permute.xlu0 %3955 }
 0xa03   : > { %v4436_v2 = vsel %vm1190_vm9, 0.0, %v9187_v11  ;;  %v3992_v28 = vsel %vm1120_vm7, %v9173_v53, %v9189_v37  ;;  %v5275_v53 = vsel %vm1334_vm13, %v9157_v43, 0.0 }
 0xa04   : > { %4159 = vrot.lane.b32.xlu1 %v9132_v24, %s10576_s0  ;;  %v4451_v37 = vmul.f32 %v6438_v34, %v4436_v2  ;;  %v4092_v38 = vmul.f32 %v10872_v4, %v3992_v28  ;;  %v5290_v1 = vmul.f32 %v6449_v62, %v5275_v53  ;;  %v10877_v28 = vld [vmem:[#allocation52_spill] sm:$0xff] }
 0xa05   : > { %4593 = vrot.lane.b32.xlu0 %v9161_v63, %s10578_s29 }
 0xa06   : > { %v9212_v50 = vpop.permute.xlu1 %4793  ;;  %v4364_v61 = vpop.permute.xlu0 %4363  ;;  %v5362_v40 = vmul.f32 %v10876_v17, %v5290_v1 }
 0xa07   : > { %v4400_v16 = vsel %vm1190_vm9, %v9187_v11, %v4364_v61  ;;  %v4115_v11 = vadd.f32 %v4091_v35, %v3923_v15 }
 0xa08   : > { %4591 = vrot.lane.b32.xlu1 %v9132_v24, %s10578_s29 }
 0xa09   : > { %3971 = vrot.lane.b32.xlu0 %v9214_v36, %s10574_s9 }
 0xa0a   : > { %v9227_v59 = vpop.permute.xlu1 %5009  ;;  %v4796_v26 = vpop.permute.xlu0 %4795 }
 0xa0b   : > { %v4868_v13 = vsel %vm1264_vm11, %v4796_v26, 0.0 }
 0xa0c   : > { %4807 = vrot.lane.b32.xlu1 %v9132_v24, %s10580_s1  ;;  %v4884_v9 = vmul.f32 %v6434_v31, %v4868_v13 }
 0xa0d   : > { %4379 = vrot.lane.b32.xlu0 %v9214_v36, %s10577_s28 }
 0xa0e   : > { %v9247_v52 = vpop.permute.xlu1 %5201  ;;  %v9249_v23 = vpop.permute.xlu0 %5011  ;;  %v4956_v53 = vmul.f32 %v10878_v10, %v4884_v9 }
 0xa10   : > { %5023 = vrot.lane.b32.xlu1 %v9132_v24, %s10581_s11 }
 0xa11   : > { %4811 = vrot.lane.b32.xlu0 %v9214_v36, %s10580_s1 }
 0xa12   : > { %v3740_v7 = vpop.permute.xlu1 %3739  ;;  %v5204_v20 = vpop.permute.xlu0 %5203 }
 0xa13   : > { %v3776_v57 = vsel %vm1083_vm4, %v9148_v6, %v3740_v7  ;;  %v5239_v6 = vsel %vm1334_vm13, %v9120_v27, %v9157_v43  ;;  %v4452_v27 = vmul.f32 %v6434_v31, %v4400_v16  ;;  %v4832_v43 = vsel %vm1264_vm11, %v9212_v50, %v4796_v26 }
 0xa14   : > { %v3828_v47 = vmul.f32 %v6434_v31, %v3776_v57  ;;  %3969 = vrot.lane.b32.xlu1 %v9161_v63, %s10574_s9  ;;  %v5289_v54 = vmul.f32 %v6455_v19, %v5239_v6  ;;  %v4523_v50 = vmul.f32 %v10875_v22, %v4451_v37  ;;  %v5240_v2 = vsel %vm1334_vm13, %v9247_v52, %v5204_v20 }
 0xa15   : > { %3757 = vrot.lane.b32.xlu0 %v9263_v60, %s10573_s3  ;;  %v4524_v58 = vmul.f32 %v10875_v22, %v4452_v27  ;;  %v5048_v52 = vsel %vm1301_vm12, %v9227_v59, %v9249_v23 }
 0xa16   : > { %v3900_v61 = vmul.f32 %v10867_v30, %v3828_v47  ;;  %v4148_v39 = vpop.permute.xlu1 %4147  ;;  %v9298_v5 = vpop.permute.xlu0 %3741  ;;  %v5361_v51 = vmul.f32 %v10876_v17, %v5289_v54  ;;  %v10881_v54 = vld [vmem:[#allocation10_spill] sm:$0xff] }
 0xa17   : > { %v4184_v42 = vsel %vm1153_vm5, %v9159_v48, %v4148_v39  ;;  %v4331_v48 = vadd.f32 %v4307_v49, %v4115_v11  ;;  %v5291_v11 = vmul.f32 %v6455_v19, %v5240_v2  ;;  %v5386_v49 = vadd.f32 %v5362_v40, %v5170_v18  ;;  %v10884_v40 = vld [vmem:[#allocation105_spill] sm:$0xff] }
 0xa18   : > { %v3924_v55 = vadd.f32 %v3900_v61, %v3684_v41  ;;  %v4236_v30 = vmul.f32 %v6449_v62, %v4184_v42  ;;  %4377 = vrot.lane.b32.xlu1 %v9161_v63, %s10577_s28  ;;  %v4883_v41 = vmul.f32 %v6438_v34, %v4832_v43  ;;  %v10885_v2 = vld [vmem:[#allocation97_spill] sm:$0xff] }
 0xa19   : > { %4165 = vrot.lane.b32.xlu0 %v9263_v60, %s10576_s0  ;;  %v4547_v57 = vadd.f32 %v4523_v50, %v4331_v48  ;;  %v5363_v1 = vmul.f32 %v10881_v54, %v5291_v11 }
 0xa1a   : > { %v4116_v12 = vadd.f32 %v4092_v38, %v3924_v55  ;;  %v4308_v26 = vmul.f32 %v10874_v33, %v4236_v30  ;;  %v4580_v29 = vpop.permute.xlu1 %4579  ;;  %v9317_v32 = vpop.permute.xlu0 %4149  ;;  %v4955_v6 = vmul.f32 %v10878_v10, %v4883_v41  ;;  %v5385_v33 = vadd.f32 %v5361_v51, %v5169_v25  ;;  %v10879_v38 = vld [vmem:[#allocation19_spill] sm:$0xff] }
 0xa1b   : > { %v4616_v56 = vsel %vm1227_vm10, %v9175_v21, %v4580_v29  ;;  %v4652_v14 = vsel %vm1227_vm10, %v4580_v29, 0.0  ;;  %v5276_v21 = vsel %vm1334_vm13, %v5204_v20, 0.0  ;;  %v5084_v20 = vsel %vm1301_vm12, %v9249_v23, 0.0  ;;  %v10880_v55 = vld [vmem:[#allocation95_spill] sm:$0xff] }
 0xa1c   : > { %v4332_v4 = vadd.f32 %v4308_v26, %v4116_v12  ;;  %v4667_v35 = vmul.f32 %v6455_v19, %v4616_v56  ;;  %v4668_v7 = vmul.f32 %v6449_v62, %v4652_v14  ;;  %4809 = vrot.lane.b32.xlu1 %v9161_v63, %s10580_s1  ;;  %v5292_v37 = vmul.f32 %v6449_v62, %v5276_v21  ;;  %v10882_v12 = vld [vmem:[#allocation96_spill] sm:$0xff]  ;;  %v10883_v56 = vld [vmem:[#allocation99_spill] sm:$0xff] }
 0xa1d   : > { %4597 = vrot.lane.b32.xlu0 %v9263_v60, %s10578_s29  ;;  %v5147_v27 = vmul.f32 %v10879_v38, %v5048_v52  ;;  %v5148_v59 = vmul.f32 %v10879_v38, %v5084_v20  ;;  %v3573_v30 = vadd.f32 %v10880_v55, %v10864_v44  ;;  %v5470_v26 = vadd.f32 %v10882_v12, %v5386_v49  ;;  %v10886_v20 = vld [vmem:[#allocation98_spill] sm:$0xff] }
 0xa1e   : > { %v4548_v15 = vadd.f32 %v4524_v58, %v4332_v4  ;;  %v4739_v16 = vmul.f32 %v10877_v28, %v4667_v35  ;;  %v4740_v47 = vmul.f32 %v10877_v28, %v4668_v7  ;;  %v9338_v0 = vpop.permute.xlu1 %3957  ;;  %v9340_v3 = vpop.permute.xlu0 %4581  ;;  %v5364_v25 = vmul.f32 %v10881_v54, %v5292_v37 }
 0xa1f   : > { %v5469_v44 = vadd.f32 %v10882_v12, %v5385_v33  ;;  %v9373_v41 = vmax.f32 %v3573_v30, 0.0  ;;  %v5494_v35 = vmax.f32 %v5470_v26, 0.0  ;;  %v3577_v21 = vadd.f32 %v10885_v2, %v10884_v40 }
 0xa20   : > { %v4763_v61 = vadd.f32 %v4739_v16, %v4547_v57  ;;  %v4764_v39 = vadd.f32 %v4740_v47, %v4548_v15  ;;  %5025 = vrot.lane.b32.xlu1 %v9161_v63, %s10581_s11  ;;  %v3579_v11 = vadd.f32 %v10886_v20, %v10884_v40  ;;  %v3813_v33 = vsel %vm1083_vm4, 0.0, %v9298_v5 }
 0xa21   : > { %5029 = vrot.lane.b32.xlu0 %v9263_v60, %s10581_s11  ;;  %v5493_v17 = vmax.f32 %v5469_v44, 0.0  ;;  %v9389_v47 = vmax.f32 %v3577_v21, 0.0  ;;  %v4029_v30 = vsel %vm1120_vm7, 0.0, %v9338_v0  ;;  %v10890_v44 = vld [vmem:[#allocation74_spill] sm:$0xff] }
 0xa22   : > { %v4979_v42 = vadd.f32 %v4955_v6, %v4763_v61  ;;  %v4980_v23 = vadd.f32 %v4956_v53, %v4764_v39  ;;  %v9357_v43 = vpop.permute.xlu1 %4365  ;;  %v9359_v13 = vpop.permute.xlu0 %5013  ;;  %v9415_v39 = vmax.f32 %v3579_v11, 0.0 }
 0xa23   : > { %v4437_v26 = vsel %vm1190_vm9, 0.0, %v9357_v43 }
 0xa24   : > { %v5171_v48 = vadd.f32 %v5147_v27, %v4979_v42  ;;  %5217 = vrot.lane.b32.xlu1 %v9161_v63, %s10582_s2  ;;  %v5172_v18 = vadd.f32 %v5148_v59, %v4980_v23  ;;  %v3829_v27 = vmul.f32 %v6438_v34, %v3813_v33 }
 0xa25   : > { %5221 = vrot.lane.b32.xlu0 %v9263_v60, %s10582_s2 }
 0xa26   : > { %v9369_v22 = vpop.permute.xlu1 %4797  ;;  %v5388_v50 = vadd.f32 %v5364_v25, %v5172_v18  ;;  %v5387_v29 = vadd.f32 %v5363_v1, %v5171_v48  ;;  %v9375_v9 = vpop.permute.xlu0 %5205  ;;  %v4221_v1 = vsel %vm1153_vm5, 0.0, %v9317_v32  ;;  %v10888_v18 = vld [vmem:[#allocation41_spill] sm:$0xff] }
 0xa28   : > { %3755 = vrot.lane.b32.xlu1 %v9214_v36, %s10573_s3  ;;  %v5472_v14 = vadd.f32 %v10883_v56, %v5388_v50  ;;  %v5471_v58 = vadd.f32 %v10883_v56, %v5387_v29  ;;  %v10889_v50 = vld [vmem:[#allocation58_spill] sm:$0xff]  ;;  %v4093_v56 = vmul.f32 %v10890_v44, %v4029_v30 }
 0xa29   : > { %3975 = vrot.lane.b32.xlu0 %v9373_v41, %s10574_s9  ;;  %v3685_v12 = vmul.f32 %v10889_v50, %v10888_v18 }
 0xa2a   : > { %v3744_v4 = vpop.permute.xlu1 %3743  ;;  %v5496_v7 = vmax.f32 %v5472_v14, 0.0  ;;  %v5495_v51 = vmax.f32 %v5471_v58, 0.0  ;;  %v3960_v57 = vpop.permute.xlu0 %3959  ;;  %v10891_v14 = vld [vmem:[#allocation128_spill] sm:$0xff] }
 0xa2b   : > { %v3777_v38 = vsel %vm1083_vm4, %v9298_v5, %v3744_v4  ;;  %v10887_v5 = vld [vmem:[#allocation61_spill] sm:$0xff]  ;;  %v3686_v58 = vmul.f32 %v10889_v50, %v10891_v14  ;;  %v4237_v4 = vmul.f32 %v6455_v19, %v4221_v1  ;;  %v10897_v50 = vld [vmem:[#allocation50_spill] sm:$0xff]  ;;  %v10898_v14 = vld [vmem:[#allocation111_spill] sm:$0xff] }
 0xa2c   : > { %4163 = vrot.lane.b32.xlu1 %v9214_v36, %s10576_s0  ;;  %v5878_v15 = vpack.c.bf16 %v5496_v7, %v5494_v35  ;;  %v5880_v28 = vpack.c.bf16 %v5495_v51, %v5493_v17  ;;  %v3830_v42 = vmul.f32 %v6434_v31, %v3777_v38  ;;  %v3901_v55 = vmul.f32 %v10887_v5, %v3829_v27  ;;  %v10894_v38 = vld [vmem:[#allocation89_spill] sm:$0xff] }
 0xa2d   : > { %4383 = vrot.lane.b32.xlu0 %v9373_v41, %s10577_s28  ;;  %v3993_v7 = vsel %vm1120_vm7, %v9338_v0, %v3960_v57  ;;  %v10892_v0 = vld [vmem:[#allocation44_spill] sm:$0xff]  ;;  %v4309_v27 = vmul.f32 %v10894_v38, %v4237_v4 }
 0xa2e   : > { %v4152_v16 = vpop.permute.xlu1 %4151  ;;  %5879 = vmatprep.subr.bf16.mxu0 %v5878_v15  ;;  %v4368_v10 = vpop.permute.xlu0 %4367  ;;  %v3902_v25 = vmul.f32 %v10887_v5, %v3830_v42  ;;  %v3925_v35 = vadd.f32 %v3901_v55, %v3685_v12  ;;  %v10893_v57 = vld [vmem:[#allocation100_spill] sm:$0xff]  ;;  %v10895_v42 = vld [vmem:[#allocation5_spill] sm:$0xff]  ;;  %v3687_v12 = vmul.f32 %v10897_v50, %v8983_v45 }
 0xa2f   : > { %5881 = vmatpush1.bf16.msra.mxu0 %v5880_v28  ;;  %v4185_v29 = vsel %vm1153_vm5, %v9317_v32, %v4152_v16  ;;  %v4453_v32 = vmul.f32 %v6438_v34, %v4437_v26  ;;  %v4094_v28 = vmul.f32 %v10890_v44, %v3993_v7  ;;  %v4401_v16 = vsel %vm1190_vm9, %v9357_v43, %v4368_v10  ;;  %v10896_v10 = vld [vmem:[#allocation101_spill] sm:$0xff] }
 0xa30   : > { %4595 = vrot.lane.b32.xlu1 %v9214_v36, %s10578_s29  ;;  %v3926_v51 = vadd.f32 %v3902_v25, %v3686_v58  ;;  %v4238_v40 = vmul.f32 %v6449_v62, %v4185_v29  ;;  %v4117_v15 = vadd.f32 %v4093_v56, %v3925_v35  ;;  %v3583_v20 = vadd.f32 %v10893_v57, %v10892_v0 }
 0xa31   : > { %3761 = vrot.lane.b32.xlu0 %v9389_v47, %s10573_s3  ;;  %v4525_v5 = vmul.f32 %v10895_v42, %v4453_v32  ;;  %v4454_v43 = vmul.f32 %v6434_v31, %v4401_v16  ;;  %v9486_v25 = vadd.f32 %v10896_v10, %v10892_v0  ;;  %v3688_v26 = vmul.f32 %v10897_v50, %v8998_v8  ;;  %v10901_v50 = vld [vmem:[#allocation16_spill] sm:$0xff] }
 0xa32   : > { %v9395_v6 = vpop.permute.xlu1 %4583  ;;  %v9397_v53 = vpop.permute.xlu0 %4799  ;;  %v4118_v55 = vadd.f32 %v4094_v28, %v3926_v51  ;;  %v4310_v30 = vmul.f32 %v10894_v38, %v4238_v40  ;;  %v4333_v18 = vadd.f32 %v4309_v27, %v4117_v15  ;;  %v9494_v29 = vmax.f32 %v3583_v20, 0.0  ;;  %v10899_v27 = vld [vmem:[#allocation75_spill] sm:$0xff] }
 0xa33   : > { %v4617_v44 = vsel %vm1227_vm10, %v9340_v3, %v9395_v6  ;;  %v4653_v56 = vsel %vm1227_vm10, %v9395_v6, 0.0  ;;  %v4526_v51 = vmul.f32 %v10895_v42, %v4454_v43  ;;  %v4833_v3 = vsel %vm1264_vm11, %v9369_v22, %v9397_v53 }
 0xa34   : > { %5027 = vrot.lane.b32.xlu1 %v9214_v36, %s10581_s11  ;;  %v4549_v35 = vadd.f32 %v4525_v5, %v4333_v18  ;;  %v4334_v45 = vadd.f32 %v4310_v30, %v4118_v55  ;;  %v4869_v15 = vsel %vm1264_vm11, %v9397_v53, 0.0  ;;  %v4885_v38 = vmul.f32 %v6438_v34, %v4833_v3 }
 0xa35   : > { %4169 = vrot.lane.b32.xlu0 %v9389_v47, %s10576_s0  ;;  %v4886_v18 = vmul.f32 %v6434_v31, %v4869_v15  ;;  %v10903_v15 = vld [vmem:[#allocation69_spill] sm:$0xff] }
 0xa36   : > { %v9403_v52 = vpop.permute.xlu1 %5015  ;;  %v9407_v37 = vpop.permute.xlu0 %5207 }
 0xa38   : > { %5219 = vrot.lane.b32.xlu1 %v9214_v36, %s10582_s2 }
 0xa39   : > { %4601 = vrot.lane.b32.xlu0 %v9389_v47, %s10578_s29 }
 0xa3a   : > { %v9413_v61 = vpop.permute.xlu1 %3961  ;;  %v3746_v49 = vpop.permute.xlu0 %3745 }
 0xa3b   : > { %v3814_v2 = vsel %vm1083_vm4, 0.0, %v3746_v49  ;;  %v4030_v6 = vsel %vm1120_vm7, 0.0, %v9413_v61 }
 0xa3c   : > { %3973 = vrot.lane.b32.xlu1 %v9263_v60, %s10574_s9  ;;  %v3831_v11 = vmul.f32 %v6438_v34, %v3814_v2  ;;  %v4669_v2 = vmul.f32 %v6455_v19, %v4617_v44  ;;  %v4095_v53 = vmul.f32 %v10899_v27, %v4030_v6 }
 0xa3d   : > { %3979 = vrot.lane.b32.xlu0 %v9415_v39, %s10574_s9 }
 0xa3e   : > { %v9426_v59 = vpop.permute.xlu1 %4369  ;;  %v9429_v23 = vpop.permute.xlu0 %4153  ;;  %v3903_v58 = vmul.f32 %v10898_v14, %v3831_v11  ;;  %v4550_v11 = vadd.f32 %v4526_v51, %v4334_v45  ;;  %v5049_v51 = vsel %vm1301_vm12, %v9359_v13, %v9403_v52 }
 0xa3f   : > { %v4222_v7 = vsel %vm1153_vm5, 0.0, %v9429_v23  ;;  %v4438_v42 = vsel %vm1190_vm9, 0.0, %v9426_v59 }
 0xa40   : > { %4381 = vrot.lane.b32.xlu1 %v9263_v60, %s10577_s28  ;;  %v3927_v22 = vadd.f32 %v3903_v58, %v3687_v12  ;;  %v4239_v16 = vmul.f32 %v6455_v19, %v4222_v7 }
 0xa41   : > { %4387 = vrot.lane.b32.xlu0 %v9415_v39, %s10577_s28 }
 0xa42   : > { %v9438_v54 = vpop.permute.xlu1 %4801  ;;  %v9443_v48 = vpop.permute.xlu0 %4585  ;;  %v4311_v12 = vmul.f32 %v10901_v50, %v4239_v16  ;;  %v5277_v16 = vsel %vm1334_vm13, %v9407_v37, 0.0 }
 0xa44   : > { %4813 = vrot.lane.b32.xlu1 %v9263_v60, %s10580_s1 }
 0xa45   : > { %4819 = vrot.lane.b32.xlu0 %v9415_v39, %s10580_s1 }
 0xa46   : > { %v9461_v17 = vpop.permute.xlu1 %5017 }
 0xa47   : > { %v3964_v21 = vpop.permute.xlu0 %3963 }
 0xa48   : > { %3759 = vrot.lane.b32.xlu1 %v9373_v41, %s10573_s3  ;;  %v3994_v28 = vsel %vm1120_vm7, %v9413_v61, %v3964_v21 }
 0xa49   : > { %5035 = vrot.lane.b32.xlu0 %v9415_v39, %s10581_s11  ;;  %v4096_v5 = vmul.f32 %v10899_v27, %v3994_v28  ;;  %v10904_v27 = vld [vmem:[#allocation90_spill] sm:$0xff] }
 0xa4a   : > { %v9476_v33 = vpop.permute.xlu1 %5209 }
 0xa4b   : > { %v4372_v1 = vpop.permute.xlu0 %4371 }
 0xa4c   : > { %4167 = vrot.lane.b32.xlu1 %v9373_v41, %s10576_s0  ;;  %v4402_v0 = vsel %vm1190_vm9, %v9426_v59, %v4372_v1  ;;  %v10900_v1 = vld [vmem:[#allocation20_spill] sm:$0xff]  ;;  %v4119_v59 = vadd.f32 %v4095_v53, %v3927_v22  ;;  %v5241_v22 = vsel %vm1334_vm13, %v9375_v9, %v9407_v37 }
 0xa4d   : > { %5227 = vrot.lane.b32.xlu0 %v9415_v39, %s10582_s2  ;;  %v4741_v43 = vmul.f32 %v10900_v1, %v4669_v2 }
 0xa4e   : > { %v3748_v4 = vpop.permute.xlu1 %3747 }
 0xa4f   : > { %v3778_v32 = vsel %vm1083_vm4, %v3746_v49, %v3748_v4  ;;  %v9505_v8 = vpop.permute.xlu0 %3749  ;;  %v4670_v49 = vmul.f32 %v6449_v62, %v4653_v56  ;;  %v4455_v4 = vmul.f32 %v6438_v34, %v4438_v42  ;;  %v4765_v2 = vadd.f32 %v4741_v43, %v4549_v35 }
 0xa50   : > { %v3832_v40 = vmul.f32 %v6434_v31, %v3778_v32  ;;  %4599 = vrot.lane.b32.xlu1 %v9373_v41, %s10578_s29  ;;  %v9586_v42 = vmax.f32 %v9486_v25, 0.0  ;;  %v5294_v25 = vmul.f32 %v6449_v62, %v5277_v16 }
 0xa51   : > { %3765 = vrot.lane.b32.xlu0 %v9494_v29, %s10573_s3  ;;  %v4742_v10 = vmul.f32 %v10900_v1, %v4670_v49 }
 0xa52   : > { %v3904_v57 = vmul.f32 %v10898_v14, %v3832_v40  ;;  %v4156_v20 = vpop.permute.xlu1 %4155  ;;  %v10902_v14 = vld [vmem:[#allocation36_spill] sm:$0xff] }
 0xa53   : > { %v4186_v61 = vsel %vm1153_vm5, %v9429_v23, %v4156_v20  ;;  %v9532_v21 = vpop.permute.xlu0 %4157  ;;  %v4456_v23 = vmul.f32 %v6434_v31, %v4402_v0  ;;  %v4957_v58 = vmul.f32 %v10902_v14, %v4885_v38  ;;  %v4766_v49 = vadd.f32 %v4742_v10, %v4550_v11  ;;  %v10906_v10 = vld [vmem:[#allocation13_spill] sm:$0xff] }
 0xa54   : > { %v3928_v55 = vadd.f32 %v3904_v57, %v3688_v26  ;;  %v4240_v30 = vmul.f32 %v6449_v62, %v4186_v61  ;;  %4815 = vrot.lane.b32.xlu1 %v9373_v41, %s10580_s1  ;;  %v4958_v13 = vmul.f32 %v10902_v14, %v4886_v18  ;;  %v4335_v0 = vadd.f32 %v4311_v12, %v4119_v59 }
 0xa55   : > { %4173 = vrot.lane.b32.xlu0 %v9494_v29, %s10576_s0  ;;  %v4528_v28 = vmul.f32 %v10903_v15, %v4456_v23  ;;  %v4527_v57 = vmul.f32 %v10903_v15, %v4455_v4 }
 0xa56   : > { %v4120_v26 = vadd.f32 %v4096_v5, %v3928_v55  ;;  %v4312_v44 = vmul.f32 %v10901_v50, %v4240_v30  ;;  %v4588_v56 = vpop.permute.xlu1 %4587  ;;  %v4981_v5 = vadd.f32 %v4957_v58, %v4765_v2  ;;  %v10905_v55 = vld [vmem:[#allocation31_spill] sm:$0xff]  ;;  %v5293_v50 = vmul.f32 %v6455_v19, %v5241_v22 }
 0xa57   : > { %v4618_v45 = vsel %vm1227_vm10, %v9443_v48, %v4588_v56  ;;  %v4654_v7 = vsel %vm1227_vm10, %v4588_v56, 0.0  ;;  %v9553_v32 = vpop.permute.xlu0 %4589  ;;  %v5085_v48 = vsel %vm1301_vm12, %v9403_v52, 0.0  ;;  %v5149_v30 = vmul.f32 %v10905_v55, %v5049_v51  ;;  %v10907_v51 = vld [vmem:[#allocation37_spill] sm:$0xff] }
 0xa58   : > { %v4336_v3 = vadd.f32 %v4312_v44, %v4120_v26  ;;  %v4671_v6 = vmul.f32 %v6455_v19, %v4618_v45  ;;  %v4672_v40 = vmul.f32 %v6449_v62, %v4654_v7  ;;  %5031 = vrot.lane.b32.xlu1 %v9373_v41, %s10581_s11  ;;  %v5150_v1 = vmul.f32 %v10905_v55, %v5085_v48  ;;  %v10911_v55 = vld [vmem:[#allocation121_spill] sm:$0xff] }
 0xa59   : > { %4605 = vrot.lane.b32.xlu0 %v9494_v29, %s10578_s29  ;;  %v4551_v43 = vadd.f32 %v4527_v57, %v4335_v0  ;;  %v5173_v58 = vadd.f32 %v5149_v30, %v4981_v5 }
 0xa5a   : > { %v4804_v35 = vpop.permute.xlu1 %4803  ;;  %v4552_v20 = vadd.f32 %v4528_v28, %v4336_v3  ;;  %v4743_v53 = vmul.f32 %v10904_v27, %v4671_v6  ;;  %v4744_v61 = vmul.f32 %v10904_v27, %v4672_v40  ;;  %v10908_v40 = vld [vmem:[#allocation93_spill] sm:$0xff] }
 0xa5b   : > { %v4834_v52 = vsel %vm1264_vm11, %v9438_v54, %v4804_v35  ;;  %v4870_v11 = vsel %vm1264_vm11, %v4804_v35, 0.0  ;;  %v9577_v38 = vpop.permute.xlu0 %5021  ;;  %v4982_v54 = vadd.f32 %v4958_v13, %v4766_v49  ;;  %v5365_v2 = vmul.f32 %v10908_v40, %v5293_v50 }
 0xa5c   : > { %v4887_v9 = vmul.f32 %v6438_v34, %v4834_v52  ;;  %v4888_v37 = vmul.f32 %v6434_v31, %v4870_v11  ;;  %5223 = vrot.lane.b32.xlu1 %v9373_v41, %s10582_s2  ;;  %v4767_v56 = vadd.f32 %v4743_v53, %v4551_v43  ;;  %v4768_v14 = vadd.f32 %v4744_v61, %v4552_v20  ;;  %v10909_v20 = vld [vmem:[#allocation46_spill] sm:$0xff]  ;;  %v10912_v43 = vld [vmem:[#allocation107_spill] sm:$0xff] }
 0xa5d   : > { %4821 = vrot.lane.b32.xlu0 %v9494_v29, %s10580_s1  ;;  %v5174_v4 = vadd.f32 %v5150_v1, %v4982_v54  ;;  %v5366_v49 = vmul.f32 %v10908_v40, %v5294_v25  ;;  %v5389_v16 = vadd.f32 %v5365_v2, %v5173_v58 }
 0xa5e   : > { %v4959_v18 = vmul.f32 %v10906_v10, %v4887_v9  ;;  %v4960_v23 = vmul.f32 %v10906_v10, %v4888_v37  ;;  %v5020_v59 = vpop.permute.xlu1 %5019  ;;  %v10910_v9 = vld [vmem:[#allocation39_spill] sm:$0xff] }
 0xa5f   : > { %v5050_v12 = vsel %vm1301_vm12, %v9461_v17, %v5020_v59  ;;  %v5086_v26 = vsel %vm1301_vm12, %v5020_v59, 0.0  ;;  %v9599_v44 = vpop.permute.xlu0 %5213  ;;  %v5390_v0 = vadd.f32 %v5366_v49, %v5174_v4  ;;  %v5473_v5 = vadd.f32 %v10910_v9, %v5389_v16  ;;  %v10913_v10 = vld [vmem:[#allocation103_spill] sm:$0xff] }
 0xa60   : > { %3977 = vrot.lane.b32.xlu1 %v9389_v47, %s10574_s9  ;;  %v4983_v45 = vadd.f32 %v4959_v18, %v4767_v56  ;;  %v4984_v7 = vadd.f32 %v4960_v23, %v4768_v14  ;;  %v5151_v3 = vmul.f32 %v10907_v51, %v5050_v12  ;;  %v5152_v17 = vmul.f32 %v10907_v51, %v5086_v26 }
 0xa61   : > { %3983 = vrot.lane.b32.xlu0 %v9586_v42, %s10574_s9  ;;  %v5474_v37 = vadd.f32 %v10910_v9, %v5390_v0  ;;  %v3589_v18 = vadd.f32 %v10913_v10, %v10912_v43  ;;  %v5497_v25 = vmax.f32 %v5473_v5, 0.0 }
 0xa62   : > { %v5212_v6 = vpop.permute.xlu1 %5211  ;;  %v5175_v35 = vadd.f32 %v5151_v3, %v4983_v45  ;;  %v5176_v57 = vadd.f32 %v5152_v17, %v4984_v7  ;;  %v10914_v3 = vld [vmem:[#allocation104_spill] sm:$0xff] }
 0xa63   : > { %v5242_v48 = vsel %vm1334_vm13, %v9476_v33, %v5212_v6  ;;  %v5278_v15 = vsel %vm1334_vm13, %v5212_v6, 0.0  ;;  %v9612_v28 = vpop.permute.xlu0 %3967  ;;  %v5498_v59 = vmax.f32 %v5474_v37, 0.0  ;;  %v9646_v56 = vmax.f32 %v3589_v18, 0.0 }
 0xa64   : > { %v5295_v13 = vmul.f32 %v6455_v19, %v5242_v48  ;;  %v5296_v22 = vmul.f32 %v6449_v62, %v5278_v15  ;;  %4385 = vrot.lane.b32.xlu1 %v9389_v47, %s10577_s28  ;;  %v3591_v17 = vadd.f32 %v10914_v3, %v10912_v43  ;;  %v4223_v43 = vsel %vm1153_vm5, 0.0, %v9532_v21  ;;  %v10918_v3 = vld [vmem:[#allocation11_spill] sm:$0xff] }
 0xa65   : > { %4391 = vrot.lane.b32.xlu0 %v9586_v42, %s10577_s28 }
 0xa66   : > { %v5367_v33 = vmul.f32 %v10909_v20, %v5295_v13  ;;  %v5368_v52 = vmul.f32 %v10909_v20, %v5296_v22  ;;  %v9622_v11 = vpop.permute.xlu1 %3965  ;;  %v9668_v2 = vmax.f32 %v3591_v17, 0.0 }
 0xa67   : > { %v9624_v27 = vpop.permute.xlu0 %4375 }
 0xa68   : > { %v5391_v53 = vadd.f32 %v5367_v33, %v5175_v35  ;;  %4817 = vrot.lane.b32.xlu1 %v9389_v47, %s10580_s1  ;;  %v5392_v61 = vadd.f32 %v5368_v52, %v5176_v57  ;;  %v3815_v57 = vsel %vm1083_vm4, 0.0, %v9505_v8  ;;  %v10915_v52 = vld [vmem:[#allocation63_spill] sm:$0xff] }
 0xa69   : > { %5039 = vrot.lane.b32.xlu0 %v9586_v42, %s10581_s11  ;;  %v3833_v33 = vmul.f32 %v6438_v34, %v3815_v57 }
 0xa6a   : > { %v9632_v54 = vpop.permute.xlu1 %4373  ;;  %v5476_v30 = vadd.f32 %v10911_v55, %v5392_v61  ;;  %v5475_v1 = vadd.f32 %v10911_v55, %v5391_v53  ;;  %v3995_v55 = vsel %vm1120_vm7, %v9622_v11, %v9612_v28  ;;  %v921_v28 = vld [vmem:[%s10284_s24 + $0x8] sm:$0xff] }
 0xa6b   : > { %v9638_v23 = vpop.permute.xlu0 %5215 }
 0xa6c   : > { %5033 = vrot.lane.b32.xlu1 %v9389_v47, %s10581_s11  ;;  %v5500_v50 = vmax.f32 %v5476_v30, 0.0  ;;  %v5499_v12 = vmax.f32 %v5475_v1, 0.0  ;;  %v4031_v30 = vsel %vm1120_vm7, 0.0, %v9622_v11  ;;  %v3905_v1 = vmul.f32 %v10915_v52, %v3833_v33 }
 0xa6d   : > { %5231 = vrot.lane.b32.xlu0 %v9586_v42, %s10582_s2 }
 0xa6e   : > { %v9644_v26 = vpop.permute.xlu1 %4805  ;;  %v5882_v58 = vpack.c.bf16 %v5500_v50, %v5498_v59  ;;  %v5884_v4 = vpack.c.bf16 %v5499_v12, %v5497_v25  ;;  %v10917_v50 = vld [vmem:[#allocation76_spill] sm:$0xff] }
 0xa6f   : > { %v9648_v14 = vpop.permute.xlu0 %3753  ;;  %v4097_v25 = vmul.f32 %v10917_v50, %v4031_v30  ;;  %v4098_v12 = vmul.f32 %v10917_v50, %v3995_v55 }
 0xa70   : > { %5225 = vrot.lane.b32.xlu1 %v9389_v47, %s10582_s2  ;;  %5883 = vmatprep.subr.bf16.mxu0 %v5882_v58  ;;  %v4403_v58 = vsel %vm1190_vm9, %v9632_v54, %v9624_v27 }
 0xa71   : > { %3769 = vrot.lane.b32.xlu0 %v9646_v56, %s10573_s3  ;;  %5885 = vmatpush1.bf16.msra.mxu0 %v5884_v4  ;;  %v4439_v4 = vsel %vm1190_vm9, 0.0, %v9632_v54 }
 0xa72   : > { %v3752_v45 = vpop.permute.xlu1 %3751  ;;  %v4457_v33 = vmul.f32 %v6438_v34, %v4439_v4 }
 0xa73   : > { %v9654_v7 = vpop.permute.xlu0 %4161  ;;  %v3779_v22 = vsel %vm1083_vm4, %v9505_v8, %v3752_v45  ;;  %v10916_v8 = vld [vmem:[#allocation60_spill] sm:$0xff] }
 0xa74   : > { %3763 = vrot.lane.b32.xlu1 %v9415_v39, %s10573_s3  ;;  %v3834_v0 = vmul.f32 %v6434_v31, %v3779_v22  ;;  %v3690_v5 = vmul.f32 %v10916_v8, %v9132_v24  ;;  %v3689_v11 = vmul.f32 %v10916_v8, %v9083_v46  ;;  %v3816_v46 = vsel %vm1083_vm4, 0.0, %v9648_v14 }
 0xa75   : > { %4177 = vrot.lane.b32.xlu0 %v9646_v56, %s10576_s0  ;;  %v3835_v8 = vmul.f32 %v6438_v34, %v3816_v46  ;;  %v5243_v46 = vsel %vm1334_vm13, %v9599_v44, %v9638_v23 }
 0xa76   : > { %v4160_v51 = vpop.permute.xlu1 %4159  ;;  %v3906_v53 = vmul.f32 %v10915_v52, %v3834_v0  ;;  %v3929_v45 = vadd.f32 %v3905_v1, %v3689_v11  ;;  %v926_v0 = vld [vmem:[%s10286_s26] sm:$0xff]  ;;  %v4458_v52 = vmul.f32 %v6434_v31, %v4403_v58  ;;  %v10921_v58 = vld [vmem:[#allocation113_spill] sm:$0xff] }
 0xa77   : > { %v9662_v6 = vpop.permute.xlu0 %4593  ;;  %v4187_v9 = vsel %vm1153_vm5, %v9532_v21, %v4160_v51  ;;  %v4241_v21 = vmul.f32 %v6455_v19, %v4223_v43  ;;  %v3907_v4 = vmul.f32 %v10921_v58, %v3835_v8 }
 0xa78   : > { %4171 = vrot.lane.b32.xlu1 %v9415_v39, %s10576_s0  ;;  %v3930_v10 = vadd.f32 %v3906_v53, %v3690_v5  ;;  %v4242_v24 = vmul.f32 %v6449_v62, %v4187_v9  ;;  %v4121_v54 = vadd.f32 %v4097_v25, %v3929_v45  ;;  %v10920_v25 = vld [vmem:[#allocation18_spill] sm:$0xff] }
 0xa79   : > { %4609 = vrot.lane.b32.xlu0 %v9646_v56, %s10578_s29  ;;  %v4313_v9 = vmul.f32 %v10918_v3, %v4241_v21 }
 0xa7a   : > { %v4592_v40 = vpop.permute.xlu1 %4591  ;;  %v4122_v51 = vadd.f32 %v4098_v12, %v3930_v10  ;;  %v4314_v17 = vmul.f32 %v10918_v3, %v4242_v24  ;;  %v10919_v10 = vld [vmem:[#allocation51_spill] sm:$0xff]  ;;  %v4529_v12 = vmul.f32 %v10920_v25, %v4457_v33  ;;  %v10923_v33 = vld [vmem:[#allocation78_spill] sm:$0xff] }
 0xa7b   : > { %v9670_v49 = vpop.permute.xlu0 %3971  ;;  %v4619_v27 = vsel %vm1227_vm10, %v9553_v32, %v4592_v40  ;;  %v4655_v53 = vsel %vm1227_vm10, %v4592_v40, 0.0  ;;  %v4224_v32 = vsel %vm1153_vm5, 0.0, %v9654_v7  ;;  %v928_v40 = vld [vmem:[%s10286_s26 + $0x10] sm:$0xff]  ;;  %v3691_v24 = vmul.f32 %v10919_v10, %v9161_v63 }
 0xa7c   : > { %4603 = vrot.lane.b32.xlu1 %v9415_v39, %s10578_s29  ;;  %v4338_v5 = vadd.f32 %v4314_v17, %v4122_v51  ;;  %v4673_v55 = vmul.f32 %v6455_v19, %v4619_v27  ;;  %v4674_v43 = vmul.f32 %v6449_v62, %v4655_v53  ;;  %v3692_v11 = vmul.f32 %v10919_v10, %v9214_v36  ;;  %v10922_v17 = vld [vmem:[#allocation35_spill] sm:$0xff] }
 0xa7d   : > { %3987 = vrot.lane.b32.xlu0 %v9668_v2, %s10574_s9  ;;  %v4337_v50 = vadd.f32 %v4313_v9, %v4121_v54  ;;  %v4243_v63 = vmul.f32 %v6455_v19, %v4224_v32  ;;  %v5279_v51 = vsel %vm1334_vm13, %v9638_v23, 0.0 }
 0xa7e   : > { %v9676_v48 = vpop.permute.xlu1 %4807  ;;  %v4746_v54 = vmul.f32 %v10922_v17, %v4674_v43  ;;  %v3931_v43 = vadd.f32 %v3907_v4, %v3691_v24 }
 0xa7f   : > { %v9678_v15 = vpop.permute.xlu0 %4379  ;;  %v4835_v30 = vsel %vm1264_vm11, %v9644_v26, %v9676_v48  ;;  %v4530_v26 = vmul.f32 %v10920_v25, %v4458_v52  ;;  %v4871_v45 = vsel %vm1264_vm11, %v9676_v48, 0.0  ;;  %v4553_v44 = vadd.f32 %v4529_v12, %v4337_v50 }
 0xa80   : > { %3981 = vrot.lane.b32.xlu1 %v9494_v29, %s10574_s9  ;;  %v4889_v36 = vmul.f32 %v6438_v34, %v4835_v30  ;;  %v4890_v8 = vmul.f32 %v6434_v31, %v4871_v45  ;;  %v10925_v30 = vld [vmem:[#allocation23_spill] sm:$0xff] }
 0xa81   : > { %4395 = vrot.lane.b32.xlu0 %v9668_v2, %s10577_s28  ;;  %v4554_v3 = vadd.f32 %v4530_v26, %v4338_v5  ;;  %v10924_v5 = vld [vmem:[#allocation77_spill] sm:$0xff] }
 0xa82   : > { %v9684_v13 = vpop.permute.xlu1 %5023 }
 0xa83   : > { %v9688_v16 = vpop.permute.xlu0 %4811  ;;  %v5051_v50 = vsel %vm1301_vm12, %v9577_v38, %v9684_v13  ;;  %v4770_v12 = vadd.f32 %v4746_v54, %v4554_v3  ;;  %v5087_v45 = vsel %vm1301_vm12, %v9684_v13, 0.0 }
 0xa84   : > { %4389 = vrot.lane.b32.xlu1 %v9494_v29, %s10577_s28 }
 0xa85   : > { %4827 = vrot.lane.b32.xlu0 %v9668_v2, %s10580_s1 }
 0xa86   : > { %v9695_v35 = vpop.permute.xlu1 %3969 }
 0xa87   : > { %v9699_v20 = vpop.permute.xlu0 %3757  ;;  %v4032_v21 = vsel %vm1120_vm7, 0.0, %v9695_v35 }
 0xa88   : > { %5037 = vrot.lane.b32.xlu1 %v9494_v29, %s10581_s11  ;;  %v4099_v52 = vmul.f32 %v10923_v33, %v4032_v21 }
 0xa89   : > { %5041 = vrot.lane.b32.xlu0 %v9646_v56, %s10581_s11 }
 0xa8a   : > { %v9707_v61 = vpop.permute.xlu1 %4377  ;;  %v4123_v26 = vadd.f32 %v4099_v52, %v3931_v43  ;;  %v10928_v43 = vld [vmem:[#allocation21_spill] sm:$0xff] }
 0xa8b   : > { %v9711_v37 = vpop.permute.xlu0 %4165  ;;  %v4440_v48 = vsel %vm1190_vm9, 0.0, %v9707_v61  ;;  %v4404_v23 = vsel %vm1190_vm9, %v9707_v61, %v9678_v15 }
 0xa8c   : > { %3767 = vrot.lane.b32.xlu1 %v9586_v42, %s10573_s3  ;;  %v4459_v15 = vmul.f32 %v6438_v34, %v4440_v48  ;;  %v4460_v21 = vmul.f32 %v6434_v31, %v4404_v23 }
 0xa8d   : > { %5233 = vrot.lane.b32.xlu0 %v9646_v56, %s10582_s2 }
 0xa8e   : > { %v9728_v18 = vpop.permute.xlu1 %4809 }
 0xa8f   : > { %v9733_v59 = vpop.permute.xlu0 %4597 }
 0xa90   : > { %4175 = vrot.lane.b32.xlu1 %v9586_v42, %s10576_s0 }
 0xa91   : > { %5520 = vperm.xlu0 %6038, %v921_v28  }
 0xa92   : > { %v9750_v22 = vpop.permute.xlu1 %5025 }
 0xa93   : > { %v9757_v57 = vpop.permute.xlu0 %5029 }
 0xa94   : > { %4607 = vrot.lane.b32.xlu1 %v9586_v42, %s10578_s29 }
 0xa95   : > { %5623 = vperm.xlu0 %6038, %v926_v0   ;;  %v4745_v0 = vmul.f32 %v10922_v17, %v4673_v55  ;;  %v4315_v55 = vmul.f32 %v10924_v5, %v4243_v63  ;;  %v4872_v17 = vsel %vm1264_vm11, %v9688_v16, 0.0 }
 0xa96   : > { %v9772_v1 = vpop.permute.xlu1 %5217 }
 0xa97   : > { %v9780_v28 = vpop.permute.xlu0 %5221  ;;  %v4769_v10 = vadd.f32 %v4745_v0, %v4553_v44  ;;  %v10927_v0 = vld [vmem:[#allocation28_spill] sm:$0xff]  ;;  %v4339_v52 = vadd.f32 %v4315_v55, %v4123_v26 }
 0xa98   : > { %4823 = vrot.lane.b32.xlu1 %v9586_v42, %s10580_s1  ;;  %v4532_v48 = vmul.f32 %v10927_v0, %v4460_v21  ;;  %v10929_v26 = vld [vmem:[#allocation92_spill] sm:$0xff] }
 0xa99   : > { %5633 = vperm.xlu0 %6038, %v928_v40   ;;  %v4961_v40 = vmul.f32 %v10925_v30, %v4889_v36  ;;  %v10926_v36 = vld [vmem:[#allocation25_spill] sm:$0xff] }
 0xa9a   : > { %v3756_v27 = vpop.permute.xlu1 %3755  ;;  %v5153_v3 = vmul.f32 %v10926_v36, %v5051_v50  ;;  %v5154_v55 = vmul.f32 %v10926_v36, %v5087_v45 }
 0xa9b   : > { %v3780_v53 = vsel %vm1083_vm4, %v9648_v14, %v3756_v27  ;;  %v9807_v9 = vpop.permute.xlu0 %3975  ;;  %v3996_v14 = vsel %vm1120_vm7, %v9695_v35, %v9670_v49  ;;  %v4962_v49 = vmul.f32 %v10925_v30, %v4890_v8 }
 0xa9c   : > { %v3836_v32 = vmul.f32 %v6434_v31, %v3780_v53  ;;  %3985 = vrot.lane.b32.xlu1 %v9646_v56, %s10574_s9  ;;  %v4100_v35 = vmul.f32 %v10923_v33, %v3996_v14 }
 0xa9e   : > { %v3908_v61 = vmul.f32 %v10921_v58, %v3836_v32  ;;  %v4164_v25 = vpop.permute.xlu1 %4163  ;;  %v4985_v58 = vadd.f32 %v4961_v40, %v4769_v10  ;;  %v5297_v32 = vmul.f32 %v6455_v19, %v5243_v46 }
 0xa9f   : > { %v4188_v24 = vsel %vm1153_vm5, %v9654_v7, %v4164_v25  ;;  %v9829_v4 = vpop.permute.xlu0 %4383  ;;  %v4836_v7 = vsel %vm1264_vm11, %v9728_v18, %v9688_v16 }
 0xaa0   : > { %v3932_v63 = vadd.f32 %v3908_v61, %v3692_v11  ;;  %v4244_v38 = vmul.f32 %v6449_v62, %v4188_v24  ;;  %4393 = vrot.lane.b32.xlu1 %v9646_v56, %s10577_s28  ;;  %v4531_v11 = vmul.f32 %v10927_v0, %v4459_v15  ;;  %v4891_v18 = vmul.f32 %v6438_v34, %v4836_v7 }
 0xaa1   : > { %v5298_v15 = vmul.f32 %v6449_v62, %v5279_v51  ;;  %v5177_v25 = vadd.f32 %v5153_v3, %v4985_v58 }
 0xaa2   : > { %v4124_v27 = vadd.f32 %v4100_v35, %v3932_v63  ;;  %v4316_v54 = vmul.f32 %v10924_v5, %v4244_v38  ;;  %v4596_v33 = vpop.permute.xlu1 %4595  ;;  %v4986_v5 = vadd.f32 %v4962_v49, %v4770_v12  ;;  %v4555_v30 = vadd.f32 %v4531_v11, %v4339_v52  ;;  %v10930_v63 = vld [vmem:[#allocation7_spill] sm:$0xff] }
 0xaa3   : > { %v4620_v13 = vsel %vm1227_vm10, %v9662_v6, %v4596_v33  ;;  %v4656_v53 = vsel %vm1227_vm10, %v4596_v33, 0.0  ;;  %v9850_v44 = vpop.permute.xlu0 %3761  ;;  %v4892_v6 = vmul.f32 %v6434_v31, %v4872_v17  ;;  %v4963_v21 = vmul.f32 %v10929_v26, %v4891_v18 }
 0xaa4   : > { %v4340_v8 = vadd.f32 %v4316_v54, %v4124_v27  ;;  %v4675_v16 = vmul.f32 %v6455_v19, %v4620_v13  ;;  %v4676_v23 = vmul.f32 %v6449_v62, %v4656_v53  ;;  %4825 = vrot.lane.b32.xlu1 %v9646_v56, %s10580_s1  ;;  %v5178_v24 = vadd.f32 %v5154_v55, %v4986_v5  ;;  %v10931_v27 = vld [vmem:[#allocation102_spill] sm:$0xff]  ;;  %v10932_v53 = vld [vmem:[#allocation108_spill] sm:$0xff]  ;;  %s10981_s1 = sld [smem:[#allocation144_spill]] }
 0xaa5   : > { %v4964_v49 = vmul.f32 %v10929_v26, %v4892_v6  ;;  %v5369_v38 = vmul.f32 %v10930_v63, %v5297_v32  ;;  %v5370_v58 = vmul.f32 %v10930_v63, %v5298_v15  ;;  %v10933_v32 = vld [vmem:[#allocation116_spill] sm:$0xff] }
 0xaa6   : > { %v4556_v40 = vadd.f32 %v4532_v48, %v4340_v8  ;;  %v4747_v14 = vmul.f32 %v10928_v43, %v4675_v16  ;;  %v4748_v10 = vmul.f32 %v10928_v43, %v4676_v23  ;;  %v5028_v50 = vpop.permute.xlu1 %5027  ;;  %v920_v63 = vld [vmem:[%s10284_s24] sm:$0xff] }
 0xaa7   : > { %v9863_v61 = vpop.permute.xlu0 %4169  ;;  %v5052_v35 = vsel %vm1301_vm12, %v9750_v22, %v5028_v50  ;;  %v5088_v51 = vsel %vm1301_vm12, %v5028_v50, 0.0  ;;  %v5393_v11 = vadd.f32 %v5369_v38, %v5177_v25  ;;  %v5394_v33 = vadd.f32 %v5370_v58, %v5178_v24  ;;  %v927_v58 = vld [vmem:[%s10286_s26 + $0x8] sm:$0xff] }
 0xaa8   : > { %v4771_v46 = vadd.f32 %v4747_v14, %v4555_v30  ;;  %v4772_v12 = vadd.f32 %v4748_v10, %v4556_v40  ;;  %3771 = vrot.lane.b32.xlu1 %v9668_v2, %s10573_s3  ;;  %v5155_v54 = vmul.f32 %v10931_v27, %v5052_v35  ;;  %v5156_v52 = vmul.f32 %v10931_v27, %v5088_v51  ;;  %v10934_v40 = vld [vmem:[#allocation124_spill] sm:$0xff]  ;;  %v922_v51 = vld [vmem:[%s10284_s24 + $0x10] sm:$0xff] }
 0xaa9   : > { %v5477_v5 = vadd.f32 %v10933_v32, %v5393_v11  ;;  %v5478_v30 = vadd.f32 %v10933_v32, %v5394_v33  ;;  %v10936_v32 = vld [vmem:[#allocation62_spill] sm:$0xff] }
 0xaaa   : > { %v4987_v45 = vadd.f32 %v4963_v21, %v4771_v46  ;;  %v5220_v36 = vpop.permute.xlu1 %5219  ;;  %v4988_v3 = vadd.f32 %v4964_v49, %v4772_v12 }
 0xaab   : > { %v5244_v7 = vsel %vm1334_vm13, %v9772_v1, %v5220_v36  ;;  %v5280_v17 = vsel %vm1334_vm13, %v5220_v36, 0.0  ;;  %v9877_v0 = vpop.permute.xlu0 %4601  ;;  %v5501_v50 = vmax.f32 %v5477_v5, 0.0  ;;  %v5502_v26 = vmax.f32 %v5478_v30, 0.0 }
 0xaac   : > { %v5299_v22 = vmul.f32 %v6455_v19, %v5244_v7  ;;  %4179 = vrot.lane.b32.xlu1 %v9668_v2, %s10576_s0  ;;  %v5300_v48 = vmul.f32 %v6449_v62, %v5280_v17  ;;  %v5179_v13 = vadd.f32 %v5155_v54, %v4987_v45  ;;  %v5180_v8 = vadd.f32 %v5156_v52, %v4988_v3  ;;  %s5920_s0 = smul.u32 48, %s10979_s7 }
 0xaad   : > { %v3694_v5 = vmul.f32 %v10936_v32, %v9373_v41  ;;  %v10937_v41 = vld [vmem:[#allocation79_spill] sm:$0xff] }
 0xaae   : > { %v5371_v1 = vmul.f32 %v10932_v53, %v5299_v22  ;;  %v3974_v18 = vpop.permute.xlu1 %3973  ;;  %v5372_v16 = vmul.f32 %v10932_v53, %v5300_v48  ;;  %v3817_v48 = vsel %vm1083_vm4, 0.0, %v9699_v20 }
 0xaaf   : > { %v9887_v23 = vpop.permute.xlu0 %3979  ;;  %v4033_v30 = vsel %vm1120_vm7, 0.0, %v3974_v18 }
 0xab0   : > { %v5395_v55 = vadd.f32 %v5371_v1, %v5179_v13  ;;  %4611 = vrot.lane.b32.xlu1 %v9668_v2, %s10578_s29  ;;  %v5396_v6 = vadd.f32 %v5372_v16, %v5180_v8  ;;  %v10935_v13 = vld [vmem:[#allocation65_spill] sm:$0xff]  ;;  %v3837_v1 = vmul.f32 %v6438_v34, %v3817_v48 }
 0xab2   : > { %v5479_v43 = vadd.f32 %v10934_v40, %v5395_v55  ;;  %v4382_v14 = vpop.permute.xlu1 %4381  ;;  %v5480_v10 = vadd.f32 %v10934_v40, %v5396_v6  ;;  %v3997_v55 = vsel %vm1120_vm7, %v3974_v18, %v9807_v9  ;;  %v4101_v18 = vmul.f32 %v10937_v41, %v4033_v30 }
 0xab3   : > { %v9895_v25 = vpop.permute.xlu0 %4387  ;;  %v4441_v9 = vsel %vm1190_vm9, 0.0, %v4382_v14 }
 0xab4   : > { %v5503_v15 = vmax.f32 %v5479_v43, 0.0  ;;  %5043 = vrot.lane.b32.xlu1 %v9668_v2, %s10581_s11  ;;  %v5504_v21 = vmax.f32 %v5480_v10, 0.0  ;;  %v3909_v10 = vmul.f32 %v10935_v13, %v3837_v1 }
 0xab6   : > { %v9899_v46 = vpop.permute.xlu1 %4813  ;;  %v5888_v12 = vpack.c.bf16 %v5503_v15, %v5501_v50  ;;  %v5886_v24 = vpack.c.bf16 %v5504_v21, %v5502_v26  ;;  %v3818_v50 = vsel %vm1083_vm4, 0.0, %v9850_v44  ;;  %v4102_v26 = vmul.f32 %v10937_v41, %v3997_v55 }
 0xab7   : > { %v9903_v49 = vpop.permute.xlu0 %4819 }
 0xab8   : > { %5235 = vrot.lane.b32.xlu1 %v9668_v2, %s10582_s2  ;;  %5887 = vmatprep.subr.bf16.mxu0 %v5886_v24  ;;  %v3839_v24 = vmul.f32 %v6438_v34, %v3818_v50 }
 0xab9   : > { %5889 = vmatpush1.bf16.msra.mxu0 %v5888_v12  ;;  %v4405_v12 = vsel %vm1190_vm9, %v4382_v14, %v9829_v4  ;;  %v4226_v4 = vsel %vm1153_vm5, 0.0, %v9863_v61 }
 0xaba   : > { %v3760_v35 = vpop.permute.xlu1 %3759  ;;  %v4462_v14 = vmul.f32 %v6434_v31, %v4405_v12  ;;  %v4247_v55 = vmul.f32 %v6455_v19, %v4226_v4  ;;  %v10944_v4 = vld [vmem:[#allocation24_spill] sm:$0xff] }
 0xabb   : > { %v9910_v45 = vpop.permute.xlu0 %5035  ;;  %v3781_v27 = vsel %vm1083_vm4, %v9699_v20, %v3760_v35  ;;  %v4225_v20 = vsel %vm1153_vm5, 0.0, %v9711_v37 }
 0xabc   : > { %5229 = vrot.lane.b32.xlu1 %v9494_v29, %s10582_s2  ;;  %v3838_v22 = vmul.f32 %v6434_v31, %v3781_v27  ;;  %v4245_v21 = vmul.f32 %v6455_v19, %v4225_v20  ;;  %v4461_v27 = vmul.f32 %v6438_v34, %v4441_v9  ;;  %v10940_v20 = vld [vmem:[#allocation6_spill] sm:$0xff]  ;;  %v10941_v9 = vld [vmem:[#allocation32_spill] sm:$0xff]  ;;  %s818_s2 = scalar_lea.vmem %s10981_s1, %s5920_s0 }
 0xabd   : > { %v4534_v50 = vmul.f32 %v10940_v20, %v4462_v14 }
 0xabe   : > { %v4168_v38 = vpop.permute.xlu1 %4167  ;;  %v3910_v53 = vmul.f32 %v10935_v13, %v3838_v22  ;;  %v4533_v30 = vmul.f32 %v10940_v20, %v4461_v27  ;;  %v10946_v20 = vld [vmem:[#allocation106_spill] sm:$0xff] }
 0xabf   : > { %v9918_v3 = vpop.permute.xlu0 %5227  ;;  %v4189_v8 = vsel %vm1153_vm5, %v9711_v37, %v4168_v38  ;;  %v3693_v37 = vmul.f32 %v10936_v32, %v9263_v60 }
 0xac0   : > { %5515 = vperm.xlu1 %6039, %v920_v63   ;;  %v3934_v40 = vadd.f32 %v3910_v53, %v3694_v5  ;;  %v4246_v43 = vmul.f32 %v6449_v62, %v4189_v8  ;;  %v10938_v63 = vld [vmem:[#allocation70_spill] sm:$0xff]  ;;  %v4874_v53 = vsel %vm1264_vm11, %v9903_v49, 0.0  ;;  %v10939_v8 = vld [vmem:[#allocation115_spill] sm:$0xff] }
 0xac1   : > { %v4317_v1 = vmul.f32 %v10938_v63, %v4245_v21  ;;  %v3911_v32 = vmul.f32 %v10939_v8, %v3839_v24  ;;  %v4896_v41 = vmul.f32 %v6434_v31, %v4874_v53 }
 0xac2   : > { %v4600_v36 = vpop.permute.xlu1 %4599  ;;  %v4126_v35 = vadd.f32 %v4102_v26, %v3934_v40  ;;  %v4318_v38 = vmul.f32 %v10938_v63, %v4246_v43 }
 0xac3   : > { %v9922_v11 = vpop.permute.xlu0 %3765  ;;  %v4657_v22 = vsel %vm1227_vm10, %v4600_v36, 0.0  ;;  %v10006_v14 = vmul.f32 %v10944_v4, %v4896_v41 }
 0xac4   : > { %5525 = vperm.xlu1 %6039, %v922_v51   ;;  %v4621_v51 = vsel %vm1227_vm10, %v9733_v59, %v4600_v36  ;;  %v4342_v36 = vadd.f32 %v4318_v38, %v4126_v35  ;;  %v4678_v5 = vmul.f32 %v6449_v62, %v4657_v22  ;;  %v10943_v38 = vld [vmem:[#allocation9_spill] sm:$0xff] }
 0xac5   : > { %v4677_v59 = vmul.f32 %v6455_v19, %v4621_v51  ;;  %v4319_v51 = vmul.f32 %v10943_v38, %v4247_v55 }
 0xac6   : > { %v4816_v7 = vpop.permute.xlu1 %4815 }
 0xac7   : > { %v9929_v33 = vpop.permute.xlu0 %4173  ;;  %v4837_v40 = vsel %vm1264_vm11, %v9899_v46, %v4816_v7  ;;  %v4873_v43 = vsel %vm1264_vm11, %v4816_v7, 0.0  ;;  %v4749_v21 = vmul.f32 %v10941_v9, %v4677_v59  ;;  %v4558_v46 = vadd.f32 %v4534_v50, %v4342_v36 }
 0xac8   : > { %5628 = vperm.xlu1 %6039, %v927_v58   ;;  %v3933_v58 = vadd.f32 %v3909_v10, %v3693_v37  ;;  %v10942_v37 = vld [vmem:[#allocation54_spill] sm:$0xff]  ;;  %v4750_v7 = vmul.f32 %v10941_v9, %v4678_v5  ;;  %v4893_v35 = vmul.f32 %v6438_v34, %v4837_v40  ;;  %v4894_v63 = vmul.f32 %v6434_v31, %v4873_v43 }
 0xac9   : > { %v3696_v22 = vmul.f32 %v10942_v37, %v9415_v39  ;;  %v5282_v36 = vsel %vm1334_vm13, %v9918_v3, 0.0 }
 0xaca   : > { %v9920_v17 = vpop.permute.xlu1 %5031  ;;  %v4125_v13 = vadd.f32 %v4101_v18, %v3933_v58  ;;  %v3695_v18 = vmul.f32 %v10942_v37, %v9389_v47  ;;  %v4774_v55 = vadd.f32 %v4750_v7, %v4558_v46  ;;  %v4966_v40 = vmul.f32 %v10946_v20, %v4894_v63 }
 0xacb   : > { %v9945_v6 = vpop.permute.xlu0 %4605 }
 0xacc   : > { %v4341_v26 = vadd.f32 %v4317_v1, %v4125_v13  ;;  %v3935_v27 = vadd.f32 %v3911_v32, %v3695_v18  ;;  %v10945_v13 = vld [vmem:[#allocation80_spill] sm:$0xff] }
 0xace   : > { %v9926_v54 = vpop.permute.xlu1 %5223  ;;  %v4557_v58 = vadd.f32 %v4533_v30, %v4341_v26  ;;  %v4965_v30 = vmul.f32 %v10946_v20, %v4893_v35 }
 0xacf   : > { %v9970_v48 = vpop.permute.xlu0 %4821  ;;  %v5245_v50 = vsel %vm1334_vm13, %v9780_v28, %v9926_v54  ;;  %v5281_v9 = vsel %vm1334_vm13, %v9926_v54, 0.0 }
 0xad0   : > { %v4773_v5 = vadd.f32 %v4749_v21, %v4557_v58  ;;  %v5301_v7 = vmul.f32 %v6455_v19, %v5245_v50  ;;  %v5302_v35 = vmul.f32 %v6449_v62, %v5281_v9 }
 0xad2   : > { %v9931_v52 = vpop.permute.xlu1 %3977 }
 0xad3   : > { %v4034_v12 = vsel %vm1120_vm7, 0.0, %v9931_v52  ;;  %v9997_v24 = vpop.permute.xlu0 %3983  ;;  %v3998_v43 = vsel %vm1120_vm7, %v9931_v52, %v9887_v23  ;;  %v5089_v52 = vsel %vm1301_vm12, %v9920_v17, 0.0 }
 0xad4   : > { %v4103_v53 = vmul.f32 %v10945_v13, %v4034_v12  ;;  %v4104_v28 = vmul.f32 %v10945_v13, %v3998_v43  ;;  %v4989_v12 = vadd.f32 %v4965_v30, %v4773_v5  ;;  %v10950_v43 = vld [vmem:[#allocation67_spill] sm:$0xff] }
 0xad6   : > { %v9939_v16 = vpop.permute.xlu1 %4385  ;;  %v4127_v21 = vadd.f32 %v4103_v53, %v3935_v27 }
 0xad7   : > { %v4442_v59 = vsel %vm1190_vm9, 0.0, %v9939_v16  ;;  %v4406_v39 = vsel %vm1190_vm9, %v9939_v16, %v9895_v25  ;;  %v10031_v16 = vpop.permute.xlu0 %4391 }
 0xad8   : > { %v4463_v25 = vmul.f32 %v6438_v34, %v4442_v59  ;;  %v4464_v23 = vmul.f32 %v6434_v31, %v4406_v39  ;;  %v4990_v39 = vadd.f32 %v4966_v40, %v4774_v55 }
 0xada   : > { %v9954_v15 = vpop.permute.xlu1 %4817 }
 0xadb   : > { %v4838_v54 = vsel %vm1264_vm11, %v9954_v15, %v9903_v49 }
 0xadc   : > { %v4895_v59 = vmul.f32 %v6438_v34, %v4838_v54 }
 0xade   : > { %v9972_v60 = vpop.permute.xlu1 %5033 }
 0xae2   : > { %v9988_v10 = vpop.permute.xlu1 %5225 }
 0xae6   : > { %v3764_v47 = vpop.permute.xlu1 %3763 }
 0xae7   : > { %v3782_v1 = vsel %vm1083_vm4, %v9850_v44, %v3764_v47  ;;  %v5053_v44 = vsel %vm1301_vm12, %v9757_v57, %v9920_v17 }
 0xae8   : > { %v3840_v32 = vmul.f32 %v6434_v31, %v3782_v1  ;;  %v10056_v1 = vpop.permute.xlu0 %5039 }
 0xaea   : > { %v3912_v41 = vmul.f32 %v10939_v8, %v3840_v32  ;;  %v4172_v26 = vpop.permute.xlu1 %4171  ;;  %v10947_v8 = vld [vmem:[#allocation38_spill] sm:$0xff] }
 0xaeb   : > { %v4190_v57 = vsel %vm1153_vm5, %v9863_v61, %v4172_v26  ;;  %v5157_v46 = vmul.f32 %v10947_v8, %v5053_v44  ;;  %v10948_v61 = vld [vmem:[#allocation17_spill] sm:$0xff]  ;;  %v5054_v26 = vsel %vm1301_vm12, %v9972_v60, %v9910_v45 }
 0xaec   : > { %v3936_v37 = vadd.f32 %v3912_v41, %v3696_v22  ;;  %v4248_v18 = vmul.f32 %v6449_v62, %v4190_v57  ;;  %v4535_v63 = vmul.f32 %v10948_v61, %v4463_v25  ;;  %v4343_v22 = vadd.f32 %v4319_v51, %v4127_v21  ;;  %v10949_v51 = vld [vmem:[#allocation91_spill] sm:$0xff] }
 0xaed   : > { %v4536_v47 = vmul.f32 %v10948_v61, %v4464_v23  ;;  %v5373_v32 = vmul.f32 %v10949_v51, %v5301_v7  ;;  %v5090_v41 = vsel %vm1301_vm12, %v9910_v45, 0.0  ;;  %v5181_v55 = vadd.f32 %v5157_v46, %v4989_v12  ;;  %v10953_v61 = vld [vmem:[#allocation122_spill] sm:$0xff] }
 0xaee   : > { %v4128_v58 = vadd.f32 %v4104_v28, %v3936_v37  ;;  %v4320_v17 = vmul.f32 %v10943_v38, %v4248_v18  ;;  %v4604_v27 = vpop.permute.xlu1 %4603  ;;  %v5158_v38 = vmul.f32 %v10947_v8, %v5089_v52  ;;  %v4559_v20 = vadd.f32 %v4535_v63, %v4343_v22  ;;  %v10951_v28 = vld [vmem:[#allocation110_spill] sm:$0xff]  ;;  %v10079_v18 = vpop.permute.xlu0 %5231 }
 0xaef   : > { %v4622_v13 = vsel %vm1227_vm10, %v9877_v0, %v4604_v27  ;;  %v4658_v53 = vsel %vm1227_vm10, %v4604_v27, 0.0  ;;  %v5246_v0 = vsel %vm1334_vm13, %v9988_v10, %v9918_v3  ;;  %v5374_v40 = vmul.f32 %v10949_v51, %v5302_v35 }
 0xaf0   : > { %v4344_v49 = vadd.f32 %v4320_v17, %v4128_v58  ;;  %v4679_v15 = vmul.f32 %v6455_v19, %v4622_v13  ;;  %v4680_v5 = vmul.f32 %v6449_v62, %v4658_v53  ;;  %v4967_v3 = vmul.f32 %v10944_v4, %v4895_v59  ;;  %v10952_v4 = vld [vmem:[#allocation114_spill] sm:$0xff] }
 0xaf1   : > { %v5303_v10 = vmul.f32 %v6455_v19, %v5246_v0  ;;  %v5304_v23 = vmul.f32 %v6449_v62, %v5282_v36  ;;  %v5182_v57 = vadd.f32 %v5158_v38, %v4990_v39  ;;  %v5397_v52 = vadd.f32 %v5373_v32, %v5181_v55 }
 0xaf2   : > { %v4560_v30 = vadd.f32 %v4536_v47, %v4344_v49  ;;  %v4751_v44 = vmul.f32 %v10950_v43, %v4679_v15  ;;  %v4752_v50 = vmul.f32 %v10950_v43, %v4680_v5  ;;  %v10067_v25 = vpop.permute.xlu1 %3981  ;;  %v5159_v37 = vmul.f32 %v10951_v28, %v5054_v26  ;;  %v10954_v47 = vld [vmem:[#allocation125_spill] sm:$0xff] }
 0xaf3   : > { %v5160_v45 = vmul.f32 %v10951_v28, %v5090_v41  ;;  %v5398_v60 = vadd.f32 %v5374_v40, %v5182_v57  ;;  %v5375_v7 = vmul.f32 %v10952_v4, %v5303_v10  ;;  %v5376_v35 = vmul.f32 %v10952_v4, %v5304_v23  ;;  %v10955_v41 = vld [vmem:[#allocation66_spill] sm:$0xff]  ;;  %v10956_v10 = vld [vmem:[#allocation64_spill] sm:$0xff] }
 0xaf4   : > { %v4775_v9 = vadd.f32 %v4751_v44, %v4559_v20  ;;  %v4776_v21 = vadd.f32 %v4752_v50, %v4560_v30  ;;  %v5481_v63 = vadd.f32 %v10953_v61, %v5397_v52  ;;  %v3819_v40 = vsel %vm1083_vm4, 0.0, %v9922_v11 }
 0xaf5   : > { %v5482_v22 = vadd.f32 %v10953_v61, %v5398_v60  ;;  %v3999_v57 = vsel %vm1120_vm7, %v10067_v25, %v9997_v24  ;;  %v3841_v52 = vmul.f32 %v6438_v34, %v3819_v40 }
 0xaf6   : > { %v4991_v12 = vadd.f32 %v4967_v3, %v4775_v9  ;;  %v4992_v8 = vadd.f32 %v10006_v14, %v4776_v21  ;;  %v10082_v46 = vpop.permute.xlu1 %4389  ;;  %v10091_v14 = vpop.permute.xlu0 %3769  ;;  %v5505_v59 = vmax.f32 %v5481_v63, 0.0  ;;  %v3698_v9 = vmul.f32 %v10956_v10, %v9586_v42  ;;  %v10959_v63 = vld [vmem:[#allocation117_spill] sm:$0xff] }
 0xaf7   : > { %v5506_v5 = vmax.f32 %v5482_v22, 0.0  ;;  %v3820_v23 = vsel %vm1083_vm4, 0.0, %v10091_v14  ;;  %v4407_v42 = vsel %vm1190_vm9, %v10082_v46, %v10031_v16  ;;  %v3913_v60 = vmul.f32 %v10955_v41, %v3841_v52 }
 0xaf8   : > { %v5183_v54 = vadd.f32 %v5159_v37, %v4991_v12  ;;  %v5184_v36 = vadd.f32 %v5160_v45, %v4992_v8  ;;  %v3843_v37 = vmul.f32 %v6438_v34, %v3820_v23  ;;  %v10957_v12 = vld [vmem:[#allocation81_spill] sm:$0xff]  ;;  %v4035_v16 = vsel %vm1120_vm7, 0.0, %v10067_v25 }
 0xaf9   : > { %v4106_v8 = vmul.f32 %v10957_v12, %v3999_v57  ;;  %v4466_v22 = vmul.f32 %v6434_v31, %v4407_v42 }
 0xafa   : > { %v10088_v58 = vpop.permute.xlu1 %5037  ;;  %v5399_v17 = vadd.f32 %v5375_v7, %v5183_v54  ;;  %v5400_v27 = vadd.f32 %v5376_v35, %v5184_v36  ;;  %v10095_v32 = vpop.permute.xlu0 %4177  ;;  %v10958_v54 = vld [vmem:[#allocation8_spill] sm:$0xff]  ;;  %v4227_v35 = vsel %vm1153_vm5, 0.0, %v9929_v33  ;;  %v3697_v36 = vmul.f32 %v10956_v10, %v9494_v29  ;;  %v10962_v10 = vld [vmem:[#allocation82_spill] sm:$0xff] }
 0xafb   : > { %v10960_v29 = vld [vmem:[#allocation56_spill] sm:$0xff] }
 0xafc   : > { %v5483_v13 = vadd.f32 %v10954_v47, %v5399_v17  ;;  %v5484_v53 = vadd.f32 %v10954_v47, %v5400_v27  ;;  %v3915_v17 = vmul.f32 %v10959_v63, %v3843_v37  ;;  %v4228_v27 = vsel %vm1153_vm5, 0.0, %v10095_v32 }
 0xafe   : > { %v3768_v49 = vpop.permute.xlu1 %3767  ;;  %v5507_v15 = vmax.f32 %v5483_v13, 0.0  ;;  %v5508_v39 = vmax.f32 %v5484_v53, 0.0  ;;  %v10099_v43 = vpop.permute.xlu0 %4609  ;;  %v5283_v13 = vsel %vm1334_vm13, %v10079_v18, 0.0  ;;  %v3699_v53 = vmul.f32 %v10960_v29, %v9646_v56 }
 0xaff   : > { %v3783_v20 = vsel %vm1083_vm4, %v9922_v11, %v3768_v49  ;;  %v3937_v49 = vadd.f32 %v3913_v60, %v3697_v36  ;;  %v5306_v56 = vmul.f32 %v6449_v62, %v5283_v13 }
 0xb00   : > { %v5892_v38 = vpack.c.bf16 %v5507_v15, %v5505_v59  ;;  %v5890_v51 = vpack.c.bf16 %v5508_v39, %v5506_v5  ;;  %v3842_v44 = vmul.f32 %v6434_v31, %v3783_v20  ;;  %v3700_v59 = vmul.f32 %v10960_v29, %v9668_v2  ;;  %v10961_v20 = vld [vmem:[#allocation83_spill] sm:$0xff] }
 0xb01   : > { %v4249_v39 = vmul.f32 %v6455_v19, %v4227_v35  ;;  %v10965_v35 = vld [vmem:[#allocation112_spill] sm:$0xff] }
 0xb02   : > { %v4176_v0 = vpop.permute.xlu1 %4175  ;;  %5891 = vmatprep.subr.bf16.mxu0 %v5890_v51  ;;  %v3914_v55 = vmul.f32 %v10955_v41, %v3842_v44  ;;  %v3988_v3 = vpop.permute.xlu0 %3987  ;;  %v4251_v51 = vmul.f32 %v6455_v19, %v4228_v27  ;;  %v4538_v44 = vmul.f32 %v10961_v20, %v4466_v22 }
 0xb03   : > { %5893 = vmatpush1.bf16.msra.mxu0 %v5892_v38  ;;  %v4191_v26 = vsel %vm1153_vm5, %v9929_v33, %v4176_v0  ;;  %v5091_v38 = vsel %vm1301_vm12, %v10056_v1, 0.0  ;;  %v4105_v0 = vmul.f32 %v10957_v12, %v4035_v16 }
 0xb04   : > { %v3938_v28 = vadd.f32 %v3914_v55, %v3698_v9  ;;  %v4250_v11 = vmul.f32 %v6449_v62, %v4191_v26  ;;  %v3939_v55 = vadd.f32 %v3915_v17, %v3699_v53  ;;  %v4443_v26 = vsel %vm1190_vm9, 0.0, %v10082_v46  ;;  %v10966_v53 = vld [vmem:[#allocation22_spill] sm:$0xff] }
 0xb05   : > { %v4129_v60 = vadd.f32 %v4105_v0, %v3937_v49 }
 0xb06   : > { %v4608_v30 = vpop.permute.xlu1 %4607  ;;  %v4396_v4 = vpop.permute.xlu0 %4395  ;;  %v4130_v7 = vadd.f32 %v4106_v8, %v3938_v28  ;;  %v4322_v24 = vmul.f32 %v10958_v54, %v4250_v11  ;;  %v10963_v28 = vld [vmem:[#allocation30_spill] sm:$0xff] }
 0xb07   : > { %v4659_v61 = vsel %vm1227_vm10, %v4608_v30, 0.0  ;;  %v10964_v8 = vld [vmem:[#allocation14_spill] sm:$0xff] }
 0xb08   : > { %v4346_v15 = vadd.f32 %v4322_v24, %v4130_v7  ;;  %v4682_v5 = vmul.f32 %v6449_v62, %v4659_v61  ;;  %v4323_v42 = vmul.f32 %v10964_v8, %v4251_v51  ;;  %v4623_v24 = vsel %vm1227_vm10, %v9945_v6, %v4608_v30 }
 0xb09   : > { %v4681_v13 = vmul.f32 %v6455_v19, %v4623_v24 }
 0xb0a   : > { %v10102_v50 = vpop.permute.xlu1 %4823  ;;  %v4828_v2 = vpop.permute.xlu0 %4827  ;;  %v4562_v52 = vadd.f32 %v4538_v44, %v4346_v15  ;;  %v4754_v11 = vmul.f32 %v10963_v28, %v4682_v5 }
 0xb0b   : > { %v4875_v33 = vsel %vm1264_vm11, %v10102_v50, 0.0  ;;  %v4876_v7 = vsel %vm1264_vm11, %v4828_v2, 0.0 }
 0xb0c   : > { %v4898_v41 = vmul.f32 %v6434_v31, %v4875_v33  ;;  %v4778_v22 = vadd.f32 %v4754_v11, %v4562_v52  ;;  %v4900_v30 = vmul.f32 %v6434_v31, %v4876_v7  ;;  %v10969_v11 = vld [vmem:[#allocation120_spill] sm:$0xff] }
 0xb0e   : > { %v3986_v21 = vpop.permute.xlu1 %3985  ;;  %v4970_v36 = vmul.f32 %v10965_v35, %v4898_v41  ;;  %v5042_v0 = vpop.permute.xlu0 %5041  ;;  %v10967_v41 = vld [vmem:[#allocation33_spill] sm:$0xff] }
 0xb0f   : > { %v4036_v25 = vsel %vm1120_vm7, 0.0, %v3986_v21  ;;  %v4000_v46 = vsel %vm1120_vm7, %v3986_v21, %v3988_v3 }
 0xb10   : > { %v4107_v9 = vmul.f32 %v10962_v10, %v4036_v25  ;;  %v4108_v3 = vmul.f32 %v10962_v10, %v4000_v46  ;;  %v4994_v29 = vadd.f32 %v4970_v36, %v4778_v22 }
 0xb12   : > { %v4394_v45 = vpop.permute.xlu1 %4393 }
 0xb13   : > { %v4444_v23 = vsel %vm1190_vm9, 0.0, %v4394_v45  ;;  %v4408_v37 = vsel %vm1190_vm9, %v4394_v45, %v4396_v4  ;;  %v4465_v45 = vmul.f32 %v6438_v34, %v4443_v26  ;;  %v4131_v4 = vadd.f32 %v4107_v9, %v3939_v55  ;;  %v10968_v9 = vld [vmem:[#allocation15_spill] sm:$0xff] }
 0xb14   : > { %v4468_v27 = vmul.f32 %v6434_v31, %v4408_v37  ;;  %v5162_v55 = vmul.f32 %v10967_v41, %v5091_v38  ;;  %v5378_v37 = vmul.f32 %v10969_v11, %v5306_v56  ;;  %v5055_v56 = vsel %vm1301_vm12, %v10088_v58, %v10056_v1 }
 0xb16   : > { %v4826_v47 = vpop.permute.xlu1 %4825  ;;  %v4540_v25 = vmul.f32 %v10966_v53, %v4468_v27 }
 0xb17   : > { %v4840_v33 = vsel %vm1264_vm11, %v4826_v47, %v4828_v2  ;;  %v4321_v2 = vmul.f32 %v10958_v54, %v4249_v39  ;;  %v10970_v54 = vld [vmem:[#allocation29_spill] sm:$0xff] }
 0xb18   : > { %v4972_v39 = vmul.f32 %v10970_v54, %v4900_v30  ;;  %v10972_v30 = vld [vmem:[#allocation12_spill] sm:$0xff] }
 0xb1a   : > { %v3772_v40 = vpop.permute.xlu1 %3771 }
 0xb1b   : > { %v3784_v57 = vsel %vm1083_vm4, %v10091_v14, %v3772_v40  ;;  %v4467_v14 = vmul.f32 %v6438_v34, %v4444_v23  ;;  %v4537_v40 = vmul.f32 %v10961_v20, %v4465_v45  ;;  %vm5528_vm4 = vcmask 785408  }
 0xb1c   : > { %v3844_v12 = vmul.f32 %v6434_v31, %v3784_v57 }
 0xb1d   : > { %v4539_v49 = vmul.f32 %v10966_v53, %v4467_v14 }
 0xb1e   : > { %v3916_v61 = vmul.f32 %v10959_v63, %v3844_v12  ;;  %v4180_v17 = vpop.permute.xlu1 %4179  ;;  %v4839_v63 = vsel %vm1264_vm11, %v9970_v48, %v10102_v50  ;;  %v4899_v48 = vmul.f32 %v6438_v34, %v4840_v33  ;;  %v4345_v12 = vadd.f32 %v4321_v2, %v4129_v60  ;;  %v5234_v60 = vpop.permute.xlu0 %5233 }
 0xb1f   : > { %v4192_v16 = vsel %vm1153_vm5, %v10095_v32, %v4180_v17  ;;  %v4897_v26 = vmul.f32 %v6438_v34, %v4839_v63 }
 0xb20   : > { %v3940_v21 = vadd.f32 %v3916_v61, %v3700_v59  ;;  %v4252_v6 = vmul.f32 %v6449_v62, %v4192_v16  ;;  %v4347_v59 = vadd.f32 %v4323_v42, %v4131_v4  ;;  %v5186_v42 = vadd.f32 %v5162_v55, %v4994_v29  ;;  %v10971_v16 = vld [vmem:[#allocation118_spill] sm:$0xff] }
 0xb21   : > { %v4971_v38 = vmul.f32 %v10970_v54, %v4899_v48  ;;  %v4561_v34 = vadd.f32 %v4537_v40, %v4345_v12  ;;  %v4969_v46 = vmul.f32 %v10965_v35, %v4897_v26  ;;  %v5161_v29 = vmul.f32 %v10967_v41, %v5055_v56  ;;  %v10976_v40 = vld [vmem:[#allocation84_spill] sm:$0xff]  ;;  %v10977_v26 = vld [vmem:[#allocation53_spill] sm:$0xff] }
 0xb22   : > { %v4132_v32 = vadd.f32 %v4108_v3, %v3940_v21  ;;  %v4324_v15 = vmul.f32 %v10964_v8, %v4252_v6  ;;  %v4612_v5 = vpop.permute.xlu1 %4611  ;;  %v4563_v10 = vadd.f32 %v4539_v49, %v4347_v59  ;;  %v4753_v8 = vmul.f32 %v10963_v28, %v4681_v13 }
 0xb23   : > { %v4624_v31 = vsel %vm1227_vm10, %v10099_v43, %v4612_v5  ;;  %v4660_v51 = vsel %vm1227_vm10, %v4612_v5, 0.0  ;;  %v5402_v27 = vadd.f32 %v5378_v37, %v5186_v42  ;;  %v10973_v5 = vld [vmem:[#allocation126_spill] sm:$0xff]  ;;  %v5521_v37 = vpop.permute.xlu0 %5520 }
 0xb24   : > { %v4348_v50 = vadd.f32 %v4324_v15, %v4132_v32  ;;  %v4683_v47 = vmul.f32 %v6455_v19, %v4624_v31  ;;  %v4684_v44 = vmul.f32 %v6449_v62, %v4660_v51  ;;  %v4777_v17 = vadd.f32 %v4753_v8, %v4561_v34  ;;  %v10974_v31 = vld [vmem:[#allocation127_spill] sm:$0xff] }
 0xb25   : > { %v5486_v59 = vadd.f32 %v10973_v5, %v5402_v27 }
 0xb26   : > { %v4564_v43 = vadd.f32 %v4540_v25, %v4348_v50  ;;  %v4755_v23 = vmul.f32 %v10968_v9, %v4683_v47  ;;  %v4756_v57 = vmul.f32 %v10968_v9, %v4684_v44  ;;  %v5044_v52 = vpop.permute.xlu1 %5043  ;;  %v4993_v6 = vadd.f32 %v4969_v46, %v4777_v17  ;;  %v919_v9 = vld [vmem:[%s10975_s6 + $0x10] sm:$0xff] }
 0xb27   : > { %v5056_v24 = vsel %vm1301_vm12, %v5042_v0, %v5044_v52  ;;  %v5092_v36 = vsel %vm1301_vm12, %v5044_v52, 0.0  ;;  %v5510_v50 = vmax.f32 %v5486_v59, 0.0  ;;  %v925_v52 = vld [vmem:[%s10980_s25 + $0x10] sm:$0xff]  ;;  %v5624_v8 = vpop.permute.xlu0 %5623 }
 0xb28   : > { %v4779_v20 = vadd.f32 %v4755_v23, %v4563_v10  ;;  %v4780_v7 = vadd.f32 %v4756_v57, %v4564_v43  ;;  %v5163_v35 = vmul.f32 %v10971_v16, %v5056_v24  ;;  %v5164_v22 = vmul.f32 %v10971_v16, %v5092_v36  ;;  %v918_v43 = vld [vmem:[%s10975_s6 + $0x8] sm:$0xff]  ;;  %v923_v23 = vld [vmem:[%s10980_s25] sm:$0xff] }
 0xb29   : > { %v10978_v10 = vmov 0.0   ;;  %v924_v57 = vld [vmem:[%s10980_s25 + $0x8] sm:$0xff] }
 0xb2a   : > { %v4995_v28 = vadd.f32 %v4971_v38, %v4779_v20  ;;  %v4996_v14 = vadd.f32 %v4972_v39, %v4780_v7  ;;  %v5236_v61 = vpop.permute.xlu1 %5235 }
 0xb2b   : > { %v5248_v45 = vsel %vm1334_vm13, %v5234_v60, %v5236_v61  ;;  %v5284_v4 = vsel %vm1334_vm13, %v5236_v61, 0.0  ;;  %v5634_v56 = vpop.permute.xlu0 %5633 }
 0xb2c   : > { %v5307_v3 = vmul.f32 %v6455_v19, %v5248_v45  ;;  %v5308_v21 = vmul.f32 %v6449_v62, %v5284_v4  ;;  %v5187_v1 = vadd.f32 %v5163_v35, %v4995_v28  ;;  %v5188_v58 = vadd.f32 %v5164_v22, %v4996_v14 }
 0xb2d   : > { %v5185_v62 = vadd.f32 %v5161_v29, %v4993_v6 }
 0xb2e   : > { %v5379_v13 = vmul.f32 %v10972_v30, %v5307_v3  ;;  %v5380_v63 = vmul.f32 %v10972_v30, %v5308_v21  ;;  %v5230_v33 = vpop.permute.xlu1 %5229 }
 0xb2f   : > { %v5247_v53 = vsel %vm1334_vm13, %v5230_v33, %v10079_v18 }
 0xb30   : > { %v5403_v49 = vadd.f32 %v5379_v13, %v5187_v1  ;;  %v5404_v32 = vadd.f32 %v5380_v63, %v5188_v58  ;;  %v5305_v15 = vmul.f32 %v6455_v19, %v5247_v53  ;;  %v917_v19 = vld [vmem:[%s10975_s6] sm:$0xff] }
 0xb32   : > { %v5377_v25 = vmul.f32 %v10969_v11, %v5305_v15  ;;  %v5488_v51 = vadd.f32 %v10974_v31, %v5404_v32  ;;  %v5487_v0 = vadd.f32 %v10974_v31, %v5403_v49 }
 0xb34   : > { %v5401_v48 = vadd.f32 %v5377_v25, %v5185_v62  ;;  %v5512_v47 = vmax.f32 %v5488_v51, 0.0  ;;  %v5511_v18 = vmax.f32 %v5487_v0, 0.0 }
 0xb36   : > { %v5485_v44 = vadd.f32 %v10973_v5, %v5401_v48  ;;  %v5894_v2 = vpack.c.bf16 %v5512_v47, %v5510_v50 }
 0xb38   : > { %v5509_v41 = vmax.f32 %v5485_v44, 0.0  ;;  %5895 = vmatprep.subr.bf16.mxu0 %v5894_v2 }
 0xb3a   : > { %v5896_v55 = vpack.c.bf16 %v5511_v18, %v5509_v41 }
 0xb3c   : > { %5897 = vmatpush1.bf16.msra.mxu0 %v5896_v55 }
 0xb3d   : > { %5899 = vmatprep.subr.bf16.mxu0 %v10976_v40 }
 0xb3f   : > { %5839 = vmatmul.mubr.msk.f32.vlgmr.msra.gmra.mrb[20].mxu0 %vm5528_vm4, %v917_v19  ;;  %v5516_v11 = vpop.permute.xlu1 %5515 }
 0xb40   : > { %5901 = vmatpush1.bf16.msra.mxu0 %v10977_v26  ;;  %5608 = vmatprep.mubr.f32.mxu0 %v10978_v10  ;;  %v5902_v42 = vadd.f32 %v5624_v8, %v5516_v11 }
 0xb43   : > { %5840 = vmatmul.mubr.msk.f32.gmra.mrb[22].mxu0 %vm5528_vm4, %v918_v43  ;;  %v5526_v12 = vpop.permute.xlu1 %5525 }
 0xb44   : > { %5614 = vmatprep.mubr.f32.mxu0 %v10978_v10  ;;  %v5910_v28 = vadd.f32 %v5634_v56, %v5526_v12 }
 0xb47   : > { %5841 = vmatmul.mubr.msk.f32.gmra.mrb[24].mxu0 %vm5528_vm4, %v919_v9  ;;  %v5629_v54 = vpop.permute.xlu1 %5628 }
 0xb48   : > { %5709 = vmatprep.mubr.f32.mxu0 %v10978_v10  ;;  %v5906_v34 = vadd.f32 %v5629_v54, %v5521_v37 }
 0xb4b   : > { %5842 = vmatmul.mubr.msk.f32.vlgmr.msra.gmra.mrb[20].mxu0 %vm1120_vm7, %v923_v23 }
 0xb4c   : > { %5715 = vmatprep.mubr.f32.mxu0 %v10978_v10 }
 0xb4f   : > { %5843 = vmatmul.mubr.msk.f32.gmra.mrb[22].mxu0 %vm1120_vm7, %v924_v57 }
 0xb50   : > { %5721 = vmatprep.mubr.f32.mxu0 %v10978_v10 }
 0xb53   : > { %5844 = vmatmul.mubr.msk.f32.gmra.mrb[24].mxu0 %vm1120_vm7, %v925_v52 }
 0xc1e   : > { %v5711_v39 = vpop.f32.mrb[20].mxu0 }
 0xc1f   : > { %v5903_v38 = vadd.f32 %v5902_v42, %v5711_v39  ;;  %v5713_v20 = vpop.f32.mrb[21].mxu0 }
 0xc20   : > { %v5905_v7 = vadd.f32 %v5902_v42, %v5713_v20 }
 0xc21   : > { %5734 = vst [vmem:[%s818_s2] sm:$0xff] %v5903_v38 }
 0xc22   : > { %5735 = vst [vmem:[%s818_s2 + $0x8] sm:$0xff] %v5905_v7  ;;  %v5717_v46 = vpop.f32.mrb[22].mxu0 }
 0xc23   : > { %v5907_v24 = vadd.f32 %v5906_v34, %v5717_v46  ;;  %v5719_v36 = vpop.f32.mrb[23].mxu0 }
 0xc24   : > { %v5909_v60 = vadd.f32 %v5906_v34, %v5719_v36 }
 0xc25   : > { %5736 = vst [vmem:[%s818_s2 + $0x10] sm:$0xff] %v5907_v24 }
 0xc26   : > { %5737 = vst [vmem:[%s818_s2 + $0x18] sm:$0xff] %v5909_v60  ;;  %v5723_v14 = vpop.f32.mrb[24].mxu0 }
 0xc27   : > { %v5911_v61 = vadd.f32 %v5910_v28, %v5723_v14  ;;  %v5725_v17 = vpop.f32.mrb[25].mxu0 }
 0xc28   : > { %v5913_v45 = vadd.f32 %v5910_v28, %v5725_v17 }
 0xc29   : > { %5738 = vst [vmem:[%s818_s2 + $0x20] sm:$0xff] %v5911_v61 }
 0xc2a   : > { %5739 = vst [vmem:[%s818_s2 + $0x28] sm:$0xff] %v5913_v45 }
 0xc2b PF: > { %s10982_s11 = sld [smem:[#allocation2_spill]] }
 0xc31   : > { %s37_s7 = sadd.s32 1, %s10982_s11  }
 0xc32   : > { %p34_p4 = scmp.ge.s32.totalorder %s37_s7, 4  }
 0xc34   :  { %36 = sbr.rel (!%p34_p4) target bundleno = 17 (0x11), region = 158 }

</bundles_post_ra>
